<compile_context>
chip_gen: v7x
topology: tpu7x:2x2x1
jax: 0.10.0
libtpu: 0.0.40
codegen_flags: <defaults>
</compile_context>

<pallas_src>
import functools

import jax
import jax.numpy as jnp
from jax.experimental import pallas as pl
from jax.experimental.pallas import tpu as pltpu

EPS = 1e-5
LEAK = 0.2
CPAD = 128      # lane-padded channel count used for every layer's output
WPAD = 16       # padded width (W + 2 rounded up to a sublane multiple)


def _decoder_kernel(x_ref, w1_ref, w2_ref, w3_ref, w4_ref, gam_ref, bet_ref,
                    o_ref, pad1, pad2, pad3, pad4, col_ref, *, N, H, W):
    M = N * H * W

    def fill_padded(pad_ref, act_nhwc):
        # Zero-pad `act_nhwc` (N,H,W,C) by one pixel into the (N,H+2,WPAD,C) scratch.
        pad_ref[...] = jnp.zeros_like(pad_ref)
        pad_ref[:, 1:1 + H, 1:1 + W, :] = act_nhwc

    def conv_bn_act(pad_ref, w_ref, cin, li, act):
        """3x3 conv as a single long-K bf16 MXU matmul over an im2col scratch,
        then training-mode BatchNorm + activation.  Returns (M, CPAD) f32."""
        K = 9 * cin
        # im2col: 9 shifted patches -> lane-aligned columns (offsets are multiples
        # of 128/256).  One patch live at a time (no whole-input hoist).
        for dy in range(3):
            for dx in range(3):
                k = dy * 3 + dx
                patch = pad_ref[:, dy:dy + H, dx:dx + W, :]          # (N,H,W,cin) f32
                col_ref[:, k * cin:(k + 1) * cin] = (
                    patch.reshape(M, cin).astype(jnp.bfloat16))
        # One K=9*cin matmul on the MXU (bf16 in, f32 accumulate).
        acc = jnp.dot(col_ref[:, :K], w_ref[...],
                      preferred_element_type=jnp.float32)            # (M, CPAD)
        # BatchNorm2d, training-mode batch statistics (biased var), one pass.
        # Conv bias omitted: cancelled exactly by the mean subtraction.
        mean = jnp.mean(acc, axis=0, keepdims=True)
        var = jnp.mean(acc * acc, axis=0, keepdims=True) - mean * mean
        y = (acc - mean) * jax.lax.rsqrt(jnp.maximum(var, 0.0) + EPS)
        y = y * gam_ref[li:li + 1, :] + bet_ref[li:li + 1, :]
        if act == "lrelu":
            y = jnp.where(y >= 0, y, LEAK * y)
        else:
            y = jax.nn.sigmoid(y)
        return y

    # layer 1: real Cin=256 -> Cout=128
    fill_padded(pad1, x_ref[...])
    y1 = conv_bn_act(pad1, w1_ref, x_ref.shape[-1], 0, "lrelu")
    # layers 2-4: channels zero-padded to 128 lanes (padded lanes stay exactly 0
    # through conv/BN/lrelu because their weights are 0 and gamma=1, beta=0).
    fill_padded(pad2, y1.reshape(N, H, W, CPAD))
    y2 = conv_bn_act(pad2, w2_ref, CPAD, 1, "lrelu")
    fill_padded(pad3, y2.reshape(N, H, W, CPAD))
    y3 = conv_bn_act(pad3, w3_ref, CPAD, 2, "lrelu")
    fill_padded(pad4, y3.reshape(N, H, W, CPAD))
    y4 = conv_bn_act(pad4, w4_ref, CPAD, 3, "sigmoid")

    o_ref[...] = y4                         # lane-dense (M, 128) f32 store


def _make_decoder_call(N, H, W, cin0):
    M = N * H * W
    vmem = pl.BlockSpec(memory_space=pltpu.MemorySpace.VMEM)
    kernel = functools.partial(_decoder_kernel, N=N, H=H, W=W)
    col_lanes = 9 * max(cin0, CPAD)
    return pl.pallas_call(
        kernel,
        out_shape=jax.ShapeDtypeStruct((M, CPAD), jnp.float32),
        in_specs=[vmem] * 7,
        out_specs=vmem,
        scratch_shapes=[
            pltpu.VMEM((N, H + 2, WPAD, cin0), jnp.float32),   # padded input, layer 1
            pltpu.VMEM((N, H + 2, WPAD, CPAD), jnp.float32),   # padded act, layer 2
            pltpu.VMEM((N, H + 2, WPAD, CPAD), jnp.float32),   # padded act, layer 3
            pltpu.VMEM((N, H + 2, WPAD, CPAD), jnp.float32),   # padded act, layer 4
            pltpu.VMEM((M, col_lanes), jnp.bfloat16),          # shared im2col buffer
        ],
    )


def init_params(key):
    """Parameters matching DecoderIr.__init__: conv weights ~ N(0, 0.001^2),
    conv bias = 0 (omitted -- cancelled by train-mode BN), BN gamma=1 / beta=0.
    Weights are stored im2col-style (9*Cin_pad, 128), zero-padded to 128 lanes, bf16."""
    chans = [(256, 128), (128, 64), (64, 32), (32, 1)]
    keys = jax.random.split(key, len(chans))
    ws = []
    for k, (cin, cout) in zip(keys, chans):
        w = 0.001 * jax.random.normal(k, (3, 3, cin, cout), jnp.float32)
        cin_p = max(cin, CPAD)
        wp = jnp.zeros((3, 3, cin_p, CPAD), jnp.float32)
        wp = wp.at[:, :, :cin, :cout].set(w)
        ws.append(wp.reshape(9 * cin_p, CPAD).astype(jnp.bfloat16))
    gam = jnp.ones((len(chans), CPAD), jnp.float32)
    bet = jnp.zeros((len(chans), CPAD), jnp.float32)
    return (*ws, gam, bet)


def decoder_ir(feature_ir_nchw, params):
    """NCHW (N,256,H,W) float input -> NCHW (N,1,H,W) output, DecoderIr.forward."""
    w1, w2, w3, w4, gam, bet = params
    x = jnp.transpose(feature_ir_nchw, (0, 2, 3, 1)).astype(jnp.float32)   # -> NHWC
    N, H, W, cin0 = x.shape
    out = _make_decoder_call(N, H, W, cin0)(x, w1, w2, w3, w4, gam, bet)   # (N*H*W, 128)
    return out[:, 0].reshape(N, 1, H, W)                                   # keep channel 0


if __name__ == "__main__":
    key = jax.random.PRNGKey(0)
    pkey, xkey = jax.random.split(key)
    params = init_params(pkey)

    # small spatial / batch; input channel count (256) is fixed by the module.
    x = jax.random.normal(xkey, (2, 256, 8, 8), jnp.float32)

    out = jax.jit(decoder_ir)(x, params)
    out = jax.block_until_ready(out)
    assert out.shape == (2, 1, 8, 8), out.shape
    assert bool(jnp.all(jnp.isfinite(out)))
    print("KERNEL_OK")
</pallas_src>

<mosaic_0001>
module attributes {stable_mosaic.version = 11 : i64} {
  func.func @_decoder_kernel(%arg0: memref<2x8x8x256xf32, #tpu.memory_space<vmem>>, %arg1: memref<2304x128xbf16, #tpu.memory_space<vmem>>, %arg2: memref<1152x128xbf16, #tpu.memory_space<vmem>>, %arg3: memref<1152x128xbf16, #tpu.memory_space<vmem>>, %arg4: memref<1152x128xbf16, #tpu.memory_space<vmem>>, %arg5: memref<4x128xf32, #tpu.memory_space<vmem>>, %arg6: memref<4x128xf32, #tpu.memory_space<vmem>>, %arg7: memref<128x128xf32, #tpu.memory_space<vmem>>, %arg8: memref<2x10x16x256xf32, #tpu.memory_space<vmem>>, %arg9: memref<2x10x16x128xf32, #tpu.memory_space<vmem>>, %arg10: memref<2x10x16x128xf32, #tpu.memory_space<vmem>>, %arg11: memref<2x10x16x128xf32, #tpu.memory_space<vmem>>, %arg12: memref<128x2304xbf16, #tpu.memory_space<vmem>>) attributes {dimension_semantics = [], scalar_prefetch = 0 : i64, scratch_operands = 5 : i64, tpu.core_type = #tpu.core_type<tc>} {
    %c0 = arith.constant 0 : index
    %c0_0 = arith.constant 0 : index
    %c0_1 = arith.constant 0 : index
    %c0_2 = arith.constant 0 : index
    %0 = vector.load %arg0[%c0, %c0_0, %c0_1, %c0_2] : memref<2x8x8x256xf32, #tpu.memory_space<vmem>>, vector<2x8x8x256xf32>
    %cst = arith.constant 0.000000e+00 : f32
    %1 = vector.broadcast %cst : f32 to vector<2x10x16x256xf32>
    %c0_3 = arith.constant 0 : index
    %c0_4 = arith.constant 0 : index
    %c0_5 = arith.constant 0 : index
    %c0_6 = arith.constant 0 : index
    %2 = vector.load %arg8[%c0_3, %c0_4, %c0_5, %c0_6] : memref<2x10x16x256xf32, #tpu.memory_space<vmem>>, vector<2x10x16x256xf32>
    tpu.vector_store %arg8[%c0_3, %c0_4, %c0_5, %c0_6], %1 {strides = array<i32>} : memref<2x10x16x256xf32, #tpu.memory_space<vmem>>, vector<2x10x16x256xf32>,
    %c0_7 = arith.constant 0 : index
    %c1 = arith.constant 1 : index
    %c1_8 = arith.constant 1 : index
    %c0_9 = arith.constant 0 : index
    %3 = vector.load %arg8[%c0_7, %c1, %c1_8, %c0_9] : memref<2x10x16x256xf32, #tpu.memory_space<vmem>>, vector<2x8x8x256xf32>
    tpu.vector_store %arg8[%c0_7, %c1, %c1_8, %c0_9], %0 {strides = array<i32>} : memref<2x10x16x256xf32, #tpu.memory_space<vmem>>, vector<2x8x8x256xf32>,
    %c0_10 = arith.constant 0 : index
    %c0_11 = arith.constant 0 : index
    %c0_12 = arith.constant 0 : index
    %c0_13 = arith.constant 0 : index
    %4 = vector.load %arg8[%c0_10, %c0_11, %c0_12, %c0_13] : memref<2x10x16x256xf32, #tpu.memory_space<vmem>>, vector<2x8x8x256xf32>
    %5 = vector.shape_cast %4 : vector<2x8x8x256xf32> to vector<128x256xf32>
    %6 = arith.truncf %5 : vector<128x256xf32> to vector<128x256xbf16>
    %c0_14 = arith.constant 0 : index
    %c0_15 = arith.constant 0 : index
    %7 = vector.load %arg12[%c0_14, %c0_15] : memref<128x2304xbf16, #tpu.memory_space<vmem>>, vector<128x256xbf16>
    tpu.vector_store %arg12[%c0_14, %c0_15], %6 {strides = array<i32>} : memref<128x2304xbf16, #tpu.memory_space<vmem>>, vector<128x256xbf16>,
    %c0_16 = arith.constant 0 : index
    %c0_17 = arith.constant 0 : index
    %c1_18 = arith.constant 1 : index
    %c0_19 = arith.constant 0 : index
    %8 = vector.load %arg8[%c0_16, %c0_17, %c1_18, %c0_19] : memref<2x10x16x256xf32, #tpu.memory_space<vmem>>, vector<2x8x8x256xf32>
    %9 = vector.shape_cast %8 : vector<2x8x8x256xf32> to vector<128x256xf32>
    %10 = arith.truncf %9 : vector<128x256xf32> to vector<128x256xbf16>
    %c0_20 = arith.constant 0 : index
    %c256 = arith.constant 256 : index
    %11 = vector.load %arg12[%c0_20, %c256] : memref<128x2304xbf16, #tpu.memory_space<vmem>>, vector<128x256xbf16>
    tpu.vector_store %arg12[%c0_20, %c256], %10 {strides = array<i32>} : memref<128x2304xbf16, #tpu.memory_space<vmem>>, vector<128x256xbf16>,
    %c0_21 = arith.constant 0 : index
    %c0_22 = arith.constant 0 : index
    %c2 = arith.constant 2 : index
    %c0_23 = arith.constant 0 : index
    %12 = vector.load %arg8[%c0_21, %c0_22, %c2, %c0_23] : memref<2x10x16x256xf32, #tpu.memory_space<vmem>>, vector<2x8x8x256xf32>
    %13 = vector.shape_cast %12 : vector<2x8x8x256xf32> to vector<128x256xf32>
    %14 = arith.truncf %13 : vector<128x256xf32> to vector<128x256xbf16>
    %c0_24 = arith.constant 0 : index
    %c512 = arith.constant 512 : index
    %15 = vector.load %arg12[%c0_24, %c512] : memref<128x2304xbf16, #tpu.memory_space<vmem>>, vector<128x256xbf16>
    tpu.vector_store %arg12[%c0_24, %c512], %14 {strides = array<i32>} : memref<128x2304xbf16, #tpu.memory_space<vmem>>, vector<128x256xbf16>,
    %c0_25 = arith.constant 0 : index
    %c1_26 = arith.constant 1 : index
    %c0_27 = arith.constant 0 : index
    %c0_28 = arith.constant 0 : index
    %16 = vector.load %arg8[%c0_25, %c1_26, %c0_27, %c0_28] : memref<2x10x16x256xf32, #tpu.memory_space<vmem>>, vector<2x8x8x256xf32>
    %17 = vector.shape_cast %16 : vector<2x8x8x256xf32> to vector<128x256xf32>
    %18 = arith.truncf %17 : vector<128x256xf32> to vector<128x256xbf16>
    %c0_29 = arith.constant 0 : index
    %c768 = arith.constant 768 : index
    %19 = vector.load %arg12[%c0_29, %c768] : memref<128x2304xbf16, #tpu.memory_space<vmem>>, vector<128x256xbf16>
    tpu.vector_store %arg12[%c0_29, %c768], %18 {strides = array<i32>} : memref<128x2304xbf16, #tpu.memory_space<vmem>>, vector<128x256xbf16>,
    %c0_30 = arith.constant 0 : index
    %c1_31 = arith.constant 1 : index
    %c1_32 = arith.constant 1 : index
    %c0_33 = arith.constant 0 : index
    %20 = vector.load %arg8[%c0_30, %c1_31, %c1_32, %c0_33] : memref<2x10x16x256xf32, #tpu.memory_space<vmem>>, vector<2x8x8x256xf32>
    %21 = vector.shape_cast %20 : vector<2x8x8x256xf32> to vector<128x256xf32>
    %22 = arith.truncf %21 : vector<128x256xf32> to vector<128x256xbf16>
    %c0_34 = arith.constant 0 : index
    %c1024 = arith.constant 1024 : index
    %23 = vector.load %arg12[%c0_34, %c1024] : memref<128x2304xbf16, #tpu.memory_space<vmem>>, vector<128x256xbf16>
    tpu.vector_store %arg12[%c0_34, %c1024], %22 {strides = array<i32>} : memref<128x2304xbf16, #tpu.memory_space<vmem>>, vector<128x256xbf16>,
    %c0_35 = arith.constant 0 : index
    %c1_36 = arith.constant 1 : index
    %c2_37 = arith.constant 2 : index
    %c0_38 = arith.constant 0 : index
    %24 = vector.load %arg8[%c0_35, %c1_36, %c2_37, %c0_38] : memref<2x10x16x256xf32, #tpu.memory_space<vmem>>, vector<2x8x8x256xf32>
    %25 = vector.shape_cast %24 : vector<2x8x8x256xf32> to vector<128x256xf32>
    %26 = arith.truncf %25 : vector<128x256xf32> to vector<128x256xbf16>
    %c0_39 = arith.constant 0 : index
    %c1280 = arith.constant 1280 : index
    %27 = vector.load %arg12[%c0_39, %c1280] : memref<128x2304xbf16, #tpu.memory_space<vmem>>, vector<128x256xbf16>
    tpu.vector_store %arg12[%c0_39, %c1280], %26 {strides = array<i32>} : memref<128x2304xbf16, #tpu.memory_space<vmem>>, vector<128x256xbf16>,
    %c0_40 = arith.constant 0 : index
    %c2_41 = arith.constant 2 : index
    %c0_42 = arith.constant 0 : index
    %c0_43 = arith.constant 0 : index
    %28 = vector.load %arg8[%c0_40, %c2_41, %c0_42, %c0_43] : memref<2x10x16x256xf32, #tpu.memory_space<vmem>>, vector<2x8x8x256xf32>
    %29 = vector.shape_cast %28 : vector<2x8x8x256xf32> to vector<128x256xf32>
    %30 = arith.truncf %29 : vector<128x256xf32> to vector<128x256xbf16>
    %c0_44 = arith.constant 0 : index
    %c1536 = arith.constant 1536 : index
    %31 = vector.load %arg12[%c0_44, %c1536] : memref<128x2304xbf16, #tpu.memory_space<vmem>>, vector<128x256xbf16>
    tpu.vector_store %arg12[%c0_44, %c1536], %30 {strides = array<i32>} : memref<128x2304xbf16, #tpu.memory_space<vmem>>, vector<128x256xbf16>,
    %c0_45 = arith.constant 0 : index
    %c2_46 = arith.constant 2 : index
    %c1_47 = arith.constant 1 : index
    %c0_48 = arith.constant 0 : index
    %32 = vector.load %arg8[%c0_45, %c2_46, %c1_47, %c0_48] : memref<2x10x16x256xf32, #tpu.memory_space<vmem>>, vector<2x8x8x256xf32>
    %33 = vector.shape_cast %32 : vector<2x8x8x256xf32> to vector<128x256xf32>
    %34 = arith.truncf %33 : vector<128x256xf32> to vector<128x256xbf16>
    %c0_49 = arith.constant 0 : index
    %c1792 = arith.constant 1792 : index
    %35 = vector.load %arg12[%c0_49, %c1792] : memref<128x2304xbf16, #tpu.memory_space<vmem>>, vector<128x256xbf16>
    tpu.vector_store %arg12[%c0_49, %c1792], %34 {strides = array<i32>} : memref<128x2304xbf16, #tpu.memory_space<vmem>>, vector<128x256xbf16>,
    %c0_50 = arith.constant 0 : index
    %c2_51 = arith.constant 2 : index
    %c2_52 = arith.constant 2 : index
    %c0_53 = arith.constant 0 : index
    %36 = vector.load %arg8[%c0_50, %c2_51, %c2_52, %c0_53] : memref<2x10x16x256xf32, #tpu.memory_space<vmem>>, vector<2x8x8x256xf32>
    %37 = vector.shape_cast %36 : vector<2x8x8x256xf32> to vector<128x256xf32>
    %38 = arith.truncf %37 : vector<128x256xf32> to vector<128x256xbf16>
    %c0_54 = arith.constant 0 : index
    %c2048 = arith.constant 2048 : index
    %39 = vector.load %arg12[%c0_54, %c2048] : memref<128x2304xbf16, #tpu.memory_space<vmem>>, vector<128x256xbf16>
    tpu.vector_store %arg12[%c0_54, %c2048], %38 {strides = array<i32>} : memref<128x2304xbf16, #tpu.memory_space<vmem>>, vector<128x256xbf16>,
    %c0_55 = arith.constant 0 : index
    %c0_56 = arith.constant 0 : index
    %40 = vector.load %arg12[%c0_55, %c0_56] : memref<128x2304xbf16, #tpu.memory_space<vmem>>, vector<128x2304xbf16>
    %c0_57 = arith.constant 0 : index
    %c0_58 = arith.constant 0 : index
    %41 = vector.load %arg1[%c0_57, %c0_58] : memref<2304x128xbf16, #tpu.memory_space<vmem>>, vector<2304x128xbf16>
    %cst_59 = arith.constant dense<0.000000e+00> : vector<128x128xf32>
    %42 = tpu.matmul %40, %41, %cst_59 {dimension_numbers = #tpu.dot_dimension_numbers<[1], [0], [0], [1], [0, 0, 1, 1], [], []>} : vector<128x2304xbf16>, vector<2304x128xbf16>, vector<128x128xf32> -> vector<128x128xf32>
    %cst_60 = arith.constant dense<0.000000e+00> : vector<128xf32>
    %43 = vector.multi_reduction <add>, %42, %cst_60 [0] : vector<128x128xf32> to vector<128xf32>
    %44 = vector.shape_cast %43 : vector<128xf32> to vector<1x128xf32>
    %cst_61 = arith.constant 1.280000e+02 : f32
    %45 = vector.broadcast %cst_61 : f32 to vector<1x128xf32>
    %46 = arith.divf %44, %45 : vector<1x128xf32>
    %47 = arith.mulf %42, %42 : vector<128x128xf32>
    %cst_62 = arith.constant dense<0.000000e+00> : vector<128xf32>
    %48 = vector.multi_reduction <add>, %47, %cst_62 [0] : vector<128x128xf32> to vector<128xf32>
    %49 = vector.shape_cast %48 : vector<128xf32> to vector<1x128xf32>
    %cst_63 = arith.constant 1.280000e+02 : f32
    %50 = vector.broadcast %cst_63 : f32 to vector<1x128xf32>
    %51 = arith.divf %49, %50 : vector<1x128xf32>
    %52 = arith.mulf %46, %46 : vector<1x128xf32>
    %53 = arith.subf %51, %52 : vector<1x128xf32>
    %54 = vector.broadcast %46 : vector<1x128xf32> to vector<128x128xf32>
    %55 = arith.subf %42, %54 : vector<128x128xf32>
    %cst_64 = arith.constant 0.000000e+00 : f32
    %56 = vector.broadcast %cst_64 : f32 to vector<1x128xf32>
    %57 = arith.maximumf %53, %56 : vector<1x128xf32>
    %cst_65 = arith.constant 9.99999974E-6 : f32
    %58 = vector.broadcast %cst_65 : f32 to vector<1x128xf32>
    %59 = arith.addf %57, %58 : vector<1x128xf32>
    %60 = math.rsqrt %59 : vector<1x128xf32>
    %61 = vector.broadcast %60 : vector<1x128xf32> to vector<128x128xf32>
    %62 = arith.mulf %55, %61 : vector<128x128xf32>
    %c0_66 = arith.constant 0 : index
    %c0_67 = arith.constant 0 : index
    %63 = vector.load %arg5[%c0_66, %c0_67] : memref<4x128xf32, #tpu.memory_space<vmem>>, vector<1x128xf32>
    %64 = vector.broadcast %63 : vector<1x128xf32> to vector<128x128xf32>
    %65 = arith.mulf %62, %64 : vector<128x128xf32>
    %c0_68 = arith.constant 0 : index
    %c0_69 = arith.constant 0 : index
    %66 = vector.load %arg6[%c0_68, %c0_69] : memref<4x128xf32, #tpu.memory_space<vmem>>, vector<1x128xf32>
    %67 = vector.broadcast %66 : vector<1x128xf32> to vector<128x128xf32>
    %68 = arith.addf %65, %67 : vector<128x128xf32>
    %cst_70 = arith.constant 0.000000e+00 : f32
    %69 = vector.broadcast %cst_70 : f32 to vector<128x128xf32>
    %70 = arith.cmpf oge, %68, %69 : vector<128x128xf32>
    %cst_71 = arith.constant 2.000000e-01 : f32
    %71 = vector.broadcast %cst_71 : f32 to vector<128x128xf32>
    %72 = arith.mulf %71, %68 : vector<128x128xf32>
    %73 = arith.select %70, %68, %72 : vector<128x128xi1>, vector<128x128xf32>
    %74 = vector.shape_cast %73 : vector<128x128xf32> to vector<2x8x8x128xf32>
    %cst_72 = arith.constant 0.000000e+00 : f32
    %75 = vector.broadcast %cst_72 : f32 to vector<2x10x16x128xf32>
    %c0_73 = arith.constant 0 : index
    %c0_74 = arith.constant 0 : index
    %c0_75 = arith.constant 0 : index
    %c0_76 = arith.constant 0 : index
    %76 = vector.load %arg9[%c0_73, %c0_74, %c0_75, %c0_76] : memref<2x10x16x128xf32, #tpu.memory_space<vmem>>, vector<2x10x16x128xf32>
    tpu.vector_store %arg9[%c0_73, %c0_74, %c0_75, %c0_76], %75 {strides = array<i32>} : memref<2x10x16x128xf32, #tpu.memory_space<vmem>>, vector<2x10x16x128xf32>,
    %c0_77 = arith.constant 0 : index
    %c1_78 = arith.constant 1 : index
    %c1_79 = arith.constant 1 : index
    %c0_80 = arith.constant 0 : index
    %77 = vector.load %arg9[%c0_77, %c1_78, %c1_79, %c0_80] : memref<2x10x16x128xf32, #tpu.memory_space<vmem>>, vector<2x8x8x128xf32>
    tpu.vector_store %arg9[%c0_77, %c1_78, %c1_79, %c0_80], %74 {strides = array<i32>} : memref<2x10x16x128xf32, #tpu.memory_space<vmem>>, vector<2x8x8x128xf32>,
    %c0_81 = arith.constant 0 : index
    %c0_82 = arith.constant 0 : index
    %c0_83 = arith.constant 0 : index
    %c0_84 = arith.constant 0 : index
    %78 = vector.load %arg9[%c0_81, %c0_82, %c0_83, %c0_84] : memref<2x10x16x128xf32, #tpu.memory_space<vmem>>, vector<2x8x8x128xf32>
    %79 = vector.shape_cast %78 : vector<2x8x8x128xf32> to vector<128x128xf32>
    %80 = arith.truncf %79 : vector<128x128xf32> to vector<128x128xbf16>
    %c0_85 = arith.constant 0 : index
    %c0_86 = arith.constant 0 : index
    %81 = vector.load %arg12[%c0_85, %c0_86] : memref<128x2304xbf16, #tpu.memory_space<vmem>>, vector<128x128xbf16>
    tpu.vector_store %arg12[%c0_85, %c0_86], %80 {strides = array<i32>} : memref<128x2304xbf16, #tpu.memory_space<vmem>>, vector<128x128xbf16>,
    %c0_87 = arith.constant 0 : index
    %c0_88 = arith.constant 0 : index
    %c1_89 = arith.constant 1 : index
    %c0_90 = arith.constant 0 : index
    %82 = vector.load %arg9[%c0_87, %c0_88, %c1_89, %c0_90] : memref<2x10x16x128xf32, #tpu.memory_space<vmem>>, vector<2x8x8x128xf32>
    %83 = vector.shape_cast %82 : vector<2x8x8x128xf32> to vector<128x128xf32>
    %84 = arith.truncf %83 : vector<128x128xf32> to vector<128x128xbf16>
    %c0_91 = arith.constant 0 : index
    %c128 = arith.constant 128 : index
    %85 = vector.load %arg12[%c0_91, %c128] : memref<128x2304xbf16, #tpu.memory_space<vmem>>, vector<128x128xbf16>
    tpu.vector_store %arg12[%c0_91, %c128], %84 {strides = array<i32>} : memref<128x2304xbf16, #tpu.memory_space<vmem>>, vector<128x128xbf16>,
    %c0_92 = arith.constant 0 : index
    %c0_93 = arith.constant 0 : index
    %c2_94 = arith.constant 2 : index
    %c0_95 = arith.constant 0 : index
    %86 = vector.load %arg9[%c0_92, %c0_93, %c2_94, %c0_95] : memref<2x10x16x128xf32, #tpu.memory_space<vmem>>, vector<2x8x8x128xf32>
    %87 = vector.shape_cast %86 : vector<2x8x8x128xf32> to vector<128x128xf32>
    %88 = arith.truncf %87 : vector<128x128xf32> to vector<128x128xbf16>
    %c0_96 = arith.constant 0 : index
    %c256_97 = arith.constant 256 : index
    %89 = vector.load %arg12[%c0_96, %c256_97] : memref<128x2304xbf16, #tpu.memory_space<vmem>>, vector<128x128xbf16>
    tpu.vector_store %arg12[%c0_96, %c256_97], %88 {strides = array<i32>} : memref<128x2304xbf16, #tpu.memory_space<vmem>>, vector<128x128xbf16>,
    %c0_98 = arith.constant 0 : index
    %c1_99 = arith.constant 1 : index
    %c0_100 = arith.constant 0 : index
    %c0_101 = arith.constant 0 : index
    %90 = vector.load %arg9[%c0_98, %c1_99, %c0_100, %c0_101] : memref<2x10x16x128xf32, #tpu.memory_space<vmem>>, vector<2x8x8x128xf32>
    %91 = vector.shape_cast %90 : vector<2x8x8x128xf32> to vector<128x128xf32>
    %92 = arith.truncf %91 : vector<128x128xf32> to vector<128x128xbf16>
    %c0_102 = arith.constant 0 : index
    %c384 = arith.constant 384 : index
    %93 = vector.load %arg12[%c0_102, %c384] : memref<128x2304xbf16, #tpu.memory_space<vmem>>, vector<128x128xbf16>
    tpu.vector_store %arg12[%c0_102, %c384], %92 {strides = array<i32>} : memref<128x2304xbf16, #tpu.memory_space<vmem>>, vector<128x128xbf16>,
    %c0_103 = arith.constant 0 : index
    %c1_104 = arith.constant 1 : index
    %c1_105 = arith.constant 1 : index
    %c0_106 = arith.constant 0 : index
    %94 = vector.load %arg9[%c0_103, %c1_104, %c1_105, %c0_106] : memref<2x10x16x128xf32, #tpu.memory_space<vmem>>, vector<2x8x8x128xf32>
    %95 = vector.shape_cast %94 : vector<2x8x8x128xf32> to vector<128x128xf32>
    %96 = arith.truncf %95 : vector<128x128xf32> to vector<128x128xbf16>
    %c0_107 = arith.constant 0 : index
    %c512_108 = arith.constant 512 : index
    %97 = vector.load %arg12[%c0_107, %c512_108] : memref<128x2304xbf16, #tpu.memory_space<vmem>>, vector<128x128xbf16>
    tpu.vector_store %arg12[%c0_107, %c512_108], %96 {strides = array<i32>} : memref<128x2304xbf16, #tpu.memory_space<vmem>>, vector<128x128xbf16>,
    %c0_109 = arith.constant 0 : index
    %c1_110 = arith.constant 1 : index
    %c2_111 = arith.constant 2 : index
    %c0_112 = arith.constant 0 : index
    %98 = vector.load %arg9[%c0_109, %c1_110, %c2_111, %c0_112] : memref<2x10x16x128xf32, #tpu.memory_space<vmem>>, vector<2x8x8x128xf32>
    %99 = vector.shape_cast %98 : vector<2x8x8x128xf32> to vector<128x128xf32>
    %100 = arith.truncf %99 : vector<128x128xf32> to vector<128x128xbf16>
    %c0_113 = arith.constant 0 : index
    %c640 = arith.constant 640 : index
    %101 = vector.load %arg12[%c0_113, %c640] : memref<128x2304xbf16, #tpu.memory_space<vmem>>, vector<128x128xbf16>
    tpu.vector_store %arg12[%c0_113, %c640], %100 {strides = array<i32>} : memref<128x2304xbf16, #tpu.memory_space<vmem>>, vector<128x128xbf16>,
    %c0_114 = arith.constant 0 : index
    %c2_115 = arith.constant 2 : index
    %c0_116 = arith.constant 0 : index
    %c0_117 = arith.constant 0 : index
    %102 = vector.load %arg9[%c0_114, %c2_115, %c0_116, %c0_117] : memref<2x10x16x128xf32, #tpu.memory_space<vmem>>, vector<2x8x8x128xf32>
    %103 = vector.shape_cast %102 : vector<2x8x8x128xf32> to vector<128x128xf32>
    %104 = arith.truncf %103 : vector<128x128xf32> to vector<128x128xbf16>
    %c0_118 = arith.constant 0 : index
    %c768_119 = arith.constant 768 : index
    %105 = vector.load %arg12[%c0_118, %c768_119] : memref<128x2304xbf16, #tpu.memory_space<vmem>>, vector<128x128xbf16>
    tpu.vector_store %arg12[%c0_118, %c768_119], %104 {strides = array<i32>} : memref<128x2304xbf16, #tpu.memory_space<vmem>>, vector<128x128xbf16>,
    %c0_120 = arith.constant 0 : index
    %c2_121 = arith.constant 2 : index
    %c1_122 = arith.constant 1 : index
    %c0_123 = arith.constant 0 : index
    %106 = vector.load %arg9[%c0_120, %c2_121, %c1_122, %c0_123] : memref<2x10x16x128xf32, #tpu.memory_space<vmem>>, vector<2x8x8x128xf32>
    %107 = vector.shape_cast %106 : vector<2x8x8x128xf32> to vector<128x128xf32>
    %108 = arith.truncf %107 : vector<128x128xf32> to vector<128x128xbf16>
    %c0_124 = arith.constant 0 : index
    %c896 = arith.constant 896 : index
    %109 = vector.load %arg12[%c0_124, %c896] : memref<128x2304xbf16, #tpu.memory_space<vmem>>, vector<128x128xbf16>
    tpu.vector_store %arg12[%c0_124, %c896], %108 {strides = array<i32>} : memref<128x2304xbf16, #tpu.memory_space<vmem>>, vector<128x128xbf16>,
    %c0_125 = arith.constant 0 : index
    %c2_126 = arith.constant 2 : index
    %c2_127 = arith.constant 2 : index
    %c0_128 = arith.constant 0 : index
    %110 = vector.load %arg9[%c0_125, %c2_126, %c2_127, %c0_128] : memref<2x10x16x128xf32, #tpu.memory_space<vmem>>, vector<2x8x8x128xf32>
    %111 = vector.shape_cast %110 : vector<2x8x8x128xf32> to vector<128x128xf32>
    %112 = arith.truncf %111 : vector<128x128xf32> to vector<128x128xbf16>
    %c0_129 = arith.constant 0 : index
    %c1024_130 = arith.constant 1024 : index
    %113 = vector.load %arg12[%c0_129, %c1024_130] : memref<128x2304xbf16, #tpu.memory_space<vmem>>, vector<128x128xbf16>
    tpu.vector_store %arg12[%c0_129, %c1024_130], %112 {strides = array<i32>} : memref<128x2304xbf16, #tpu.memory_space<vmem>>, vector<128x128xbf16>,
    %c0_131 = arith.constant 0 : index
    %c0_132 = arith.constant 0 : index
    %114 = vector.load %arg12[%c0_131, %c0_132] : memref<128x2304xbf16, #tpu.memory_space<vmem>>, vector<128x1152xbf16>
    %c0_133 = arith.constant 0 : index
    %c0_134 = arith.constant 0 : index
    %115 = vector.load %arg2[%c0_133, %c0_134] : memref<1152x128xbf16, #tpu.memory_space<vmem>>, vector<1152x128xbf16>
    %cst_135 = arith.constant dense<0.000000e+00> : vector<128x128xf32>
    %116 = tpu.matmul %114, %115, %cst_135 {dimension_numbers = #tpu.dot_dimension_numbers<[1], [0], [0], [1], [0, 0, 1, 1], [], []>} : vector<128x1152xbf16>, vector<1152x128xbf16>, vector<128x128xf32> -> vector<128x128xf32>
    %cst_136 = arith.constant dense<0.000000e+00> : vector<128xf32>
    %117 = vector.multi_reduction <add>, %116, %cst_136 [0] : vector<128x128xf32> to vector<128xf32>
    %118 = vector.shape_cast %117 : vector<128xf32> to vector<1x128xf32>
    %cst_137 = arith.constant 1.280000e+02 : f32
    %119 = vector.broadcast %cst_137 : f32 to vector<1x128xf32>
    %120 = arith.divf %118, %119 : vector<1x128xf32>
    %121 = arith.mulf %116, %116 : vector<128x128xf32>
    %cst_138 = arith.constant dense<0.000000e+00> : vector<128xf32>
    %122 = vector.multi_reduction <add>, %121, %cst_138 [0] : vector<128x128xf32> to vector<128xf32>
    %123 = vector.shape_cast %122 : vector<128xf32> to vector<1x128xf32>
    %cst_139 = arith.constant 1.280000e+02 : f32
    %124 = vector.broadcast %cst_139 : f32 to vector<1x128xf32>
    %125 = arith.divf %123, %124 : vector<1x128xf32>
    %126 = arith.mulf %120, %120 : vector<1x128xf32>
    %127 = arith.subf %125, %126 : vector<1x128xf32>
    %128 = vector.broadcast %120 : vector<1x128xf32> to vector<128x128xf32>
    %129 = arith.subf %116, %128 : vector<128x128xf32>
    %cst_140 = arith.constant 0.000000e+00 : f32
    %130 = vector.broadcast %cst_140 : f32 to vector<1x128xf32>
    %131 = arith.maximumf %127, %130 : vector<1x128xf32>
    %cst_141 = arith.constant 9.99999974E-6 : f32
    %132 = vector.broadcast %cst_141 : f32 to vector<1x128xf32>
    %133 = arith.addf %131, %132 : vector<1x128xf32>
    %134 = math.rsqrt %133 : vector<1x128xf32>
    %135 = vector.broadcast %134 : vector<1x128xf32> to vector<128x128xf32>
    %136 = arith.mulf %129, %135 : vector<128x128xf32>
    %c1_142 = arith.constant 1 : index
    %c0_143 = arith.constant 0 : index
    %137 = vector.load %arg5[%c1_142, %c0_143] : memref<4x128xf32, #tpu.memory_space<vmem>>, vector<1x128xf32>
    %138 = vector.broadcast %137 : vector<1x128xf32> to vector<128x128xf32>
    %139 = arith.mulf %136, %138 : vector<128x128xf32>
    %c1_144 = arith.constant 1 : index
    %c0_145 = arith.constant 0 : index
    %140 = vector.load %arg6[%c1_144, %c0_145] : memref<4x128xf32, #tpu.memory_space<vmem>>, vector<1x128xf32>
    %141 = vector.broadcast %140 : vector<1x128xf32> to vector<128x128xf32>
    %142 = arith.addf %139, %141 : vector<128x128xf32>
    %cst_146 = arith.constant 0.000000e+00 : f32
    %143 = vector.broadcast %cst_146 : f32 to vector<128x128xf32>
    %144 = arith.cmpf oge, %142, %143 : vector<128x128xf32>
    %cst_147 = arith.constant 2.000000e-01 : f32
    %145 = vector.broadcast %cst_147 : f32 to vector<128x128xf32>
    %146 = arith.mulf %145, %142 : vector<128x128xf32>
    %147 = arith.select %144, %142, %146 : vector<128x128xi1>, vector<128x128xf32>
    %148 = vector.shape_cast %147 : vector<128x128xf32> to vector<2x8x8x128xf32>
    %cst_148 = arith.constant 0.000000e+00 : f32
    %149 = vector.broadcast %cst_148 : f32 to vector<2x10x16x128xf32>
    %c0_149 = arith.constant 0 : index
    %c0_150 = arith.constant 0 : index
    %c0_151 = arith.constant 0 : index
    %c0_152 = arith.constant 0 : index
    %150 = vector.load %arg10[%c0_149, %c0_150, %c0_151, %c0_152] : memref<2x10x16x128xf32, #tpu.memory_space<vmem>>, vector<2x10x16x128xf32>
    tpu.vector_store %arg10[%c0_149, %c0_150, %c0_151, %c0_152], %149 {strides = array<i32>} : memref<2x10x16x128xf32, #tpu.memory_space<vmem>>, vector<2x10x16x128xf32>,
    %c0_153 = arith.constant 0 : index
    %c1_154 = arith.constant 1 : index
    %c1_155 = arith.constant 1 : index
    %c0_156 = arith.constant 0 : index
    %151 = vector.load %arg10[%c0_153, %c1_154, %c1_155, %c0_156] : memref<2x10x16x128xf32, #tpu.memory_space<vmem>>, vector<2x8x8x128xf32>
    tpu.vector_store %arg10[%c0_153, %c1_154, %c1_155, %c0_156], %148 {strides = array<i32>} : memref<2x10x16x128xf32, #tpu.memory_space<vmem>>, vector<2x8x8x128xf32>,
    %c0_157 = arith.constant 0 : index
    %c0_158 = arith.constant 0 : index
    %c0_159 = arith.constant 0 : index
    %c0_160 = arith.constant 0 : index
    %152 = vector.load %arg10[%c0_157, %c0_158, %c0_159, %c0_160] : memref<2x10x16x128xf32, #tpu.memory_space<vmem>>, vector<2x8x8x128xf32>
    %153 = vector.shape_cast %152 : vector<2x8x8x128xf32> to vector<128x128xf32>
    %154 = arith.truncf %153 : vector<128x128xf32> to vector<128x128xbf16>
    %c0_161 = arith.constant 0 : index
    %c0_162 = arith.constant 0 : index
    %155 = vector.load %arg12[%c0_161, %c0_162] : memref<128x2304xbf16, #tpu.memory_space<vmem>>, vector<128x128xbf16>
    tpu.vector_store %arg12[%c0_161, %c0_162], %154 {strides = array<i32>} : memref<128x2304xbf16, #tpu.memory_space<vmem>>, vector<128x128xbf16>,
    %c0_163 = arith.constant 0 : index
    %c0_164 = arith.constant 0 : index
    %c1_165 = arith.constant 1 : index
    %c0_166 = arith.constant 0 : index
    %156 = vector.load %arg10[%c0_163, %c0_164, %c1_165, %c0_166] : memref<2x10x16x128xf32, #tpu.memory_space<vmem>>, vector<2x8x8x128xf32>
    %157 = vector.shape_cast %156 : vector<2x8x8x128xf32> to vector<128x128xf32>
    %158 = arith.truncf %157 : vector<128x128xf32> to vector<128x128xbf16>
    %c0_167 = arith.constant 0 : index
    %c128_168 = arith.constant 128 : index
    %159 = vector.load %arg12[%c0_167, %c128_168] : memref<128x2304xbf16, #tpu.memory_space<vmem>>, vector<128x128xbf16>
    tpu.vector_store %arg12[%c0_167, %c128_168], %158 {strides = array<i32>} : memref<128x2304xbf16, #tpu.memory_space<vmem>>, vector<128x128xbf16>,
    %c0_169 = arith.constant 0 : index
    %c0_170 = arith.constant 0 : index
    %c2_171 = arith.constant 2 : index
    %c0_172 = arith.constant 0 : index
    %160 = vector.load %arg10[%c0_169, %c0_170, %c2_171, %c0_172] : memref<2x10x16x128xf32, #tpu.memory_space<vmem>>, vector<2x8x8x128xf32>
    %161 = vector.shape_cast %160 : vector<2x8x8x128xf32> to vector<128x128xf32>
    %162 = arith.truncf %161 : vector<128x128xf32> to vector<128x128xbf16>
    %c0_173 = arith.constant 0 : index
    %c256_174 = arith.constant 256 : index
    %163 = vector.load %arg12[%c0_173, %c256_174] : memref<128x2304xbf16, #tpu.memory_space<vmem>>, vector<128x128xbf16>
    tpu.vector_store %arg12[%c0_173, %c256_174], %162 {strides = array<i32>} : memref<128x2304xbf16, #tpu.memory_space<vmem>>, vector<128x128xbf16>,
    %c0_175 = arith.constant 0 : index
    %c1_176 = arith.constant 1 : index
    %c0_177 = arith.constant 0 : index
    %c0_178 = arith.constant 0 : index
    %164 = vector.load %arg10[%c0_175, %c1_176, %c0_177, %c0_178] : memref<2x10x16x128xf32, #tpu.memory_space<vmem>>, vector<2x8x8x128xf32>
    %165 = vector.shape_cast %164 : vector<2x8x8x128xf32> to vector<128x128xf32>
    %166 = arith.truncf %165 : vector<128x128xf32> to vector<128x128xbf16>
    %c0_179 = arith.constant 0 : index
    %c384_180 = arith.constant 384 : index
    %167 = vector.load %arg12[%c0_179, %c384_180] : memref<128x2304xbf16, #tpu.memory_space<vmem>>, vector<128x128xbf16>
    tpu.vector_store %arg12[%c0_179, %c384_180], %166 {strides = array<i32>} : memref<128x2304xbf16, #tpu.memory_space<vmem>>, vector<128x128xbf16>,
    %c0_181 = arith.constant 0 : index
    %c1_182 = arith.constant 1 : index
    %c1_183 = arith.constant 1 : index
    %c0_184 = arith.constant 0 : index
    %168 = vector.load %arg10[%c0_181, %c1_182, %c1_183, %c0_184] : memref<2x10x16x128xf32, #tpu.memory_space<vmem>>, vector<2x8x8x128xf32>
    %169 = vector.shape_cast %168 : vector<2x8x8x128xf32> to vector<128x128xf32>
    %170 = arith.truncf %169 : vector<128x128xf32> to vector<128x128xbf16>
    %c0_185 = arith.constant 0 : index
    %c512_186 = arith.constant 512 : index
    %171 = vector.load %arg12[%c0_185, %c512_186] : memref<128x2304xbf16, #tpu.memory_space<vmem>>, vector<128x128xbf16>
    tpu.vector_store %arg12[%c0_185, %c512_186], %170 {strides = array<i32>} : memref<128x2304xbf16, #tpu.memory_space<vmem>>, vector<128x128xbf16>,
    %c0_187 = arith.constant 0 : index
    %c1_188 = arith.constant 1 : index
    %c2_189 = arith.constant 2 : index
    %c0_190 = arith.constant 0 : index
    %172 = vector.load %arg10[%c0_187, %c1_188, %c2_189, %c0_190] : memref<2x10x16x128xf32, #tpu.memory_space<vmem>>, vector<2x8x8x128xf32>
    %173 = vector.shape_cast %172 : vector<2x8x8x128xf32> to vector<128x128xf32>
    %174 = arith.truncf %173 : vector<128x128xf32> to vector<128x128xbf16>
    %c0_191 = arith.constant 0 : index
    %c640_192 = arith.constant 640 : index
    %175 = vector.load %arg12[%c0_191, %c640_192] : memref<128x2304xbf16, #tpu.memory_space<vmem>>, vector<128x128xbf16>
    tpu.vector_store %arg12[%c0_191, %c640_192], %174 {strides = array<i32>} : memref<128x2304xbf16, #tpu.memory_space<vmem>>, vector<128x128xbf16>,
    %c0_193 = arith.constant 0 : index
    %c2_194 = arith.constant 2 : index
    %c0_195 = arith.constant 0 : index
    %c0_196 = arith.constant 0 : index
    %176 = vector.load %arg10[%c0_193, %c2_194, %c0_195, %c0_196] : memref<2x10x16x128xf32, #tpu.memory_space<vmem>>, vector<2x8x8x128xf32>
    %177 = vector.shape_cast %176 : vector<2x8x8x128xf32> to vector<128x128xf32>
    %178 = arith.truncf %177 : vector<128x128xf32> to vector<128x128xbf16>
    %c0_197 = arith.constant 0 : index
    %c768_198 = arith.constant 768 : index
    %179 = vector.load %arg12[%c0_197, %c768_198] : memref<128x2304xbf16, #tpu.memory_space<vmem>>, vector<128x128xbf16>
    tpu.vector_store %arg12[%c0_197, %c768_198], %178 {strides = array<i32>} : memref<128x2304xbf16, #tpu.memory_space<vmem>>, vector<128x128xbf16>,
    %c0_199 = arith.constant 0 : index
    %c2_200 = arith.constant 2 : index
    %c1_201 = arith.constant 1 : index
    %c0_202 = arith.constant 0 : index
    %180 = vector.load %arg10[%c0_199, %c2_200, %c1_201, %c0_202] : memref<2x10x16x128xf32, #tpu.memory_space<vmem>>, vector<2x8x8x128xf32>
    %181 = vector.shape_cast %180 : vector<2x8x8x128xf32> to vector<128x128xf32>
    %182 = arith.truncf %181 : vector<128x128xf32> to vector<128x128xbf16>
    %c0_203 = arith.constant 0 : index
    %c896_204 = arith.constant 896 : index
    %183 = vector.load %arg12[%c0_203, %c896_204] : memref<128x2304xbf16, #tpu.memory_space<vmem>>, vector<128x128xbf16>
    tpu.vector_store %arg12[%c0_203, %c896_204], %182 {strides = array<i32>} : memref<128x2304xbf16, #tpu.memory_space<vmem>>, vector<128x128xbf16>,
    %c0_205 = arith.constant 0 : index
    %c2_206 = arith.constant 2 : index
    %c2_207 = arith.constant 2 : index
    %c0_208 = arith.constant 0 : index
    %184 = vector.load %arg10[%c0_205, %c2_206, %c2_207, %c0_208] : memref<2x10x16x128xf32, #tpu.memory_space<vmem>>, vector<2x8x8x128xf32>
    %185 = vector.shape_cast %184 : vector<2x8x8x128xf32> to vector<128x128xf32>
    %186 = arith.truncf %185 : vector<128x128xf32> to vector<128x128xbf16>
    %c0_209 = arith.constant 0 : index
    %c1024_210 = arith.constant 1024 : index
    %187 = vector.load %arg12[%c0_209, %c1024_210] : memref<128x2304xbf16, #tpu.memory_space<vmem>>, vector<128x128xbf16>
    tpu.vector_store %arg12[%c0_209, %c1024_210], %186 {strides = array<i32>} : memref<128x2304xbf16, #tpu.memory_space<vmem>>, vector<128x128xbf16>,
    %c0_211 = arith.constant 0 : index
    %c0_212 = arith.constant 0 : index
    %188 = vector.load %arg12[%c0_211, %c0_212] : memref<128x2304xbf16, #tpu.memory_space<vmem>>, vector<128x1152xbf16>
    %c0_213 = arith.constant 0 : index
    %c0_214 = arith.constant 0 : index
    %189 = vector.load %arg3[%c0_213, %c0_214] : memref<1152x128xbf16, #tpu.memory_space<vmem>>, vector<1152x128xbf16>
    %cst_215 = arith.constant dense<0.000000e+00> : vector<128x128xf32>
    %190 = tpu.matmul %188, %189, %cst_215 {dimension_numbers = #tpu.dot_dimension_numbers<[1], [0], [0], [1], [0, 0, 1, 1], [], []>} : vector<128x1152xbf16>, vector<1152x128xbf16>, vector<128x128xf32> -> vector<128x128xf32>
    %cst_216 = arith.constant dense<0.000000e+00> : vector<128xf32>
    %191 = vector.multi_reduction <add>, %190, %cst_216 [0] : vector<128x128xf32> to vector<128xf32>
    %192 = vector.shape_cast %191 : vector<128xf32> to vector<1x128xf32>
    %cst_217 = arith.constant 1.280000e+02 : f32
    %193 = vector.broadcast %cst_217 : f32 to vector<1x128xf32>
    %194 = arith.divf %192, %193 : vector<1x128xf32>
    %195 = arith.mulf %190, %190 : vector<128x128xf32>
    %cst_218 = arith.constant dense<0.000000e+00> : vector<128xf32>
    %196 = vector.multi_reduction <add>, %195, %cst_218 [0] : vector<128x128xf32> to vector<128xf32>
    %197 = vector.shape_cast %196 : vector<128xf32> to vector<1x128xf32>
    %cst_219 = arith.constant 1.280000e+02 : f32
    %198 = vector.broadcast %cst_219 : f32 to vector<1x128xf32>
    %199 = arith.divf %197, %198 : vector<1x128xf32>
    %200 = arith.mulf %194, %194 : vector<1x128xf32>
    %201 = arith.subf %199, %200 : vector<1x128xf32>
    %202 = vector.broadcast %194 : vector<1x128xf32> to vector<128x128xf32>
    %203 = arith.subf %190, %202 : vector<128x128xf32>
    %cst_220 = arith.constant 0.000000e+00 : f32
    %204 = vector.broadcast %cst_220 : f32 to vector<1x128xf32>
    %205 = arith.maximumf %201, %204 : vector<1x128xf32>
    %cst_221 = arith.constant 9.99999974E-6 : f32
    %206 = vector.broadcast %cst_221 : f32 to vector<1x128xf32>
    %207 = arith.addf %205, %206 : vector<1x128xf32>
    %208 = math.rsqrt %207 : vector<1x128xf32>
    %209 = vector.broadcast %208 : vector<1x128xf32> to vector<128x128xf32>
    %210 = arith.mulf %203, %209 : vector<128x128xf32>
    %c2_222 = arith.constant 2 : index
    %c0_223 = arith.constant 0 : index
    %211 = vector.load %arg5[%c2_222, %c0_223] : memref<4x128xf32, #tpu.memory_space<vmem>>, vector<1x128xf32>
    %212 = vector.broadcast %211 : vector<1x128xf32> to vector<128x128xf32>
    %213 = arith.mulf %210, %212 : vector<128x128xf32>
    %c2_224 = arith.constant 2 : index
    %c0_225 = arith.constant 0 : index
    %214 = vector.load %arg6[%c2_224, %c0_225] : memref<4x128xf32, #tpu.memory_space<vmem>>, vector<1x128xf32>
    %215 = vector.broadcast %214 : vector<1x128xf32> to vector<128x128xf32>
    %216 = arith.addf %213, %215 : vector<128x128xf32>
    %cst_226 = arith.constant 0.000000e+00 : f32
    %217 = vector.broadcast %cst_226 : f32 to vector<128x128xf32>
    %218 = arith.cmpf oge, %216, %217 : vector<128x128xf32>
    %cst_227 = arith.constant 2.000000e-01 : f32
    %219 = vector.broadcast %cst_227 : f32 to vector<128x128xf32>
    %220 = arith.mulf %219, %216 : vector<128x128xf32>
    %221 = arith.select %218, %216, %220 : vector<128x128xi1>, vector<128x128xf32>
    %222 = vector.shape_cast %221 : vector<128x128xf32> to vector<2x8x8x128xf32>
    %cst_228 = arith.constant 0.000000e+00 : f32
    %223 = vector.broadcast %cst_228 : f32 to vector<2x10x16x128xf32>
    %c0_229 = arith.constant 0 : index
    %c0_230 = arith.constant 0 : index
    %c0_231 = arith.constant 0 : index
    %c0_232 = arith.constant 0 : index
    %224 = vector.load %arg11[%c0_229, %c0_230, %c0_231, %c0_232] : memref<2x10x16x128xf32, #tpu.memory_space<vmem>>, vector<2x10x16x128xf32>
    tpu.vector_store %arg11[%c0_229, %c0_230, %c0_231, %c0_232], %223 {strides = array<i32>} : memref<2x10x16x128xf32, #tpu.memory_space<vmem>>, vector<2x10x16x128xf32>,
    %c0_233 = arith.constant 0 : index
    %c1_234 = arith.constant 1 : index
    %c1_235 = arith.constant 1 : index
    %c0_236 = arith.constant 0 : index
    %225 = vector.load %arg11[%c0_233, %c1_234, %c1_235, %c0_236] : memref<2x10x16x128xf32, #tpu.memory_space<vmem>>, vector<2x8x8x128xf32>
    tpu.vector_store %arg11[%c0_233, %c1_234, %c1_235, %c0_236], %222 {strides = array<i32>} : memref<2x10x16x128xf32, #tpu.memory_space<vmem>>, vector<2x8x8x128xf32>,
    %c0_237 = arith.constant 0 : index
    %c0_238 = arith.constant 0 : index
    %c0_239 = arith.constant 0 : index
    %c0_240 = arith.constant 0 : index
    %226 = vector.load %arg11[%c0_237, %c0_238, %c0_239, %c0_240] : memref<2x10x16x128xf32, #tpu.memory_space<vmem>>, vector<2x8x8x128xf32>
    %227 = vector.shape_cast %226 : vector<2x8x8x128xf32> to vector<128x128xf32>
    %228 = arith.truncf %227 : vector<128x128xf32> to vector<128x128xbf16>
    %c0_241 = arith.constant 0 : index
    %c0_242 = arith.constant 0 : index
    %229 = vector.load %arg12[%c0_241, %c0_242] : memref<128x2304xbf16, #tpu.memory_space<vmem>>, vector<128x128xbf16>
    tpu.vector_store %arg12[%c0_241, %c0_242], %228 {strides = array<i32>} : memref<128x2304xbf16, #tpu.memory_space<vmem>>, vector<128x128xbf16>,
    %c0_243 = arith.constant 0 : index
    %c0_244 = arith.constant 0 : index
    %c1_245 = arith.constant 1 : index
    %c0_246 = arith.constant 0 : index
    %230 = vector.load %arg11[%c0_243, %c0_244, %c1_245, %c0_246] : memref<2x10x16x128xf32, #tpu.memory_space<vmem>>, vector<2x8x8x128xf32>
    %231 = vector.shape_cast %230 : vector<2x8x8x128xf32> to vector<128x128xf32>
    %232 = arith.truncf %231 : vector<128x128xf32> to vector<128x128xbf16>
    %c0_247 = arith.constant 0 : index
    %c128_248 = arith.constant 128 : index
    %233 = vector.load %arg12[%c0_247, %c128_248] : memref<128x2304xbf16, #tpu.memory_space<vmem>>, vector<128x128xbf16>
    tpu.vector_store %arg12[%c0_247, %c128_248], %232 {strides = array<i32>} : memref<128x2304xbf16, #tpu.memory_space<vmem>>, vector<128x128xbf16>,
    %c0_249 = arith.constant 0 : index
    %c0_250 = arith.constant 0 : index
    %c2_251 = arith.constant 2 : index
    %c0_252 = arith.constant 0 : index
    %234 = vector.load %arg11[%c0_249, %c0_250, %c2_251, %c0_252] : memref<2x10x16x128xf32, #tpu.memory_space<vmem>>, vector<2x8x8x128xf32>
    %235 = vector.shape_cast %234 : vector<2x8x8x128xf32> to vector<128x128xf32>
    %236 = arith.truncf %235 : vector<128x128xf32> to vector<128x128xbf16>
    %c0_253 = arith.constant 0 : index
    %c256_254 = arith.constant 256 : index
    %237 = vector.load %arg12[%c0_253, %c256_254] : memref<128x2304xbf16, #tpu.memory_space<vmem>>, vector<128x128xbf16>
    tpu.vector_store %arg12[%c0_253, %c256_254], %236 {strides = array<i32>} : memref<128x2304xbf16, #tpu.memory_space<vmem>>, vector<128x128xbf16>,
    %c0_255 = arith.constant 0 : index
    %c1_256 = arith.constant 1 : index
    %c0_257 = arith.constant 0 : index
    %c0_258 = arith.constant 0 : index
    %238 = vector.load %arg11[%c0_255, %c1_256, %c0_257, %c0_258] : memref<2x10x16x128xf32, #tpu.memory_space<vmem>>, vector<2x8x8x128xf32>
    %239 = vector.shape_cast %238 : vector<2x8x8x128xf32> to vector<128x128xf32>
    %240 = arith.truncf %239 : vector<128x128xf32> to vector<128x128xbf16>
    %c0_259 = arith.constant 0 : index
    %c384_260 = arith.constant 384 : index
    %241 = vector.load %arg12[%c0_259, %c384_260] : memref<128x2304xbf16, #tpu.memory_space<vmem>>, vector<128x128xbf16>
    tpu.vector_store %arg12[%c0_259, %c384_260], %240 {strides = array<i32>} : memref<128x2304xbf16, #tpu.memory_space<vmem>>, vector<128x128xbf16>,
    %c0_261 = arith.constant 0 : index
    %c1_262 = arith.constant 1 : index
    %c1_263 = arith.constant 1 : index
    %c0_264 = arith.constant 0 : index
    %242 = vector.load %arg11[%c0_261, %c1_262, %c1_263, %c0_264] : memref<2x10x16x128xf32, #tpu.memory_space<vmem>>, vector<2x8x8x128xf32>
    %243 = vector.shape_cast %242 : vector<2x8x8x128xf32> to vector<128x128xf32>
    %244 = arith.truncf %243 : vector<128x128xf32> to vector<128x128xbf16>
    %c0_265 = arith.constant 0 : index
    %c512_266 = arith.constant 512 : index
    %245 = vector.load %arg12[%c0_265, %c512_266] : memref<128x2304xbf16, #tpu.memory_space<vmem>>, vector<128x128xbf16>
    tpu.vector_store %arg12[%c0_265, %c512_266], %244 {strides = array<i32>} : memref<128x2304xbf16, #tpu.memory_space<vmem>>, vector<128x128xbf16>,
    %c0_267 = arith.constant 0 : index
    %c1_268 = arith.constant 1 : index
    %c2_269 = arith.constant 2 : index
    %c0_270 = arith.constant 0 : index
    %246 = vector.load %arg11[%c0_267, %c1_268, %c2_269, %c0_270] : memref<2x10x16x128xf32, #tpu.memory_space<vmem>>, vector<2x8x8x128xf32>
    %247 = vector.shape_cast %246 : vector<2x8x8x128xf32> to vector<128x128xf32>
    %248 = arith.truncf %247 : vector<128x128xf32> to vector<128x128xbf16>
    %c0_271 = arith.constant 0 : index
    %c640_272 = arith.constant 640 : index
    %249 = vector.load %arg12[%c0_271, %c640_272] : memref<128x2304xbf16, #tpu.memory_space<vmem>>, vector<128x128xbf16>
    tpu.vector_store %arg12[%c0_271, %c640_272], %248 {strides = array<i32>} : memref<128x2304xbf16, #tpu.memory_space<vmem>>, vector<128x128xbf16>,
    %c0_273 = arith.constant 0 : index
    %c2_274 = arith.constant 2 : index
    %c0_275 = arith.constant 0 : index
    %c0_276 = arith.constant 0 : index
    %250 = vector.load %arg11[%c0_273, %c2_274, %c0_275, %c0_276] : memref<2x10x16x128xf32, #tpu.memory_space<vmem>>, vector<2x8x8x128xf32>
    %251 = vector.shape_cast %250 : vector<2x8x8x128xf32> to vector<128x128xf32>
    %252 = arith.truncf %251 : vector<128x128xf32> to vector<128x128xbf16>
    %c0_277 = arith.constant 0 : index
    %c768_278 = arith.constant 768 : index
    %253 = vector.load %arg12[%c0_277, %c768_278] : memref<128x2304xbf16, #tpu.memory_space<vmem>>, vector<128x128xbf16>
    tpu.vector_store %arg12[%c0_277, %c768_278], %252 {strides = array<i32>} : memref<128x2304xbf16, #tpu.memory_space<vmem>>, vector<128x128xbf16>,
    %c0_279 = arith.constant 0 : index
    %c2_280 = arith.constant 2 : index
    %c1_281 = arith.constant 1 : index
    %c0_282 = arith.constant 0 : index
    %254 = vector.load %arg11[%c0_279, %c2_280, %c1_281, %c0_282] : memref<2x10x16x128xf32, #tpu.memory_space<vmem>>, vector<2x8x8x128xf32>
    %255 = vector.shape_cast %254 : vector<2x8x8x128xf32> to vector<128x128xf32>
    %256 = arith.truncf %255 : vector<128x128xf32> to vector<128x128xbf16>
    %c0_283 = arith.constant 0 : index
    %c896_284 = arith.constant 896 : index
    %257 = vector.load %arg12[%c0_283, %c896_284] : memref<128x2304xbf16, #tpu.memory_space<vmem>>, vector<128x128xbf16>
    tpu.vector_store %arg12[%c0_283, %c896_284], %256 {strides = array<i32>} : memref<128x2304xbf16, #tpu.memory_space<vmem>>, vector<128x128xbf16>,
    %c0_285 = arith.constant 0 : index
    %c2_286 = arith.constant 2 : index
    %c2_287 = arith.constant 2 : index
    %c0_288 = arith.constant 0 : index
    %258 = vector.load %arg11[%c0_285, %c2_286, %c2_287, %c0_288] : memref<2x10x16x128xf32, #tpu.memory_space<vmem>>, vector<2x8x8x128xf32>
    %259 = vector.shape_cast %258 : vector<2x8x8x128xf32> to vector<128x128xf32>
    %260 = arith.truncf %259 : vector<128x128xf32> to vector<128x128xbf16>
    %c0_289 = arith.constant 0 : index
    %c1024_290 = arith.constant 1024 : index
    %261 = vector.load %arg12[%c0_289, %c1024_290] : memref<128x2304xbf16, #tpu.memory_space<vmem>>, vector<128x128xbf16>
    tpu.vector_store %arg12[%c0_289, %c1024_290], %260 {strides = array<i32>} : memref<128x2304xbf16, #tpu.memory_space<vmem>>, vector<128x128xbf16>,
    %c0_291 = arith.constant 0 : index
    %c0_292 = arith.constant 0 : index
    %262 = vector.load %arg12[%c0_291, %c0_292] : memref<128x2304xbf16, #tpu.memory_space<vmem>>, vector<128x1152xbf16>
    %c0_293 = arith.constant 0 : index
    %c0_294 = arith.constant 0 : index
    %263 = vector.load %arg4[%c0_293, %c0_294] : memref<1152x128xbf16, #tpu.memory_space<vmem>>, vector<1152x128xbf16>
    %cst_295 = arith.constant dense<0.000000e+00> : vector<128x128xf32>
    %264 = tpu.matmul %262, %263, %cst_295 {dimension_numbers = #tpu.dot_dimension_numbers<[1], [0], [0], [1], [0, 0, 1, 1], [], []>} : vector<128x1152xbf16>, vector<1152x128xbf16>, vector<128x128xf32> -> vector<128x128xf32>
    %cst_296 = arith.constant dense<0.000000e+00> : vector<128xf32>
    %265 = vector.multi_reduction <add>, %264, %cst_296 [0] : vector<128x128xf32> to vector<128xf32>
    %266 = vector.shape_cast %265 : vector<128xf32> to vector<1x128xf32>
    %cst_297 = arith.constant 1.280000e+02 : f32
    %267 = vector.broadcast %cst_297 : f32 to vector<1x128xf32>
    %268 = arith.divf %266, %267 : vector<1x128xf32>
    %269 = arith.mulf %264, %264 : vector<128x128xf32>
    %cst_298 = arith.constant dense<0.000000e+00> : vector<128xf32>
    %270 = vector.multi_reduction <add>, %269, %cst_298 [0] : vector<128x128xf32> to vector<128xf32>
    %271 = vector.shape_cast %270 : vector<128xf32> to vector<1x128xf32>
    %cst_299 = arith.constant 1.280000e+02 : f32
    %272 = vector.broadcast %cst_299 : f32 to vector<1x128xf32>
    %273 = arith.divf %271, %272 : vector<1x128xf32>
    %274 = arith.mulf %268, %268 : vector<1x128xf32>
    %275 = arith.subf %273, %274 : vector<1x128xf32>
    %276 = vector.broadcast %268 : vector<1x128xf32> to vector<128x128xf32>
    %277 = arith.subf %264, %276 : vector<128x128xf32>
    %cst_300 = arith.constant 0.000000e+00 : f32
    %278 = vector.broadcast %cst_300 : f32 to vector<1x128xf32>
    %279 = arith.maximumf %275, %278 : vector<1x128xf32>
    %cst_301 = arith.constant 9.99999974E-6 : f32
    %280 = vector.broadcast %cst_301 : f32 to vector<1x128xf32>
    %281 = arith.addf %279, %280 : vector<1x128xf32>
    %282 = math.rsqrt %281 : vector<1x128xf32>
    %283 = vector.broadcast %282 : vector<1x128xf32> to vector<128x128xf32>
    %284 = arith.mulf %277, %283 : vector<128x128xf32>
    %c3 = arith.constant 3 : index
    %c0_302 = arith.constant 0 : index
    %285 = vector.load %arg5[%c3, %c0_302] : memref<4x128xf32, #tpu.memory_space<vmem>>, vector<1x128xf32>
    %286 = vector.broadcast %285 : vector<1x128xf32> to vector<128x128xf32>
    %287 = arith.mulf %284, %286 : vector<128x128xf32>
    %c3_303 = arith.constant 3 : index
    %c0_304 = arith.constant 0 : index
    %288 = vector.load %arg6[%c3_303, %c0_304] : memref<4x128xf32, #tpu.memory_space<vmem>>, vector<1x128xf32>
    %289 = vector.broadcast %288 : vector<1x128xf32> to vector<128x128xf32>
    %290 = arith.addf %287, %289 : vector<128x128xf32>
    %291 = arith.negf %290 : vector<128x128xf32>
    %292 = math.exp %291 : vector<128x128xf32>
    %cst_305 = arith.constant 1.000000e+00 : f32
    %293 = vector.broadcast %cst_305 : f32 to vector<128x128xf32>
    %294 = arith.addf %293, %292 : vector<128x128xf32>
    %295 = arith.divf %293, %294 : vector<128x128xf32>
    %c0_306 = arith.constant 0 : index
    %c0_307 = arith.constant 0 : index
    %296 = vector.load %arg7[%c0_306, %c0_307] : memref<128x128xf32, #tpu.memory_space<vmem>>, vector<128x128xf32>
    tpu.vector_store %arg7[%c0_306, %c0_307], %295 {strides = array<i32>} : memref<128x128xf32, #tpu.memory_space<vmem>>, vector<128x128xf32>,
    return
  }
}

</mosaic_0001>

<bundles_post_ra>
// kernel: squeeze.1
= control target key start
LH: loop header
LB: loop body
LE: loop exit
PB: predicated region body
PF: predicated region fallthrough
CT: control target
= control target key end

     0   :  { %s207_s0 = inlined_call_operand.vmem [shape: f32[128], index: 0, kind: input, shape index: {}]   ;;  %s208_s1 = inlined_call_operand.hbm [shape: f32[2,1,8,8], index: 1, kind: output, shape index: {}]  }
   0x1   :  { %v5_v0 = vld [vmem:[%s207_s0] sm:$0x1] }
   0x2   :  { %6 = vst [vmem:[#allocation2] sm:$0x1] %v5_v0 }
   0x3   :  { %2 = vsyncpa [#allocation1], 0  ;;  %s150_s0 = smov 120   ;;  %s151_s8 = smov 104   ;;  %vm8_vm0 = vcmask 64512  }
   0x4   :  { %s152_s9 = smov 112   ;;  %s153_s10 = smov 96  }
   0x5   :  { %s154_s11 = smov 88   ;;  %s155_s12 = smov 80  }
   0x6   :  { %s156_s13 = smov 72   ;;  %s157_s14 = smov 64  }
   0x7   :  { %s158_s15 = smov 56   ;;  %s159_s16 = smov 48  }
   0x8   :  { %s160_s17 = smov 40   ;;  %s161_s18 = smov 32  }
   0x9   :  { %v10_v1 = vld [vmem:[#allocation2] sm:$0x1]   ;;  %s162_s19 = smov 24   ;;  %s163_s20 = smov 16  }
   0xa   :  { %v22_v2 = vld [vmem:[#allocation2] sm:$0x1]   ;;  %11 = vrot.lane.b32.xlu0 %v10_v1, %s150_s0  ;;  %s164_s21 = smov 8   ;;  %s165_s22 = smov [#allocation0]  }
   0xb   :  { %23 = vrot.lane.b32.xlu1 %v22_v2, %s151_s8  ;;  %v16_v3 = vld [vmem:[#allocation2] sm:$0x1]   ;;  %s104_s23 = sshll.u32 %s165_s22, 4  ;;  %s105_s23 = int_to_ptr.vmem [resolvable:$true] %s104_s23 }
   0xc   :  { %v28_v4 = vld [vmem:[#allocation2] sm:$0x1]   ;;  %s126_s24 = scalar_lea.vmem %s105_s23, 256  ;;  %p131_p1 = scmp.lt.s32.totalorder %s105_s23, %s105_s23 }
   0xd   :  { %v34_v5 = vld [vmem:[#allocation2] sm:$0x1]   ;;  %p127_p0 = scmp.ne.s32.totalorder %s105_s23, %s126_s24  ;;  %p132_p2 = scmp.lt.s32.totalorder %s126_s24, %s126_s24 }
   0xe   :  { %17 = vrot.lane.b32.xlu0 %v16_v3, %s152_s9  ;;  %v40_v6 = vld [vmem:[#allocation2] sm:$0x1]  }
   0xf   :  { %29 = vrot.lane.b32.xlu1 %v28_v4, %s153_s10  ;;  %v46_v7 = vld [vmem:[#allocation2] sm:$0x1]   ;;  %p133_p3 = por %p132_p2, %p131_p1 }
  0x10   :  { %v52_v8 = vld [vmem:[#allocation2] sm:$0x1]  }
  0x11   :  { %v58_v9 = vld [vmem:[#allocation2] sm:$0x1]   ;;  %p134_p4 = pnand %p133_p3, %p127_p0 }
  0x12   :  { %35 = vrot.lane.b32.xlu0 %v34_v5, %s154_s11  ;;  %v64_v10 = vld [vmem:[#allocation2] sm:$0x1]  }
  0x13   :  { %41 = vrot.lane.b32.xlu1 %v40_v6, %s155_s12  ;;  %v7_v11 = vld [vmem:[#allocation2] sm:$0x1]  }
  0x14   :  { %9 = vst.msk [vmem:[#allocation0] sm:$0x1] %vm8_vm0, %v7_v11   ;;  %v70_v12 = vld [vmem:[#allocation2] sm:$0x1]  }
  0x15   :  { %v76_v13 = vld [vmem:[#allocation2] sm:$0x1]  }
  0x16   :  { %47 = vrot.lane.b32.xlu0 %v46_v7, %s156_s13  ;;  %v82_v14 = vld [vmem:[#allocation2] sm:$0x1]  }
  0x17   :  { %53 = vrot.lane.b32.xlu1 %v52_v8, %s157_s14  ;;  %v88_v15 = vld [vmem:[#allocation2] sm:$0x1]  }
  0x18   :  { %v94_v16 = vld [vmem:[#allocation2] sm:$0x1]  }
  0x1a   :  { %59 = vrot.lane.b32.xlu0 %v58_v9, %s158_s15 }
  0x1b   :  { %65 = vrot.lane.b32.xlu1 %v64_v10, %s159_s16 }
  0x1e   :  { %71 = vrot.lane.b32.xlu0 %v70_v12, %s160_s17 }
  0x1f   :  { %77 = vrot.lane.b32.xlu1 %v76_v13, %s161_s18 }
  0x22   :  { %83 = vrot.lane.b32.xlu0 %v82_v14, %s162_s19 }
  0x23   :  { %89 = vrot.lane.b32.xlu1 %v88_v15, %s163_s20 }
  0x26   :  { %95 = vrot.lane.b32.xlu0 %v94_v16, %s164_s21 }
  0x7c   :  { %v12_v17 = vpop.permute.xlu0 %11  }
  0x7d   :  { %v24_v18 = vpop.permute.xlu1 %23   ;;  %15 = vst.msk [vmem:[#allocation0 + $0x1] sm:$0x1] %vm8_vm0, %v12_v17  }
  0x7e   :  { %27 = vst.msk [vmem:[#allocation0 + $0x3] sm:$0x1] %vm8_vm0, %v24_v18  }
  0x80   :  { %v18_v19 = vpop.permute.xlu0 %17  }
  0x81   :  { %v30_v20 = vpop.permute.xlu1 %29   ;;  %21 = vst.msk [vmem:[#allocation0 + $0x2] sm:$0x1] %vm8_vm0, %v18_v19  }
  0x82   :  { %33 = vst.msk [vmem:[#allocation0 + $0x4] sm:$0x1] %vm8_vm0, %v30_v20  }
  0x84   :  { %v36_v21 = vpop.permute.xlu0 %35  }
  0x85   :  { %v42_v22 = vpop.permute.xlu1 %41   ;;  %39 = vst.msk [vmem:[#allocation0 + $0x5] sm:$0x1] %vm8_vm0, %v36_v21  }
  0x86   :  { %45 = vst.msk [vmem:[#allocation0 + $0x6] sm:$0x1] %vm8_vm0, %v42_v22  }
  0x88   :  { %v48_v23 = vpop.permute.xlu0 %47  }
  0x89   :  { %v54_v24 = vpop.permute.xlu1 %53   ;;  %51 = vst.msk [vmem:[#allocation0 + $0x7] sm:$0x1] %vm8_vm0, %v48_v23  }
  0x8a   :  { %57 = vst.msk [vmem:[#allocation0 + $0x8] sm:$0x1] %vm8_vm0, %v54_v24  }
  0x8c   :  { %v60_v25 = vpop.permute.xlu0 %59  }
  0x8d   :  { %v66_v26 = vpop.permute.xlu1 %65   ;;  %63 = vst.msk [vmem:[#allocation0 + $0x9] sm:$0x1] %vm8_vm0, %v60_v25  }
  0x8e   :  { %69 = vst.msk [vmem:[#allocation0 + $0xa] sm:$0x1] %vm8_vm0, %v66_v26  }
  0x90   :  { %v72_v27 = vpop.permute.xlu0 %71  }
  0x91   :  { %v78_v28 = vpop.permute.xlu1 %77   ;;  %75 = vst.msk [vmem:[#allocation0 + $0xb] sm:$0x1] %vm8_vm0, %v72_v27  }
  0x92   :  { %81 = vst.msk [vmem:[#allocation0 + $0xc] sm:$0x1] %vm8_vm0, %v78_v28  }
  0x94   :  { %v84_v29 = vpop.permute.xlu0 %83  }
  0x95   :  { %v90_v30 = vpop.permute.xlu1 %89   ;;  %87 = vst.msk [vmem:[#allocation0 + $0xd] sm:$0x1] %vm8_vm0, %v84_v29  }
  0x96   :  { %93 = vst.msk [vmem:[#allocation0 + $0xe] sm:$0x1] %vm8_vm0, %v90_v30  }
  0x98   :  { %v96_v31 = vpop.permute.xlu0 %95  }
  0x99   :  { %99 = vst.msk [vmem:[#allocation0 + $0xf] sm:$0x1] %vm8_vm0, %v96_v31  }
  0x9a   :  { %137 = shalt.err (!%p134_p4)
}
  0x9b   :  { %s138_s27 = scalar_lea.hbm %s208_s1, 256 }
  0x9c   :  { %p139_p5 = scmp.ne.s32.totalorder %s208_s1, %s138_s27  ;;  %p142_p6 = scmp.lt.u32.totalorder %s138_s27, %s208_s1 }
  0x9e   :  { %p144_p7 = pnand %p142_p6, %p139_p5 }
  0xa0   :  { %147 = shalt.err (!%p144_p7)
}
  0xa1   :  { %107 = dma.vmem_to_hbm [thread:$0]  %s105_s23, 256, %s208_s1, [#allocation1]  }
  0xa2   :  { %148 = dma.done.wait [#allocation1], 256  }
  0xa3   :  { %149 = vsyncadd [#allocation1], 4294967040 }
  0xa4   :  { %109 = vsyncpa [#allocation1], 1 }

// kernel: decoder_ir.1
= control target key start
LH: loop header
LB: loop body
LE: loop exit
PB: predicated region body
PF: predicated region fallthrough
CT: control target
= control target key end

     0   :  { %12 = vsyncpa [#allocation8], 0  ;;  %s14785_s0 = inlined_call_operand.hbm [shape: f32[2,8,8,256], index: 0, kind: input, shape index: {}]   ;;  %s14786_s1 = inlined_call_operand.hbm [shape: bf16[2304,128], index: 1, kind: input, shape index: {}]   ;;  %s14787_s2 = inlined_call_operand.hbm [shape: bf16[1152,128], index: 2, kind: input, shape index: {}]   ;;  %s14788_s3 = inlined_call_operand.hbm [shape: bf16[1152,128], index: 3, kind: input, shape index: {}]   ;;  %s14789_s4 = inlined_call_operand.hbm [shape: bf16[1152,128], index: 4, kind: input, shape index: {}]   ;;  %s14790_s5 = inlined_call_operand.vmem [shape: f32[4,128], index: 5, kind: input, shape index: {}]   ;;  %s14791_s6 = inlined_call_operand.vmem [shape: f32[4,128], index: 6, kind: input, shape index: {}]   ;;  %s14792_s7 = inlined_call_operand.vmem [shape: f32[128,128], index: 7, kind: output, shape index: {}]  }
   0x1   :  { %13 = vsyncpa [#allocation10], 0 }
   0x2   :  { %14 = vsyncpa [#allocation13], 0  ;;  %s12168_s24 = smov [#allocation9]   ;;  %s12052_s28 = scalar_lea.hbm %s14786_s1, 18432 }
   0x3   :  { %s32_s25 = sshll.u32 %s12168_s24, 4  ;;  %p12053_p0 = scmp.ne.s32.totalorder %s14786_s1, %s12052_s28  ;;  %s33_s25 = int_to_ptr.vmem [resolvable:$true] %s32_s25 }
   0x4   :  { %p12056_p1 = scmp.lt.u32.totalorder %s12052_s28, %s14786_s1 }
   0x6   :  { %p12058_p2 = pnand %p12056_p1, %p12053_p0 }
   0x8   :  { %12061 = shalt.err (!%p12058_p2)
}
   0x9   :  { %s12062_s10 = scalar_lea.vmem %s33_s25, 18432  ;;  %p12067_p4 = scmp.lt.s32.totalorder %s33_s25, %s33_s25 }
   0xa   :  { %p12063_p3 = scmp.ne.s32.totalorder %s33_s25, %s12062_s10  ;;  %p12068_p5 = scmp.lt.s32.totalorder %s12062_s10, %s12062_s10 }
   0xc   :  { %p12069_p6 = por %p12068_p5, %p12067_p4 }
   0xe   :  { %p12070_p7 = pnand %p12069_p6, %p12063_p3 }
  0x10   :  { %12073 = shalt.err (!%p12070_p7)
}
  0x11   :  { %s12169_s11 = smov 64   ;;  %s12170_s12 = smov 4  }
  0x12   :  { %38 = dma.hbm_to_vmem [thread:$0]  %s14786_s1, 18432, %s33_s25, [#allocation10], %s12169_s11, %s12169_s11, %s12170_s12  }
  0x13   :  { %s12171_s15 = smov [#allocation12]   ;;  %s12172_s17 = smov [#allocation7]  }
  0x14   :  { %s56_s16 = sshll.u32 %s12171_s15, 4  ;;  %s20_s18 = sshll.u32 %s12172_s17, 4  ;;  %s57_s16 = int_to_ptr.vmem [resolvable:$true] %s56_s16  ;;  %s21_s18 = int_to_ptr.vmem [resolvable:$true] %s20_s18 }
  0x15   :  { %s12074_s21 = scalar_lea.hbm %s14788_s3, 9216 }
  0x16   :  { %p12075_p8 = scmp.ne.s32.totalorder %s14788_s3, %s12074_s21  ;;  %p12078_p9 = scmp.lt.u32.totalorder %s12074_s21, %s14788_s3 }
  0x18   :  { %p12080_p10 = pnand %p12078_p9, %p12075_p8 }
  0x1a   :  { %12083 = shalt.err (!%p12080_p10)
}
  0x1b   :  { %s12084_s1 = scalar_lea.vmem %s57_s16, 9216  ;;  %p12089_p12 = scmp.lt.s32.totalorder %s57_s16, %s57_s16 }
  0x1c   :  { %p12085_p11 = scmp.ne.s32.totalorder %s57_s16, %s12084_s1  ;;  %p12090_p13 = scmp.lt.s32.totalorder %s12084_s1, %s12084_s1 }
  0x1e   :  { %p12091_p0 = por %p12090_p13, %p12089_p12 }
  0x20   :  { %p12092_p1 = pnand %p12091_p0, %p12085_p11 }
  0x22   :  { %12095 = shalt.err (!%p12092_p1)
}
  0x23   :  { %62 = dma.hbm_to_vmem [thread:$0]  %s14788_s3, 9216, %s57_s16, [#allocation13], %s12169_s11, %s12169_s11, %s12170_s12  }
  0x24   :  { %s12096_s30 = scalar_lea.hbm %s14785_s0, 4096 }
  0x25   :  { %p12097_p2 = scmp.ne.s32.totalorder %s14785_s0, %s12096_s30  ;;  %p12100_p3 = scmp.lt.u32.totalorder %s12096_s30, %s14785_s0 }
  0x27   :  { %p12102_p4 = pnand %p12100_p3, %p12097_p2 }
  0x29   :  { %12105 = shalt.err (!%p12102_p4)
}
  0x2a   :  { %s12106_s14 = scalar_lea.vmem %s21_s18, 4096  ;;  %p12111_p6 = scmp.lt.s32.totalorder %s21_s18, %s21_s18 }
  0x2b   :  { %p12107_p5 = scmp.ne.s32.totalorder %s21_s18, %s12106_s14  ;;  %p12112_p7 = scmp.lt.s32.totalorder %s12106_s14, %s12106_s14 }
  0x2d   :  { %p12113_p8 = por %p12112_p7, %p12111_p6 }
  0x2f   :  { %p12114_p9 = pnand %p12113_p8, %p12107_p5 }
  0x31   :  { %12117 = shalt.err (!%p12114_p9)
}
  0x32   :  { %s12173_s3 = smov 256   ;;  %s12174_s15 = smov 16  }
  0x33   :  { %26 = dma.hbm_to_vmem [thread:$0]  %s14785_s0, 4096, %s21_s18, [#allocation8], %s12173_s3, %s12173_s3, %s12174_s15  }
  0x34   :  { %s12175_s19 = smov [#allocation11]   ;;  %s12176_s21 = smov [#allocation14]  }
  0x35   :  { %s44_s20 = sshll.u32 %s12175_s19, 4  ;;  %s68_s22 = sshll.u32 %s12176_s21, 4  ;;  %s45_s20 = int_to_ptr.vmem [resolvable:$true] %s44_s20  ;;  %s69_s22 = int_to_ptr.vmem [resolvable:$true] %s68_s22 }
  0x36   :  { %s12118_s26 = scalar_lea.hbm %s14787_s2, 9216 }
  0x37   :  { %p12119_p10 = scmp.ne.s32.totalorder %s14787_s2, %s12118_s26  ;;  %p12122_p11 = scmp.lt.u32.totalorder %s12118_s26, %s14787_s2 }
  0x39   :  { %p12124_p12 = pnand %p12122_p11, %p12119_p10 }
  0x3b   :  { %12127 = shalt.err (!%p12124_p12)
}
  0x3c   :  { %s12128_s0 = scalar_lea.vmem %s45_s20, 9216  ;;  %p12133_p0 = scmp.lt.s32.totalorder %s45_s20, %s45_s20 }
  0x3d   :  { %p12129_p13 = scmp.ne.s32.totalorder %s45_s20, %s12128_s0  ;;  %p12134_p1 = scmp.lt.s32.totalorder %s12128_s0, %s12128_s0 }
  0x3f   :  { %p12135_p2 = por %p12134_p1, %p12133_p0 }
  0x41   :  { %p12136_p3 = pnand %p12135_p2, %p12129_p13 }
  0x43   :  { %12139 = shalt.err (!%p12136_p3)
}
  0x44   :  { %50 = dma.hbm_to_vmem [thread:$0]  %s14787_s2, 9216, %s45_s20, [#allocation10], %s12169_s11, %s12169_s11, %s12170_s12  }
  0x45   :  { %s12140_s9 = scalar_lea.hbm %s14789_s4, 9216 }
  0x46   :  { %p12141_p4 = scmp.ne.s32.totalorder %s14789_s4, %s12140_s9  ;;  %p12144_p5 = scmp.lt.u32.totalorder %s12140_s9, %s14789_s4 }
  0x48   :  { %p12146_p6 = pnand %p12144_p5, %p12141_p4 }
  0x4a   :  { %12149 = shalt.err (!%p12146_p6)
}
  0x4b   :  { %s12150_s15 = scalar_lea.vmem %s69_s22, 9216  ;;  %p12155_p8 = scmp.lt.s32.totalorder %s69_s22, %s69_s22 }
  0x4c   :  { %p12151_p7 = scmp.ne.s32.totalorder %s69_s22, %s12150_s15  ;;  %p12156_p9 = scmp.lt.s32.totalorder %s12150_s15, %s12150_s15 }
  0x4e   :  { %p12157_p10 = por %p12156_p9, %p12155_p8 }
  0x50   :  { %p12158_p11 = pnand %p12157_p10, %p12151_p7 }
  0x52   :  { %12161 = shalt.err (!%p12158_p11)
}
  0x53   :  { %74 = dma.hbm_to_vmem [thread:$0]  %s14789_s4, 9216, %s69_s22, [#allocation13], %s12169_s11, %s12169_s11, %s12170_s12  }
  0x54   :  { %12162 = dma.done.wait [#allocation8], 4096  }
  0x55   :  { %12163 = vsyncadd [#allocation8], 4294963200 }
  0x56   :  { %12164 = dma.done.wait [#allocation10], 27648  }
  0x57   :  { %12165 = vsyncadd [#allocation10], 4294939648 }
  0x58   :  { %12166 = dma.done.wait [#allocation13], 18432  }
  0x59   :  { %12167 = vsyncadd [#allocation13], 4294948864  ;;  %v12177_v0 = vmov 0.0   ;;  %v11615_v1 = vld [vmem:[#allocation9 + $0x40] sm:$0xff]   ;;  %v11619_v5 = vld [vmem:[#allocation9 + $0x48] sm:$0xff]   ;;  %vm560_vm0 = vcmask 1046528  }
  0x5a   :  { %128 = vst [vmem:[#allocation2 + $0x8] sm:$0xff] %v12177_v0  ;;  %132 = vst [vmem:[#allocation2 + $0x28] sm:$0xff] %v12177_v0  ;;  %v11616_v2 = vld [vmem:[#allocation9 + $0xc0] sm:$0xff]   ;;  %10101 = vmatprep.subr.bf16.mxu0 %v11615_v1  ;;  %v11620_v6 = vld [vmem:[#allocation9 + $0xc8] sm:$0xff]   ;;  %vm849_vm1 = vcmask 1045504  }
  0x5b   :  { %127 = vst [vmem:[#allocation2] sm:$0xff] %v12177_v0  ;;  %129 = vst [vmem:[#allocation2 + $0x10] sm:$0xff] %v12177_v0  ;;  %v11617_v3 = vld [vmem:[#allocation9] sm:$0xff]   ;;  %10165 = vmatprep.subr.bf16.mxu1 %v11616_v2  ;;  %v11621_v7 = vld [vmem:[#allocation9 + $0x8] sm:$0xff]  }
  0x5c   :  { %130 = vst [vmem:[#allocation2 + $0x18] sm:$0xff] %v12177_v0  ;;  %131 = vst [vmem:[#allocation2 + $0x20] sm:$0xff] %v12177_v0  ;;  %v11618_v4 = vld [vmem:[#allocation9 + $0x80] sm:$0xff]   ;;  %10102 = vmatpush3.bf16.msra.mxu0 %v11617_v3  ;;  %v11622_v8 = vld [vmem:[#allocation9 + $0x88] sm:$0xff]  }
  0x5d   :  { %133 = vst [vmem:[#allocation2 + $0x30] sm:$0xff] %v12177_v0  ;;  %134 = vst [vmem:[#allocation2 + $0x38] sm:$0xff] %v12177_v0  ;;  %10166 = vmatpush3.bf16.msra.mxu1 %v11618_v4  ;;  %10103 = vmatprep.subr.bf16.mxu0 %v11619_v5  ;;  %v11623_v9 = vld [vmem:[#allocation9 + $0x50] sm:$0xff]   ;;  %v11627_v13 = vld [vmem:[#allocation9 + $0x58] sm:$0xff]  }
  0x5e   :  { %135 = vst [vmem:[#allocation2 + $0x40] sm:$0xff] %v12177_v0  ;;  %136 = vst [vmem:[#allocation2 + $0x48] sm:$0xff] %v12177_v0  ;;  %10167 = vmatprep.subr.bf16.mxu1 %v11620_v6  ;;  %v11624_v10 = vld [vmem:[#allocation9 + $0xd0] sm:$0xff]   ;;  %v11628_v14 = vld [vmem:[#allocation9 + $0xd8] sm:$0xff]  }
  0x5f   :  { %137 = vst [vmem:[#allocation2 + $0x50] sm:$0xff] %v12177_v0  ;;  %138 = vst [vmem:[#allocation2 + $0x58] sm:$0xff] %v12177_v0  ;;  %v11625_v11 = vld [vmem:[#allocation9 + $0x10] sm:$0xff]   ;;  %v11629_v15 = vld [vmem:[#allocation9 + $0x18] sm:$0xff]  }
  0x60   :  { %139 = vst [vmem:[#allocation2 + $0x60] sm:$0xff] %v12177_v0  ;;  %140 = vst [vmem:[#allocation2 + $0x68] sm:$0xff] %v12177_v0  ;;  %10104 = vmatpush3.bf16.msra.mxu0 %v11621_v7  ;;  %v11626_v12 = vld [vmem:[#allocation9 + $0x90] sm:$0xff]   ;;  %v11630_v16 = vld [vmem:[#allocation9 + $0x98] sm:$0xff]  }
  0x61   :  { %141 = vst [vmem:[#allocation2 + $0x70] sm:$0xff] %v12177_v0  ;;  %142 = vst [vmem:[#allocation2 + $0x78] sm:$0xff] %v12177_v0  ;;  %10168 = vmatpush3.bf16.msra.mxu1 %v11622_v8  ;;  %10105 = vmatprep.subr.bf16.mxu0 %v11623_v9  ;;  %v11631_v17 = vld [vmem:[#allocation9 + $0x60] sm:$0xff]   ;;  %v11635_v21 = vld [vmem:[#allocation9 + $0x68] sm:$0xff]  }
  0x62   :  { %143 = vst [vmem:[#allocation2 + $0x80] sm:$0xff] %v12177_v0  ;;  %144 = vst [vmem:[#allocation2 + $0x88] sm:$0xff] %v12177_v0  ;;  %10169 = vmatprep.subr.bf16.mxu1 %v11624_v10  ;;  %v11632_v18 = vld [vmem:[#allocation9 + $0xe0] sm:$0xff]   ;;  %v11636_v22 = vld [vmem:[#allocation9 + $0xe8] sm:$0xff]  }
  0x63   :  { %145 = vst [vmem:[#allocation2 + $0x90] sm:$0xff] %v12177_v0  ;;  %146 = vst [vmem:[#allocation2 + $0x98] sm:$0xff] %v12177_v0  ;;  %v11633_v19 = vld [vmem:[#allocation9 + $0x20] sm:$0xff]   ;;  %v11637_v23 = vld [vmem:[#allocation9 + $0x28] sm:$0xff]  }
  0x64   :  { %147 = vst [vmem:[#allocation2 + $0xa0] sm:$0xff] %v12177_v0  ;;  %148 = vst [vmem:[#allocation2 + $0xa8] sm:$0xff] %v12177_v0  ;;  %10106 = vmatpush3.bf16.msra.mxu0 %v11625_v11  ;;  %v11634_v20 = vld [vmem:[#allocation9 + $0xa0] sm:$0xff]   ;;  %v11638_v24 = vld [vmem:[#allocation9 + $0xa8] sm:$0xff]  }
  0x65   :  { %149 = vst [vmem:[#allocation2 + $0xb0] sm:$0xff] %v12177_v0  ;;  %150 = vst [vmem:[#allocation2 + $0xb8] sm:$0xff] %v12177_v0  ;;  %10170 = vmatpush3.bf16.msra.mxu1 %v11626_v12  ;;  %10107 = vmatprep.subr.bf16.mxu0 %v11627_v13  ;;  %v11639_v25 = vld [vmem:[#allocation9 + $0x70] sm:$0xff]   ;;  %v11643_v29 = vld [vmem:[#allocation9 + $0x78] sm:$0xff]  }
  0x66   :  { %151 = vst [vmem:[#allocation2 + $0xc0] sm:$0xff] %v12177_v0  ;;  %152 = vst [vmem:[#allocation2 + $0xc8] sm:$0xff] %v12177_v0  ;;  %10171 = vmatprep.subr.bf16.mxu1 %v11628_v14  ;;  %v11640_v26 = vld [vmem:[#allocation9 + $0xf0] sm:$0xff]   ;;  %v11644_v30 = vld [vmem:[#allocation9 + $0xf8] sm:$0xff]  }
  0x67   :  { %153 = vst [vmem:[#allocation2 + $0xd0] sm:$0xff] %v12177_v0  ;;  %154 = vst [vmem:[#allocation2 + $0xd8] sm:$0xff] %v12177_v0  ;;  %v11641_v27 = vld [vmem:[#allocation9 + $0x30] sm:$0xff]   ;;  %v11645_v31 = vld [vmem:[#allocation9 + $0x38] sm:$0xff]  }
  0x68   :  { %155 = vst [vmem:[#allocation2 + $0xe0] sm:$0xff] %v12177_v0  ;;  %156 = vst [vmem:[#allocation2 + $0xe8] sm:$0xff] %v12177_v0  ;;  %10108 = vmatpush3.bf16.msra.mxu0 %v11629_v15  ;;  %v11642_v28 = vld [vmem:[#allocation9 + $0xb0] sm:$0xff]   ;;  %v11646_v32 = vld [vmem:[#allocation9 + $0xb8] sm:$0xff]  }
  0x69   :  { %157 = vst [vmem:[#allocation2 + $0xf0] sm:$0xff] %v12177_v0  ;;  %158 = vst [vmem:[#allocation2 + $0xf8] sm:$0xff] %v12177_v0  ;;  %10172 = vmatpush3.bf16.msra.mxu1 %v11630_v16  ;;  %10109 = vmatprep.subr.bf16.mxu0 %v11631_v17  ;;  %v96_v33 = vld [vmem:[#allocation7 + $0x8] sm:$0xff]  ;;  %v95_v36 = vld [vmem:[#allocation7] sm:$0xff] }
  0x6a   :  { %159 = vst [vmem:[#allocation2 + $0x100] sm:$0xff] %v12177_v0  ;;  %160 = vst [vmem:[#allocation2 + $0x108] sm:$0xff] %v12177_v0  ;;  %10173 = vmatprep.subr.bf16.mxu1 %v11632_v18  ;;  %v240_v34 = vrot.slane %v96_v33, 7  ;;  %v433_v35 = vld [vmem:[#allocation2 + $0x8] sm:$0xfe]  ;;  %v239_v38 = vrot.slane %v95_v36, 7 }
  0x6b   :  { %161 = vst [vmem:[#allocation2 + $0x110] sm:$0xff] %v12177_v0  ;;  %162 = vst [vmem:[#allocation2 + $0x118] sm:$0xff] %v12177_v0  ;;  %v435_v37 = vld [vmem:[#allocation2 + $0x18] sm:$0x1]  ;;  %v432_v39 = vld [vmem:[#allocation2] sm:$0xfe] }
  0x6c   :  { %163 = vst [vmem:[#allocation2 + $0x120] sm:$0xff] %v12177_v0  ;;  %164 = vst [vmem:[#allocation2 + $0x128] sm:$0xff] %v12177_v0  ;;  %10110 = vmatpush3.bf16.msra.mxu0 %v11633_v19  ;;  %v11647_v40 = vld [vmem:[#allocation9 + $0x140] sm:$0xff]   ;;  %v434_v41 = vld [vmem:[#allocation2 + $0x10] sm:$0x1]  ;;  %v564_v43 = vrot.slane %v433_v35, 1 }
  0x6d   :  { %165 = vst [vmem:[#allocation2 + $0x130] sm:$0xff] %v12177_v0  ;;  %166 = vst [vmem:[#allocation2 + $0x138] sm:$0xff] %v12177_v0  ;;  %10174 = vmatpush3.bf16.msra.mxu1 %v11634_v20  ;;  %10111 = vmatprep.subr.bf16.mxu0 %v11635_v21  ;;  %v98_v42 = vld [vmem:[#allocation7 + $0x18] sm:$0xff]  ;;  %v100_v44 = vld [vmem:[#allocation7 + $0x28] sm:$0xff]  ;;  %v565_v48 = vrot.slane %v435_v37, 1  ;;  %v561_v52 = vrot.slane %v432_v39, 1 }
  0x6e   :  { %167 = vst [vmem:[#allocation2 + $0x140] sm:$0xff] %v12177_v0  ;;  %168 = vst [vmem:[#allocation2 + $0x148] sm:$0xff] %v12177_v0  ;;  %10175 = vmatprep.subr.bf16.mxu1 %v11636_v22  ;;  %v242_v45 = vrot.slane %v98_v42, 7  ;;  %v97_v46 = vld [vmem:[#allocation7 + $0x10] sm:$0xff]  ;;  %v99_v47 = vld [vmem:[#allocation7 + $0x20] sm:$0xff]  ;;  %v244_v49 = vrot.slane %v100_v44, 7 }
  0x6f   :  { %169 = vst [vmem:[#allocation2 + $0x150] sm:$0xff] %v12177_v0  ;;  %170 = vst [vmem:[#allocation2 + $0x158] sm:$0xff] %v12177_v0  ;;  %v241_v50 = vrot.slane %v97_v46, 7  ;;  %v243_v51 = vrot.slane %v99_v47, 7  ;;  %v562_v53 = vrot.slane %v434_v41, 1  ;;  %v102_v54 = vld [vmem:[#allocation7 + $0x38] sm:$0xff]  ;;  %v566_v1 = vsel %vm560_vm0, %v564_v43, %v565_v48 }
  0x70   :  { %171 = vst [vmem:[#allocation2 + $0x160] sm:$0xff] %v12177_v0  ;;  %172 = vst [vmem:[#allocation2 + $0x168] sm:$0xff] %v12177_v0  ;;  %10112 = vmatpush3.bf16.msra.mxu0 %v11637_v23  ;;  %v104_v55 = vld [vmem:[#allocation7 + $0x48] sm:$0xff]  ;;  %v11648_v56 = vld [vmem:[#allocation9 + $0x100] sm:$0xff]   ;;  %v246_v57 = vrot.slane %v102_v54, 7 }
  0x71   :  { %173 = vst [vmem:[#allocation2 + $0x170] sm:$0xff] %v12177_v0  ;;  %174 = vst [vmem:[#allocation2 + $0x178] sm:$0xff] %v12177_v0  ;;  %10176 = vmatpush3.bf16.msra.mxu1 %v11638_v24  ;;  %10113 = vmatprep.subr.bf16.mxu0 %v11639_v25  ;;  %v248_v58 = vrot.slane %v104_v55, 7  ;;  %v101_v59 = vld [vmem:[#allocation7 + $0x30] sm:$0xff]  ;;  %v103_v60 = vld [vmem:[#allocation7 + $0x40] sm:$0xff]  ;;  %v563_v14 = vsel %vm560_vm0, %v561_v52, %v562_v53 }
  0x72   :  { %175 = vst [vmem:[#allocation2 + $0x180] sm:$0xff] %v12177_v0  ;;  %176 = vst [vmem:[#allocation2 + $0x188] sm:$0xff] %v12177_v0  ;;  %10177 = vmatprep.subr.bf16.mxu1 %v11640_v26  ;;  %v245_v2 = vrot.slane %v101_v59, 7  ;;  %v247_v8 = vrot.slane %v103_v60, 7  ;;  %v11649_v12 = vld [vmem:[#allocation9 + $0x148] sm:$0xff]   ;;  %v11651_v20 = vld [vmem:[#allocation9 + $0x150] sm:$0xff]  }
  0x73   :  { %177 = vst [vmem:[#allocation2 + $0x190] sm:$0xff] %v12177_v0  ;;  %178 = vst [vmem:[#allocation2 + $0x198] sm:$0xff] %v12177_v0  ;;  %v11650_v16 = vld [vmem:[#allocation9 + $0x108] sm:$0xff]   ;;  %v11652_v37 = vld [vmem:[#allocation9 + $0x110] sm:$0xff]  }
  0x74   :  { %179 = vst [vmem:[#allocation2 + $0x1a0] sm:$0xff] %v12177_v0  ;;  %180 = vst [vmem:[#allocation2 + $0x1a8] sm:$0xff] %v12177_v0  ;;  %10114 = vmatpush3.bf16.msra.mxu0 %v11641_v27 }
  0x75   :  { %181 = vst [vmem:[#allocation2 + $0x1b0] sm:$0xff] %v12177_v0  ;;  %182 = vst [vmem:[#allocation2 + $0x1b8] sm:$0xff] %v12177_v0  ;;  %10178 = vmatpush3.bf16.msra.mxu1 %v11642_v28  ;;  %10115 = vmatprep.subr.bf16.mxu0 %v11643_v29 }
  0x76   :  { %183 = vst [vmem:[#allocation2 + $0x1c0] sm:$0xff] %v12177_v0  ;;  %184 = vst [vmem:[#allocation2 + $0x1c8] sm:$0xff] %v12177_v0  ;;  %10179 = vmatprep.subr.bf16.mxu1 %v11644_v30 }
  0x77   :  { %185 = vst [vmem:[#allocation2 + $0x1d0] sm:$0xff] %v12177_v0  ;;  %186 = vst [vmem:[#allocation2 + $0x1d8] sm:$0xff] %v12177_v0 }
  0x78   :  { %187 = vst [vmem:[#allocation2 + $0x1e0] sm:$0xff] %v12177_v0  ;;  %188 = vst [vmem:[#allocation2 + $0x1e8] sm:$0xff] %v12177_v0  ;;  %10116 = vmatpush3.bf16.msra.mxu0 %v11645_v31 }
  0x79   :  { %189 = vst [vmem:[#allocation2 + $0x1f0] sm:$0xff] %v12177_v0  ;;  %190 = vst [vmem:[#allocation2 + $0x1f8] sm:$0xff] %v12177_v0  ;;  %10180 = vmatpush3.bf16.msra.mxu1 %v11646_v32  ;;  %10229 = vmatprep.subr.bf16.mxu0 %v11647_v40 }
  0x7a   :  { %191 = vst [vmem:[#allocation2 + $0x200] sm:$0xff] %v12177_v0  ;;  %192 = vst [vmem:[#allocation2 + $0x208] sm:$0xff] %v12177_v0 }
  0x7b   :  { %193 = vst [vmem:[#allocation2 + $0x210] sm:$0xff] %v12177_v0  ;;  %194 = vst [vmem:[#allocation2 + $0x218] sm:$0xff] %v12177_v0 }
  0x7c   :  { %195 = vst [vmem:[#allocation2 + $0x220] sm:$0xff] %v12177_v0  ;;  %196 = vst [vmem:[#allocation2 + $0x228] sm:$0xff] %v12177_v0 }
  0x7d   :  { %197 = vst [vmem:[#allocation2 + $0x230] sm:$0xff] %v12177_v0  ;;  %198 = vst [vmem:[#allocation2 + $0x238] sm:$0xff] %v12177_v0 }
  0x7e   :  { %199 = vst [vmem:[#allocation2 + $0x240] sm:$0xff] %v12177_v0  ;;  %200 = vst [vmem:[#allocation2 + $0x248] sm:$0xff] %v12177_v0 }
  0x7f   :  { %201 = vst [vmem:[#allocation2 + $0x250] sm:$0xff] %v12177_v0  ;;  %202 = vst [vmem:[#allocation2 + $0x258] sm:$0xff] %v12177_v0 }
  0x80   :  { %203 = vst [vmem:[#allocation2 + $0x260] sm:$0xff] %v12177_v0  ;;  %204 = vst [vmem:[#allocation2 + $0x268] sm:$0xff] %v12177_v0 }
  0x81   :  { %205 = vst [vmem:[#allocation2 + $0x270] sm:$0xff] %v12177_v0  ;;  %206 = vst [vmem:[#allocation2 + $0x278] sm:$0xff] %v12177_v0 }
  0x82   :  { %4648 = vst [vmem:[#allocation3] sm:$0xff] %v12177_v0  ;;  %4649 = vst [vmem:[#allocation3 + $0x8] sm:$0xff] %v12177_v0 }
  0x83   :  { %4650 = vst [vmem:[#allocation3 + $0x10] sm:$0xff] %v12177_v0  ;;  %4651 = vst [vmem:[#allocation3 + $0x18] sm:$0xff] %v12177_v0 }
  0x84   :  { %4652 = vst [vmem:[#allocation3 + $0x20] sm:$0xff] %v12177_v0  ;;  %4653 = vst [vmem:[#allocation3 + $0x28] sm:$0xff] %v12177_v0 }
  0x85   :  { %4654 = vst [vmem:[#allocation3 + $0x30] sm:$0xff] %v12177_v0  ;;  %4655 = vst [vmem:[#allocation3 + $0x38] sm:$0xff] %v12177_v0 }
  0x86   :  { %4656 = vst [vmem:[#allocation3 + $0x40] sm:$0xff] %v12177_v0  ;;  %4657 = vst [vmem:[#allocation3 + $0x48] sm:$0xff] %v12177_v0 }
  0x87   :  { %4658 = vst [vmem:[#allocation3 + $0x50] sm:$0xff] %v12177_v0  ;;  %4659 = vst [vmem:[#allocation3 + $0x58] sm:$0xff] %v12177_v0 }
  0x88   :  { %4660 = vst [vmem:[#allocation3 + $0x60] sm:$0xff] %v12177_v0  ;;  %4661 = vst [vmem:[#allocation3 + $0x68] sm:$0xff] %v12177_v0 }
  0x89   :  { %4662 = vst [vmem:[#allocation3 + $0x70] sm:$0xff] %v12177_v0  ;;  %4663 = vst [vmem:[#allocation3 + $0x78] sm:$0xff] %v12177_v0 }
  0x8a   :  { %4664 = vst [vmem:[#allocation3 + $0x80] sm:$0xff] %v12177_v0  ;;  %4665 = vst [vmem:[#allocation3 + $0x88] sm:$0xff] %v12177_v0 }
  0x8b   :  { %4666 = vst [vmem:[#allocation3 + $0x90] sm:$0xff] %v12177_v0  ;;  %4667 = vst [vmem:[#allocation3 + $0x98] sm:$0xff] %v12177_v0 }
  0x8c   :  { %4668 = vst [vmem:[#allocation3 + $0xa0] sm:$0xff] %v12177_v0  ;;  %4669 = vst [vmem:[#allocation3 + $0xa8] sm:$0xff] %v12177_v0 }
  0x8d   :  { %4670 = vst [vmem:[#allocation3 + $0xb0] sm:$0xff] %v12177_v0  ;;  %4671 = vst [vmem:[#allocation3 + $0xb8] sm:$0xff] %v12177_v0 }
  0x8e   :  { %4672 = vst [vmem:[#allocation3 + $0xc0] sm:$0xff] %v12177_v0  ;;  %4673 = vst [vmem:[#allocation3 + $0xc8] sm:$0xff] %v12177_v0 }
  0x8f   :  { %4674 = vst [vmem:[#allocation3 + $0xd0] sm:$0xff] %v12177_v0  ;;  %4675 = vst [vmem:[#allocation3 + $0xd8] sm:$0xff] %v12177_v0 }
  0x90   :  { %4676 = vst [vmem:[#allocation3 + $0xe0] sm:$0xff] %v12177_v0  ;;  %4677 = vst [vmem:[#allocation3 + $0xe8] sm:$0xff] %v12177_v0 }
  0x91   :  { %4678 = vst [vmem:[#allocation3 + $0xf0] sm:$0xff] %v12177_v0  ;;  %4679 = vst [vmem:[#allocation3 + $0xf8] sm:$0xff] %v12177_v0 }
  0x92   :  { %4680 = vst [vmem:[#allocation3 + $0x100] sm:$0xff] %v12177_v0  ;;  %4681 = vst [vmem:[#allocation3 + $0x108] sm:$0xff] %v12177_v0 }
  0x93   :  { %4682 = vst [vmem:[#allocation3 + $0x110] sm:$0xff] %v12177_v0  ;;  %4683 = vst [vmem:[#allocation3 + $0x118] sm:$0xff] %v12177_v0 }
  0x94   :  { %4684 = vst [vmem:[#allocation3 + $0x120] sm:$0xff] %v12177_v0  ;;  %4685 = vst [vmem:[#allocation3 + $0x128] sm:$0xff] %v12177_v0 }
  0x95   :  { %4686 = vst [vmem:[#allocation3 + $0x130] sm:$0xff] %v12177_v0  ;;  %4687 = vst [vmem:[#allocation3 + $0x138] sm:$0xff] %v12177_v0 }
  0x96   :  { %6314 = vst [vmem:[#allocation4] sm:$0xff] %v12177_v0  ;;  %6315 = vst [vmem:[#allocation4 + $0x8] sm:$0xff] %v12177_v0 }
  0x97   :  { %6316 = vst [vmem:[#allocation4 + $0x10] sm:$0xff] %v12177_v0  ;;  %6317 = vst [vmem:[#allocation4 + $0x18] sm:$0xff] %v12177_v0 }
  0x98   :  { %6318 = vst [vmem:[#allocation4 + $0x20] sm:$0xff] %v12177_v0  ;;  %6319 = vst [vmem:[#allocation4 + $0x28] sm:$0xff] %v12177_v0 }
  0x99   :  { %6320 = vst [vmem:[#allocation4 + $0x30] sm:$0xff] %v12177_v0  ;;  %6321 = vst [vmem:[#allocation4 + $0x38] sm:$0xff] %v12177_v0 }
  0x9a   :  { %6322 = vst [vmem:[#allocation4 + $0x40] sm:$0xff] %v12177_v0  ;;  %6323 = vst [vmem:[#allocation4 + $0x48] sm:$0xff] %v12177_v0 }
  0x9b   :  { %6324 = vst [vmem:[#allocation4 + $0x50] sm:$0xff] %v12177_v0  ;;  %6325 = vst [vmem:[#allocation4 + $0x58] sm:$0xff] %v12177_v0 }
  0x9c   :  { %6326 = vst [vmem:[#allocation4 + $0x60] sm:$0xff] %v12177_v0  ;;  %6327 = vst [vmem:[#allocation4 + $0x68] sm:$0xff] %v12177_v0 }
  0x9d   :  { %6328 = vst [vmem:[#allocation4 + $0x70] sm:$0xff] %v12177_v0  ;;  %6329 = vst [vmem:[#allocation4 + $0x78] sm:$0xff] %v12177_v0 }
  0x9e   :  { %6330 = vst [vmem:[#allocation4 + $0x80] sm:$0xff] %v12177_v0  ;;  %6331 = vst [vmem:[#allocation4 + $0x88] sm:$0xff] %v12177_v0 }
  0x9f   :  { %6332 = vst [vmem:[#allocation4 + $0x90] sm:$0xff] %v12177_v0  ;;  %6333 = vst [vmem:[#allocation4 + $0x98] sm:$0xff] %v12177_v0 }
  0xa0   :  { %6334 = vst [vmem:[#allocation4 + $0xa0] sm:$0xff] %v12177_v0  ;;  %6335 = vst [vmem:[#allocation4 + $0xa8] sm:$0xff] %v12177_v0 }
  0xa1   :  { %6336 = vst [vmem:[#allocation4 + $0xb0] sm:$0xff] %v12177_v0  ;;  %6337 = vst [vmem:[#allocation4 + $0xb8] sm:$0xff] %v12177_v0 }
  0xa2   :  { %6338 = vst [vmem:[#allocation4 + $0xc0] sm:$0xff] %v12177_v0  ;;  %6339 = vst [vmem:[#allocation4 + $0xc8] sm:$0xff] %v12177_v0 }
  0xa3   :  { %6340 = vst [vmem:[#allocation4 + $0xd0] sm:$0xff] %v12177_v0  ;;  %6341 = vst [vmem:[#allocation4 + $0xd8] sm:$0xff] %v12177_v0 }
  0xa4   :  { %6342 = vst [vmem:[#allocation4 + $0xe0] sm:$0xff] %v12177_v0  ;;  %6343 = vst [vmem:[#allocation4 + $0xe8] sm:$0xff] %v12177_v0 }
  0xa5   :  { %6344 = vst [vmem:[#allocation4 + $0xf0] sm:$0xff] %v12177_v0  ;;  %6345 = vst [vmem:[#allocation4 + $0xf8] sm:$0xff] %v12177_v0 }
  0xa6   :  { %6346 = vst [vmem:[#allocation4 + $0x100] sm:$0xff] %v12177_v0  ;;  %6347 = vst [vmem:[#allocation4 + $0x108] sm:$0xff] %v12177_v0 }
  0xa7   :  { %6348 = vst [vmem:[#allocation4 + $0x110] sm:$0xff] %v12177_v0  ;;  %6349 = vst [vmem:[#allocation4 + $0x118] sm:$0xff] %v12177_v0 }
  0xa8   :  { %6350 = vst [vmem:[#allocation4 + $0x120] sm:$0xff] %v12177_v0  ;;  %6351 = vst [vmem:[#allocation4 + $0x128] sm:$0xff] %v12177_v0 }
  0xa9   :  { %6352 = vst [vmem:[#allocation4 + $0x130] sm:$0xff] %v12177_v0  ;;  %6353 = vst [vmem:[#allocation4 + $0x138] sm:$0xff] %v12177_v0 }
  0xaa   :  { %7980 = vst [vmem:[#allocation5] sm:$0xff] %v12177_v0  ;;  %7981 = vst [vmem:[#allocation5 + $0x8] sm:$0xff] %v12177_v0 }
  0xab   :  { %7982 = vst [vmem:[#allocation5 + $0x10] sm:$0xff] %v12177_v0  ;;  %7983 = vst [vmem:[#allocation5 + $0x18] sm:$0xff] %v12177_v0 }
  0xac   :  { %7984 = vst [vmem:[#allocation5 + $0x20] sm:$0xff] %v12177_v0  ;;  %7985 = vst [vmem:[#allocation5 + $0x28] sm:$0xff] %v12177_v0 }
  0xad   :  { %7986 = vst [vmem:[#allocation5 + $0x30] sm:$0xff] %v12177_v0  ;;  %7987 = vst [vmem:[#allocation5 + $0x38] sm:$0xff] %v12177_v0 }
  0xae   :  { %7988 = vst [vmem:[#allocation5 + $0x40] sm:$0xff] %v12177_v0  ;;  %7989 = vst [vmem:[#allocation5 + $0x48] sm:$0xff] %v12177_v0 }
  0xaf   :  { %7990 = vst [vmem:[#allocation5 + $0x50] sm:$0xff] %v12177_v0  ;;  %7991 = vst [vmem:[#allocation5 + $0x58] sm:$0xff] %v12177_v0 }
  0xb0   :  { %7992 = vst [vmem:[#allocation5 + $0x60] sm:$0xff] %v12177_v0  ;;  %7993 = vst [vmem:[#allocation5 + $0x68] sm:$0xff] %v12177_v0 }
  0xb1   :  { %7994 = vst [vmem:[#allocation5 + $0x70] sm:$0xff] %v12177_v0  ;;  %7995 = vst [vmem:[#allocation5 + $0x78] sm:$0xff] %v12177_v0 }
  0xb2   :  { %7996 = vst [vmem:[#allocation5 + $0x80] sm:$0xff] %v12177_v0  ;;  %7997 = vst [vmem:[#allocation5 + $0x88] sm:$0xff] %v12177_v0 }
  0xb3   :  { %7998 = vst [vmem:[#allocation5 + $0x90] sm:$0xff] %v12177_v0  ;;  %7999 = vst [vmem:[#allocation5 + $0x98] sm:$0xff] %v12177_v0 }
  0xb4   :  { %8000 = vst [vmem:[#allocation5 + $0xa0] sm:$0xff] %v12177_v0  ;;  %8001 = vst [vmem:[#allocation5 + $0xa8] sm:$0xff] %v12177_v0 }
  0xb5   :  { %8002 = vst [vmem:[#allocation5 + $0xb0] sm:$0xff] %v12177_v0  ;;  %8003 = vst [vmem:[#allocation5 + $0xb8] sm:$0xff] %v12177_v0 }
  0xb6   :  { %8004 = vst [vmem:[#allocation5 + $0xc0] sm:$0xff] %v12177_v0  ;;  %8005 = vst [vmem:[#allocation5 + $0xc8] sm:$0xff] %v12177_v0 }
  0xb7   :  { %8006 = vst [vmem:[#allocation5 + $0xd0] sm:$0xff] %v12177_v0  ;;  %8007 = vst [vmem:[#allocation5 + $0xd8] sm:$0xff] %v12177_v0 }
  0xb8   :  { %8008 = vst [vmem:[#allocation5 + $0xe0] sm:$0xff] %v12177_v0  ;;  %8009 = vst [vmem:[#allocation5 + $0xe8] sm:$0xff] %v12177_v0 }
  0xb9   :  { %8010 = vst [vmem:[#allocation5 + $0xf0] sm:$0xff] %v12177_v0  ;;  %8011 = vst [vmem:[#allocation5 + $0xf8] sm:$0xff] %v12177_v0 }
  0xba   :  { %8012 = vst [vmem:[#allocation5 + $0x100] sm:$0xff] %v12177_v0  ;;  %8013 = vst [vmem:[#allocation5 + $0x108] sm:$0xff] %v12177_v0 }
  0xbb   :  { %8014 = vst [vmem:[#allocation5 + $0x110] sm:$0xff] %v12177_v0  ;;  %8015 = vst [vmem:[#allocation5 + $0x118] sm:$0xff] %v12177_v0 }
  0xbc   :  { %8016 = vst [vmem:[#allocation5 + $0x120] sm:$0xff] %v12177_v0  ;;  %8017 = vst [vmem:[#allocation5 + $0x128] sm:$0xff] %v12177_v0 }
  0xbd   :  { %8018 = vst [vmem:[#allocation5 + $0x130] sm:$0xff] %v12177_v0  ;;  %8019 = vst [vmem:[#allocation5 + $0x138] sm:$0xff] %v12177_v0 }
  0xbe   :  { %305 = vst [vmem:[#allocation2 + $0x28] sm:$0xfe] %v240_v34  ;;  %307 = vst [vmem:[#allocation2 + $0x38] sm:$0x1] %v240_v34 }
  0xbf   :  { %304 = vst [vmem:[#allocation2 + $0x20] sm:$0xfe] %v239_v38  ;;  %306 = vst [vmem:[#allocation2 + $0x30] sm:$0x1] %v239_v38 }
  0xc0   :  { %309 = vst [vmem:[#allocation2 + $0x48] sm:$0xfe] %v242_v45  ;;  %311 = vst [vmem:[#allocation2 + $0x58] sm:$0x1] %v242_v45 }
  0xc1   :  { %313 = vst [vmem:[#allocation2 + $0x68] sm:$0xfe] %v244_v49  ;;  %315 = vst [vmem:[#allocation2 + $0x78] sm:$0x1] %v244_v49 }
  0xc2   :  { %308 = vst [vmem:[#allocation2 + $0x40] sm:$0xfe] %v241_v50  ;;  %312 = vst [vmem:[#allocation2 + $0x60] sm:$0xfe] %v243_v51 }
  0xc3   :  { %310 = vst [vmem:[#allocation2 + $0x50] sm:$0x1] %v241_v50  ;;  %314 = vst [vmem:[#allocation2 + $0x70] sm:$0x1] %v243_v51 }
  0xc4   :  { %317 = vst [vmem:[#allocation2 + $0x88] sm:$0xfe] %v246_v57  ;;  %321 = vst [vmem:[#allocation2 + $0xa8] sm:$0xfe] %v248_v58 }
  0xc5   :  { %v371_v61 = vld [vmem:[#allocation2 + $0x28] sm:$0xff]  ;;  %v439_v63 = vld [vmem:[#allocation2 + $0x38] sm:$0x1]  ;;  %319 = vst [vmem:[#allocation2 + $0x98] sm:$0x1] %v246_v57 }
  0xc6   :  { %v437_v62 = vld [vmem:[#allocation2 + $0x28] sm:$0xfe]  ;;  %v401_v3 = vpack.c.bf16 %v371_v61, %v12177_v0  ;;  %v571_v5 = vrot.slane %v439_v63, 1  ;;  %v12492_v6 = vld [vmem:[#allocation2 + $0x20] sm:$0xff]  ;;  %323 = vst [vmem:[#allocation2 + $0xb8] sm:$0x1] %v248_v58 }
  0xc7   :  { %v570_v4 = vrot.slane %v437_v62, 1  ;;  %v436_v7 = vld [vmem:[#allocation2 + $0x20] sm:$0xfe]  ;;  %v400_v9 = vpack.c.bf16 %v12492_v6, %v12177_v0  ;;  %v438_v10 = vld [vmem:[#allocation2 + $0x30] sm:$0x1]  ;;  %v12498_v18 = vld [vmem:[#allocation2 + $0x48] sm:$0xff] }
  0xc8   :  { %v567_v11 = vrot.slane %v436_v7, 1  ;;  %316 = vst [vmem:[#allocation2 + $0x80] sm:$0xfe] %v245_v2  ;;  %318 = vst [vmem:[#allocation2 + $0x90] sm:$0x1] %v245_v2  ;;  %3619 = vmatprep.mubr.bf16.mxu0 %v401_v3  ;;  %v568_v15 = vrot.slane %v438_v10, 1 }
  0xc9   :  { %v572_v13 = vsel %vm560_vm0, %v570_v4, %v571_v5  ;;  %320 = vst [vmem:[#allocation2 + $0xa0] sm:$0xfe] %v247_v8  ;;  %322 = vst [vmem:[#allocation2 + $0xb0] sm:$0x1] %v247_v8  ;;  %3620 = vmatmul.mubr.bf16.vlgmr.msra.gmra.mrb[0].mxu0 %v400_v9  ;;  %v441_v19 = vld [vmem:[#allocation2 + $0x48] sm:$0xfe] }
  0xca   :  { %v690_v17 = vpack.c.bf16 %v572_v13, %v566_v1  ;;  %v443_v0 = vld [vmem:[#allocation2 + $0x58] sm:$0x1]  ;;  %v569_v21 = vsel %vm560_vm0, %v567_v11, %v568_v15  ;;  %10230 = vmatpush3.bf16.msra.mxu0 %v11648_v56  ;;  %v12501_v22 = vld [vmem:[#allocation2 + $0x68] sm:$0xff]  ;;  %v576_v25 = vrot.slane %v441_v19, 1  ;;  %v12505_v30 = vld [vmem:[#allocation2 + $0x40] sm:$0xff] }
  0xcb   :  { %v445_v23 = vld [vmem:[#allocation2 + $0x68] sm:$0xfe]  ;;  %v447_v24 = vld [vmem:[#allocation2 + $0x78] sm:$0x1]  ;;  %v689_v26 = vpack.c.bf16 %v569_v21, %v563_v14  ;;  %v403_v27 = vpack.c.bf16 %v12501_v22, %v12498_v18  ;;  %v577_v28 = vrot.slane %v443_v0, 1  ;;  %v12507_v31 = vld [vmem:[#allocation2 + $0x60] sm:$0xff]  ;;  %10231 = vmatprep.subr.bf16.mxu0 %v11649_v12  ;;  %v1042_v38 = vpack.c.bf16 %v12505_v30, %v12492_v6 }
  0xcc   :  { %3716 = vmatprep.mubr.bf16.mxu1 %v690_v17  ;;  %v582_v29 = vrot.slane %v445_v23, 1  ;;  %v440_v32 = vld [vmem:[#allocation2 + $0x40] sm:$0xfe]  ;;  %v583_v33 = vrot.slane %v447_v24, 1  ;;  %v442_v34 = vld [vmem:[#allocation2 + $0x50] sm:$0x1]  ;;  %v402_v40 = vpack.c.bf16 %v12507_v31, %v12505_v30 }
  0xcd   :  { %v444_v35 = vld [vmem:[#allocation2 + $0x60] sm:$0xfe]  ;;  %v573_v36 = vrot.slane %v440_v32, 1  ;;  %3717 = vmatmul.mubr.bf16.vlgmr.msra.gmra.mrb[0].mxu1 %v689_v26  ;;  %3627 = vmatprep.mubr.bf16.mxu0 %v403_v27  ;;  %v578_v39 = vsel %vm560_vm0, %v576_v25, %v577_v28  ;;  %v446_v41 = vld [vmem:[#allocation2 + $0x70] sm:$0x1]  ;;  %v574_v42 = vrot.slane %v442_v34, 1 }
  0xce   :  { %v579_v43 = vrot.slane %v444_v35, 1  ;;  %v12514_v44 = vld [vmem:[#allocation2 + $0x88] sm:$0xff]  ;;  %v584_v46 = vsel %vm560_vm0, %v582_v29, %v583_v33  ;;  %v580_v47 = vrot.slane %v446_v41, 1  ;;  %10232 = vmatpush3.bf16.msra.mxu0 %v11650_v16  ;;  %v451_v50 = vld [vmem:[#allocation2 + $0x98] sm:$0x1]  ;;  %v105_v14 = vld [vmem:[#allocation7 + $0x50] sm:$0xff] }
  0xcf   :  { %v12516_v45 = vld [vmem:[#allocation2 + $0xa8] sm:$0xff]  ;;  %v12521_v51 = vld [vmem:[#allocation2 + $0x80] sm:$0xff]  ;;  %v1045_v52 = vpack.c.bf16 %v12514_v44, %v12501_v22  ;;  %v692_v53 = vpack.c.bf16 %v584_v46, %v578_v39  ;;  %v575_v54 = vsel %vm560_vm0, %v573_v36, %v574_v42  ;;  %v455_v56 = vld [vmem:[#allocation2 + $0xb8] sm:$0x1]  ;;  %v589_v58 = vrot.slane %v451_v50, 1  ;;  %10233 = vmatprep.subr.bf16.mxu0 %v11651_v20 }
  0xd0   :  { %v405_v48 = vpack.c.bf16 %v12516_v45, %v12514_v44  ;;  %v449_v49 = vld [vmem:[#allocation2 + $0x88] sm:$0xfe]  ;;  %v581_v59 = vsel %vm560_vm0, %v579_v43, %v580_v47  ;;  %v595_v61 = vrot.slane %v455_v56, 1  ;;  %v12527_v62 = vld [vmem:[#allocation2 + $0xa0] sm:$0xff]  ;;  %v106_v1 = vld [vmem:[#allocation7 + $0x58] sm:$0xff]  ;;  %v1044_v2 = vpack.c.bf16 %v12521_v51, %v12507_v31 }
  0xd1   :  { %v453_v55 = vld [vmem:[#allocation2 + $0xa8] sm:$0xfe]  ;;  %v588_v57 = vrot.slane %v449_v49, 1  ;;  %v448_v63 = vld [vmem:[#allocation2 + $0x80] sm:$0xfe]  ;;  %3724 = vmatprep.mubr.bf16.mxu1 %v692_v53  ;;  %3628 = vmatmul.mubr.bf16.gmra.mrb[4].mxu0 %v402_v40  ;;  %v691_v3 = vpack.c.bf16 %v581_v59, %v575_v54  ;;  %v250_v19 = vrot.slane %v106_v1, 7  ;;  %v404_v24 = vpack.c.bf16 %v12527_v62, %v12521_v51 }
  0xd2   :  { %v594_v60 = vrot.slane %v453_v55, 1  ;;  %v450_v5 = vld [vmem:[#allocation2 + $0x90] sm:$0x1]  ;;  %v452_v7 = vld [vmem:[#allocation2 + $0xa0] sm:$0xfe]  ;;  %3635 = vmatprep.mubr.bf16.mxu0 %v405_v48  ;;  %v585_v10 = vrot.slane %v448_v63, 1  ;;  %10234 = vmatpush3.bf16.msra.mxu0 %v11652_v37 }
  0xd3   :  { %v590_v4 = vsel %vm560_vm0, %v588_v57, %v589_v58  ;;  %v454_v8 = vld [vmem:[#allocation2 + $0xb0] sm:$0x1]  ;;  %v586_v11 = vrot.slane %v450_v5, 1  ;;  %v591_v12 = vrot.slane %v452_v7, 1  ;;  %v108_v13 = vld [vmem:[#allocation7 + $0x68] sm:$0xff]  ;;  %v107_v15 = vld [vmem:[#allocation7 + $0x60] sm:$0xff] }
  0xd4   :  { %v596_v9 = vsel %vm560_vm0, %v594_v60, %v595_v61  ;;  %v592_v17 = vrot.slane %v454_v8, 1  ;;  %v252_v0 = vrot.slane %v108_v13, 7  ;;  %v11653_v20 = vld [vmem:[#allocation9 + $0x158] sm:$0xff]   ;;  %v249_v21 = vrot.slane %v105_v14, 7  ;;  %325 = vst [vmem:[#allocation2 + $0xc8] sm:$0xfe] %v250_v19 }
  0xd5   :  { %v694_v16 = vpack.c.bf16 %v596_v9, %v590_v4  ;;  %v251_v23 = vrot.slane %v107_v15, 7  ;;  %3725 = vmatmul.mubr.bf16.gmra.mrb[4].mxu1 %v691_v3  ;;  %327 = vst [vmem:[#allocation2 + $0xd8] sm:$0x1] %v250_v19  ;;  %10235 = vmatprep.subr.bf16.mxu0 %v11653_v20  ;;  %v11654_v25 = vld [vmem:[#allocation9 + $0x118] sm:$0xff]   ;;  %v112_v26 = vld [vmem:[#allocation7 + $0x88] sm:$0xff]  ;;  %v587_v27 = vsel %vm560_vm0, %v585_v10, %v586_v11  ;;  %v111_v33 = vld [vmem:[#allocation7 + $0x80] sm:$0xff] }
  0xd6   :  { %329 = vst [vmem:[#allocation2 + $0xe8] sm:$0xfe] %v252_v0  ;;  %331 = vst [vmem:[#allocation2 + $0xf8] sm:$0x1] %v252_v0  ;;  %v593_v28 = vsel %vm560_vm0, %v591_v12, %v592_v17  ;;  %v256_v29 = vrot.slane %v112_v26, 7  ;;  %10236 = vmatpush3.bf16.msra.mxu0 %v11654_v25  ;;  %v255_v35 = vrot.slane %v111_v33, 7 }
  0xd7   :  { %3732 = vmatprep.mubr.bf16.mxu1 %v694_v16  ;;  %324 = vst [vmem:[#allocation2 + $0xc0] sm:$0xfe] %v249_v21  ;;  %328 = vst [vmem:[#allocation2 + $0xe0] sm:$0xfe] %v251_v23  ;;  %v12537_v32 = vld [vmem:[#allocation2 + $0x148] sm:$0xfe]  ;;  %v693_v41 = vpack.c.bf16 %v593_v28, %v587_v27 }
  0xd8   :  { %326 = vst [vmem:[#allocation2 + $0xd0] sm:$0x1] %v249_v21  ;;  %330 = vst [vmem:[#allocation2 + $0xf0] sm:$0x1] %v251_v23  ;;  %v467_v34 = vld [vmem:[#allocation2 + $0x158] sm:$0x1] }
  0xd9   :  { %v12539_v36 = vld [vmem:[#allocation2 + $0x140] sm:$0xfe]  ;;  %337 = vst [vmem:[#allocation2 + $0x168] sm:$0xfe] %v256_v29  ;;  %339 = vst [vmem:[#allocation2 + $0x178] sm:$0x1] %v256_v29  ;;  %3636 = vmatmul.mubr.bf16.gmra.mrb[8].mxu0 %v404_v24 }
  0xda   :  { %v11655_v37 = vld [vmem:[#allocation9 + $0x160] sm:$0xff]   ;;  %v12541_v39 = vld [vmem:[#allocation2 + $0x150] sm:$0x1]  ;;  %v612_v42 = vrot.slane %v12537_v32, 1  ;;  %336 = vst [vmem:[#allocation2 + $0x160] sm:$0xfe] %v255_v35 }
  0xdb   :  { %v11656_v40 = vld [vmem:[#allocation9 + $0x120] sm:$0xff]   ;;  %338 = vst [vmem:[#allocation2 + $0x170] sm:$0x1] %v255_v35  ;;  %10237 = vmatprep.subr.bf16.mxu0 %v11655_v37  ;;  %v613_v46 = vrot.slane %v467_v34, 1  ;;  %v12544_v48 = vld [vmem:[#allocation2 + $0xc8] sm:$0xff]  ;;  %v609_v53 = vrot.slane %v12539_v36, 1 }
  0xdc   :  { %v11657_v43 = vld [vmem:[#allocation9 + $0x1c0] sm:$0xff]   ;;  %10238 = vmatpush3.bf16.msra.mxu0 %v11656_v40  ;;  %v457_v50 = vld [vmem:[#allocation2 + $0xc8] sm:$0xfe]  ;;  %v610_v54 = vrot.slane %v12541_v39, 1  ;;  %v459_v56 = vld [vmem:[#allocation2 + $0xd8] sm:$0x1]  ;;  %v1047_v59 = vpack.c.bf16 %v12544_v48, %v12516_v45 }
  0xdd   :  { %10293 = vmatprep.subr.bf16.mxu1 %v11657_v43  ;;  %v11658_v47 = vld [vmem:[#allocation9 + $0x180] sm:$0xff]   ;;  %v12546_v49 = vld [vmem:[#allocation2 + $0xe8] sm:$0xff]  ;;  %3733 = vmatmul.mubr.bf16.gmra.mrb[8].mxu1 %v693_v41  ;;  %v463_v58 = vld [vmem:[#allocation2 + $0xf8] sm:$0x1]  ;;  %v600_v60 = vrot.slane %v457_v50, 1  ;;  %v601_v61 = vrot.slane %v459_v56, 1  ;;  %v614_v27 = vsel %vm560_vm0, %v612_v42, %v613_v46 }
  0xde   :  { %v407_v55 = vpack.c.bf16 %v12546_v49, %v12544_v48  ;;  %v461_v57 = vld [vmem:[#allocation2 + $0xe8] sm:$0xfe]  ;;  %v607_v1 = vrot.slane %v463_v58, 1  ;;  %v12554_v3 = vld [vmem:[#allocation2 + $0xc0] sm:$0xff]  ;;  %10294 = vmatpush3.bf16.msra.mxu1 %v11658_v47  ;;  %v114_v43 = vld [vmem:[#allocation7 + $0x98] sm:$0xff] }
  0xdf   :  { %v606_v63 = vrot.slane %v461_v57, 1  ;;  %v12556_v4 = vld [vmem:[#allocation2 + $0xe0] sm:$0xff]  ;;  %v458_v8 = vld [vmem:[#allocation2 + $0xd0] sm:$0x1]  ;;  %v1046_v10 = vpack.c.bf16 %v12554_v3, %v12527_v62  ;;  %v602_v11 = vsel %vm560_vm0, %v600_v60, %v601_v61  ;;  %v12047_v21 = vld [vmem:[#allocation2 + $0x8] sm:$0xff]  ;;  %v258_v42 = vrot.slane %v114_v43, 7 }
  0xe0   :  { %3643 = vmatprep.mubr.bf16.mxu0 %v407_v55  ;;  %v406_v5 = vpack.c.bf16 %v12556_v4, %v12554_v3  ;;  %v456_v7 = vld [vmem:[#allocation2 + $0xc0] sm:$0xfe]  ;;  %v462_v13 = vld [vmem:[#allocation2 + $0xf0] sm:$0x1]  ;;  %v598_v15 = vrot.slane %v458_v8, 1  ;;  %v12564_v16 = vld [vmem:[#allocation2 + $0x168] sm:$0xff]  ;;  %v611_v60 = vsel %vm560_vm0, %v609_v53, %v610_v54 }
  0xe1   :  { %v460_v9 = vld [vmem:[#allocation2 + $0xe0] sm:$0xfe]  ;;  %v608_v12 = vsel %vm560_vm0, %v606_v63, %v607_v1  ;;  %v597_v14 = vrot.slane %v456_v7, 1  ;;  %v604_v20 = vrot.slane %v462_v13, 1  ;;  %v409_v23 = vpack.c.bf16 %v12564_v16, %v12047_v21  ;;  %v469_v24 = vld [vmem:[#allocation2 + $0x168] sm:$0xfe] }
  0xe2   :  { %v12566_v17 = vld [vmem:[#allocation2 + $0x160] sm:$0xff]  ;;  %v696_v19 = vpack.c.bf16 %v608_v12, %v602_v11  ;;  %3644 = vmatmul.mubr.bf16.gmra.mrb[12].mxu0 %v406_v5  ;;  %v603_v0 = vrot.slane %v460_v9, 1  ;;  %v471_v25 = vld [vmem:[#allocation2 + $0x178] sm:$0x1]  ;;  %v618_v28 = vrot.slane %v469_v24, 1  ;;  %v11659_v41 = vld [vmem:[#allocation9 + $0x1c8] sm:$0xff]  }
  0xe3   :  { %v599_v26 = vsel %vm560_vm0, %v597_v14, %v598_v15  ;;  %v619_v29 = vrot.slane %v471_v25, 1  ;;  %v468_v32 = vld [vmem:[#allocation2 + $0x160] sm:$0xfe]  ;;  %v470_v33 = vld [vmem:[#allocation2 + $0x170] sm:$0x1]  ;;  %3651 = vmatprep.mubr.bf16.mxu0 %v409_v23  ;;  %v116_v47 = vld [vmem:[#allocation7 + $0xa8] sm:$0xff]  ;;  %v408_v55 = vpack.c.bf16 %v12566_v17, %v12047_v21  ;;  %10295 = vmatprep.subr.bf16.mxu1 %v11659_v41 }
  0xe4   :  { %3740 = vmatprep.mubr.bf16.mxu1 %v696_v19  ;;  %v605_v34 = vsel %vm560_vm0, %v603_v0, %v604_v20  ;;  %v615_v35 = vrot.slane %v468_v32, 1  ;;  %v616_v37 = vrot.slane %v470_v33, 1  ;;  %v260_v46 = vrot.slane %v116_v47, 7  ;;  %v11660_v56 = vld [vmem:[#allocation9 + $0x188] sm:$0xff]   ;;  %v113_v57 = vld [vmem:[#allocation7 + $0x90] sm:$0xff]  ;;  %v115_v58 = vld [vmem:[#allocation7 + $0xa0] sm:$0xff] }
  0xe5   :  { %v695_v39 = vpack.c.bf16 %v605_v34, %v599_v26  ;;  %v620_v40 = vsel %vm560_vm0, %v618_v28, %v619_v29  ;;  %341 = vst [vmem:[#allocation2 + $0x188] sm:$0xfe] %v258_v42  ;;  %343 = vst [vmem:[#allocation2 + $0x198] sm:$0x1] %v258_v42  ;;  %v257_v63 = vrot.slane %v113_v57, 7  ;;  %v259_v1 = vrot.slane %v115_v58, 7  ;;  %10296 = vmatpush3.bf16.msra.mxu1 %v11660_v56 }
  0xe6   :  { %v698_v50 = vpack.c.bf16 %v620_v40, %v614_v27  ;;  %v617_v61 = vsel %vm560_vm0, %v615_v35, %v616_v37  ;;  %345 = vst [vmem:[#allocation2 + $0x1a8] sm:$0xfe] %v260_v46  ;;  %347 = vst [vmem:[#allocation2 + $0x1b8] sm:$0x1] %v260_v46  ;;  %v11661_v5 = vld [vmem:[#allocation9 + $0x168] sm:$0xff]   ;;  %v11663_v36 = vld [vmem:[#allocation9 + $0x1d0] sm:$0xff]  }
  0xe7   :  { %3741 = vmatmul.mubr.bf16.gmra.mrb[12].mxu1 %v695_v39  ;;  %340 = vst [vmem:[#allocation2 + $0x180] sm:$0xfe] %v257_v63  ;;  %344 = vst [vmem:[#allocation2 + $0x1a0] sm:$0xfe] %v259_v1  ;;  %v11662_v7 = vld [vmem:[#allocation9 + $0x128] sm:$0xff]   ;;  %v697_v8 = vpack.c.bf16 %v617_v61, %v611_v60  ;;  %10239 = vmatprep.subr.bf16.mxu0 %v11661_v5  ;;  %v11664_v53 = vld [vmem:[#allocation9 + $0x190] sm:$0xff]  }
  0xe8   :  { %3748 = vmatprep.mubr.bf16.mxu1 %v698_v50  ;;  %342 = vst [vmem:[#allocation2 + $0x190] sm:$0x1] %v257_v63  ;;  %346 = vst [vmem:[#allocation2 + $0x1b0] sm:$0x1] %v259_v1  ;;  %10240 = vmatpush3.bf16.msra.mxu0 %v11662_v7  ;;  %v11665_v54 = vld [vmem:[#allocation9 + $0x1d8] sm:$0xff]   ;;  %v120_v11 = vld [vmem:[#allocation7 + $0xc8] sm:$0xff] }
  0xe9   :  { %10297 = vmatprep.subr.bf16.mxu1 %v11663_v36  ;;  %v118_v9 = vld [vmem:[#allocation7 + $0xb8] sm:$0xff]  ;;  %v264_v13 = vrot.slane %v120_v11, 7  ;;  %v117_v42 = vld [vmem:[#allocation7 + $0xb0] sm:$0xff]  ;;  %v119_v58 = vld [vmem:[#allocation7 + $0xc0] sm:$0xff] }
  0xea   :  { %3652 = vmatmul.mubr.bf16.gmra.mrb[16].mxu0 %v408_v55  ;;  %10298 = vmatpush3.bf16.msra.mxu1 %v11664_v53  ;;  %v262_v12 = vrot.slane %v118_v9, 7  ;;  %v11666_v55 = vld [vmem:[#allocation9 + $0x198] sm:$0xff]   ;;  %v261_v60 = vrot.slane %v117_v42, 7  ;;  %v263_v63 = vrot.slane %v119_v58, 7  ;;  %v11667_v1 = vld [vmem:[#allocation9 + $0x170] sm:$0xff]  }
  0xeb   :  { %10299 = vmatprep.subr.bf16.mxu1 %v11665_v54  ;;  %353 = vst [vmem:[#allocation2 + $0x1e8] sm:$0xfe] %v264_v13  ;;  %355 = vst [vmem:[#allocation2 + $0x1f8] sm:$0x1] %v264_v13  ;;  %v11668_v7 = vld [vmem:[#allocation9 + $0x130] sm:$0xff]   ;;  %10241 = vmatprep.subr.bf16.mxu0 %v11667_v1 }
  0xec   :  { %v12578_v14 = vld [vmem:[#allocation2 + $0x188] sm:$0xff]  ;;  %v475_v20 = vld [vmem:[#allocation2 + $0x198] sm:$0x1]  ;;  %349 = vst [vmem:[#allocation2 + $0x1c8] sm:$0xfe] %v262_v12  ;;  %10242 = vmatpush3.bf16.msra.mxu0 %v11668_v7  ;;  %v123_v7 = vld [vmem:[#allocation7 + $0xe0] sm:$0xff] }
  0xed   :  { %v12580_v15 = vld [vmem:[#allocation2 + $0x1a8] sm:$0xff]  ;;  %v479_v23 = vld [vmem:[#allocation2 + $0x1b8] sm:$0x1]  ;;  %351 = vst [vmem:[#allocation2 + $0x1d8] sm:$0x1] %v262_v12  ;;  %v1051_v24 = vpack.c.bf16 %v12578_v14, %v12564_v16  ;;  %v625_v26 = vrot.slane %v475_v20, 1 }
  0xee   :  { %v473_v19 = vld [vmem:[#allocation2 + $0x188] sm:$0xfe]  ;;  %v411_v0 = vpack.c.bf16 %v12580_v15, %v12578_v14  ;;  %v631_v28 = vrot.slane %v479_v23, 1  ;;  %v12586_v29 = vld [vmem:[#allocation2 + $0x180] sm:$0xff]  ;;  %10300 = vmatpush3.bf16.msra.mxu1 %v11666_v55  ;;  %348 = vst [vmem:[#allocation2 + $0x1c0] sm:$0xfe] %v261_v60 }
  0xef   :  { %3749 = vmatmul.mubr.bf16.gmra.mrb[16].mxu1 %v697_v8  ;;  %v477_v21 = vld [vmem:[#allocation2 + $0x1a8] sm:$0xfe]  ;;  %v624_v25 = vrot.slane %v473_v19, 1  ;;  %v12588_v32 = vld [vmem:[#allocation2 + $0x1a0] sm:$0xff]  ;;  %v474_v35 = vld [vmem:[#allocation2 + $0x190] sm:$0x1]  ;;  %v1050_v39 = vpack.c.bf16 %v12586_v29, %v12566_v17 }
  0xf0   :  { %v630_v27 = vrot.slane %v477_v21, 1  ;;  %3659 = vmatprep.mubr.bf16.mxu0 %v411_v0  ;;  %v410_v33 = vpack.c.bf16 %v12588_v32, %v12586_v29  ;;  %v472_v34 = vld [vmem:[#allocation2 + $0x180] sm:$0xfe]  ;;  %v478_v43 = vld [vmem:[#allocation2 + $0x1b0] sm:$0x1]  ;;  %v622_v50 = vrot.slane %v474_v35, 1 }
  0xf1   :  { %v476_v37 = vld [vmem:[#allocation2 + $0x1a0] sm:$0xfe]  ;;  %v626_v40 = vsel %vm560_vm0, %v624_v25, %v625_v26  ;;  %v621_v47 = vrot.slane %v472_v34, 1  ;;  %v628_v57 = vrot.slane %v478_v43, 1  ;;  %350 = vst [vmem:[#allocation2 + $0x1d0] sm:$0x1] %v261_v60 }
  0xf2   :  { %v632_v41 = vsel %vm560_vm0, %v630_v27, %v631_v28  ;;  %3660 = vmatmul.mubr.bf16.gmra.mrb[20].mxu0 %v410_v33  ;;  %v627_v56 = vrot.slane %v476_v37, 1  ;;  %v12600_v53 = vld [vmem:[#allocation2 + $0x1e8] sm:$0xff]  ;;  %352 = vst [vmem:[#allocation2 + $0x1e0] sm:$0xfe] %v263_v63  ;;  %354 = vst [vmem:[#allocation2 + $0x1f0] sm:$0x1] %v263_v63 }
  0xf3   :  { %v700_v46 = vpack.c.bf16 %v632_v41, %v626_v40  ;;  %v623_v61 = vsel %vm560_vm0, %v621_v47, %v622_v50  ;;  %v12598_v36 = vld [vmem:[#allocation2 + $0x1c8] sm:$0xff]  ;;  %v487_v13 = vld [vmem:[#allocation2 + $0x1f8] sm:$0x1]  ;;  %v11669_v25 = vld [vmem:[#allocation9 + $0x1e0] sm:$0xff]  }
  0xf4   :  { %v629_v5 = vsel %vm560_vm0, %v627_v56, %v628_v57  ;;  %v481_v54 = vld [vmem:[#allocation2 + $0x1c8] sm:$0xfe]  ;;  %v413_v9 = vpack.c.bf16 %v12600_v53, %v12598_v36  ;;  %v483_v11 = vld [vmem:[#allocation2 + $0x1d8] sm:$0x1]  ;;  %v1053_v19 = vpack.c.bf16 %v12598_v36, %v12580_v15  ;;  %v643_v23 = vrot.slane %v487_v13, 1  ;;  %v11670_v28 = vld [vmem:[#allocation9 + $0x1a0] sm:$0xff]   ;;  %10301 = vmatprep.subr.bf16.mxu1 %v11669_v25 }
  0xf5   :  { %3756 = vmatprep.mubr.bf16.mxu1 %v700_v46  ;;  %v699_v8 = vpack.c.bf16 %v629_v5, %v623_v61  ;;  %v485_v12 = vld [vmem:[#allocation2 + $0x1e8] sm:$0xfe]  ;;  %v636_v0 = vrot.slane %v481_v54, 1  ;;  %v637_v20 = vrot.slane %v483_v11, 1  ;;  %v122_v35 = vld [vmem:[#allocation7 + $0xd8] sm:$0xff]  ;;  %v12608_v40 = vld [vmem:[#allocation2 + $0x1c0] sm:$0xff]  ;;  %10302 = vmatpush3.bf16.msra.mxu1 %v11670_v28 }
  0xf6   :  { %v642_v21 = vrot.slane %v485_v12, 1  ;;  %3667 = vmatprep.mubr.bf16.mxu0 %v413_v9  ;;  %v11671_v34 = vld [vmem:[#allocation9 + $0x1e8] sm:$0xff]   ;;  %v480_v41 = vld [vmem:[#allocation2 + $0x1c0] sm:$0xfe]  ;;  %v266_v47 = vrot.slane %v122_v35, 7  ;;  %v1052_v56 = vpack.c.bf16 %v12608_v40, %v12588_v32  ;;  %v121_v5 = vld [vmem:[#allocation7 + $0xd0] sm:$0xff] }
  0xf7   :  { %3757 = vmatmul.mubr.bf16.gmra.mrb[20].mxu1 %v699_v8  ;;  %v638_v26 = vsel %vm560_vm0, %v636_v0, %v637_v20  ;;  %v124_v37 = vld [vmem:[#allocation7 + $0xe8] sm:$0xff]  ;;  %v633_v46 = vrot.slane %v480_v41, 1  ;;  %10303 = vmatprep.subr.bf16.mxu1 %v11671_v34  ;;  %v265_v9 = vrot.slane %v121_v5, 7  ;;  %v267_v11 = vrot.slane %v123_v7, 7  ;;  %v11673_v13 = vld [vmem:[#allocation9 + $0x178] sm:$0xff]   ;;  %v11675_v20 = vld [vmem:[#allocation9 + $0x1f0] sm:$0xff]  }
  0xf8   :  { %v644_v27 = vsel %vm560_vm0, %v642_v21, %v643_v23  ;;  %v482_v43 = vld [vmem:[#allocation2 + $0x1d0] sm:$0x1]  ;;  %357 = vst [vmem:[#allocation2 + $0x208] sm:$0xfe] %v266_v47  ;;  %359 = vst [vmem:[#allocation2 + $0x218] sm:$0x1] %v266_v47  ;;  %10243 = vmatprep.subr.bf16.mxu0 %v11673_v13 }
  0xf9   :  { %v702_v33 = vpack.c.bf16 %v644_v27, %v638_v26  ;;  %v12610_v50 = vld [vmem:[#allocation2 + $0x1e0] sm:$0xff]  ;;  %v486_v42 = vld [vmem:[#allocation2 + $0x1f0] sm:$0x1]  ;;  %v634_v58 = vrot.slane %v482_v43, 1  ;;  %v11672_v63 = vld [vmem:[#allocation9 + $0x1a8] sm:$0xff]   ;;  %v268_v1 = vrot.slane %v124_v37, 7 }
  0xfa   :  { %v484_v55 = vld [vmem:[#allocation2 + $0x1e0] sm:$0xfe]  ;;  %v412_v57 = vpack.c.bf16 %v12610_v50, %v12608_v40  ;;  %v640_v61 = vrot.slane %v486_v42, 1  ;;  %10304 = vmatpush3.bf16.msra.mxu1 %v11672_v63  ;;  %356 = vst [vmem:[#allocation2 + $0x200] sm:$0xfe] %v265_v9  ;;  %v11674_v0 = vld [vmem:[#allocation9 + $0x138] sm:$0xff]  }
  0xfb   :  { %3764 = vmatprep.mubr.bf16.mxu1 %v702_v33  ;;  %v639_v60 = vrot.slane %v484_v55, 1  ;;  %v635_v8 = vsel %vm560_vm0, %v633_v46, %v634_v58  ;;  %361 = vst [vmem:[#allocation2 + $0x228] sm:$0xfe] %v268_v1  ;;  %363 = vst [vmem:[#allocation2 + $0x238] sm:$0x1] %v268_v1  ;;  %10244 = vmatpush3.bf16.msra.mxu0 %v11674_v0  ;;  %v11676_v21 = vld [vmem:[#allocation9 + $0x1b0] sm:$0xff]  }
  0xfc   :  { %3668 = vmatmul.mubr.bf16.gmra.mrb[24].mxu0 %v412_v57  ;;  %360 = vst [vmem:[#allocation2 + $0x220] sm:$0xfe] %v267_v11  ;;  %358 = vst [vmem:[#allocation2 + $0x210] sm:$0x1] %v265_v9  ;;  %10305 = vmatprep.subr.bf16.mxu1 %v11675_v20  ;;  %v11677_v33 = vld [vmem:[#allocation9 + $0x1f8] sm:$0xff]   ;;  %v11679_v20 = vld [vmem:[#allocation9 + $0x240] sm:$0xff]  }
  0xfd   :  { %v641_v54 = vsel %vm560_vm0, %v639_v60, %v640_v61  ;;  %362 = vst [vmem:[#allocation2 + $0x230] sm:$0x1] %v267_v11  ;;  %v722_v34 = vld [vmem:[#allocation2 + $0x8] sm:$0xfc]  ;;  %v11678_v35 = vld [vmem:[#allocation9 + $0x1b8] sm:$0xff]   ;;  %10357 = vmatprep.subr.bf16.mxu0 %v11679_v20  ;;  %v11684_v6 = vld [vmem:[#allocation9 + $0x210] sm:$0xff]  }
  0xfe   :  { %v701_v12 = vpack.c.bf16 %v641_v54, %v635_v8  ;;  %10306 = vmatpush3.bf16.msra.mxu1 %v11676_v21  ;;  %v724_v37 = vld [vmem:[#allocation2 + $0x18] sm:$0x3]  ;;  %v726_v41 = vld [vmem:[#allocation2 + $0x28] sm:$0xfc]  ;;  %v853_v46 = vrot.slane %v722_v34, 2  ;;  %v11699_v29 = vld [vmem:[#allocation9 + $0x270] sm:$0xff]  }
  0xff   :  { %v12618_v23 = vld [vmem:[#allocation2 + $0x208] sm:$0xff]  ;;  %v491_v26 = vld [vmem:[#allocation2 + $0x218] sm:$0x1]  ;;  %10307 = vmatprep.subr.bf16.mxu1 %v11677_v33  ;;  %v11701_v36 = vld [vmem:[#allocation9 + $0x2e0] sm:$0xff]  }
 0x100   :  { %3765 = vmatmul.mubr.bf16.gmra.mrb[24].mxu1 %v701_v12  ;;  %v489_v25 = vld [vmem:[#allocation2 + $0x208] sm:$0xfe]  ;;  %v649_v28 = vrot.slane %v491_v26, 1  ;;  %v728_v42 = vld [vmem:[#allocation2 + $0x38] sm:$0x3]  ;;  %v854_v26 = vrot.slane %v724_v37, 2  ;;  %v1055_v15 = vpack.c.bf16 %v12618_v23, %v12600_v53 }
 0x101   :  { %v648_v27 = vrot.slane %v489_v25, 1  ;;  %v12625_v63 = vld [vmem:[#allocation2 + $0x200] sm:$0xff]  ;;  %v860_v34 = vrot.slane %v728_v42, 2  ;;  %v746_v30 = vld [vmem:[#allocation2 + $0xc8] sm:$0xfc] }
 0x102   :  { %v12620_v43 = vld [vmem:[#allocation2 + $0x228] sm:$0xff]  ;;  %v495_v55 = vld [vmem:[#allocation2 + $0x238] sm:$0x1]  ;;  %v488_v5 = vld [vmem:[#allocation2 + $0x200] sm:$0xfe]  ;;  %10308 = vmatpush3.bf16.msra.mxu1 %v11678_v35  ;;  %v889_v22 = vrot.slane %v746_v30, 2 }
 0x103   :  { %v493_v47 = vld [vmem:[#allocation2 + $0x228] sm:$0xfe]  ;;  %v415_v57 = vpack.c.bf16 %v12620_v43, %v12618_v23  ;;  %v650_v58 = vsel %vm560_vm0, %v648_v27, %v649_v28  ;;  %v655_v61 = vrot.slane %v495_v55, 1  ;;  %v12627_v1 = vld [vmem:[#allocation2 + $0x220] sm:$0xff]  ;;  %v490_v8 = vld [vmem:[#allocation2 + $0x210] sm:$0x1] }
 0x104   :  { %v654_v60 = vrot.slane %v493_v47, 1  ;;  %v414_v7 = vpack.c.bf16 %v12627_v1, %v12625_v63  ;;  %v492_v54 = vld [vmem:[#allocation2 + $0x220] sm:$0xfe]  ;;  %v494_v9 = vld [vmem:[#allocation2 + $0x230] sm:$0x1]  ;;  %v645_v12 = vrot.slane %v488_v5, 1 }
 0x105   :  { %3675 = vmatprep.mubr.bf16.mxu0 %v415_v57  ;;  %v646_v13 = vrot.slane %v490_v8, 1  ;;  %v651_v0 = vrot.slane %v492_v54, 1  ;;  %v652_v25 = vrot.slane %v494_v9, 1  ;;  %v859_v27 = vrot.slane %v726_v41, 2  ;;  %v1011_v28 = vld [vmem:[#allocation2 + $0x28] sm:$0xff]  ;;  %v11680_v42 = vld [vmem:[#allocation9 + $0x200] sm:$0xff]  }
 0x106   :  { %v656_v11 = vsel %vm560_vm0, %v654_v60, %v655_v61  ;;  %3676 = vmatmul.mubr.bf16.gmra.mrb[28].mxu0 %v414_v7  ;;  %v721_v47 = vld [vmem:[#allocation2] sm:$0xfc]  ;;  %v723_v55 = vld [vmem:[#allocation2 + $0x10] sm:$0x3]  ;;  %v1043_v35 = vpack.c.bf16 %v12498_v18, %v1011_v28  ;;  %v855_v60 = vsel %vm849_vm1, %v853_v46, %v854_v26  ;;  %v736_v46 = vld [vmem:[#allocation2 + $0x78] sm:$0x3] }
 0x107   :  { %v704_v21 = vpack.c.bf16 %v656_v11, %v650_v58  ;;  %v647_v33 = vsel %vm560_vm0, %v645_v12, %v646_v13  ;;  %v653_v57 = vsel %vm560_vm0, %v651_v0, %v652_v25  ;;  %v725_v61 = vld [vmem:[#allocation2 + $0x20] sm:$0xfc]  ;;  %v727_v58 = vld [vmem:[#allocation2 + $0x30] sm:$0x3]  ;;  %v850_v5 = vrot.slane %v721_v47, 2  ;;  %v11681_v28 = vld [vmem:[#allocation9 + $0x248] sm:$0xff]  }
 0x108   :  { %v851_v7 = vrot.slane %v723_v55, 2  ;;  %v703_v37 = vpack.c.bf16 %v653_v57, %v647_v33  ;;  %v861_v41 = vsel %vm849_vm1, %v859_v27, %v860_v34  ;;  %v856_v8 = vrot.slane %v725_v61, 2  ;;  %v730_v12 = vld [vmem:[#allocation2 + $0x48] sm:$0xfc]  ;;  %v732_v13 = vld [vmem:[#allocation2 + $0x58] sm:$0x3] }
 0x109   :  { %3772 = vmatprep.mubr.bf16.mxu1 %v704_v21  ;;  %v857_v54 = vrot.slane %v727_v58, 2  ;;  %v979_v9 = vpack.c.bf16 %v861_v41, %v855_v60  ;;  %v734_v0 = vld [vmem:[#allocation2 + $0x68] sm:$0xfc]  ;;  %v865_v21 = vrot.slane %v730_v12, 2  ;;  %v866_v25 = vrot.slane %v732_v13, 2 }
 0x10a   :  { %v852_v11 = vsel %vm849_vm1, %v850_v5, %v851_v7  ;;  %3773 = vmatmul.mubr.bf16.gmra.mrb[28].mxu1 %v703_v37  ;;  %v871_v26 = vrot.slane %v734_v0, 2  ;;  %v729_v27 = vld [vmem:[#allocation2 + $0x40] sm:$0xfc]  ;;  %v872_v33 = vrot.slane %v736_v46, 2  ;;  %v731_v34 = vld [vmem:[#allocation2 + $0x50] sm:$0x3] }
 0x10b   :  { %v858_v18 = vsel %vm849_vm1, %v856_v8, %v857_v54  ;;  %3813 = vmatprep.mubr.bf16.mxu0 %v979_v9  ;;  %3910 = vmatprep.mubr.bf16.mxu1 %v1043_v35  ;;  %v733_v47 = vld [vmem:[#allocation2 + $0x60] sm:$0xfc]  ;;  %v862_v55 = vrot.slane %v729_v27, 2  ;;  %v867_v57 = vsel %vm849_vm1, %v865_v21, %v866_v25  ;;  %v735_v60 = vld [vmem:[#allocation2 + $0x70] sm:$0x3]  ;;  %v863_v61 = vrot.slane %v731_v34, 2 }
 0x10c   :  { %v978_v20 = vpack.c.bf16 %v858_v18, %v852_v11  ;;  %v868_v58 = vrot.slane %v733_v47, 2  ;;  %v873_v5 = vsel %vm849_vm1, %v871_v26, %v872_v33  ;;  %v869_v7 = vrot.slane %v735_v60, 2  ;;  %v11682_v35 = vld [vmem:[#allocation9 + $0x208] sm:$0xff]   ;;  %v740_v54 = vld [vmem:[#allocation2 + $0x98] sm:$0x3]  ;;  %v11683_v60 = vld [vmem:[#allocation9 + $0x250] sm:$0xff]  }
 0x10d   :  { %v981_v37 = vpack.c.bf16 %v873_v5, %v867_v57  ;;  %v864_v41 = vsel %vm849_vm1, %v862_v55, %v863_v61  ;;  %v738_v8 = vld [vmem:[#allocation2 + $0x88] sm:$0xfc]  ;;  %v744_v12 = vld [vmem:[#allocation2 + $0xb8] sm:$0x3]  ;;  %v878_v13 = vrot.slane %v740_v54, 2 }
 0x10e   :  { %3814 = vmatmul.mubr.bf16.vlgmr.msra.gmra.mrb[32].mxu0 %v978_v20  ;;  %v870_v9 = vsel %vm849_vm1, %v868_v58, %v869_v7  ;;  %v742_v11 = vld [vmem:[#allocation2 + $0xa8] sm:$0xfc]  ;;  %v877_v18 = vrot.slane %v738_v8, 2  ;;  %v737_v20 = vld [vmem:[#allocation2 + $0x80] sm:$0xfc] }
 0x10f   :  { %10358 = vmatpush3.bf16.msra.mxu0 %v11680_v42  ;;  %3821 = vmatprep.mubr.bf16.mxu0 %v981_v37  ;;  %v980_v0 = vpack.c.bf16 %v870_v9, %v864_v41  ;;  %v883_v46 = vrot.slane %v742_v11, 2  ;;  %v884_v42 = vrot.slane %v744_v12, 2  ;;  %v739_v21 = vld [vmem:[#allocation2 + $0x90] sm:$0x3]  ;;  %v741_v26 = vld [vmem:[#allocation2 + $0xa0] sm:$0xfc] }
 0x110   :  { %10359 = vmatprep.subr.bf16.mxu0 %v11681_v28  ;;  %v879_v25 = vsel %vm849_vm1, %v877_v18, %v878_v13  ;;  %v743_v27 = vld [vmem:[#allocation2 + $0xb0] sm:$0x3]  ;;  %v874_v28 = vrot.slane %v737_v20, 2  ;;  %v875_v33 = vrot.slane %v739_v21, 2  ;;  %v880_v47 = vrot.slane %v741_v26, 2  ;;  %v11685_v20 = vld [vmem:[#allocation9 + $0x258] sm:$0xff]  }
 0x111   :  { %v885_v34 = vsel %vm849_vm1, %v883_v46, %v884_v42  ;;  %v881_v55 = vrot.slane %v743_v27, 2  ;;  %v750_v5 = vld [vmem:[#allocation2 + $0xe8] sm:$0xfc]  ;;  %v752_v7 = vld [vmem:[#allocation2 + $0xf8] sm:$0x3]  ;;  %v109_v27 = vld [vmem:[#allocation7 + $0x70] sm:$0xff] }
 0x112   :  { %3911 = vmatmul.mubr.bf16.vlgmr.msra.gmra.mrb[32].mxu1 %v1042_v38  ;;  %v983_v57 = vpack.c.bf16 %v885_v34, %v879_v25  ;;  %v748_v38 = vld [vmem:[#allocation2 + $0xd8] sm:$0x3]  ;;  %v876_v61 = vsel %vm849_vm1, %v874_v28, %v875_v33  ;;  %v745_v37 = vld [vmem:[#allocation2 + $0xc0] sm:$0xfc]  ;;  %v747_v41 = vld [vmem:[#allocation2 + $0xd0] sm:$0x3] }
 0x113   :  { %10360 = vmatpush3.bf16.msra.mxu0 %v11682_v35  ;;  %3918 = vmatprep.mubr.bf16.mxu1 %v1045_v52  ;;  %v882_v58 = vsel %vm849_vm1, %v880_v47, %v881_v55  ;;  %v890_v44 = vrot.slane %v748_v38, 2  ;;  %v895_v52 = vrot.slane %v750_v5, 2  ;;  %v896_v35 = vrot.slane %v752_v7, 2  ;;  %v749_v54 = vld [vmem:[#allocation2 + $0xe0] sm:$0xfc]  ;;  %v110_v21 = vld [vmem:[#allocation7 + $0x78] sm:$0xff] }
 0x114   :  { %10361 = vmatprep.subr.bf16.mxu0 %v11683_v60  ;;  %v751_v9 = vld [vmem:[#allocation2 + $0xf0] sm:$0x3]  ;;  %v982_v11 = vpack.c.bf16 %v882_v58, %v876_v61  ;;  %v886_v18 = vrot.slane %v745_v37, 2  ;;  %v887_v13 = vrot.slane %v747_v41, 2  ;;  %v892_v46 = vrot.slane %v749_v54, 2  ;;  %v11686_v26 = vld [vmem:[#allocation9 + $0x218] sm:$0xff]  }
 0x115   :  { %v891_v8 = vsel %vm849_vm1, %v889_v22, %v890_v44  ;;  %v897_v12 = vsel %vm849_vm1, %v895_v52, %v896_v35  ;;  %v893_v42 = vrot.slane %v751_v9, 2  ;;  %v254_v25 = vrot.slane %v110_v21, 7  ;;  %v754_v33 = vld [vmem:[#allocation2 + $0x148] sm:$0xfc]  ;;  %v756_v34 = vld [vmem:[#allocation2 + $0x158] sm:$0x3] }
 0x116   :  { %3822 = vmatmul.mubr.bf16.gmra.mrb[36].mxu0 %v980_v0  ;;  %v985_v0 = vpack.c.bf16 %v897_v12, %v891_v8  ;;  %v253_v28 = vrot.slane %v109_v27, 7  ;;  %v11687_v47 = vld [vmem:[#allocation9 + $0x260] sm:$0xff]   ;;  %v758_v31 = vld [vmem:[#allocation2 + $0x168] sm:$0xfc]  ;;  %v760_v51 = vld [vmem:[#allocation2 + $0x178] sm:$0x3] }
 0x117   :  { %3829 = vmatprep.mubr.bf16.mxu0 %v983_v57  ;;  %10362 = vmatpush3.bf16.msra.mxu0 %v11684_v6  ;;  %333 = vst [vmem:[#allocation2 + $0x108] sm:$0xfe] %v254_v25  ;;  %335 = vst [vmem:[#allocation2 + $0x118] sm:$0x1] %v254_v25  ;;  %v902_v55 = vrot.slane %v756_v34, 2  ;;  %v888_v57 = vsel %vm849_vm1, %v886_v18, %v887_v13  ;;  %v894_v45 = vsel %vm849_vm1, %v892_v46, %v893_v42  ;;  %v11688_v52 = vld [vmem:[#allocation9 + $0x220] sm:$0xff]  }
 0x118   :  { %10363 = vmatprep.subr.bf16.mxu0 %v11685_v20  ;;  %332 = vst [vmem:[#allocation2 + $0x100] sm:$0xfe] %v253_v28  ;;  %334 = vst [vmem:[#allocation2 + $0x110] sm:$0x1] %v253_v28  ;;  %v907_v48 = vrot.slane %v758_v31, 2  ;;  %v984_v22 = vpack.c.bf16 %v894_v45, %v888_v57  ;;  %v11689_v41 = vld [vmem:[#allocation9 + $0x2c0] sm:$0xff]  }
 0x119   :  { %v753_v60 = vld [vmem:[#allocation2 + $0x140] sm:$0xfc]  ;;  %v755_v6 = vld [vmem:[#allocation2 + $0x150] sm:$0x3]  ;;  %10421 = vmatprep.subr.bf16.mxu1 %v11689_v41  ;;  %v11691_v12 = vld [vmem:[#allocation9 + $0x2c8] sm:$0xff]  }
 0x11a   :  { %3919 = vmatmul.mubr.bf16.gmra.mrb[36].mxu1 %v1044_v2  ;;  %v901_v2 = vrot.slane %v754_v33, 2  ;;  %v757_v38 = vld [vmem:[#allocation2 + $0x160] sm:$0xfc]  ;;  %v759_v61 = vld [vmem:[#allocation2 + $0x170] sm:$0x3]  ;;  %v898_v5 = vrot.slane %v753_v60, 2 }
 0x11b   :  { %3926 = vmatprep.mubr.bf16.mxu1 %v1047_v59  ;;  %10364 = vmatpush3.bf16.msra.mxu0 %v11686_v26  ;;  %v908_v59 = vrot.slane %v760_v51, 2  ;;  %v899_v7 = vrot.slane %v755_v6, 2  ;;  %v904_v44 = vrot.slane %v757_v38, 2  ;;  %v905_v37 = vrot.slane %v759_v61, 2  ;;  %v11690_v8 = vld [vmem:[#allocation9 + $0x280] sm:$0xff]   ;;  %v11692_v25 = vld [vmem:[#allocation9 + $0x288] sm:$0xff]  }
 0x11c   :  { %v903_v30 = vsel %vm849_vm1, %v901_v2, %v902_v55  ;;  %10365 = vmatprep.subr.bf16.mxu0 %v11687_v47  ;;  %10422 = vmatpush3.bf16.msra.mxu1 %v11690_v8  ;;  %v762_v18 = vld [vmem:[#allocation2 + $0x188] sm:$0xfc]  ;;  %v768_v46 = vld [vmem:[#allocation2 + $0x1b8] sm:$0x3]  ;;  %v761_v26 = vld [vmem:[#allocation2 + $0x180] sm:$0xfc] }
 0x11d   :  { %v909_v58 = vsel %vm849_vm1, %v907_v48, %v908_v59  ;;  %v900_v62 = vsel %vm849_vm1, %v898_v5, %v899_v7  ;;  %v906_v3 = vsel %vm849_vm1, %v904_v44, %v905_v37  ;;  %10423 = vmatprep.subr.bf16.mxu1 %v11691_v12  ;;  %v913_v42 = vrot.slane %v762_v18, 2  ;;  %v763_v33 = vld [vmem:[#allocation2 + $0x190] sm:$0x3]  ;;  %v765_v34 = vld [vmem:[#allocation2 + $0x1a0] sm:$0xfc]  ;;  %v11693_v57 = vld [vmem:[#allocation9 + $0x268] sm:$0xff]  }
 0x11e   :  { %3830 = vmatmul.mubr.bf16.gmra.mrb[40].mxu0 %v982_v11  ;;  %v987_v35 = vpack.c.bf16 %v909_v58, %v903_v30  ;;  %v1025_v54 = vld [vmem:[#allocation2 + $0x108] sm:$0xff]  ;;  %v986_v27 = vpack.c.bf16 %v906_v3, %v900_v62  ;;  %v767_v47 = vld [vmem:[#allocation2 + $0x1b0] sm:$0x3]  ;;  %v910_v51 = vrot.slane %v761_v26, 2  ;;  %v911_v2 = vrot.slane %v763_v33, 2  ;;  %v11697_v38 = vld [vmem:[#allocation9 + $0x2d8] sm:$0xff]  }
 0x11f   :  { %3837 = vmatprep.mubr.bf16.mxu0 %v985_v0  ;;  %10366 = vmatpush3.bf16.msra.mxu0 %v11688_v52  ;;  %v1049_v9 = vpack.c.bf16 %v1025_v54, %v12546_v49  ;;  %v1024_v11 = vld [vmem:[#allocation2 + $0x100] sm:$0xff]  ;;  %v766_v0 = vld [vmem:[#allocation2 + $0x1a8] sm:$0xfc]  ;;  %v920_v49 = vrot.slane %v768_v46, 2  ;;  %v916_v55 = vrot.slane %v765_v34, 2  ;;  %v917_v45 = vrot.slane %v767_v47, 2 }
 0x120   :  { %v1048_v13 = vpack.c.bf16 %v1024_v11, %v12556_v4  ;;  %v919_v21 = vrot.slane %v766_v0, 2  ;;  %10424 = vmatpush3.bf16.msra.mxu1 %v11692_v25  ;;  %v11694_v48 = vld [vmem:[#allocation9 + $0x228] sm:$0xff]   ;;  %10367 = vmatprep.subr.bf16.mxu0 %v11693_v57  ;;  %v11695_v59 = vld [vmem:[#allocation9 + $0x2d0] sm:$0xff]   ;;  %v912_v60 = vsel %vm849_vm1, %v910_v51, %v911_v2  ;;  %v772_v58 = vld [vmem:[#allocation2 + $0x1d8] sm:$0x3]  ;;  %v1054_v47 = vpack.c.bf16 %v12625_v63, %v12610_v50 }
 0x121   :  { %v918_v6 = vsel %vm849_vm1, %v916_v55, %v917_v45  ;;  %v11696_v30 = vld [vmem:[#allocation9 + $0x290] sm:$0xff]   ;;  %10425 = vmatprep.subr.bf16.mxu1 %v11695_v59  ;;  %v770_v61 = vld [vmem:[#allocation2 + $0x1c8] sm:$0xfc]  ;;  %v776_v14 = vld [vmem:[#allocation2 + $0x1f8] sm:$0x3]  ;;  %v926_v5 = vrot.slane %v772_v58, 2 }
 0x122   :  { %3927 = vmatmul.mubr.bf16.gmra.mrb[40].mxu1 %v1046_v10  ;;  %v764_v10 = vld [vmem:[#allocation2 + $0x198] sm:$0x3]  ;;  %v921_v4 = vsel %vm849_vm1, %v919_v21, %v920_v49  ;;  %v774_v16 = vld [vmem:[#allocation2 + $0x1e8] sm:$0xfc]  ;;  %v988_v7 = vpack.c.bf16 %v918_v6, %v912_v60  ;;  %v932_v44 = vrot.slane %v776_v14, 2  ;;  %v11700_v3 = vld [vmem:[#allocation9 + $0x230] sm:$0xff]  }
 0x123   :  { %3934 = vmatprep.mubr.bf16.mxu1 %v1049_v9  ;;  %v914_v20 = vrot.slane %v764_v10, 2  ;;  %10368 = vmatpush3.bf16.msra.mxu0 %v11694_v48  ;;  %v769_v37 = vld [vmem:[#allocation2 + $0x1c0] sm:$0xfc]  ;;  %v771_v41 = vld [vmem:[#allocation2 + $0x1d0] sm:$0x3]  ;;  %v11703_v0 = vld [vmem:[#allocation9 + $0x2e8] sm:$0xff]  }
 0x124   :  { %10426 = vmatpush3.bf16.msra.mxu1 %v11696_v30  ;;  %v773_v54 = vld [vmem:[#allocation2 + $0x1e0] sm:$0xfc]  ;;  %v775_v9 = vld [vmem:[#allocation2 + $0x1f0] sm:$0x3]  ;;  %v922_v11 = vrot.slane %v769_v37, 2  ;;  %v923_v12 = vrot.slane %v771_v41, 2  ;;  %10369 = vmatprep.subr.bf16.mxu0 %v11699_v29 }
 0x125   :  { %v915_v28 = vsel %vm849_vm1, %v913_v42, %v914_v20  ;;  %10427 = vmatprep.subr.bf16.mxu1 %v11697_v38  ;;  %v929_v17 = vrot.slane %v775_v9, 2  ;;  %v778_v46 = vld [vmem:[#allocation2 + $0x208] sm:$0xfc]  ;;  %v780_v42 = vld [vmem:[#allocation2 + $0x218] sm:$0x3]  ;;  %v125_v6 = vld [vmem:[#allocation7 + $0xf0] sm:$0xff] }
 0x126   :  { %3838 = vmatmul.mubr.bf16.gmra.mrb[44].mxu0 %v984_v22  ;;  %v989_v31 = vpack.c.bf16 %v921_v4, %v915_v28  ;;  %v931_v22 = vrot.slane %v774_v16, 2  ;;  %v782_v20 = vld [vmem:[#allocation2 + $0x228] sm:$0xfc]  ;;  %v784_v21 = vld [vmem:[#allocation2 + $0x238] sm:$0x3]  ;;  %v937_v49 = vrot.slane %v778_v46, 2 }
 0x127   :  { %3845 = vmatprep.mubr.bf16.mxu0 %v987_v35  ;;  %v11698_v35 = vld [vmem:[#allocation9 + $0x298] sm:$0xff]   ;;  %10370 = vmatpush3.bf16.msra.mxu0 %v11700_v3  ;;  %v938_v25 = vrot.slane %v780_v42, 2  ;;  %v943_v26 = vrot.slane %v782_v20, 2  ;;  %v944_v53 = vrot.slane %v784_v21, 2  ;;  %v777_v28 = vld [vmem:[#allocation2 + $0x200] sm:$0xfc] }
 0x128   :  { %v933_v8 = vsel %vm849_vm1, %v931_v22, %v932_v44  ;;  %10428 = vmatpush3.bf16.msra.mxu1 %v11698_v35  ;;  %v779_v4 = vld [vmem:[#allocation2 + $0x210] sm:$0x3]  ;;  %v781_v34 = vld [vmem:[#allocation2 + $0x220] sm:$0xfc]  ;;  %v934_v40 = vrot.slane %v777_v28, 2  ;;  %v11705_v57 = vld [vmem:[#allocation9 + $0x278] sm:$0xff]  }
 0x129   :  { %10429 = vmatprep.subr.bf16.mxu1 %v11701_v36  ;;  %v939_v23 = vsel %vm849_vm1, %v937_v49, %v938_v25  ;;  %v945_v33 = vsel %vm849_vm1, %v943_v26, %v944_v53  ;;  %v783_v32 = vld [vmem:[#allocation2 + $0x230] sm:$0x3]  ;;  %v940_v51 = vrot.slane %v781_v34, 2  ;;  %v126_v45 = vld [vmem:[#allocation7 + $0xf8] sm:$0xff]  ;;  %10371 = vmatprep.subr.bf16.mxu0 %v11705_v57  ;;  %v269_v38 = vrot.slane %v125_v6, 7  ;;  %v11711_v35 = vld [vmem:[#allocation9 + $0x340] sm:$0xff]  }
 0x12a   :  { %3935 = vmatmul.mubr.bf16.gmra.mrb[44].mxu1 %v1048_v13  ;;  %v928_v13 = vrot.slane %v773_v54, 2  ;;  %v941_v2 = vrot.slane %v783_v32, 2  ;;  %v270_v59 = vrot.slane %v126_v45, 7  ;;  %v11706_v60 = vld [vmem:[#allocation9 + $0x238] sm:$0xff]   ;;  %v11708_v50 = vld [vmem:[#allocation9 + $0x2b0] sm:$0xff]  }
 0x12b   :  { %3942 = vmatprep.mubr.bf16.mxu1 %v1051_v24  ;;  %v925_v24 = vrot.slane %v770_v61, 2  ;;  %v11707_v61 = vld [vmem:[#allocation9 + $0x2f0] sm:$0xff]   ;;  %10372 = vmatpush3.bf16.msra.mxu0 %v11706_v60  ;;  %364 = vst [vmem:[#allocation2 + $0x240] sm:$0xfe] %v269_v38  ;;  %366 = vst [vmem:[#allocation2 + $0x250] sm:$0x1] %v269_v38 }
 0x12c   :  { %v930_v62 = vsel %vm849_vm1, %v928_v13, %v929_v17  ;;  %v942_v48 = vsel %vm849_vm1, %v940_v51, %v941_v2  ;;  %365 = vst [vmem:[#allocation2 + $0x248] sm:$0xfe] %v270_v59  ;;  %367 = vst [vmem:[#allocation2 + $0x258] sm:$0x1] %v270_v59  ;;  %v11709_v63 = vld [vmem:[#allocation9 + $0x2f8] sm:$0xff]   ;;  %10485 = vmatprep.subr.bf16.mxu0 %v11711_v35  ;;  %v11714_v2 = vld [vmem:[#allocation9 + $0x308] sm:$0xff]  }
 0x12d   :  { %v927_v52 = vsel %vm849_vm1, %v925_v24, %v926_v5  ;;  %v1075_v58 = vld [vmem:[#allocation2 + $0x28] sm:$0xfe]  ;;  %v1077_v16 = vld [vmem:[#allocation2 + $0x38] sm:$0x1]  ;;  %v1074_v41 = vld [vmem:[#allocation2 + $0x20] sm:$0xfe] }
 0x12e   :  { %3846 = vmatmul.mubr.bf16.gmra.mrb[48].mxu0 %v986_v27  ;;  %v991_v18 = vpack.c.bf16 %v933_v8, %v927_v52  ;;  %v11704_v27 = vld [vmem:[#allocation9 + $0x2a8] sm:$0xff]   ;;  %v1081_v24 = vld [vmem:[#allocation2 + $0x58] sm:$0x1]  ;;  %v1205_v5 = vrot.slane %v1075_v58, 1  ;;  %v1076_v8 = vld [vmem:[#allocation2 + $0x30] sm:$0x1] }
 0x12f   :  { %3853 = vmatprep.mubr.bf16.mxu0 %v989_v31  ;;  %v993_v31 = vpack.c.bf16 %v945_v33, %v939_v23  ;;  %v1079_v14 = vld [vmem:[#allocation2 + $0x48] sm:$0xfe]  ;;  %v11710_v44 = vld [vmem:[#allocation9 + $0x2b8] sm:$0xff]   ;;  %v1212_v52 = vrot.slane %v1081_v24, 1  ;;  %v1078_v54 = vld [vmem:[#allocation2 + $0x40] sm:$0xfe] }
 0x130   :  { %v1211_v22 = vrot.slane %v1079_v14, 1  ;;  %v1208_v13 = vrot.slane %v1078_v54, 1  ;;  %v1367_v42 = vld [vmem:[#allocation2 + $0x48] sm:$0xfc]  ;;  %v1369_v20 = vld [vmem:[#allocation2 + $0x58] sm:$0x3] }
 0x131   :  { %v1499_v26 = vrot.slane %v1367_v42, 2  ;;  %v1500_v53 = vrot.slane %v1369_v20, 2  ;;  %v1362_v23 = vld [vmem:[#allocation2 + $0x20] sm:$0xfc]  ;;  %v1085_v51 = vld [vmem:[#allocation2 + $0x78] sm:$0x1] }
 0x132   :  { %3943 = vmatmul.mubr.bf16.gmra.mrb[48].mxu1 %v1050_v39  ;;  %v924_v39 = vsel %vm849_vm1, %v922_v11, %v923_v12  ;;  %v1213_v9 = vsel %vm560_vm0, %v1211_v22, %v1212_v52  ;;  %v1080_v11 = vld [vmem:[#allocation2 + $0x50] sm:$0x1]  ;;  %v1202_v12 = vrot.slane %v1074_v41, 1  ;;  %v1366_v28 = vld [vmem:[#allocation2 + $0x40] sm:$0xfc]  ;;  %v1490_v33 = vrot.slane %v1362_v23, 2 }
 0x133   :  { %3950 = vmatprep.mubr.bf16.mxu1 %v1053_v19  ;;  %v11702_v19 = vld [vmem:[#allocation9 + $0x2a0] sm:$0xff]   ;;  %v990_v10 = vpack.c.bf16 %v930_v62, %v924_v39  ;;  %v1041_v17 = vld [vmem:[#allocation2 + $0x248] sm:$0xff]  ;;  %v1209_v39 = vrot.slane %v1080_v11, 1  ;;  %v1496_v32 = vrot.slane %v1366_v28, 2  ;;  %v1089_v45 = vld [vmem:[#allocation2 + $0x98] sm:$0x1] }
 0x134   :  { %10430 = vmatpush3.bf16.msra.mxu1 %v11702_v19  ;;  %v11712_v62 = vld [vmem:[#allocation9 + $0x300] sm:$0xff]   ;;  %v1057_v3 = vpack.c.bf16 %v1041_v17, %v12620_v43  ;;  %v1363_v19 = vld [vmem:[#allocation2 + $0x28] sm:$0xfc]  ;;  %v1218_v59 = vrot.slane %v1085_v51, 1  ;;  %v1377_v54 = vld [vmem:[#allocation2 + $0x98] sm:$0x3] }
 0x135   :  { %10431 = vmatprep.subr.bf16.mxu1 %v11703_v0  ;;  %v1210_v46 = vsel %vm560_vm0, %v1208_v13, %v1209_v39  ;;  %v1493_v21 = vrot.slane %v1363_v19, 2  ;;  %v1087_v57 = vld [vmem:[#allocation2 + $0x88] sm:$0xfe]  ;;  %v1082_v38 = vld [vmem:[#allocation2 + $0x60] sm:$0xfe]  ;;  %v1512_v17 = vrot.slane %v1377_v54, 2 }
 0x136   :  { %3854 = vmatmul.mubr.bf16.gmra.mrb[52].mxu0 %v988_v7  ;;  %v1206_v7 = vrot.slane %v1077_v16, 1  ;;  %v1223_v6 = vrot.slane %v1087_v57, 1  ;;  %v1086_v58 = vld [vmem:[#allocation2 + $0x80] sm:$0xfe]  ;;  %v1088_v16 = vld [vmem:[#allocation2 + $0x90] sm:$0x1] }
 0x137   :  { %3861 = vmatprep.mubr.bf16.mxu0 %v991_v18  ;;  %v1203_v18 = vrot.slane %v1076_v8, 1  ;;  %v1214_v14 = vrot.slane %v1082_v38, 1  ;;  %v1221_v22 = vrot.slane %v1088_v16, 1  ;;  %v1371_v35 = vld [vmem:[#allocation2 + $0x68] sm:$0xfc]  ;;  %v11717_v42 = vld [vmem:[#allocation9 + $0x358] sm:$0xff]  }
 0x138   :  { %10432 = vmatpush3.bf16.msra.mxu1 %v11704_v27  ;;  %v1207_v37 = vsel %vm560_vm0, %v1205_v5, %v1206_v7  ;;  %v1364_v27 = vld [vmem:[#allocation2 + $0x30] sm:$0x3]  ;;  %v1220_v7 = vrot.slane %v1086_v58, 1  ;;  %v1375_v41 = vld [vmem:[#allocation2 + $0x88] sm:$0xfc]  ;;  %v11719_v16 = vld [vmem:[#allocation9 + $0x360] sm:$0xff]  }
 0x139   :  { %10433 = vmatprep.subr.bf16.mxu1 %v11707_v61  ;;  %v1331_v29 = vpack.c.bf16 %v1213_v9, %v1207_v37  ;;  %v1204_v36 = vsel %vm560_vm0, %v1202_v12, %v1203_v18  ;;  %v1491_v34 = vrot.slane %v1364_v27, 2  ;;  %v1084_v61 = vld [vmem:[#allocation2 + $0x70] sm:$0x1]  ;;  %v1373_v37 = vld [vmem:[#allocation2 + $0x78] sm:$0x3]  ;;  %v1505_v9 = vrot.slane %v1371_v35, 2 }
 0x13a   :  { %3951 = vmatmul.mubr.bf16.gmra.mrb[52].mxu1 %v1052_v56  ;;  %v935_v56 = vrot.slane %v779_v4, 2  ;;  %v1330_v25 = vpack.c.bf16 %v1210_v46, %v1204_v36  ;;  %v1368_v4 = vld [vmem:[#allocation2 + $0x50] sm:$0x3]  ;;  %v1215_v24 = vrot.slane %v1084_v61, 1  ;;  %v1222_v8 = vsel %vm560_vm0, %v1220_v7, %v1221_v22  ;;  %v1097_v23 = vld [vmem:[#allocation2 + $0xd8] sm:$0x1] }
 0x13b   :  { %3958 = vmatprep.mubr.bf16.mxu1 %v1055_v15  ;;  %v1040_v15 = vld [vmem:[#allocation2 + $0x240] sm:$0xff]  ;;  %v1506_v11 = vrot.slane %v1373_v37, 2  ;;  %v1511_v12 = vrot.slane %v1375_v41, 2  ;;  %v11715_v18 = vld [vmem:[#allocation9 + $0x350] sm:$0xff]   ;;  %v1385_v61 = vld [vmem:[#allocation2 + $0xd8] sm:$0x3] }
 0x13c   :  { %v936_v55 = vsel %vm849_vm1, %v934_v40, %v935_v56  ;;  %10434 = vmatpush3.bf16.msra.mxu1 %v11708_v50  ;;  %v1056_v0 = vpack.c.bf16 %v1040_v15, %v12627_v1  ;;  %v1501_v1 = vsel %vm849_vm1, %v1499_v26, %v1500_v53  ;;  %v11713_v40 = vld [vmem:[#allocation9 + $0x348] sm:$0xff]   ;;  %v1216_v52 = vsel %vm560_vm0, %v1214_v14, %v1215_v24  ;;  %v1374_v15 = vld [vmem:[#allocation2 + $0x80] sm:$0xfc]  ;;  %v1376_v19 = vld [vmem:[#allocation2 + $0x90] sm:$0x3] }
 0x13d   :  { %v992_v30 = vpack.c.bf16 %v942_v48, %v936_v55  ;;  %10435 = vmatprep.subr.bf16.mxu1 %v11709_v63  ;;  %v1492_v55 = vsel %vm849_vm1, %v1490_v33, %v1491_v34  ;;  %v1332_v13 = vpack.c.bf16 %v1222_v8, %v1216_v52  ;;  %v1507_v39 = vsel %vm849_vm1, %v1505_v9, %v1506_v11  ;;  %v11718_v26 = vld [vmem:[#allocation9 + $0x318] sm:$0xff]   ;;  %v1090_v34 = vld [vmem:[#allocation2 + $0xa0] sm:$0xfe]  ;;  %v1384_v37 = vld [vmem:[#allocation2 + $0xd0] sm:$0x3] }
 0x13e   :  { %3862 = vmatmul.mubr.bf16.gmra.mrb[56].mxu0 %v990_v10  ;;  %v1365_v10 = vld [vmem:[#allocation2 + $0x38] sm:$0x3]  ;;  %v1513_v36 = vsel %vm849_vm1, %v1511_v12, %v1512_v17  ;;  %v1508_v46 = vrot.slane %v1374_v15, 2  ;;  %v1236_v33 = vrot.slane %v1097_v23, 1  ;;  %v1226_v51 = vrot.slane %v1090_v34, 1  ;;  %v11721_v9 = vld [vmem:[#allocation9 + $0x3c0] sm:$0xff]  }
 0x13f   :  { %3869 = vmatprep.mubr.bf16.mxu0 %v993_v31  ;;  %v1494_v49 = vrot.slane %v1365_v10, 2  ;;  %v1083_v31 = vld [vmem:[#allocation2 + $0x68] sm:$0xfe]  ;;  %v1621_v20 = vpack.c.bf16 %v1513_v36, %v1507_v39  ;;  %v1524_v24 = vrot.slane %v1385_v61, 2  ;;  %v1378_v22 = vld [vmem:[#allocation2 + $0xa0] sm:$0xfc] }
 0x140   :  { %10436 = vmatpush3.bf16.msra.mxu1 %v11710_v44  ;;  %v1217_v48 = vrot.slane %v1083_v31, 1  ;;  %v1096_v31 = vld [vmem:[#allocation2 + $0xd0] sm:$0x1]  ;;  %v1382_v52 = vld [vmem:[#allocation2 + $0xc0] sm:$0xfc]  ;;  %v1514_v41 = vrot.slane %v1378_v22, 2 }
 0x141   :  { %v1495_v43 = vsel %vm849_vm1, %v1493_v21, %v1494_v49  ;;  %v1509_v21 = vrot.slane %v1376_v19, 2  ;;  %v1091_v49 = vld [vmem:[#allocation2 + $0xa8] sm:$0xfe]  ;;  %v1520_v54 = vrot.slane %v1382_v52, 2  ;;  %v1521_v12 = vrot.slane %v1384_v37, 2  ;;  %v11722_v17 = vld [vmem:[#allocation9 + $0x380] sm:$0xff]   ;;  %10549 = vmatprep.subr.bf16.mxu1 %v11721_v9 }
 0x142   :  { %3959 = vmatmul.mubr.bf16.gmra.mrb[56].mxu1 %v1054_v47  ;;  %v1619_v56 = vpack.c.bf16 %v1501_v1, %v1495_v43  ;;  %v1497_v47 = vrot.slane %v1368_v4, 2  ;;  %v1219_v63 = vsel %vm560_vm0, %v1217_v48, %v1218_v59  ;;  %v1095_v43 = vld [vmem:[#allocation2 + $0xc8] sm:$0xfe]  ;;  %v1229_v27 = vrot.slane %v1091_v49, 1  ;;  %v1104_v49 = vld [vmem:[#allocation2 + $0x110] sm:$0x1] }
 0x143   :  { %3966 = vmatprep.mubr.bf16.mxu1 %v1057_v3  ;;  %v1372_v3 = vld [vmem:[#allocation2 + $0x70] sm:$0x3]  ;;  %v1510_v1 = vsel %vm849_vm1, %v1508_v46, %v1509_v21  ;;  %v1235_v4 = vrot.slane %v1095_v43, 1  ;;  %v1103_v39 = vld [vmem:[#allocation2 + $0x108] sm:$0xfe]  ;;  %v1522_v36 = vsel %vm849_vm1, %v1520_v54, %v1521_v12  ;;  %v1245_v23 = vrot.slane %v1104_v49, 1 }
 0x144   :  { %v1498_v60 = vsel %vm849_vm1, %v1496_v32, %v1497_v47  ;;  %v1092_v32 = vld [vmem:[#allocation2 + $0xb0] sm:$0x1]  ;;  %v1094_v47 = vld [vmem:[#allocation2 + $0xc0] sm:$0xfe]  ;;  %v1247_v19 = vrot.slane %v1103_v39, 1 }
 0x145   :  { %v1618_v50 = vpack.c.bf16 %v1498_v60, %v1492_v55  ;;  %v1237_v55 = vsel %vm560_vm0, %v1235_v4, %v1236_v33  ;;  %v1232_v57 = vrot.slane %v1094_v47, 1  ;;  %v1379_v60 = vld [vmem:[#allocation2 + $0xa8] sm:$0xfc]  ;;  %v1100_v46 = vld [vmem:[#allocation2 + $0xf0] sm:$0x1] }
 0x146   :  { %3870 = vmatmul.mubr.bf16.gmra.mrb[60].mxu0 %v992_v30  ;;  %v1224_v30 = vrot.slane %v1089_v45, 1  ;;  %v1233_v45 = vrot.slane %v1096_v31, 1  ;;  %v1102_v21 = vld [vmem:[#allocation2 + $0x100] sm:$0xfe]  ;;  %v1389_v4 = vld [vmem:[#allocation2 + $0xf8] sm:$0x3] }
 0x147   :  { %4007 = vmatprep.mubr.bf16.mxu0 %v1331_v29  ;;  %v11716_v29 = vld [vmem:[#allocation9 + $0x310] sm:$0xff]   ;;  %v1244_v43 = vrot.slane %v1102_v21, 1  ;;  %v1391_v33 = vld [vmem:[#allocation2 + $0x108] sm:$0xfc]  ;;  %v1113_v22 = vld [vmem:[#allocation2 + $0x198] sm:$0x1] }
 0x148   :  { %v1225_v5 = vsel %vm560_vm0, %v1223_v6, %v1224_v30  ;;  %v1381_v6 = vld [vmem:[#allocation2 + $0xb8] sm:$0x3]  ;;  %v1383_v30 = vld [vmem:[#allocation2 + $0xc8] sm:$0xfc]  ;;  %v1234_v38 = vsel %vm560_vm0, %v1232_v57, %v1233_v45  ;;  %v1535_v47 = vrot.slane %v1391_v33, 2  ;;  %v11727_v49 = vld [vmem:[#allocation9 + $0x3d0] sm:$0xff]  }
 0x149   :  { %v1333_v44 = vpack.c.bf16 %v1225_v5, %v1219_v63  ;;  %v1518_v63 = vrot.slane %v1381_v6, 2  ;;  %v1523_v58 = vrot.slane %v1383_v30, 2  ;;  %v11720_v5 = vld [vmem:[#allocation9 + $0x320] sm:$0xff]   ;;  %v1246_v34 = vsel %vm560_vm0, %v1244_v43, %v1245_v23  ;;  %v11723_v31 = vld [vmem:[#allocation9 + $0x3c8] sm:$0xff]   ;;  %v1392_v6 = vld [vmem:[#allocation2 + $0x110] sm:$0x3] }
 0x14a   :  { %3967 = vmatmul.mubr.bf16.gmra.mrb[60].mxu1 %v1056_v0  ;;  %v1503_v0 = vrot.slane %v1372_v3, 2  ;;  %v1386_v45 = vld [vmem:[#allocation2 + $0xe0] sm:$0xfc]  ;;  %v1108_v54 = vld [vmem:[#allocation2 + $0x170] sm:$0x1] }
 0x14b   :  { %4104 = vmatprep.mubr.bf16.mxu1 %v1619_v56  ;;  %v1525_v35 = vsel %vm849_vm1, %v1523_v58, %v1524_v24  ;;  %v1526_v30 = vrot.slane %v1386_v45, 2  ;;  %v1533_v58 = vrot.slane %v1392_v6, 2  ;;  %v11726_v24 = vld [vmem:[#allocation9 + $0x328] sm:$0xff]   ;;  %v1110_v12 = vld [vmem:[#allocation2 + $0x180] sm:$0xfe] }
 0x14c   :  { %v1256_v39 = vrot.slane %v1110_v12, 1  ;;  %v1394_v23 = vld [vmem:[#allocation2 + $0x160] sm:$0xfc] }
 0x14d   :  { %v1538_v33 = vrot.slane %v1394_v23, 2  ;;  %v1123_v23 = vld [vmem:[#allocation2 + $0x1e8] sm:$0xfe] }
 0x14e   :  { %4008 = vmatmul.mubr.bf16.vlgmr.msra.gmra.mrb[64].mxu0 %v1330_v25  ;;  %v1093_v25 = vld [vmem:[#allocation2 + $0xb8] sm:$0x1] }
 0x14f   :  { %10486 = vmatpush3.bf16.msra.mxu0 %v11712_v62  ;;  %4015 = vmatprep.mubr.bf16.mxu0 %v1333_v44  ;;  %v1370_v62 = vld [vmem:[#allocation2 + $0x60] sm:$0xfc]  ;;  %v1230_v28 = vrot.slane %v1093_v25, 1  ;;  %v1380_v44 = vld [vmem:[#allocation2 + $0xb0] sm:$0x3] }
 0x150   :  { %10487 = vmatprep.subr.bf16.mxu0 %v11713_v40  ;;  %v1502_v10 = vrot.slane %v1370_v62, 2  ;;  %v1515_v8 = vrot.slane %v1380_v44, 2  ;;  %v1105_v62 = vld [vmem:[#allocation2 + $0x118] sm:$0x1] }
 0x151   :  { %v1231_v56 = vsel %vm560_vm0, %v1229_v27, %v1230_v28 }
 0x152   :  { %4105 = vmatmul.mubr.bf16.vlgmr.msra.gmra.mrb[64].mxu1 %v1618_v50  ;;  %v1504_v53 = vsel %vm849_vm1, %v1502_v10, %v1503_v0  ;;  %v1335_v48 = vpack.c.bf16 %v1237_v55, %v1231_v56  ;;  %v1517_v50 = vrot.slane %v1379_v60, 2  ;;  %v1248_v10 = vrot.slane %v1105_v62, 1  ;;  %v1098_v0 = vld [vmem:[#allocation2 + $0xe0] sm:$0xfe]  ;;  %v11724_v55 = vld [vmem:[#allocation9 + $0x388] sm:$0xff]  }
 0x153   :  { %10488 = vmatpush3.bf16.msra.mxu0 %v11714_v2  ;;  %4112 = vmatprep.mubr.bf16.mxu1 %v1621_v20  ;;  %v1620_v40 = vpack.c.bf16 %v1510_v1, %v1504_v53  ;;  %v1227_v2 = vrot.slane %v1092_v32, 1  ;;  %v1238_v25 = vrot.slane %v1098_v0, 1  ;;  %v1387_v1 = vld [vmem:[#allocation2 + $0xe8] sm:$0xfc]  ;;  %v1393_v32 = vld [vmem:[#allocation2 + $0x118] sm:$0x3] }
 0x154   :  { %10489 = vmatprep.subr.bf16.mxu0 %v11715_v18  ;;  %v1519_v7 = vsel %vm849_vm1, %v1517_v50, %v1518_v63  ;;  %v1099_v18 = vld [vmem:[#allocation2 + $0xe8] sm:$0xfe]  ;;  %10550 = vmatpush3.bf16.msra.mxu1 %v11722_v17  ;;  %v1249_v53 = vsel %vm560_vm0, %v1247_v19, %v1248_v10  ;;  %v1530_v56 = vrot.slane %v1389_v4, 2  ;;  %v1251_v17 = vrot.slane %v1108_v54, 1  ;;  %v1397_v19 = vld [vmem:[#allocation2 + $0x178] sm:$0x3] }
 0x155   :  { %v1228_v59 = vsel %vm560_vm0, %v1226_v51, %v1227_v2  ;;  %v1623_v11 = vpack.c.bf16 %v1525_v35, %v1519_v7  ;;  %v1241_v3 = vrot.slane %v1099_v18, 1  ;;  %v1536_v2 = vrot.slane %v1393_v32, 2  ;;  %10551 = vmatprep.subr.bf16.mxu1 %v11723_v31  ;;  %v11725_v50 = vld [vmem:[#allocation9 + $0x368] sm:$0xff]   ;;  %v1112_v18 = vld [vmem:[#allocation2 + $0x190] sm:$0x1]  ;;  %v11730_v31 = vld [vmem:[#allocation9 + $0x398] sm:$0xff]  }
 0x156   :  { %4016 = vmatmul.mubr.bf16.gmra.mrb[68].mxu0 %v1332_v13  ;;  %v1334_v14 = vpack.c.bf16 %v1234_v38, %v1228_v59  ;;  %v1101_v13 = vld [vmem:[#allocation2 + $0xf8] sm:$0x1]  ;;  %v1390_v59 = vld [vmem:[#allocation2 + $0x100] sm:$0xfc]  ;;  %v1111_v7 = vld [vmem:[#allocation2 + $0x188] sm:$0xfe] }
 0x157   :  { %10490 = vmatpush3.bf16.msra.mxu0 %v11716_v29  ;;  %4023 = vmatprep.mubr.bf16.mxu0 %v1335_v48  ;;  %v1516_v29 = vsel %vm849_vm1, %v1514_v41, %v1515_v8  ;;  %v1242_v15 = vrot.slane %v1101_v13, 1  ;;  %v1388_v48 = vld [vmem:[#allocation2 + $0xf0] sm:$0x3]  ;;  %v1537_v60 = vsel %vm849_vm1, %v1535_v47, %v1536_v2  ;;  %v1532_v61 = vrot.slane %v1390_v59, 2  ;;  %v1106_v8 = vld [vmem:[#allocation2 + $0x160] sm:$0xfe] }
 0x158   :  { %10491 = vmatprep.subr.bf16.mxu0 %v11717_v42  ;;  %v1622_v42 = vpack.c.bf16 %v1522_v36, %v1516_v29  ;;  %v1527_v38 = vrot.slane %v1388_v48, 2  ;;  %10552 = vmatpush3.bf16.msra.mxu1 %v11724_v55  ;;  %v1259_v37 = vrot.slane %v1111_v7, 1  ;;  %v1260_v41 = vrot.slane %v1113_v22, 1  ;;  %v1395_v36 = vld [vmem:[#allocation2 + $0x168] sm:$0xfc]  ;;  %v11731_v22 = vld [vmem:[#allocation9 + $0x370] sm:$0xff]  }
 0x159   :  { %v1243_v20 = vsel %vm560_vm0, %v1241_v3, %v1242_v15  ;;  %v1534_v35 = vsel %vm849_vm1, %v1532_v61, %v1533_v58  ;;  %v1250_v13 = vrot.slane %v1106_v8, 1  ;;  %v1257_v62 = vrot.slane %v1112_v18, 1  ;;  %v1399_v10 = vld [vmem:[#allocation2 + $0x188] sm:$0xfc]  ;;  %10553 = vmatprep.subr.bf16.mxu1 %v11727_v49  ;;  %v1400_v4 = vld [vmem:[#allocation2 + $0x190] sm:$0x3] }
 0x15a   :  { %4113 = vmatmul.mubr.bf16.gmra.mrb[68].mxu1 %v1620_v40  ;;  %v1337_v27 = vpack.c.bf16 %v1249_v53, %v1243_v20  ;;  %v1529_v40 = vrot.slane %v1387_v1, 2  ;;  %v1261_v29 = vsel %vm560_vm0, %v1259_v37, %v1260_v41  ;;  %v1542_v20 = vrot.slane %v1397_v19, 2  ;;  %v11728_v53 = vld [vmem:[#allocation9 + $0x390] sm:$0xff]   ;;  %v1115_v55 = vld [vmem:[#allocation2 + $0x1a8] sm:$0xfe] }
 0x15b   :  { %10492 = vmatpush3.bf16.msra.mxu0 %v11718_v26  ;;  %4120 = vmatprep.mubr.bf16.mxu1 %v1623_v11  ;;  %v1239_v26 = vrot.slane %v1100_v46, 1  ;;  %v1252_v15 = vsel %vm560_vm0, %v1250_v13, %v1251_v17  ;;  %v1258_v0 = vsel %vm560_vm0, %v1256_v39, %v1257_v62  ;;  %v1401_v46 = vld [vmem:[#allocation2 + $0x198] sm:$0x3]  ;;  %v1547_v21 = vrot.slane %v1399_v10, 2  ;;  %v1119_v48 = vld [vmem:[#allocation2 + $0x1c8] sm:$0xfe] }
 0x15c   :  { %10493 = vmatprep.subr.bf16.mxu0 %v11719_v16  ;;  %v1531_v57 = vsel %vm849_vm1, %v1529_v40, %v1530_v56  ;;  %v1107_v16 = vld [vmem:[#allocation2 + $0x168] sm:$0xfe]  ;;  %10554 = vmatpush3.bf16.msra.mxu1 %v11728_v53  ;;  %v11729_v40 = vld [vmem:[#allocation9 + $0x3d8] sm:$0xff]   ;;  %v1545_v47 = vrot.slane %v1400_v4, 2  ;;  %v1118_v58 = vld [vmem:[#allocation2 + $0x1c0] sm:$0xfe] }
 0x15d   :  { %v1240_v28 = vsel %vm560_vm0, %v1238_v25, %v1239_v26  ;;  %v1625_v63 = vpack.c.bf16 %v1537_v60, %v1531_v57  ;;  %v1253_v44 = vrot.slane %v1107_v16, 1  ;;  %v1338_v25 = vpack.c.bf16 %v1258_v0, %v1252_v15  ;;  %10555 = vmatprep.subr.bf16.mxu1 %v11729_v40  ;;  %v1117_v57 = vld [vmem:[#allocation2 + $0x1b8] sm:$0x1]  ;;  %v1403_v41 = vld [vmem:[#allocation2 + $0x1a8] sm:$0xfc]  ;;  %v11733_v17 = vld [vmem:[#allocation9 + $0x3e0] sm:$0xff]  }
 0x15e   :  { %4024 = vmatmul.mubr.bf16.gmra.mrb[72].mxu0 %v1334_v14  ;;  %v1336_v51 = vpack.c.bf16 %v1246_v34, %v1240_v28  ;;  %v1109_v14 = vld [vmem:[#allocation2 + $0x178] sm:$0x1]  ;;  %v1548_v26 = vrot.slane %v1401_v46, 2  ;;  %v1398_v28 = vld [vmem:[#allocation2 + $0x180] sm:$0xfc]  ;;  %v1265_v60 = vrot.slane %v1115_v55, 1 }
 0x15f   :  { %10494 = vmatpush3.bf16.msra.mxu0 %v11720_v5  ;;  %4031 = vmatprep.mubr.bf16.mxu0 %v1337_v27  ;;  %v1528_v5 = vsel %vm849_vm1, %v1526_v30, %v1527_v38  ;;  %v1254_v52 = vrot.slane %v1109_v14, 1  ;;  %v1396_v27 = vld [vmem:[#allocation2 + $0x170] sm:$0x3]  ;;  %v1544_v32 = vrot.slane %v1398_v28, 2  ;;  %v1121_v59 = vld [vmem:[#allocation2 + $0x1d8] sm:$0x1] }
 0x160   :  { %10495 = vmatprep.subr.bf16.mxu0 %v11725_v50  ;;  %v1624_v9 = vpack.c.bf16 %v1534_v35, %v1528_v5  ;;  %v1549_v1 = vsel %vm849_vm1, %v1547_v21, %v1548_v26  ;;  %v1539_v34 = vrot.slane %v1396_v27, 2  ;;  %v1266_v6 = vrot.slane %v1117_v57, 1  ;;  %10556 = vmatpush3.bf16.msra.mxu1 %v11730_v31  ;;  %v1114_v50 = vld [vmem:[#allocation2 + $0x1a0] sm:$0xfe]  ;;  %v1120_v14 = vld [vmem:[#allocation2 + $0x1d0] sm:$0x1] }
 0x161   :  { %v1255_v11 = vsel %vm560_vm0, %v1253_v44, %v1254_v52  ;;  %v1546_v2 = vsel %vm849_vm1, %v1544_v32, %v1545_v47  ;;  %v1271_v30 = vrot.slane %v1119_v48, 1  ;;  %v1272_v38 = vrot.slane %v1121_v59, 1  ;;  %v11732_v35 = vld [vmem:[#allocation9 + $0x330] sm:$0xff]   ;;  %v1405_v8 = vld [vmem:[#allocation2 + $0x1b8] sm:$0x3]  ;;  %v11734_v62 = vld [vmem:[#allocation9 + $0x3a0] sm:$0xff]   ;;  %10557 = vmatprep.subr.bf16.mxu1 %v11733_v17 }
 0x162   :  { %4121 = vmatmul.mubr.bf16.gmra.mrb[72].mxu1 %v1622_v42  ;;  %v1339_v3 = vpack.c.bf16 %v1261_v29, %v1255_v11  ;;  %v1541_v42 = vrot.slane %v1395_v36, 2  ;;  %v1267_v61 = vsel %vm560_vm0, %v1265_v60, %v1266_v6  ;;  %v1268_v7 = vrot.slane %v1118_v58, 1  ;;  %v1407_v54 = vld [vmem:[#allocation2 + $0x1c8] sm:$0xfc]  ;;  %v1409_v11 = vld [vmem:[#allocation2 + $0x1d8] sm:$0x3] }
 0x163   :  { %4128 = vmatprep.mubr.bf16.mxu1 %v1625_v63  ;;  %10496 = vmatpush3.bf16.msra.mxu0 %v11726_v24  ;;  %v1116_v63 = vld [vmem:[#allocation2 + $0x1b0] sm:$0x1]  ;;  %v1273_v16 = vsel %vm560_vm0, %v1271_v30, %v1272_v38  ;;  %v1262_v24 = vrot.slane %v1114_v50, 1  ;;  %v1269_v52 = vrot.slane %v1120_v14, 1  ;;  %v1553_v12 = vrot.slane %v1403_v41, 2  ;;  %v11735_v21 = vld [vmem:[#allocation9 + $0x3e8] sm:$0xff]  }
 0x164   :  { %v1543_v43 = vsel %vm849_vm1, %v1541_v42, %v1542_v20  ;;  %v1263_v5 = vrot.slane %v1116_v63, 1  ;;  %v1341_v44 = vpack.c.bf16 %v1273_v16, %v1267_v61  ;;  %10497 = vmatprep.subr.bf16.mxu0 %v11731_v22  ;;  %v1554_v18 = vrot.slane %v1405_v8, 2  ;;  %v1402_v15 = vld [vmem:[#allocation2 + $0x1a0] sm:$0xfc]  ;;  %v1404_v36 = vld [vmem:[#allocation2 + $0x1b0] sm:$0x3]  ;;  %10558 = vmatpush3.bf16.msra.mxu1 %v11734_v62 }
 0x165   :  { %v1627_v56 = vpack.c.bf16 %v1549_v1, %v1543_v43  ;;  %v1559_v13 = vrot.slane %v1407_v54, 2  ;;  %v1560_v39 = vrot.slane %v1409_v11, 2  ;;  %v1406_v19 = vld [vmem:[#allocation2 + $0x1c0] sm:$0xfc]  ;;  %v1408_v0 = vld [vmem:[#allocation2 + $0x1d0] sm:$0x3]  ;;  %10559 = vmatprep.subr.bf16.mxu1 %v11735_v21 }
 0x166   :  { %4032 = vmatmul.mubr.bf16.gmra.mrb[76].mxu0 %v1336_v51  ;;  %v1540_v51 = vsel %vm849_vm1, %v1538_v33, %v1539_v34  ;;  %v1264_v37 = vsel %vm560_vm0, %v1262_v24, %v1263_v5  ;;  %v1550_v46 = vrot.slane %v1402_v15, 2  ;;  %v1551_v42 = vrot.slane %v1404_v36, 2  ;;  %v11736_v26 = vld [vmem:[#allocation9 + $0x3a8] sm:$0xff]   ;;  %v1125_v27 = vld [vmem:[#allocation2 + $0x1f8] sm:$0x1] }
 0x167   :  { %4039 = vmatprep.mubr.bf16.mxu0 %v1339_v3  ;;  %v1626_v45 = vpack.c.bf16 %v1546_v2, %v1540_v51  ;;  %10498 = vmatpush3.bf16.msra.mxu0 %v11732_v35  ;;  %v1555_v3 = vsel %vm849_vm1, %v1553_v12, %v1554_v18  ;;  %v1561_v10 = vsel %vm849_vm1, %v1559_v13, %v1560_v39  ;;  %v1556_v20 = vrot.slane %v1406_v19, 2  ;;  %v1127_v1 = vld [vmem:[#allocation2 + $0x208] sm:$0xfe]  ;;  %v1129_v4 = vld [vmem:[#allocation2 + $0x218] sm:$0x1] }
 0x168   :  { %v1629_v49 = vpack.c.bf16 %v1561_v10, %v1555_v3  ;;  %v1552_v53 = vsel %vm849_vm1, %v1550_v46, %v1551_v42  ;;  %v1277_v33 = vrot.slane %v1123_v23, 1  ;;  %v1278_v34 = vrot.slane %v1125_v27, 1  ;;  %10560 = vmatpush3.bf16.msra.mxu1 %v11736_v26  ;;  %v1122_v47 = vld [vmem:[#allocation2 + $0x1e0] sm:$0xfe]  ;;  %v1124_v31 = vld [vmem:[#allocation2 + $0x1f0] sm:$0x1] }
 0x169   :  { %v1283_v32 = vrot.slane %v1127_v1, 1  ;;  %v1284_v40 = vrot.slane %v1129_v4, 1  ;;  %v1126_v51 = vld [vmem:[#allocation2 + $0x200] sm:$0xfe]  ;;  %v1128_v55 = vld [vmem:[#allocation2 + $0x210] sm:$0x1] }
 0x16a   :  { %4129 = vmatmul.mubr.bf16.gmra.mrb[76].mxu1 %v1624_v9  ;;  %v1270_v9 = vsel %vm560_vm0, %v1268_v7, %v1269_v52  ;;  %v1274_v57 = vrot.slane %v1122_v47, 1  ;;  %v1280_v48 = vrot.slane %v1126_v51, 1  ;;  %v11737_v59 = vld [vmem:[#allocation9 + $0x378] sm:$0xff]   ;;  %v1281_v6 = vrot.slane %v1128_v55, 1  ;;  %v1411_v61 = vld [vmem:[#allocation2 + $0x1e8] sm:$0xfc] }
 0x16b   :  { %4136 = vmatprep.mubr.bf16.mxu1 %v1627_v56  ;;  %v1340_v29 = vpack.c.bf16 %v1270_v9, %v1264_v37  ;;  %v1279_v56 = vsel %vm560_vm0, %v1277_v33, %v1278_v34  ;;  %v1285_v2 = vsel %vm560_vm0, %v1283_v32, %v1284_v40  ;;  %v11738_v30 = vld [vmem:[#allocation9 + $0x338] sm:$0xff]   ;;  %v1415_v63 = vld [vmem:[#allocation2 + $0x208] sm:$0xfc]  ;;  %10499 = vmatprep.subr.bf16.mxu0 %v11737_v59  ;;  %v1565_v14 = vrot.slane %v1411_v61, 2  ;;  %v11739_v7 = vld [vmem:[#allocation9 + $0x3f0] sm:$0xff]  }
 0x16c   :  { %v1343_v60 = vpack.c.bf16 %v1285_v2, %v1279_v56  ;;  %v1413_v50 = vld [vmem:[#allocation2 + $0x1f8] sm:$0x3]  ;;  %v1282_v58 = vsel %vm560_vm0, %v1280_v48, %v1281_v6  ;;  %v1571_v5 = vrot.slane %v1415_v63, 2  ;;  %10500 = vmatpush3.bf16.msra.mxu0 %v11738_v30  ;;  %v11740_v52 = vld [vmem:[#allocation9 + $0x3b0] sm:$0xff]   ;;  %v1410_v37 = vld [vmem:[#allocation2 + $0x1e0] sm:$0xfc]  ;;  %10561 = vmatprep.subr.bf16.mxu1 %v11739_v7 }
 0x16d   :  { %v1417_v16 = vld [vmem:[#allocation2 + $0x218] sm:$0x3]  ;;  %v1566_v24 = vrot.slane %v1413_v50, 2  ;;  %v1412_v41 = vld [vmem:[#allocation2 + $0x1f0] sm:$0x3]  ;;  %v1562_v11 = vrot.slane %v1410_v37, 2  ;;  %10562 = vmatpush3.bf16.msra.mxu1 %v11740_v52 }
 0x16e   :  { %4040 = vmatmul.mubr.bf16.gmra.mrb[80].mxu0 %v1338_v25  ;;  %v1557_v25 = vrot.slane %v1408_v0, 2  ;;  %v1414_v8 = vld [vmem:[#allocation2 + $0x200] sm:$0xfc]  ;;  %v1416_v9 = vld [vmem:[#allocation2 + $0x210] sm:$0x3]  ;;  %v1563_v12 = vrot.slane %v1412_v41, 2 }
 0x16f   :  { %4047 = vmatprep.mubr.bf16.mxu0 %v1341_v44  ;;  %v1572_v44 = vrot.slane %v1417_v16, 2  ;;  %v1567_v35 = vsel %vm849_vm1, %v1565_v14, %v1566_v24  ;;  %v1568_v18 = vrot.slane %v1414_v8, 2  ;;  %v11741_v13 = vld [vmem:[#allocation9 + $0x3f8] sm:$0xff]   ;;  %v1131_v3 = vld [vmem:[#allocation2 + $0x228] sm:$0xfe]  ;;  %v1651_v50 = vld [vmem:[#allocation2 + $0x40] sm:$0xff] }
 0x170   :  { %v1558_v43 = vsel %vm849_vm1, %v1556_v20, %v1557_v25  ;;  %v1564_v39 = vsel %vm849_vm1, %v1562_v11, %v1563_v12  ;;  %10563 = vmatprep.subr.bf16.mxu1 %v11741_v13  ;;  %v1133_v15 = vld [vmem:[#allocation2 + $0x238] sm:$0x1]  ;;  %v1135_v19 = vld [vmem:[#allocation2 + $0x248] sm:$0xfe]  ;;  %v1289_v0 = vrot.slane %v1131_v3, 1  ;;  %v11744_v37 = vld [vmem:[#allocation9 + $0x400] sm:$0xff]  }
 0x171   :  { %v1628_v28 = vpack.c.bf16 %v1558_v43, %v1552_v53  ;;  %v1573_v54 = vsel %vm849_vm1, %v1571_v5, %v1572_v44  ;;  %v1137_v10 = vld [vmem:[#allocation2 + $0x258] sm:$0x1]  ;;  %v1290_v46 = vrot.slane %v1133_v15, 1  ;;  %v1652_v42 = vld [vmem:[#allocation2 + $0x48] sm:$0xff]  ;;  %v1295_v20 = vrot.slane %v1135_v19, 1  ;;  %v11743_v5 = vld [vmem:[#allocation9 + $0x440] sm:$0xff]  }
 0x172   :  { %4137 = vmatmul.mubr.bf16.gmra.mrb[80].mxu1 %v1626_v45  ;;  %v1275_v45 = vrot.slane %v1124_v31, 1  ;;  %v1631_v17 = vpack.c.bf16 %v1573_v54, %v1567_v35  ;;  %v1296_v21 = vrot.slane %v1137_v10, 1  ;;  %v1130_v25 = vld [vmem:[#allocation2 + $0x220] sm:$0xfe]  ;;  %v1132_v26 = vld [vmem:[#allocation2 + $0x230] sm:$0x1]  ;;  %10613 = vmatprep.subr.bf16.mxu0 %v11743_v5 }
 0x173   :  { %4144 = vmatprep.mubr.bf16.mxu1 %v1629_v49  ;;  %v1291_v49 = vsel %vm560_vm0, %v1289_v0, %v1290_v46  ;;  %v1134_v53 = vld [vmem:[#allocation2 + $0x240] sm:$0xfe]  ;;  %v1136_v23 = vld [vmem:[#allocation2 + $0x250] sm:$0x1]  ;;  %v1286_v27 = vrot.slane %v1130_v25, 1  ;;  %v1654_v4 = vld [vmem:[#allocation2 + $0x68] sm:$0xff] }
 0x174   :  { %v1276_v38 = vsel %vm560_vm0, %v1274_v57, %v1275_v45  ;;  %v1297_v43 = vsel %vm560_vm0, %v1295_v20, %v1296_v21  ;;  %v1292_v1 = vrot.slane %v1134_v53, 1  ;;  %v1293_v34 = vrot.slane %v1136_v23, 1  ;;  %v11742_v32 = vld [vmem:[#allocation9 + $0x3b8] sm:$0xff]   ;;  %v1419_v56 = vld [vmem:[#allocation2 + $0x228] sm:$0xfc]  ;;  %v1653_v44 = vld [vmem:[#allocation2 + $0x60] sm:$0xff] }
 0x175   :  { %v1342_v22 = vpack.c.bf16 %v1282_v58, %v1276_v38  ;;  %v1345_v33 = vpack.c.bf16 %v1297_v43, %v1291_v49  ;;  %v1421_v47 = vld [vmem:[#allocation2 + $0x238] sm:$0x3]  ;;  %v1423_v31 = vld [vmem:[#allocation2 + $0x248] sm:$0xfc]  ;;  %v1684_v51 = vpack.c.bf16 %v1654_v4, %v1652_v42  ;;  %v1577_v57 = vrot.slane %v1419_v56, 2  ;;  %10564 = vmatpush3.bf16.msra.mxu1 %v11742_v32  ;;  %v1655_v25 = vld [vmem:[#allocation2 + $0x80] sm:$0xff] }
 0x176   :  { %4048 = vmatmul.mubr.bf16.gmra.mrb[84].mxu0 %v1340_v29  ;;  %v1569_v29 = vrot.slane %v1416_v9, 2  ;;  %v1294_v2 = vsel %vm560_vm0, %v1292_v1, %v1293_v34  ;;  %v1425_v55 = vld [vmem:[#allocation2 + $0x258] sm:$0x3]  ;;  %v1578_v45 = vrot.slane %v1421_v47, 2  ;;  %v1583_v48 = vrot.slane %v1423_v31, 2  ;;  %v1656_v21 = vld [vmem:[#allocation2 + $0x88] sm:$0xff] }
 0x177   :  { %4055 = vmatprep.mubr.bf16.mxu0 %v1343_v60  ;;  %v1584_v60 = vrot.slane %v1425_v55, 2  ;;  %v1418_v30 = vld [vmem:[#allocation2 + $0x220] sm:$0xfc]  ;;  %v1420_v38 = vld [vmem:[#allocation2 + $0x230] sm:$0x3]  ;;  %v1683_v8 = vpack.c.bf16 %v1653_v44, %v1651_v50  ;;  %v1658_v49 = vld [vmem:[#allocation2 + $0xa8] sm:$0xff] }
 0x178   :  { %v1570_v62 = vsel %vm849_vm1, %v1568_v18, %v1569_v29  ;;  %v1579_v6 = vsel %vm849_vm1, %v1577_v57, %v1578_v45  ;;  %v1422_v61 = vld [vmem:[#allocation2 + $0x240] sm:$0xfc]  ;;  %v1424_v58 = vld [vmem:[#allocation2 + $0x250] sm:$0x3]  ;;  %v1574_v16 = vrot.slane %v1418_v30, 2  ;;  %v1575_v14 = vrot.slane %v1420_v38, 2 }
 0x179   :  { %v1630_v36 = vpack.c.bf16 %v1570_v62, %v1564_v39  ;;  %v1585_v63 = vsel %vm849_vm1, %v1583_v48, %v1584_v60  ;;  %v1580_v24 = vrot.slane %v1422_v61, 2  ;;  %v1716_v54 = vld [vmem:[#allocation2 + $0x48] sm:$0xfe]  ;;  %v1718_v9 = vld [vmem:[#allocation2 + $0x58] sm:$0x1]  ;;  %v1686_v43 = vpack.c.bf16 %v1658_v49, %v1656_v21  ;;  %v1657_v23 = vld [vmem:[#allocation2 + $0xa0] sm:$0xff] }
 0x17a   :  { %4145 = vmatmul.mubr.bf16.gmra.mrb[84].mxu1 %v1628_v28  ;;  %v1287_v28 = vrot.slane %v1132_v26, 1  ;;  %v1633_v7 = vpack.c.bf16 %v1585_v63, %v1579_v6  ;;  %v1576_v52 = vsel %vm849_vm1, %v1574_v16, %v1575_v14  ;;  %v1720_v11 = vld [vmem:[#allocation2 + $0x68] sm:$0xfe]  ;;  %v1722_v12 = vld [vmem:[#allocation2 + $0x78] sm:$0x1]  ;;  %v1846_v18 = vrot.slane %v1716_v54, 1 }
 0x17b   :  { %4152 = vmatprep.mubr.bf16.mxu1 %v1631_v17  ;;  %v1847_v13 = vrot.slane %v1718_v9, 1  ;;  %v1852_v17 = vrot.slane %v1720_v11, 1  ;;  %v1853_v29 = vrot.slane %v1722_v12, 1  ;;  %v1715_v39 = vld [vmem:[#allocation2 + $0x40] sm:$0xfe]  ;;  %v1685_v1 = vpack.c.bf16 %v1657_v23, %v1655_v25  ;;  %v11745_v4 = vld [vmem:[#allocation9 + $0x448] sm:$0xff]  }
 0x17c   :  { %v1288_v40 = vsel %vm560_vm0, %v1286_v27, %v1287_v28  ;;  %v1717_v62 = vld [vmem:[#allocation2 + $0x50] sm:$0x1]  ;;  %v1843_v10 = vrot.slane %v1715_v39, 1  ;;  %v1726_v34 = vld [vmem:[#allocation2 + $0x98] sm:$0x1]  ;;  %v11746_v48 = vld [vmem:[#allocation9 + $0x408] sm:$0xff]  }
 0x17d   :  { %v1344_v59 = vpack.c.bf16 %v1294_v2, %v1288_v40  ;;  %v1848_v3 = vsel %vm560_vm0, %v1846_v18, %v1847_v13  ;;  %v1854_v15 = vsel %vm560_vm0, %v1852_v17, %v1853_v29  ;;  %v1721_v19 = vld [vmem:[#allocation2 + $0x70] sm:$0x1]  ;;  %v1844_v0 = vrot.slane %v1717_v62, 1  ;;  %v1728_v56 = vld [vmem:[#allocation2 + $0xa8] sm:$0xfe] }
 0x17e   :  { %4056 = vmatmul.mubr.bf16.gmra.mrb[88].mxu0 %v1342_v22  ;;  %v1581_v22 = vrot.slane %v1424_v58, 2  ;;  %v1972_v46 = vpack.c.bf16 %v1854_v15, %v1848_v3  ;;  %v1850_v20 = vrot.slane %v1721_v19, 1  ;;  %v1730_v47 = vld [vmem:[#allocation2 + $0xb8] sm:$0x1]  ;;  %v1864_v55 = vrot.slane %v1728_v56, 1  ;;  %v1660_v5 = vld [vmem:[#allocation2 + $0xc8] sm:$0xff] }
 0x17f   :  { %4063 = vmatprep.mubr.bf16.mxu0 %v1345_v33  ;;  %v1845_v53 = vsel %vm560_vm0, %v1843_v10, %v1844_v0  ;;  %v1724_v33 = vld [vmem:[#allocation2 + $0x88] sm:$0xfe]  ;;  %v1865_v57 = vrot.slane %v1730_v47, 1  ;;  %v1725_v60 = vld [vmem:[#allocation2 + $0x90] sm:$0x1]  ;;  %v11749_v56 = vld [vmem:[#allocation9 + $0x458] sm:$0xff]  }
 0x180   :  { %v1582_v35 = vsel %vm849_vm1, %v1580_v24, %v1581_v22  ;;  %v1858_v31 = vrot.slane %v1724_v33, 1  ;;  %v1727_v38 = vld [vmem:[#allocation2 + $0xa0] sm:$0xfe]  ;;  %v1729_v61 = vld [vmem:[#allocation2 + $0xb0] sm:$0x1]  ;;  %v1856_v63 = vrot.slane %v1725_v60, 1 }
 0x181   :  { %v1632_v41 = vpack.c.bf16 %v1582_v35, %v1576_v52  ;;  %v1866_v30 = vsel %vm560_vm0, %v1864_v55, %v1865_v57  ;;  %v1861_v14 = vrot.slane %v1727_v38, 1  ;;  %v1862_v24 = vrot.slane %v1729_v61, 1  ;;  %v1659_v22 = vld [vmem:[#allocation2 + $0xc0] sm:$0xff]  ;;  %v11747_v9 = vld [vmem:[#allocation9 + $0x450] sm:$0xff]   ;;  %v1732_v11 = vld [vmem:[#allocation2 + $0xc8] sm:$0xfe] }
 0x182   :  { %4153 = vmatmul.mubr.bf16.gmra.mrb[88].mxu1 %v1630_v36  ;;  %v1719_v36 = vld [vmem:[#allocation2 + $0x60] sm:$0xfe]  ;;  %v1734_v12 = vld [vmem:[#allocation2 + $0xd8] sm:$0x1]  ;;  %v1736_v17 = vld [vmem:[#allocation2 + $0xe8] sm:$0xfe] }
 0x183   :  { %4160 = vmatprep.mubr.bf16.mxu1 %v1633_v7  ;;  %v1849_v42 = vrot.slane %v1719_v36, 1  ;;  %v1662_v7 = vld [vmem:[#allocation2 + $0xe8] sm:$0xff]  ;;  %v1863_v54 = vsel %vm560_vm0, %v1861_v14, %v1862_v24  ;;  %v1738_v29 = vld [vmem:[#allocation2 + $0xf8] sm:$0x1]  ;;  %v1870_v39 = vrot.slane %v1732_v11, 1  ;;  %v1871_v62 = vrot.slane %v1734_v12, 1 }
 0x184   :  { %v1688_v35 = vpack.c.bf16 %v1662_v7, %v1660_v5  ;;  %v1876_v36 = vrot.slane %v1736_v17, 1  ;;  %v1877_v19 = vrot.slane %v1738_v29, 1  ;;  %v11748_v0 = vld [vmem:[#allocation9 + $0x410] sm:$0xff]   ;;  %v1735_v49 = vld [vmem:[#allocation2 + $0xe0] sm:$0xfe] }
 0x185   :  { %v1851_v28 = vsel %vm560_vm0, %v1849_v42, %v1850_v20  ;;  %v1872_v10 = vsel %vm560_vm0, %v1870_v39, %v1871_v62  ;;  %v1733_v42 = vld [vmem:[#allocation2 + $0xd0] sm:$0x1]  ;;  %v1740_v47 = vld [vmem:[#allocation2 + $0x108] sm:$0xfe]  ;;  %v1746_v57 = vld [vmem:[#allocation2 + $0x138] sm:$0x1] }
 0x186   :  { %4064 = vmatmul.mubr.bf16.gmra.mrb[92].mxu0 %v1344_v59  ;;  %v1971_v40 = vpack.c.bf16 %v1851_v28, %v1845_v53  ;;  %v1723_v59 = vld [vmem:[#allocation2 + $0x80] sm:$0xfe]  ;;  %v1878_v21 = vsel %vm560_vm0, %v1876_v36, %v1877_v19  ;;  %v1737_v25 = vld [vmem:[#allocation2 + $0xf0] sm:$0x1]  ;;  %v1868_v53 = vrot.slane %v1733_v42, 1 }
 0x187   :  { %4201 = vmatprep.mubr.bf16.mxu0 %v1684_v51  ;;  %v1859_v51 = vrot.slane %v1726_v34, 1  ;;  %v1855_v50 = vrot.slane %v1723_v59, 1  ;;  %v1976_v23 = vpack.c.bf16 %v1878_v21, %v1872_v10  ;;  %v1874_v28 = vrot.slane %v1737_v25, 1  ;;  %v1744_v55 = vld [vmem:[#allocation2 + $0x128] sm:$0xfe]  ;;  %v1667_v62 = vld [vmem:[#allocation2 + $0x180] sm:$0xff] }
 0x188   :  { %v1888_v60 = vrot.slane %v1744_v55, 1  ;;  %v1739_v38 = vld [vmem:[#allocation2 + $0x100] sm:$0xfe]  ;;  %v1745_v14 = vld [vmem:[#allocation2 + $0x130] sm:$0x1] }
 0x189   :  { %v1860_v45 = vsel %vm560_vm0, %v1858_v31, %v1859_v51  ;;  %v1857_v52 = vsel %vm560_vm0, %v1855_v50, %v1856_v63  ;;  %v1879_v5 = vrot.slane %v1739_v38, 1  ;;  %v11751_v10 = vld [vmem:[#allocation9 + $0x460] sm:$0xff]   ;;  %v1752_v21 = vld [vmem:[#allocation2 + $0x1a8] sm:$0xfe] }
 0x18a   :  { %4161 = vmatmul.mubr.bf16.gmra.mrb[92].mxu1 %v1632_v41  ;;  %v1974_v16 = vpack.c.bf16 %v1866_v30, %v1860_v45  ;;  %v1973_v13 = vpack.c.bf16 %v1863_v54, %v1857_v52  ;;  %v1889_v30 = vrot.slane %v1746_v57, 1 }
 0x18b   :  { %4298 = vmatprep.mubr.bf16.mxu1 %v1972_v46  ;;  %v1731_v46 = vld [vmem:[#allocation2 + $0xc0] sm:$0xfe] }
 0x18c   :  { %v1890_v24 = vsel %vm560_vm0, %v1888_v60, %v1889_v30  ;;  %v1674_v30 = vld [vmem:[#allocation2 + $0x1e8] sm:$0xff] }
 0x18e   :  { %4202 = vmatmul.mubr.bf16.vlgmr.msra.gmra.mrb[96].mxu0 %v1683_v8 }
 0x18f   :  { %10614 = vmatpush3.bf16.msra.mxu0 %v11744_v37  ;;  %4209 = vmatprep.mubr.bf16.mxu0 %v1686_v43  ;;  %v1661_v37 = vld [vmem:[#allocation2 + $0xe0] sm:$0xff] }
 0x190   :  { %10615 = vmatprep.subr.bf16.mxu0 %v11745_v4  ;;  %v1687_v15 = vpack.c.bf16 %v1661_v37, %v1659_v22  ;;  %v1663_v4 = vld [vmem:[#allocation2 + $0x100] sm:$0xff] }
 0x192   :  { %4299 = vmatmul.mubr.bf16.vlgmr.msra.gmra.mrb[96].mxu1 %v1971_v40 }
 0x193   :  { %10616 = vmatpush3.bf16.msra.mxu0 %v11746_v48  ;;  %4306 = vmatprep.mubr.bf16.mxu1 %v1974_v16  ;;  %v1882_v48 = vrot.slane %v1740_v47, 1  ;;  %v1743_v16 = vld [vmem:[#allocation2 + $0x120] sm:$0xfe] }
 0x194   :  { %10617 = vmatprep.subr.bf16.mxu0 %v11747_v9  ;;  %v1885_v22 = vrot.slane %v1743_v16, 1  ;;  %v1671_v16 = vld [vmem:[#allocation2 + $0x1c0] sm:$0xff] }
 0x196   :  { %4210 = vmatmul.mubr.bf16.gmra.mrb[100].mxu0 %v1685_v1  ;;  %v1664_v1 = vld [vmem:[#allocation2 + $0x108] sm:$0xff] }
 0x197   :  { %4217 = vmatprep.mubr.bf16.mxu0 %v1688_v35  ;;  %10618 = vmatpush3.bf16.msra.mxu0 %v11748_v0  ;;  %v1668_v35 = vld [vmem:[#allocation2 + $0x188] sm:$0xff] }
 0x198   :  { %10619 = vmatprep.subr.bf16.mxu0 %v11749_v56  ;;  %v1748_v0 = vld [vmem:[#allocation2 + $0x188] sm:$0xfe] }
 0x199   :  { %v1894_v25 = vrot.slane %v1748_v0, 1  ;;  %v1755_v0 = vld [vmem:[#allocation2 + $0x1c0] sm:$0xfe] }
 0x19a   :  { %4307 = vmatmul.mubr.bf16.gmra.mrb[100].mxu1 %v1973_v13 }
 0x19b   :  { %4314 = vmatprep.mubr.bf16.mxu1 %v1976_v23 }
 0x19c   :  { %v10117_v26 = vpop.f32.mrb[0].mxu0 }
 0x19d   :  { %v10118_v32 = vpop.f32.mrb[1].mxu0 }
 0x19e   :  { %v10119_v2 = vadd.f32 %v10118_v32, %v10117_v26  ;;  %v10120_v44 = vpop.f32.mrb[2].mxu0  ;;  %v1867_v26 = vrot.slane %v1731_v46, 1  ;;  %4218 = vmatmul.mubr.bf16.gmra.mrb[104].mxu0 %v1687_v15  ;;  %v12781_v32 = vld [vmem:[#allocation2 + $0x8] sm:$0xff]  ;;  %v1750_v46 = vld [vmem:[#allocation2 + $0x198] sm:$0x1] }
 0x19f   :  { %v10121_v18 = vpop.f32.mrb[3].mxu0  ;;  %v1690_v40 = vpack.c.bf16 %v12781_v32, %v1664_v1  ;;  %v1689_v50 = vpack.c.bf16 %v12781_v32, %v1663_v4  ;;  %v11752_v1 = vld [vmem:[#allocation9 + $0x420] sm:$0xff]  }
 0x1a0   :  { %v10181_v27 = vpop.f32.mrb[0].mxu1  ;;  %v10122_v3 = vadd.f32 %v10121_v18, %v10120_v44  ;;  %v1869_v33 = vsel %vm560_vm0, %v1867_v26, %v1868_v53  ;;  %v1670_v18 = vld [vmem:[#allocation2 + $0x1a8] sm:$0xff]  ;;  %v1895_v26 = vrot.slane %v1750_v46, 1  ;;  %v1747_v4 = vld [vmem:[#allocation2 + $0x180] sm:$0xfe] }
 0x1a1   :  { %v10182_v6 = vpop.f32.mrb[1].mxu1  ;;  %4225 = vmatprep.mubr.bf16.mxu0 %v1690_v40  ;;  %v1692_v39 = vpack.c.bf16 %v1670_v18, %v1668_v35  ;;  %v1757_v46 = vld [vmem:[#allocation2 + $0x1d0] sm:$0x1] }
 0x1a2   :  { %v10183_v58 = vadd.f32 %v10182_v6, %v10181_v27  ;;  %v10184_v8 = vpop.f32.mrb[2].mxu1  ;;  %v1873_v27 = vrot.slane %v1735_v49, 1  ;;  %v11750_v6 = vld [vmem:[#allocation9 + $0x418] sm:$0xff]  }
 0x1a3   :  { %v10185_v20 = vpop.f32.mrb[3].mxu1  ;;  %10620 = vmatpush3.bf16.msra.mxu0 %v11750_v6  ;;  %v1754_v49 = vld [vmem:[#allocation2 + $0x1b8] sm:$0x1]  ;;  %v1672_v6 = vld [vmem:[#allocation2 + $0x1c8] sm:$0xff] }
 0x1a4   :  { %v12773_v41 = vadd.f32 %v10183_v58, %v10119_v2  ;;  %v10186_v43 = vadd.f32 %v10185_v20, %v10184_v8  ;;  %v10123_v31 = vpop.f32.mrb[4].mxu0  ;;  %v1875_v51 = vsel %vm560_vm0, %v1873_v27, %v1874_v28  ;;  %v1742_v2 = vld [vmem:[#allocation2 + $0x118] sm:$0x1]  ;;  %v1741_v58 = vld [vmem:[#allocation2 + $0x110] sm:$0x1]  ;;  %v1886_v8 = vrot.slane %v1745_v14, 1  ;;  %10621 = vmatprep.subr.bf16.mxu0 %v11751_v10 }
 0x1a5   :  { %v1975_v45 = vpack.c.bf16 %v1875_v51, %v1869_v33  ;;  %v1883_v59 = vrot.slane %v1742_v2, 1  ;;  %v1880_v7 = vrot.slane %v1741_v58, 1  ;;  %v10124_v44 = vpop.f32.mrb[5].mxu0  ;;  %v1901_v23 = vrot.slane %v1754_v49, 1  ;;  %v1749_v33 = vld [vmem:[#allocation2 + $0x190] sm:$0x1] }
 0x1a6   :  { %v12779_v34 = vadd.f32 %v10186_v43, %v10122_v3  ;;  %v10125_v54 = vadd.f32 %v10124_v44, %v10123_v31  ;;  %v10126_v11 = vpop.f32.mrb[6].mxu0  ;;  %v1669_v3 = vld [vmem:[#allocation2 + $0x1a0] sm:$0xff]  ;;  %4226 = vmatmul.mubr.bf16.gmra.mrb[108].mxu0 %v1689_v50  ;;  %v1887_v15 = vsel %vm560_vm0, %v1885_v22, %v1886_v8  ;;  %v1900_v43 = vrot.slane %v1752_v21, 1  ;;  %v1753_v51 = vld [vmem:[#allocation2 + $0x1b0] sm:$0x1]  ;;  %v11753_v44 = vld [vmem:[#allocation9 + $0x468] sm:$0xff]  }
 0x1a7   :  { %v1884_v63 = vsel %vm560_vm0, %v1882_v48, %v1883_v59  ;;  %4315 = vmatmul.mubr.bf16.gmra.mrb[104].mxu1 %v1975_v45  ;;  %v1881_v13 = vsel %vm560_vm0, %v1879_v5, %v1880_v7  ;;  %v10127_v17 = vpop.f32.mrb[7].mxu0  ;;  %4233 = vmatprep.mubr.bf16.mxu0 %v1692_v39  ;;  %v1896_v28 = vsel %vm560_vm0, %v1894_v25, %v1895_v26  ;;  %v1751_v31 = vld [vmem:[#allocation2 + $0x1a0] sm:$0xfe]  ;;  %v1891_v2 = vrot.slane %v1747_v4, 1  ;;  %v1761_v21 = vld [vmem:[#allocation2 + $0x1f0] sm:$0x1] }
 0x1a8   :  { %v10187_v61 = vpop.f32.mrb[4].mxu1  ;;  %v1978_v37 = vpack.c.bf16 %v1890_v24, %v1884_v63  ;;  %v10128_v19 = vadd.f32 %v10127_v17, %v10126_v11  ;;  %v1977_v53 = vpack.c.bf16 %v1887_v15, %v1881_v13  ;;  %v1691_v56 = vpack.c.bf16 %v1669_v3, %v1667_v62  ;;  %10622 = vmatpush3.bf16.msra.mxu0 %v11752_v1  ;;  %v1673_v14 = vld [vmem:[#allocation2 + $0x1e0] sm:$0xff]  ;;  %v1760_v11 = vld [vmem:[#allocation2 + $0x1e8] sm:$0xfe] }
 0x1a9   :  { %v10188_v52 = vpop.f32.mrb[5].mxu1  ;;  %v1902_v47 = vsel %vm560_vm0, %v1900_v43, %v1901_v23  ;;  %v1892_v55 = vrot.slane %v1749_v33, 1  ;;  %v1897_v45 = vrot.slane %v1751_v31, 1  ;;  %v1898_v48 = vrot.slane %v1753_v51, 1  ;;  %10623 = vmatprep.subr.bf16.mxu0 %v11753_v44  ;;  %v1676_v33 = vld [vmem:[#allocation2 + $0x208] sm:$0xff] }
 0x1aa   :  { %v10189_v9 = vadd.f32 %v10188_v52, %v10187_v61  ;;  %v10190_v12 = vpop.f32.mrb[6].mxu1  ;;  %4322 = vmatprep.mubr.bf16.mxu1 %v1978_v37  ;;  %v1980_v57 = vpack.c.bf16 %v1902_v47, %v1896_v28  ;;  %v1694_v58 = vpack.c.bf16 %v1674_v30, %v1672_v6  ;;  %v11754_v52 = vld [vmem:[#allocation9 + $0x428] sm:$0xff]   ;;  %v1912_v17 = vrot.slane %v1760_v11, 1  ;;  %v11756_v30 = vld [vmem:[#allocation9 + $0x430] sm:$0xff]   ;;  %v1763_v44 = vld [vmem:[#allocation2 + $0x200] sm:$0xfe] }
 0x1ab   :  { %v10191_v29 = vpop.f32.mrb[7].mxu1  ;;  %v1893_v24 = vsel %vm560_vm0, %v1891_v2, %v1892_v55  ;;  %v1899_v5 = vsel %vm560_vm0, %v1897_v45, %v1898_v48  ;;  %v1903_v49 = vrot.slane %v1755_v0, 1  ;;  %v1904_v25 = vrot.slane %v1757_v46, 1  ;;  %v11755_v2 = vld [vmem:[#allocation9 + $0x470] sm:$0xff]   ;;  %v1764_v6 = vld [vmem:[#allocation2 + $0x208] sm:$0xfe] }
 0x1ac   :  { %v12790_v36 = vadd.f32 %v10189_v9, %v10125_v54  ;;  %v10129_v42 = vpop.f32.mrb[8].mxu0  ;;  %v10192_v20 = vadd.f32 %v10191_v29, %v10190_v12  ;;  %v1756_v54 = vld [vmem:[#allocation2 + $0x1c8] sm:$0xfe]  ;;  %v1758_v9 = vld [vmem:[#allocation2 + $0x1d8] sm:$0x1]  ;;  %v1979_v39 = vpack.c.bf16 %v1899_v5, %v1893_v24  ;;  %10624 = vmatpush3.bf16.msra.mxu0 %v11754_v52  ;;  %v1910_v23 = vrot.slane %v1761_v21, 1 }
 0x1ad   :  { %v10130_v59 = vpop.f32.mrb[9].mxu0  ;;  %v1762_v12 = vld [vmem:[#allocation2 + $0x1f8] sm:$0x1]  ;;  %v1906_v18 = vrot.slane %v1756_v54, 1  ;;  %v1907_v13 = vrot.slane %v1758_v9, 1  ;;  %v1905_v55 = vsel %vm560_vm0, %v1903_v49, %v1904_v25  ;;  %10625 = vmatprep.subr.bf16.mxu0 %v11755_v2  ;;  %v1915_v11 = vrot.slane %v1763_v44, 1 }
 0x1ae   :  { %v12792_v27 = vadd.f32 %v10192_v20, %v10128_v19  ;;  %v10131_v38 = vadd.f32 %v10130_v59, %v10129_v42  ;;  %v10132_v50 = vpop.f32.mrb[10].mxu0  ;;  %4234 = vmatmul.mubr.bf16.gmra.mrb[112].mxu0 %v1691_v56  ;;  %v1913_v3 = vrot.slane %v1762_v12, 1  ;;  %v1693_v19 = vpack.c.bf16 %v1673_v14, %v1671_v16  ;;  %v1759_v42 = vld [vmem:[#allocation2 + $0x1e0] sm:$0xfe]  ;;  %v1765_v52 = vld [vmem:[#allocation2 + $0x210] sm:$0x1] }
 0x1af   :  { %4323 = vmatmul.mubr.bf16.gmra.mrb[108].mxu1 %v1977_v53  ;;  %v10133_v7 = vpop.f32.mrb[11].mxu0  ;;  %4241 = vmatprep.mubr.bf16.mxu0 %v1694_v58  ;;  %v1908_v10 = vsel %vm560_vm0, %v1906_v18, %v1907_v13  ;;  %v1909_v26 = vrot.slane %v1759_v42, 1  ;;  %v1675_v59 = vld [vmem:[#allocation2 + $0x200] sm:$0xff]  ;;  %v1770_v58 = vld [vmem:[#allocation2 + $0x238] sm:$0x1]  ;;  %v1918_v16 = vrot.slane %v1764_v6, 1 }
 0x1b0   :  { %v10193_v40 = vpop.f32.mrb[8].mxu1  ;;  %4330 = vmatprep.mubr.bf16.mxu1 %v1980_v57  ;;  %v10134_v37 = vadd.f32 %v10133_v7, %v10132_v50  ;;  %v1914_v20 = vsel %vm560_vm0, %v1912_v17, %v1913_v3  ;;  %v1766_v50 = vld [vmem:[#allocation2 + $0x218] sm:$0x1]  ;;  %v1925_v5 = vrot.slane %v1770_v58, 1  ;;  %10626 = vmatpush3.bf16.msra.mxu0 %v11756_v30  ;;  %v1767_v54 = vld [vmem:[#allocation2 + $0x220] sm:$0xfe] }
 0x1b1   :  { %v10194_v60 = vpop.f32.mrb[9].mxu1  ;;  %v1982_v43 = vpack.c.bf16 %v1914_v20, %v1908_v10  ;;  %v1911_v57 = vsel %vm560_vm0, %v1909_v26, %v1910_v23  ;;  %v1919_v14 = vrot.slane %v1766_v50, 1  ;;  %v1769_v9 = vld [vmem:[#allocation2 + $0x230] sm:$0x1]  ;;  %v1916_v12 = vrot.slane %v1765_v52, 1  ;;  %v12813_v46 = vld [vmem:[#allocation2 + $0x240] sm:$0xff] }
 0x1b2   :  { %v10195_v61 = vadd.f32 %v10194_v60, %v10193_v40  ;;  %v10196_v63 = vpop.f32.mrb[10].mxu1  ;;  %v1678_v40 = vld [vmem:[#allocation2 + $0x228] sm:$0xff]  ;;  %v1677_v60 = vld [vmem:[#allocation2 + $0x220] sm:$0xff]  ;;  %v1981_v7 = vpack.c.bf16 %v1911_v57, %v1905_v55  ;;  %v1921_v17 = vrot.slane %v1767_v54, 1  ;;  %v11757_v25 = vld [vmem:[#allocation9 + $0x478] sm:$0xff]   ;;  %v1697_v6 = vpack.c.bf16 %v12781_v32, %v12813_v46 }
 0x1b3   :  { %v10197_v22 = vpop.f32.mrb[11].mxu1  ;;  %v1696_v51 = vpack.c.bf16 %v1678_v40, %v1676_v33  ;;  %v1695_v18 = vpack.c.bf16 %v1677_v60, %v1675_v59  ;;  %v1772_v26 = vld [vmem:[#allocation2 + $0x248] sm:$0xfe]  ;;  %10627 = vmatprep.subr.bf16.mxu0 %v11757_v25  ;;  %v1771_v30 = vld [vmem:[#allocation2 + $0x240] sm:$0xfe] }
 0x1b4   :  { %v12798_v35 = vadd.f32 %v10195_v61, %v10131_v38  ;;  %v10198_v8 = vadd.f32 %v10197_v22, %v10196_v63  ;;  %v1768_v63 = vld [vmem:[#allocation2 + $0x228] sm:$0xfe]  ;;  %v1775_v50 = vld [vmem:[#allocation2 + $0x260] sm:$0xfe] }
 0x1b5   :  { %v10135_v29 = vpop.f32.mrb[12].mxu0  ;;  %v1924_v24 = vrot.slane %v1768_v63, 1  ;;  %v1776_v33 = vld [vmem:[#allocation2 + $0x268] sm:$0xfe]  ;;  %v1933_v52 = vrot.slane %v1775_v50, 1 }
 0x1b6   :  { %v12800_v62 = vadd.f32 %v10198_v8, %v10134_v37  ;;  %v10136_v53 = vpop.f32.mrb[13].mxu0  ;;  %4242 = vmatmul.mubr.bf16.gmra.mrb[116].mxu0 %v1693_v19  ;;  %v1920_v37 = vsel %vm560_vm0, %v1918_v16, %v1919_v14  ;;  %v1936_v57 = vrot.slane %v1776_v33, 1  ;;  %v1777_v16 = vld [vmem:[#allocation2 + $0x270] sm:$0x1]  ;;  %v1927_v14 = vrot.slane %v1771_v30, 1 }
 0x1b7   :  { %v10137_v28 = vadd.f32 %v10136_v53, %v10135_v29  ;;  %v10138_v4 = vpop.f32.mrb[14].mxu0  ;;  %4331 = vmatmul.mubr.bf16.gmra.mrb[112].mxu1 %v1979_v39  ;;  %4249 = vmatprep.mubr.bf16.mxu0 %v1696_v51  ;;  %v1926_v8 = vsel %vm560_vm0, %v1924_v24, %v1925_v5  ;;  %v1922_v29 = vrot.slane %v1769_v9, 1  ;;  %v11758_v53 = vld [vmem:[#allocation9 + $0x438] sm:$0xff]   ;;  %v1930_v51 = vrot.slane %v1772_v26, 1  ;;  %v2007_v25 = vld [vmem:[#allocation2 + $0x60] sm:$0xfc] }
 0x1b8   :  { %v10139_v31 = vpop.f32.mrb[15].mxu0  ;;  %4338 = vmatprep.mubr.bf16.mxu1 %v1982_v43  ;;  %v1984_v13 = vpack.c.bf16 %v1926_v8, %v1920_v37  ;;  %v1917_v43 = vsel %vm560_vm0, %v1915_v11, %v1916_v12  ;;  %10628 = vmatpush3.bf16.msra.mxu0 %v11758_v53  ;;  %v1934_v37 = vrot.slane %v1777_v16, 1  ;;  %v2004_v11 = vld [vmem:[#allocation2 + $0x48] sm:$0xfc]  ;;  %v2014_v30 = vld [vmem:[#allocation2 + $0x98] sm:$0x3] }
 0x1b9   :  { %v10140_v45 = vadd.f32 %v10139_v31, %v10138_v4  ;;  %v1923_v23 = vsel %vm560_vm0, %v1921_v17, %v1922_v29  ;;  %v1774_v4 = vld [vmem:[#allocation2 + $0x258] sm:$0x1]  ;;  %v2008_v29 = vld [vmem:[#allocation2 + $0x68] sm:$0xfc] }
 0x1ba   :  { %v10199_v15 = vpop.f32.mrb[12].mxu1  ;;  %v1778_v31 = vld [vmem:[#allocation2 + $0x278] sm:$0x1]  ;;  %v1931_v55 = vrot.slane %v1774_v4, 1  ;;  %v1983_v59 = vpack.c.bf16 %v1923_v23, %v1917_v43  ;;  %v2009_v43 = vld [vmem:[#allocation2 + $0x70] sm:$0x3] }
 0x1bb   :  { %v10200_v1 = vpop.f32.mrb[13].mxu1  ;;  %v2006_v17 = vld [vmem:[#allocation2 + $0x58] sm:$0x3] }
 0x1bc   :  { %v10201_v56 = vadd.f32 %v10200_v1, %v10199_v15  ;;  %v10202_v47 = vpop.f32.mrb[14].mxu1  ;;  %v1680_v15 = vld [vmem:[#allocation2 + $0x248] sm:$0xff]  ;;  %v1932_v63 = vsel %vm560_vm0, %v1930_v51, %v1931_v55 }
 0x1bd   :  { %v10203_v48 = vpop.f32.mrb[15].mxu1  ;;  %v10141_v39 = vpop.f32.mrb[16].mxu0  ;;  %v1698_v0 = vpack.c.bf16 %v12781_v32, %v1680_v15 }
 0x1be   :  { %v12806_v38 = vadd.f32 %v10201_v56, %v10137_v28  ;;  %v10204_v61 = vadd.f32 %v10203_v48, %v10202_v47  ;;  %v10142_v19 = vpop.f32.mrb[17].mxu0  ;;  %4250 = vmatmul.mubr.bf16.gmra.mrb[120].mxu0 %v1695_v18 }
 0x1bf   :  { %4339 = vmatmul.mubr.bf16.gmra.mrb[116].mxu1 %v1981_v7  ;;  %v10143_v42 = vadd.f32 %v10142_v19, %v10141_v39  ;;  %v10144_v21 = vpop.f32.mrb[18].mxu0  ;;  %4257 = vmatprep.mubr.bf16.mxu0 %v1698_v0  ;;  %v1935_v39 = vsel %vm560_vm0, %v1933_v52, %v1934_v37  ;;  %v2010_v19 = vld [vmem:[#allocation2 + $0x78] sm:$0x3]  ;;  %v2003_v0 = vld [vmem:[#allocation2 + $0x40] sm:$0xfc] }
 0x1c0   :  { %v12808_v22 = vadd.f32 %v10204_v61, %v10140_v45  ;;  %4346 = vmatprep.mubr.bf16.mxu1 %v1984_v13  ;;  %v10145_v28 = vpop.f32.mrb[19].mxu0  ;;  %v1937_v45 = vrot.slane %v1778_v31, 1  ;;  %v1773_v61 = vld [vmem:[#allocation2 + $0x250] sm:$0x1]  ;;  %v2141_v53 = vrot.slane %v2010_v19, 2  ;;  %v2131_v23 = vrot.slane %v2003_v0, 2 }
 0x1c1   :  { %v10146_v56 = vadd.f32 %v10145_v28, %v10144_v21  ;;  %v1928_v24 = vrot.slane %v1773_v61, 1  ;;  %v2140_v21 = vrot.slane %v2008_v29, 2  ;;  %v2016_v61 = vld [vmem:[#allocation2 + $0xa8] sm:$0xfc] }
 0x1c2   :  { %v10205_v3 = vpop.f32.mrb[16].mxu1  ;;  %v1938_v58 = vsel %vm560_vm0, %v1936_v57, %v1937_v45 }
 0x1c3   :  { %v10206_v10 = vpop.f32.mrb[17].mxu1  ;;  %v1986_v44 = vpack.c.bf16 %v1938_v58, %v1932_v63  ;;  %v12826_v32 = vsel %vm560_vm0, %v1927_v14, %v1928_v24  ;;  %v2142_v55 = vsel %vm849_vm1, %v2140_v21, %v2141_v53  ;;  %v2018_v14 = vld [vmem:[#allocation2 + $0xb8] sm:$0x3] }
 0x1c4   :  { %v10207_v20 = vadd.f32 %v10206_v10, %v10205_v3  ;;  %v10208_v49 = vpop.f32.mrb[18].mxu1  ;;  %v2134_v10 = vrot.slane %v2004_v11, 2  ;;  %v1985_v4 = vpack.c.bf16 %v1935_v39, %v12826_v32  ;;  %v2152_v32 = vrot.slane %v2016_v61, 2  ;;  %v2021_v61 = vld [vmem:[#allocation2 + $0xd0] sm:$0x3] }
 0x1c5   :  { %v10209_v1 = vpop.f32.mrb[19].mxu1  ;;  %v10147_v2 = vpop.f32.mrb[20].mxu0 }
 0x1c6   :  { %v12817_v40 = vadd.f32 %v10207_v20, %v10143_v42  ;;  %v10210_v47 = vadd.f32 %v10209_v1, %v10208_v49  ;;  %v10148_v5 = vpop.f32.mrb[21].mxu0  ;;  %v2135_v20 = vrot.slane %v2006_v17, 2  ;;  %v2005_v49 = vld [vmem:[#allocation2 + $0x50] sm:$0x3]  ;;  %4258 = vmatmul.mubr.bf16.gmra.mrb[124].mxu0 %v1697_v6 }
 0x1c7   :  { %v10149_v8 = vadd.f32 %v10148_v5, %v10147_v2  ;;  %v10150_v54 = vpop.f32.mrb[22].mxu0  ;;  %4347 = vmatmul.mubr.bf16.gmra.mrb[120].mxu1 %v1983_v59  ;;  %v2132_v28 = vrot.slane %v2005_v49, 2  ;;  %v2012_v2 = vld [vmem:[#allocation2 + $0x88] sm:$0xfc]  ;;  %v2147_v5 = vrot.slane %v2014_v30, 2 }
 0x1c8   :  { %v12819_v60 = vadd.f32 %v10210_v47, %v10146_v56  ;;  %v10151_v18 = vpop.f32.mrb[23].mxu0  ;;  %4354 = vmatprep.mubr.bf16.mxu1 %v1986_v44  ;;  %v2136_v33 = vsel %vm849_vm1, %v2134_v10, %v2135_v20  ;;  %v2137_v56 = vrot.slane %v2007_v25, 2  ;;  %v2138_v47 = vrot.slane %v2009_v43, 2  ;;  %v2020_v49 = vld [vmem:[#allocation2 + $0xc8] sm:$0xfc] }
 0x1c9   :  { %v10152_v3 = vadd.f32 %v10151_v18, %v10150_v54  ;;  %v2133_v57 = vsel %vm849_vm1, %v2131_v23, %v2132_v28  ;;  %v2260_v50 = vpack.c.bf16 %v2142_v55, %v2136_v33  ;;  %v2146_v24 = vrot.slane %v2012_v2, 2  ;;  %v2013_v54 = vld [vmem:[#allocation2 + $0x90] sm:$0x3]  ;;  %v2022_v25 = vld [vmem:[#allocation2 + $0xd8] sm:$0x3] }
 0x1ca   :  { %v10211_v48 = vpop.f32.mrb[20].mxu1  ;;  %v2139_v63 = vsel %vm849_vm1, %v2137_v56, %v2138_v47  ;;  %v2017_v18 = vld [vmem:[#allocation2 + $0xb0] sm:$0x3]  ;;  %v2144_v39 = vrot.slane %v2013_v54, 2  ;;  %v2024_v33 = vld [vmem:[#allocation2 + $0xe8] sm:$0xfc] }
 0x1cb   :  { %v10212_v7 = vpop.f32.mrb[21].mxu1  ;;  %4395 = vmatprep.mubr.bf16.mxu0 %v2260_v50  ;;  %v2148_v11 = vsel %vm849_vm1, %v2146_v24, %v2147_v5  ;;  %v2026_v56 = vld [vmem:[#allocation2 + $0xf8] sm:$0x3]  ;;  %v2158_v2 = vrot.slane %v2020_v49, 2  ;;  %v2159_v55 = vrot.slane %v2022_v25, 2 }
 0x1cc   :  { %v10214_v9 = vpop.f32.mrb[22].mxu1  ;;  %v10213_v12 = vadd.f32 %v10212_v7, %v10211_v48  ;;  %v2259_v7 = vpack.c.bf16 %v2139_v63, %v2133_v57  ;;  %v2019_v57 = vld [vmem:[#allocation2 + $0xc0] sm:$0xfc]  ;;  %v2165_v30 = vrot.slane %v2026_v56, 2 }
 0x1cd   :  { %v10215_v13 = vpop.f32.mrb[23].mxu1  ;;  %v2023_v50 = vld [vmem:[#allocation2 + $0xe0] sm:$0xfc]  ;;  %v2160_v63 = vsel %vm849_vm1, %v2158_v2, %v2159_v55 }
 0x1ce   :  { %v10216_v15 = vadd.f32 %v10215_v13, %v10214_v9  ;;  %v12829_v42 = vadd.f32 %v10213_v12, %v10149_v8  ;;  %v2011_v8 = vld [vmem:[#allocation2 + $0x80] sm:$0xfc]  ;;  %v2153_v12 = vrot.slane %v2018_v14, 2  ;;  %4396 = vmatmul.mubr.bf16.vlgmr.msra.gmra.mrb[128].mxu0 %v2259_v7  ;;  %v2156_v14 = vrot.slane %v2021_v61, 2 }
 0x1cf   :  { %v10153_v46 = vpop.f32.mrb[24].mxu0  ;;  %v2015_v9 = vld [vmem:[#allocation2 + $0xa0] sm:$0xfc]  ;;  %v2143_v13 = vrot.slane %v2011_v8, 2  ;;  %4355 = vmatmul.mubr.bf16.gmra.mrb[124].mxu1 %v1985_v4  ;;  %v2161_v24 = vrot.slane %v2023_v50, 2 }
 0x1d0   :  { %v12831_v26 = vadd.f32 %v10216_v15, %v10152_v3  ;;  %v10154_v31 = vpop.f32.mrb[25].mxu0  ;;  %v2149_v3 = vrot.slane %v2015_v9, 2  ;;  %v2150_v15 = vrot.slane %v2017_v18, 2  ;;  %v2154_v0 = vsel %vm849_vm1, %v2152_v32, %v2153_v12  ;;  %v2036_v50 = vld [vmem:[#allocation2 + $0x188] sm:$0xfc] }
 0x1d1   :  { %v10155_v45 = vadd.f32 %v10154_v31, %v10153_v46  ;;  %v10156_v59 = vpop.f32.mrb[26].mxu0  ;;  %v2262_v53 = vpack.c.bf16 %v2154_v0, %v2148_v11  ;;  %v2145_v43 = vsel %vm849_vm1, %v2143_v13, %v2144_v39  ;;  %v2028_v11 = vld [vmem:[#allocation2 + $0x108] sm:$0xfc]  ;;  %v2030_v13 = vld [vmem:[#allocation2 + $0x118] sm:$0x3] }
 0x1d2   :  { %v10157_v58 = vpop.f32.mrb[27].mxu0  ;;  %v2151_v23 = vsel %vm849_vm1, %v2149_v3, %v2150_v15  ;;  %v2034_v0 = vld [vmem:[#allocation2 + $0x138] sm:$0x3]  ;;  %v2170_v49 = vrot.slane %v2028_v11, 2  ;;  %v2171_v25 = vrot.slane %v2030_v13, 2  ;;  %v2182_v11 = vrot.slane %v2036_v50, 2 }
 0x1d3   :  { %v10217_v1 = vpop.f32.mrb[24].mxu1  ;;  %v10158_v52 = vadd.f32 %v10157_v58, %v10156_v59  ;;  %v2261_v47 = vpack.c.bf16 %v2151_v23, %v2145_v43  ;;  %4403 = vmatprep.mubr.bf16.mxu0 %v2262_v53  ;;  %v2025_v58 = vld [vmem:[#allocation2 + $0xf0] sm:$0x3] }
 0x1d4   :  { %v10218_v51 = vpop.f32.mrb[25].mxu1  ;;  %v2029_v23 = vld [vmem:[#allocation2 + $0x110] sm:$0x3] }
 0x1d5   :  { %v10219_v48 = vadd.f32 %v10218_v51, %v10217_v1  ;;  %v10220_v6 = vpop.f32.mrb[26].mxu1  ;;  %v2168_v55 = vrot.slane %v2029_v23, 2 }
 0x1d6   :  { %v10221_v16 = vpop.f32.mrb[27].mxu1  ;;  %4404 = vmatmul.mubr.bf16.gmra.mrb[132].mxu0 %v2261_v47 }
 0x1d7   :  { %v12838_v44 = vadd.f32 %v10219_v48, %v10155_v45  ;;  %v10222_v37 = vadd.f32 %v10221_v16, %v10220_v6  ;;  %v2164_v6 = vrot.slane %v2024_v33, 2  ;;  %v2155_v16 = vrot.slane %v2019_v57, 2  ;;  %v2031_v33 = vld [vmem:[#allocation2 + $0x120] sm:$0xfc] }
 0x1d8   :  { %v2173_v47 = vrot.slane %v2031_v33, 2 }
 0x1d9   :  { %v10159_v17 = vpop.f32.mrb[28].mxu0  ;;  %v12841_v29 = vadd.f32 %v10222_v37, %v10158_v52  ;;  %v2166_v52 = vsel %vm849_vm1, %v2164_v6, %v2165_v30  ;;  %v2162_v37 = vrot.slane %v2025_v58, 2  ;;  %v2157_v39 = vsel %vm849_vm1, %v2155_v16, %v2156_v14 }
 0x1da   :  { %v10160_v10 = vpop.f32.mrb[29].mxu0  ;;  %v2264_v32 = vpack.c.bf16 %v2166_v52, %v2160_v63 }
 0x1db   :  { %v10161_v46 = vadd.f32 %v10160_v10, %v10159_v17  ;;  %v10162_v21 = vpop.f32.mrb[30].mxu0  ;;  %v2032_v17 = vld [vmem:[#allocation2 + $0x128] sm:$0xfc] }
 0x1dc   :  { %v10163_v4 = vpop.f32.mrb[31].mxu0  ;;  %v2176_v53 = vrot.slane %v2032_v17, 2  ;;  %4411 = vmatprep.mubr.bf16.mxu0 %v2264_v32 }
 0x1dd   :  { %v10223_v19 = vpop.f32.mrb[28].mxu1  ;;  %v10164_v31 = vadd.f32 %v10163_v4, %v10162_v21  ;;  %v2163_v21 = vsel %vm849_vm1, %v2161_v24, %v2162_v37  ;;  %v2177_v4 = vrot.slane %v2034_v0, 2  ;;  %v2038_v24 = vld [vmem:[#allocation2 + $0x198] sm:$0x3] }
 0x1de   :  { %v10224_v20 = vpop.f32.mrb[29].mxu1  ;;  %v2263_v63 = vpack.c.bf16 %v2163_v21, %v2157_v39  ;;  %v2183_v13 = vrot.slane %v2038_v24, 2 }
 0x1df   :  { %v10225_v28 = vadd.f32 %v10224_v20, %v10223_v19  ;;  %v10226_v1 = vpop.f32.mrb[30].mxu1 }
 0x1e0   :  { %v10227_v51 = vpop.f32.mrb[31].mxu1  ;;  %4412 = vmatmul.mubr.bf16.gmra.mrb[136].mxu0 %v2263_v63  ;;  %v2184_v23 = vsel %vm849_vm1, %v2182_v11, %v2183_v13 }
 0x1e1   :  { %v10245_v45 = vpop.f32.mrb[32].mxu0  ;;  %v12846_v48 = vadd.f32 %v10225_v28, %v10161_v46  ;;  %v10228_v59 = vadd.f32 %v10227_v51, %v10226_v1  ;;  %v2027_v46 = vld [vmem:[#allocation2 + $0x100] sm:$0xfc]  ;;  %v2033_v51 = vld [vmem:[#allocation2 + $0x130] sm:$0x3] }
 0x1e2   :  { %v10246_v5 = vpop.f32.mrb[33].mxu0  ;;  %v2167_v2 = vrot.slane %v2027_v46, 2 }
 0x1e3   :  { %v12849_v7 = vadd.f32 %v10228_v59, %v10164_v31  ;;  %v10247_v8 = vadd.f32 %v10246_v5, %v10245_v45  ;;  %v10248_v54 = vpop.f32.mrb[34].mxu0  ;;  %v2172_v31 = vsel %vm849_vm1, %v2170_v49, %v2171_v25  ;;  %v2178_v59 = vsel %vm849_vm1, %v2176_v53, %v2177_v4  ;;  %v2040_v5 = vld [vmem:[#allocation2 + $0x1a8] sm:$0xfc]  ;;  %v2041_v25 = vld [vmem:[#allocation2 + $0x1b0] sm:$0x3] }
 0x1e4   :  { %v10249_v12 = vpop.f32.mrb[35].mxu0  ;;  %v2266_v37 = vpack.c.bf16 %v2178_v59, %v2172_v31  ;;  %v2188_v17 = vrot.slane %v2040_v5, 2  ;;  %v2169_v46 = vsel %vm849_vm1, %v2167_v2, %v2168_v55  ;;  %v2186_v59 = vrot.slane %v2041_v25, 2  ;;  %v12876_v5 = vld [vmem:[#allocation2 + $0x1c0] sm:$0xfc] }
 0x1e5   :  { %v10309_v9 = vpop.f32.mrb[32].mxu1  ;;  %v3816_v3 = vadd.f32 %v10247_v8, %v12773_v41  ;;  %v10250_v15 = vadd.f32 %v10249_v12, %v10248_v54  ;;  %v2174_v8 = vrot.slane %v2033_v51, 2 }
 0x1e6   :  { %v10310_v18 = vpop.f32.mrb[33].mxu1  ;;  %4419 = vmatprep.mubr.bf16.mxu0 %v2266_v37 }
 0x1e7   :  { %v10311_v19 = vadd.f32 %v10310_v18, %v10309_v9  ;;  %v10312_v10 = vpop.f32.mrb[34].mxu1  ;;  %v3819_v28 = vadd.f32 %v10250_v15, %v12779_v34  ;;  %v2042_v9 = vld [vmem:[#allocation2 + $0x1b8] sm:$0x3] }
 0x1e8   :  { %v10313_v43 = vpop.f32.mrb[35].mxu1 }
 0x1e9   :  { %v10251_v20 = vpop.f32.mrb[36].mxu0  ;;  %v12856_v1 = vadd.f32 %v10311_v19, %v3816_v3  ;;  %v10314_v41 = vadd.f32 %v10313_v43, %v10312_v10  ;;  %v2189_v3 = vrot.slane %v2042_v9, 2  ;;  %v2035_v19 = vld [vmem:[#allocation2 + $0x180] sm:$0xfc]  ;;  %v2037_v10 = vld [vmem:[#allocation2 + $0x190] sm:$0x3] }
 0x1ea   :  { %v10252_v56 = vpop.f32.mrb[37].mxu0  ;;  %v2179_v4 = vrot.slane %v2035_v19, 2 }
 0x1eb   :  { %v10254_v57 = vpop.f32.mrb[38].mxu0  ;;  %v12860_v6 = vadd.f32 %v10314_v41, %v3819_v28  ;;  %v10253_v34 = vadd.f32 %v10252_v56, %v10251_v20  ;;  %v2039_v20 = vld [vmem:[#allocation2 + $0x1a0] sm:$0xfc]  ;;  %v2190_v28 = vsel %vm849_vm1, %v2188_v17, %v2189_v3  ;;  %v2180_v41 = vrot.slane %v2037_v10, 2  ;;  %v2044_v56 = vld [vmem:[#allocation2 + $0x1c8] sm:$0xfc] }
 0x1ec   :  { %v10255_v30 = vpop.f32.mrb[39].mxu0  ;;  %v2185_v31 = vrot.slane %v2039_v20, 2  ;;  %v2194_v63 = vrot.slane %v2044_v56, 2  ;;  %v2191_v17 = vrot.slane %v12876_v5, 2  ;;  %v12892_v56 = vld [vmem:[#allocation2 + $0x210] sm:$0x3] }
 0x1ed   :  { %v10315_v45 = vpop.f32.mrb[36].mxu1  ;;  %v10256_v58 = vadd.f32 %v10255_v30, %v10254_v57  ;;  %v3824_v54 = vadd.f32 %v10253_v34, %v12790_v36  ;;  %v2175_v36 = vsel %vm849_vm1, %v2173_v47, %v2174_v8  ;;  %v2048_v47 = vld [vmem:[#allocation2 + $0x1e8] sm:$0xfc]  ;;  %v2050_v34 = vld [vmem:[#allocation2 + $0x1f8] sm:$0x3] }
 0x1ee   :  { %v10316_v61 = vpop.f32.mrb[37].mxu1  ;;  %v2201_v37 = vrot.slane %v2050_v34, 2  ;;  %v2057_v34 = vld [vmem:[#allocation2 + $0x230] sm:$0x3]  ;;  %v2060_v5 = vld [vmem:[#allocation2 + $0x248] sm:$0xfc] }
 0x1ef   :  { %v10317_v16 = vadd.f32 %v10316_v61, %v10315_v45  ;;  %v10318_v14 = vpop.f32.mrb[38].mxu1  ;;  %v3827_v18 = vadd.f32 %v10256_v58, %v12792_v27  ;;  %v2046_v45 = vld [vmem:[#allocation2 + $0x1d8] sm:$0x3]  ;;  %v2265_v61 = vpack.c.bf16 %v2175_v36, %v2169_v46 }
 0x1f0   :  { %v10319_v32 = vpop.f32.mrb[39].mxu1  ;;  %v2195_v24 = vrot.slane %v2046_v45, 2  ;;  %v2054_v36 = vld [vmem:[#allocation2 + $0x218] sm:$0x3] }
 0x1f1   :  { %v10257_v52 = vpop.f32.mrb[40].mxu0  ;;  %v12864_v39 = vadd.f32 %v10317_v16, %v3824_v54  ;;  %v10320_v15 = vadd.f32 %v10319_v32, %v10318_v14  ;;  %v2268_v14 = vpack.c.bf16 %v2190_v28, %v2184_v23  ;;  %v2047_v54 = vld [vmem:[#allocation2 + $0x1e0] sm:$0xfc]  ;;  %v2181_v32 = vsel %vm849_vm1, %v2179_v4, %v2180_v41  ;;  %4420 = vmatmul.mubr.bf16.gmra.mrb[140].mxu0 %v2265_v61  ;;  %v2056_v28 = vld [vmem:[#allocation2 + $0x228] sm:$0xfc] }
 0x1f2   :  { %v10258_v12 = vpop.f32.mrb[41].mxu0  ;;  %v2197_v46 = vrot.slane %v2047_v54, 2  ;;  %v2058_v4 = vld [vmem:[#allocation2 + $0x238] sm:$0x3] }
 0x1f3   :  { %v10260_v0 = vpop.f32.mrb[42].mxu0  ;;  %v12868_v49 = vadd.f32 %v10320_v15, %v3827_v18  ;;  %v10259_v27 = vadd.f32 %v10258_v12, %v10257_v52  ;;  %v2200_v52 = vrot.slane %v2048_v47, 2  ;;  %v2187_v12 = vsel %vm849_vm1, %v2185_v31, %v2186_v59  ;;  %v2049_v18 = vld [vmem:[#allocation2 + $0x1f0] sm:$0x3]  ;;  %4427 = vmatprep.mubr.bf16.mxu0 %v2268_v14 }
 0x1f4   :  { %v10261_v21 = vpop.f32.mrb[43].mxu0  ;;  %v2267_v41 = vpack.c.bf16 %v2187_v12, %v2181_v32  ;;  %v2212_v47 = vrot.slane %v2056_v28, 2  ;;  %v2204_v14 = vrot.slane %v12892_v56, 2  ;;  %v2210_v12 = vrot.slane %v2057_v34, 2  ;;  %v2063_v56 = vld [vmem:[#allocation2 + $0x260] sm:$0xfc] }
 0x1f5   :  { %v10321_v53 = vpop.f32.mrb[40].mxu1  ;;  %v10262_v43 = vadd.f32 %v10261_v21, %v10260_v0  ;;  %v3832_v51 = vadd.f32 %v10259_v27, %v12798_v35  ;;  %v12878_v35 = vld [vmem:[#allocation2 + $0x1d0] sm:$0x3]  ;;  %v2196_v0 = vsel %vm849_vm1, %v2194_v63, %v2195_v24  ;;  %v2052_v21 = vld [vmem:[#allocation2 + $0x208] sm:$0xfc]  ;;  %v2202_v25 = vsel %vm849_vm1, %v2200_v52, %v2201_v37 }
 0x1f6   :  { %v10322_v33 = vpop.f32.mrb[41].mxu1  ;;  %v2192_v3 = vrot.slane %v12878_v35, 2  ;;  %v2198_v27 = vrot.slane %v2049_v18, 2  ;;  %v2270_v59 = vpack.c.bf16 %v2202_v25, %v2196_v0  ;;  %v2213_v63 = vrot.slane %v2058_v4, 2  ;;  %v2062_v52 = vld [vmem:[#allocation2 + $0x258] sm:$0x3] }
 0x1f7   :  { %v3835_v2 = vadd.f32 %v10262_v43, %v12800_v62  ;;  %v10323_v55 = vadd.f32 %v10322_v33, %v10321_v53  ;;  %v10324_v57 = vpop.f32.mrb[42].mxu1  ;;  %v12890_v33 = vld [vmem:[#allocation2 + $0x200] sm:$0xfc] }
 0x1f8   :  { %v10325_v30 = vpop.f32.mrb[43].mxu1  ;;  %v2199_v32 = vsel %vm849_vm1, %v2197_v46, %v2198_v27  ;;  %v2059_v46 = vld [vmem:[#allocation2 + $0x240] sm:$0xfc] }
 0x1f9   :  { %v12874_v50 = vadd.f32 %v10323_v55, %v3832_v51  ;;  %v10326_v58 = vadd.f32 %v10325_v30, %v10324_v57  ;;  %v10263_v16 = vpop.f32.mrb[44].mxu0  ;;  %v2207_v55 = vrot.slane %v2054_v36, 2  ;;  %4428 = vmatmul.mubr.bf16.gmra.mrb[144].mxu0 %v2267_v41 }
 0x1fa   :  { %v10264_v62 = vpop.f32.mrb[45].mxu0  ;;  %4435 = vmatprep.mubr.bf16.mxu0 %v2270_v59 }
 0x1fb   :  { %v12880_v8 = vadd.f32 %v10326_v58, %v3835_v2  ;;  %v10265_v9 = vadd.f32 %v10264_v62, %v10263_v16  ;;  %v10266_v11 = vpop.f32.mrb[46].mxu0  ;;  %v2206_v2 = vrot.slane %v2052_v21, 2  ;;  %v2203_v16 = vrot.slane %v12890_v33, 2 }
 0x1fc   :  { %v10267_v13 = vpop.f32.mrb[47].mxu0 }
 0x1fd   :  { %v3840_v15 = vadd.f32 %v10265_v9, %v12806_v38  ;;  %v10327_v19 = vpop.f32.mrb[44].mxu1  ;;  %v10268_v10 = vadd.f32 %v10267_v13, %v10266_v11  ;;  %v2064_v9 = vld [vmem:[#allocation2 + $0x268] sm:$0xfc]  ;;  %v2193_v11 = vsel %vm849_vm1, %v2191_v17, %v2192_v3  ;;  %v2219_v17 = vrot.slane %v2062_v52, 2 }
 0x1fe   :  { %v10328_v20 = vpop.f32.mrb[45].mxu1  ;;  %v2269_v25 = vpack.c.bf16 %v2199_v32, %v2193_v11  ;;  %v2221_v52 = vrot.slane %v2063_v56, 2 }
 0x1ff   :  { %v3843_v53 = vadd.f32 %v10268_v10, %v12808_v22  ;;  %v10329_v43 = vadd.f32 %v10328_v20, %v10327_v19  ;;  %v10330_v23 = vpop.f32.mrb[46].mxu1  ;;  %v2055_v22 = vld [vmem:[#allocation2 + $0x220] sm:$0xfc]  ;;  %v2208_v19 = vsel %vm849_vm1, %v2206_v2, %v2207_v55  ;;  %v2218_v20 = vrot.slane %v2060_v5, 2  ;;  %v2065_v55 = vld [vmem:[#allocation2 + $0x270] sm:$0x3] }
 0x200   :  { %v10331_v38 = vpop.f32.mrb[47].mxu1  ;;  %v2209_v37 = vrot.slane %v2055_v22, 2 }
 0x201   :  { %v10269_v31 = vpop.f32.mrb[48].mxu0  ;;  %v12894_v51 = vadd.f32 %v10329_v43, %v3840_v15  ;;  %v10332_v57 = vadd.f32 %v10331_v38, %v10330_v23  ;;  %v2066_v15 = vld [vmem:[#allocation2 + $0x278] sm:$0x3]  ;;  %v2061_v23 = vld [vmem:[#allocation2 + $0x250] sm:$0x3]  ;;  %4436 = vmatmul.mubr.bf16.gmra.mrb[148].mxu0 %v2269_v25 }
 0x202   :  { %v10270_v45 = vpop.f32.mrb[49].mxu0  ;;  %v2225_v41 = vrot.slane %v2066_v15, 2  ;;  %v2211_v59 = vsel %vm849_vm1, %v2209_v37, %v2210_v12 }
 0x203   :  { %v10271_v30 = vadd.f32 %v10270_v45, %v10269_v31  ;;  %v10272_v61 = vpop.f32.mrb[50].mxu0  ;;  %v12896_v58 = vadd.f32 %v10332_v57, %v3843_v53  ;;  %v2205_v45 = vsel %vm849_vm1, %v2203_v16, %v2204_v14 }
 0x204   :  { %v10273_v24 = vpop.f32.mrb[51].mxu0 }
 0x205   :  { %v3848_v35 = vadd.f32 %v10271_v30, %v12817_v40  ;;  %v10274_v62 = vadd.f32 %v10273_v24, %v10272_v61  ;;  %v10333_v54 = vpop.f32.mrb[48].mxu1  ;;  %v2214_v40 = vsel %vm849_vm1, %v2212_v47, %v2213_v63  ;;  %v2215_v47 = vrot.slane %v2059_v46, 2 }
 0x206   :  { %v10334_v13 = vpop.f32.mrb[49].mxu1  ;;  %v2272_v43 = vpack.c.bf16 %v2214_v40, %v2208_v19  ;;  %v2220_v30 = vsel %vm849_vm1, %v2218_v20, %v2219_v17  ;;  %v2216_v63 = vrot.slane %v2061_v23, 2 }
 0x207   :  { %v3851_v18 = vadd.f32 %v10274_v62, %v12819_v60  ;;  %v10335_v10 = vadd.f32 %v10334_v13, %v10333_v54  ;;  %v10336_v0 = vpop.f32.mrb[50].mxu1  ;;  %v2224_v60 = vrot.slane %v2064_v9, 2  ;;  %v2271_v62 = vpack.c.bf16 %v2211_v59, %v2205_v45 }
 0x208   :  { %v10337_v21 = vpop.f32.mrb[51].mxu1  ;;  %4443 = vmatprep.mubr.bf16.mxu0 %v2272_v43  ;;  %v2222_v9 = vrot.slane %v2065_v55, 2  ;;  %v2217_v19 = vsel %vm849_vm1, %v2215_v47, %v2216_v63 }
 0x209   :  { %v10275_v36 = vpop.f32.mrb[52].mxu0  ;;  %v12906_v53 = vadd.f32 %v10335_v10, %v3848_v35  ;;  %v10338_v3 = vadd.f32 %v10337_v21, %v10336_v0  ;;  %v2226_v61 = vsel %vm849_vm1, %v2224_v60, %v2225_v41  ;;  %4444 = vmatmul.mubr.bf16.gmra.mrb[152].mxu0 %v2271_v62 }
 0x20a   :  { %v10276_v27 = vpop.f32.mrb[53].mxu0  ;;  %v2274_v37 = vpack.c.bf16 %v2226_v61, %v2220_v30  ;;  %v2223_v40 = vsel %vm849_vm1, %v2221_v52, %v2222_v9 }
 0x20b   :  { %v10277_v28 = vadd.f32 %v10276_v27, %v10275_v36  ;;  %v10278_v4 = vpop.f32.mrb[54].mxu0  ;;  %v12908_v38 = vadd.f32 %v10338_v3, %v3851_v18  ;;  %v2273_v17 = vpack.c.bf16 %v2223_v40, %v2217_v19 }
 0x20c   :  { %v10279_v33 = vpop.f32.mrb[55].mxu0  ;;  %4451 = vmatprep.mubr.bf16.mxu0 %v2274_v37 }
 0x20d   :  { %v3856_v31 = vadd.f32 %v10277_v28, %v12829_v42  ;;  %v10280_v2 = vadd.f32 %v10279_v33, %v10278_v4  ;;  %v10339_v57 = vpop.f32.mrb[52].mxu1 }
 0x20e   :  { %v10340_v34 = vpop.f32.mrb[53].mxu1 }
 0x20f   :  { %v3859_v22 = vadd.f32 %v10280_v2, %v12831_v26  ;;  %v10341_v24 = vadd.f32 %v10340_v34, %v10339_v57  ;;  %v10342_v42 = vpop.f32.mrb[54].mxu1 }
 0x210   :  { %v10343_v5 = vpop.f32.mrb[55].mxu1 }
 0x211   :  { %v10281_v35 = vpop.f32.mrb[56].mxu0  ;;  %v12916_v54 = vadd.f32 %v10341_v24, %v3856_v31  ;;  %v10344_v16 = vadd.f32 %v10343_v5, %v10342_v42  ;;  %4452 = vmatmul.mubr.bf16.gmra.mrb[156].mxu0 %v2273_v17 }
 0x212   :  { %v10282_v14 = vpop.f32.mrb[57].mxu0 }
 0x213   :  { %v10283_v11 = vadd.f32 %v10282_v14, %v10281_v35  ;;  %v10284_v26 = vpop.f32.mrb[58].mxu0  ;;  %v12918_v32 = vadd.f32 %v10344_v16, %v3859_v22 }
 0x214   :  { %v10285_v12 = vpop.f32.mrb[59].mxu0 }
 0x215   :  { %v3864_v18 = vadd.f32 %v10283_v11, %v12838_v44  ;;  %v10286_v13 = vadd.f32 %v10285_v12, %v10284_v26  ;;  %v10345_v15 = vpop.f32.mrb[56].mxu1 }
 0x216   :  { %v10346_v0 = vpop.f32.mrb[57].mxu1 }
 0x217   :  { %v3867_v10 = vadd.f32 %v10286_v13, %v12841_v29  ;;  %v10347_v20 = vadd.f32 %v10346_v0, %v10345_v15  ;;  %v10348_v21 = vpop.f32.mrb[58].mxu1 }
 0x218   :  { %v10349_v36 = vpop.f32.mrb[59].mxu1 }
 0x219   :  { %v10287_v25 = vpop.f32.mrb[60].mxu0  ;;  %v12924_v3 = vadd.f32 %v10347_v20, %v3864_v18  ;;  %v10350_v46 = vadd.f32 %v10349_v36, %v10348_v21 }
 0x21a   :  { %v10288_v44 = vpop.f32.mrb[61].mxu0 }
 0x21b   :  { %v10289_v27 = vadd.f32 %v10288_v44, %v10287_v25  ;;  %v10290_v43 = vpop.f32.mrb[62].mxu0  ;;  %v12926_v60 = vadd.f32 %v10350_v46, %v3867_v10 }
 0x21c   :  { %v10291_v23 = vpop.f32.mrb[63].mxu0 }
 0x21d   :  { %v3872_v28 = vadd.f32 %v10289_v27, %v12846_v48  ;;  %v10292_v4 = vadd.f32 %v10291_v23, %v10290_v43  ;;  %v10351_v41 = vpop.f32.mrb[60].mxu1 }
 0x21e   :  { %v10352_v33 = vpop.f32.mrb[61].mxu1 }
 0x21f   :  { %v3875_v29 = vadd.f32 %v10292_v4, %v12849_v7  ;;  %v10353_v31 = vadd.f32 %v10352_v33, %v10351_v41  ;;  %v10354_v2 = vpop.f32.mrb[62].mxu1 }
 0x220   :  { %v10355_v57 = vpop.f32.mrb[63].mxu1 }
 0x221   :  { %v10373_v56 = vpop.f32.mrb[64].mxu0  ;;  %v12930_v47 = vadd.f32 %v10353_v31, %v3872_v28  ;;  %v10356_v22 = vadd.f32 %v10355_v57, %v10354_v2 }
 0x222   :  { %v10374_v55 = vpop.f32.mrb[65].mxu0 }
 0x223   :  { %v10375_v45 = vadd.f32 %v10374_v55, %v10373_v56  ;;  %v10376_v59 = vpop.f32.mrb[66].mxu0  ;;  %v12933_v61 = vadd.f32 %v10356_v22, %v3875_v29 }
 0x224   :  { %v10377_v34 = vpop.f32.mrb[67].mxu0 }
 0x225   :  { %v4010_v30 = vadd.f32 %v10375_v45, %v12856_v1  ;;  %v10378_v48 = vadd.f32 %v10377_v34, %v10376_v59  ;;  %v10437_v63 = vpop.f32.mrb[64].mxu1 }
 0x226   :  { %v10438_v24 = vpop.f32.mrb[65].mxu1 }
 0x227   :  { %v4013_v7 = vadd.f32 %v10378_v48, %v12860_v6  ;;  %v10439_v42 = vadd.f32 %v10438_v24, %v10437_v63  ;;  %v10440_v5 = vpop.f32.mrb[66].mxu1 }
 0x228   :  { %v10441_v35 = vpop.f32.mrb[67].mxu1 }
 0x229   :  { %v10379_v62 = vpop.f32.mrb[68].mxu0  ;;  %v12936_v52 = vadd.f32 %v10439_v42, %v4010_v30  ;;  %v10442_v16 = vadd.f32 %v10441_v35, %v10440_v5 }
 0x22a   :  { %v10380_v14 = vpop.f32.mrb[69].mxu0 }
 0x22b   :  { %v10381_v37 = vadd.f32 %v10380_v14, %v10379_v62  ;;  %v10382_v9 = vpop.f32.mrb[70].mxu0  ;;  %v12938_v11 = vadd.f32 %v10442_v16, %v4013_v7 }
 0x22c   :  { %v10383_v1 = vpop.f32.mrb[71].mxu0 }
 0x22d   :  { %v4018_v26 = vadd.f32 %v10381_v37, %v12864_v39  ;;  %v10384_v12 = vadd.f32 %v10383_v1, %v10382_v9  ;;  %v10443_v18 = vpop.f32.mrb[68].mxu1 }
 0x22e   :  { %v10444_v13 = vpop.f32.mrb[69].mxu1 }
 0x22f   :  { %v4021_v6 = vadd.f32 %v10384_v12, %v12868_v49  ;;  %v10445_v15 = vadd.f32 %v10444_v13, %v10443_v18  ;;  %v10446_v19 = vpop.f32.mrb[70].mxu1 }
 0x230   :  { %v10447_v40 = vpop.f32.mrb[71].mxu1 }
 0x231   :  { %v12942_v10 = vadd.f32 %v10445_v15, %v4018_v26  ;;  %v10448_v0 = vadd.f32 %v10447_v40, %v10446_v19  ;;  %v10385_v20 = vpop.f32.mrb[72].mxu0 }
 0x232   :  { %v10386_v21 = vpop.f32.mrb[73].mxu0 }
 0x233   :  { %v12944_v36 = vadd.f32 %v10448_v0, %v4021_v6  ;;  %v10387_v25 = vadd.f32 %v10386_v21, %v10385_v20  ;;  %v10388_v17 = vpop.f32.mrb[74].mxu0 }
 0x234   :  { %v10389_v46 = vpop.f32.mrb[75].mxu0 }
 0x235   :  { %v4026_v39 = vadd.f32 %v10387_v25, %v12874_v50  ;;  %v10390_v44 = vadd.f32 %v10389_v46, %v10388_v17  ;;  %v10449_v27 = vpop.f32.mrb[72].mxu1 }
 0x236   :  { %v10450_v43 = vpop.f32.mrb[73].mxu1 }
 0x237   :  { %v4029_v49 = vadd.f32 %v10390_v44, %v12880_v8  ;;  %v10451_v23 = vadd.f32 %v10450_v43, %v10449_v27  ;;  %v10452_v28 = vpop.f32.mrb[74].mxu1 }
 0x238   :  { %v10453_v4 = vpop.f32.mrb[75].mxu1 }
 0x239   :  { %v10454_v29 = vadd.f32 %v10453_v4, %v10452_v28  ;;  %v10391_v41 = vpop.f32.mrb[76].mxu0  ;;  %v12948_v33 = vadd.f32 %v10451_v23, %v4026_v39 }
 0x23a   :  { %v10392_v56 = vpop.f32.mrb[77].mxu0 }
 0x23b   :  { %v10393_v31 = vadd.f32 %v10392_v56, %v10391_v41  ;;  %v10394_v2 = vpop.f32.mrb[78].mxu0  ;;  %v12950_v55 = vadd.f32 %v10454_v29, %v4029_v49 }
 0x23c   :  { %v10395_v57 = vpop.f32.mrb[79].mxu0 }
 0x23d   :  { %v4034_v50 = vadd.f32 %v10393_v31, %v12894_v51  ;;  %v10396_v45 = vadd.f32 %v10395_v57, %v10394_v2  ;;  %v10455_v59 = vpop.f32.mrb[76].mxu1 }
 0x23e   :  { %v10456_v22 = vpop.f32.mrb[77].mxu1 }
 0x23f   :  { %v4037_v8 = vadd.f32 %v10396_v45, %v12896_v58  ;;  %v10457_v34 = vadd.f32 %v10456_v22, %v10455_v59  ;;  %v10458_v30 = vpop.f32.mrb[78].mxu1 }
 0x240   :  { %v10459_v48 = vpop.f32.mrb[79].mxu1 }
 0x241   :  { %v10460_v7 = vadd.f32 %v10459_v48, %v10458_v30  ;;  %v10397_v63 = vpop.f32.mrb[80].mxu0  ;;  %v12954_v24 = vadd.f32 %v10457_v34, %v4034_v50 }
 0x242   :  { %v10398_v42 = vpop.f32.mrb[81].mxu0 }
 0x243   :  { %v10399_v5 = vadd.f32 %v10398_v42, %v10397_v63  ;;  %v10400_v35 = vpop.f32.mrb[82].mxu0  ;;  %v12956_v62 = vadd.f32 %v10460_v7, %v4037_v8  ;;  %v11759_v63 = vld [vmem:[#allocation11 + $0x40] sm:$0xff]  }
 0x244   :  { %v10401_v16 = vpop.f32.mrb[83].mxu0  ;;  %v11760_v42 = vld [vmem:[#allocation11] sm:$0xff]   ;;  %10677 = vmatprep.subr.bf16.mxu1 %v11759_v63 }
 0x245   :  { %v4042_v51 = vadd.f32 %v10399_v5, %v12906_v53  ;;  %v10402_v14 = vadd.f32 %v10401_v16, %v10400_v35  ;;  %v10461_v37 = vpop.f32.mrb[80].mxu1  ;;  %10678 = vmatpush3.bf16.msra.mxu1 %v11760_v42 }
 0x246   :  { %v10462_v9 = vpop.f32.mrb[81].mxu1 }
 0x247   :  { %v4045_v58 = vadd.f32 %v10402_v14, %v12908_v38  ;;  %v10463_v1 = vadd.f32 %v10462_v9, %v10461_v37  ;;  %v10464_v26 = vpop.f32.mrb[82].mxu1 }
 0x248   :  { %v10465_v12 = vpop.f32.mrb[83].mxu1 }
 0x249   :  { %v10466_v18 = vadd.f32 %v10465_v12, %v10464_v26  ;;  %v12960_v6 = vadd.f32 %v10463_v1, %v4042_v51  ;;  %v10403_v15 = vpop.f32.mrb[84].mxu0 }
 0x24a   :  { %v10404_v19 = vpop.f32.mrb[85].mxu0 }
 0x24b   :  { %v12962_v13 = vadd.f32 %v10466_v18, %v4045_v58  ;;  %v10405_v40 = vadd.f32 %v10404_v19, %v10403_v15  ;;  %v10406_v0 = vpop.f32.mrb[86].mxu0 }
 0x24c   :  { %v10407_v20 = vpop.f32.mrb[87].mxu0 }
 0x24d   :  { %v4050_v53 = vadd.f32 %v10405_v40, %v12916_v54  ;;  %v10408_v21 = vadd.f32 %v10407_v20, %v10406_v0  ;;  %v10467_v25 = vpop.f32.mrb[84].mxu1 }
 0x24e   :  { %v10468_v17 = vpop.f32.mrb[85].mxu1 }
 0x24f   :  { %v4053_v38 = vadd.f32 %v10408_v21, %v12918_v32  ;;  %v10469_v46 = vadd.f32 %v10468_v17, %v10467_v25  ;;  %v10470_v39 = vpop.f32.mrb[86].mxu1 }
 0x250   :  { %v10471_v44 = vpop.f32.mrb[87].mxu1 }
 0x251   :  { %v10472_v27 = vadd.f32 %v10471_v44, %v10470_v39  ;;  %v12966_v49 = vadd.f32 %v10469_v46, %v4050_v53  ;;  %v10409_v23 = vpop.f32.mrb[88].mxu0 }
 0x252   :  { %v10410_v28 = vpop.f32.mrb[89].mxu0 }
 0x253   :  { %v12968_v43 = vadd.f32 %v10472_v27, %v4053_v38  ;;  %v10411_v4 = vadd.f32 %v10410_v28, %v10409_v23  ;;  %v10412_v29 = vpop.f32.mrb[90].mxu0 }
 0x254   :  { %v10413_v41 = vpop.f32.mrb[91].mxu0 }
 0x255   :  { %v4058_v54 = vadd.f32 %v10411_v4, %v12924_v3  ;;  %v10414_v56 = vadd.f32 %v10413_v41, %v10412_v29  ;;  %v10473_v31 = vpop.f32.mrb[88].mxu1 }
 0x256   :  { %v10474_v2 = vpop.f32.mrb[89].mxu1 }
 0x257   :  { %v4061_v32 = vadd.f32 %v10414_v56, %v12926_v60  ;;  %v10475_v57 = vadd.f32 %v10474_v2, %v10473_v31  ;;  %v10476_v50 = vpop.f32.mrb[90].mxu1 }
 0x258   :  { %v10477_v45 = vpop.f32.mrb[91].mxu1 }
 0x259   :  { %v10478_v59 = vadd.f32 %v10477_v45, %v10476_v50  ;;  %v12972_v8 = vadd.f32 %v10475_v57, %v4058_v54  ;;  %v10415_v34 = vpop.f32.mrb[92].mxu0 }
 0x25a   :  { %v10416_v30 = vpop.f32.mrb[93].mxu0 }
 0x25b   :  { %v12974_v22 = vadd.f32 %v10478_v59, %v4061_v32  ;;  %v10417_v48 = vadd.f32 %v10416_v30, %v10415_v34  ;;  %v10418_v7 = vpop.f32.mrb[94].mxu0 }
 0x25c   :  { %v10419_v3 = vpop.f32.mrb[95].mxu0 }
 0x25d   :  { %v4066_v5 = vadd.f32 %v10417_v48, %v12930_v47  ;;  %v10420_v35 = vadd.f32 %v10419_v3, %v10418_v7  ;;  %v10479_v60 = vpop.f32.mrb[92].mxu1 }
 0x25e   :  { %v10480_v51 = vpop.f32.mrb[93].mxu1 }
 0x25f   :  { %v4069_v16 = vadd.f32 %v10420_v35, %v12933_v61  ;;  %v10481_v14 = vadd.f32 %v10480_v51, %v10479_v60  ;;  %v10482_v37 = vpop.f32.mrb[94].mxu1  ;;  %v11768_v51 = vld [vmem:[#allocation11 + $0xc0] sm:$0xff]  }
 0x260   :  { %v10483_v9 = vpop.f32.mrb[95].mxu1  ;;  %10741 = vmatprep.subr.bf16.mxu0 %v11768_v51 }
 0x261   :  { %v10501_v58 = vpop.f32.mrb[96].mxu0  ;;  %v10484_v26 = vadd.f32 %v10483_v9, %v10482_v37  ;;  %v12978_v15 = vadd.f32 %v10481_v14, %v4066_v5 }
 0x262   :  { %v10502_v1 = vpop.f32.mrb[97].mxu0 }
 0x263   :  { %v10503_v12 = vadd.f32 %v10502_v1, %v10501_v58  ;;  %v10504_v18 = vpop.f32.mrb[98].mxu0  ;;  %v12981_v0 = vadd.f32 %v10484_v26, %v4069_v16  ;;  %v11770_v1 = vld [vmem:[#allocation11 + $0x80] sm:$0xff]  }
 0x264   :  { %v10505_v19 = vpop.f32.mrb[99].mxu0  ;;  %10742 = vmatpush3.bf16.msra.mxu0 %v11770_v1  ;;  %v11773_v1 = vld [vmem:[#allocation11 + $0x68] sm:$0xff]  }
 0x265   :  { %v4204_v47 = vadd.f32 %v10503_v12, %v12936_v52  ;;  %v10506_v40 = vadd.f32 %v10505_v19, %v10504_v18  ;;  %v10565_v20 = vpop.f32.mrb[96].mxu1  ;;  %v11761_v18 = vld [vmem:[#allocation11 + $0x48] sm:$0xff]  }
 0x266   :  { %v10566_v53 = vpop.f32.mrb[97].mxu1  ;;  %v11762_v19 = vld [vmem:[#allocation11 + $0x8] sm:$0xff]   ;;  %10679 = vmatprep.subr.bf16.mxu1 %v11761_v18 }
 0x267   :  { %v4207_v61 = vadd.f32 %v10506_v40, %v12938_v11  ;;  %v10567_v21 = vadd.f32 %v10566_v53, %v10565_v20  ;;  %v10568_v25 = vpop.f32.mrb[98].mxu1  ;;  %10680 = vmatpush3.bf16.msra.mxu1 %v11762_v19  ;;  %v11784_v18 = vld [vmem:[#allocation11 + $0xa8] sm:$0xff]  }
 0x268   :  { %v10569_v17 = vpop.f32.mrb[99].mxu1 }
 0x269   :  { %v10507_v38 = vpop.f32.mrb[100].mxu0  ;;  %v10570_v39 = vadd.f32 %v10569_v17, %v10568_v25  ;;  %v12984_v23 = vadd.f32 %v10567_v21, %v4204_v47  ;;  %v11771_v47 = vld [vmem:[#allocation11 + $0xc8] sm:$0xff]   ;;  %v11763_v17 = vld [vmem:[#allocation11 + $0x50] sm:$0xff]  }
 0x26a   :  { %v10508_v46 = vpop.f32.mrb[101].mxu0  ;;  %10743 = vmatprep.subr.bf16.mxu0 %v11771_v47  ;;  %10681 = vmatprep.subr.bf16.mxu1 %v11763_v17  ;;  %v11789_v17 = vld [vmem:[#allocation11 + $0xf8] sm:$0xff]  }
 0x26b   :  { %v10509_v44 = vadd.f32 %v10508_v46, %v10507_v38  ;;  %v10510_v27 = vpop.f32.mrb[102].mxu0  ;;  %v12987_v29 = vadd.f32 %v10570_v39, %v4207_v61  ;;  %v11772_v61 = vld [vmem:[#allocation11 + $0x88] sm:$0xff]   ;;  %v11764_v39 = vld [vmem:[#allocation11 + $0x10] sm:$0xff]  }
 0x26c   :  { %v10511_v28 = vpop.f32.mrb[103].mxu0  ;;  %10744 = vmatpush3.bf16.msra.mxu0 %v11772_v61  ;;  %10682 = vmatpush3.bf16.msra.mxu1 %v11764_v39  ;;  %v11781_v61 = vld [vmem:[#allocation11 + $0x30] sm:$0xff]  }
 0x26d   :  { %v4212_v52 = vadd.f32 %v10509_v44, %v12942_v10  ;;  %v10512_v4 = vadd.f32 %v10511_v28, %v10510_v27  ;;  %v10571_v41 = vpop.f32.mrb[100].mxu1  ;;  %v11774_v44 = vld [vmem:[#allocation11 + $0xd0] sm:$0xff]  }
 0x26e   :  { %v10572_v54 = vpop.f32.mrb[101].mxu1  ;;  %10745 = vmatprep.subr.bf16.mxu0 %v11774_v44 }
 0x26f   :  { %v4215_v11 = vadd.f32 %v10512_v4, %v12944_v36  ;;  %v10573_v56 = vadd.f32 %v10572_v54, %v10571_v41  ;;  %v10574_v31 = vpop.f32.mrb[102].mxu1 }
 0x270   :  { %v10575_v2 = vpop.f32.mrb[103].mxu1 }
 0x271   :  { %v10513_v32 = vpop.f32.mrb[104].mxu0  ;;  %v10576_v50 = vadd.f32 %v10575_v2, %v10574_v31  ;;  %v12990_v34 = vadd.f32 %v10573_v56, %v4212_v52  ;;  %v11765_v31 = vld [vmem:[#allocation11 + $0x58] sm:$0xff]  }
 0x272   :  { %v10514_v57 = vpop.f32.mrb[105].mxu0  ;;  %v11777_v2 = vld [vmem:[#allocation11 + $0xd8] sm:$0xff]   ;;  %10683 = vmatprep.subr.bf16.mxu1 %v11765_v31 }
 0x273   :  { %v10515_v45 = vadd.f32 %v10514_v57, %v10513_v32  ;;  %v10516_v59 = vpop.f32.mrb[106].mxu0  ;;  %v12993_v7 = vadd.f32 %v10576_v50, %v4215_v11  ;;  %v11766_v32 = vld [vmem:[#allocation11 + $0x18] sm:$0xff]  }
 0x274   :  { %v10517_v30 = vpop.f32.mrb[107].mxu0  ;;  %10684 = vmatpush3.bf16.msra.mxu1 %v11766_v32 }
 0x275   :  { %v4220_v10 = vadd.f32 %v10515_v45, %v12948_v33  ;;  %v10518_v48 = vadd.f32 %v10517_v30, %v10516_v59  ;;  %v11778_v45 = vld [vmem:[#allocation11 + $0x98] sm:$0xff]  }
 0x277   :  { %v4223_v36 = vadd.f32 %v10518_v48, %v12950_v55 }
 0x279   :  { %v10519_v35 = vpop.f32.mrb[108].mxu0 }
 0x27a   :  { %v10577_v63 = vpop.f32.mrb[104].mxu1  ;;  %v10520_v16 = vpop.f32.mrb[109].mxu0 }
 0x27b   :  { %v10578_v42 = vpop.f32.mrb[105].mxu1  ;;  %v10521_v58 = vadd.f32 %v10520_v16, %v10519_v35  ;;  %v10522_v9 = vpop.f32.mrb[110].mxu0 }
 0x27c   :  { %v10579_v3 = vadd.f32 %v10578_v42, %v10577_v63  ;;  %v10580_v5 = vpop.f32.mrb[106].mxu1  ;;  %v10523_v33 = vpop.f32.mrb[111].mxu0  ;;  %v11767_v63 = vld [vmem:[#allocation11 + $0x60] sm:$0xff]  }
 0x27d   :  { %v10581_v60 = vpop.f32.mrb[107].mxu1  ;;  %v4228_v12 = vadd.f32 %v10521_v58, %v12954_v24  ;;  %v10524_v55 = vadd.f32 %v10523_v33, %v10522_v9  ;;  %v11769_v42 = vld [vmem:[#allocation11 + $0x20] sm:$0xff]   ;;  %10685 = vmatprep.subr.bf16.mxu1 %v11767_v63  ;;  %v11775_v33 = vld [vmem:[#allocation11 + $0x28] sm:$0xff]  }
 0x27e   :  { %v12996_v14 = vadd.f32 %v10579_v3, %v4220_v10  ;;  %v10582_v37 = vadd.f32 %v10581_v60, %v10580_v5  ;;  %v11780_v3 = vld [vmem:[#allocation11 + $0xe0] sm:$0xff]   ;;  %10686 = vmatpush3.bf16.msra.mxu1 %v11769_v42 }
 0x27f   :  { %v4231_v20 = vadd.f32 %v10524_v55, %v12956_v62  ;;  %v11776_v62 = vld [vmem:[#allocation11 + $0x90] sm:$0xff]   ;;  %v11783_v55 = vld [vmem:[#allocation11 + $0xe8] sm:$0xff]   ;;  %10687 = vmatprep.subr.bf16.mxu1 %v11773_v1 }
 0x280   :  { %v12998_v26 = vadd.f32 %v10582_v37, %v4223_v36  ;;  %10746 = vmatpush3.bf16.msra.mxu0 %v11776_v62  ;;  %v11790_v62 = vld [vmem:[#allocation11 + $0xb8] sm:$0xff]  }
 0x281   :  { %v10525_v38 = vpop.f32.mrb[112].mxu0  ;;  %10747 = vmatprep.subr.bf16.mxu0 %v11777_v2 }
 0x282   :  { %v10583_v40 = vpop.f32.mrb[108].mxu1  ;;  %v10526_v24 = vpop.f32.mrb[113].mxu0  ;;  %10688 = vmatpush3.bf16.msra.mxu1 %v11775_v33 }
 0x283   :  { %v10584_v53 = vpop.f32.mrb[109].mxu1  ;;  %v10527_v52 = vadd.f32 %v10526_v24, %v10525_v38  ;;  %v10528_v4 = vpop.f32.mrb[114].mxu0  ;;  %v11788_v38 = vld [vmem:[#allocation11 + $0xb0] sm:$0xff]  }
 0x284   :  { %v10585_v21 = vadd.f32 %v10584_v53, %v10583_v40  ;;  %v10586_v25 = vpop.f32.mrb[110].mxu1  ;;  %v10529_v41 = vpop.f32.mrb[115].mxu0  ;;  %10748 = vmatpush3.bf16.msra.mxu0 %v11778_v45  ;;  %v11786_v40 = vld [vmem:[#allocation11 + $0xf0] sm:$0xff]   ;;  %v11785_v53 = vld [vmem:[#allocation11 + $0x78] sm:$0xff]  }
 0x285   :  { %v10587_v46 = vpop.f32.mrb[111].mxu1  ;;  %v4236_v54 = vadd.f32 %v10527_v52, %v12960_v6  ;;  %v10530_v56 = vadd.f32 %v10529_v41, %v10528_v4  ;;  %10749 = vmatprep.subr.bf16.mxu0 %v11780_v3  ;;  %v11787_v52 = vld [vmem:[#allocation11 + $0x38] sm:$0xff]  }
 0x286   :  { %v13002_v27 = vadd.f32 %v10585_v21, %v4228_v12  ;;  %v10588_v28 = vadd.f32 %v10587_v46, %v10586_v25  ;;  %v11779_v12 = vld [vmem:[#allocation11 + $0x70] sm:$0xff]  }
 0x287   :  { %v4239_v50 = vadd.f32 %v10530_v56, %v12962_v13  ;;  %v11782_v13 = vld [vmem:[#allocation11 + $0xa0] sm:$0xff]   ;;  %10689 = vmatprep.subr.bf16.mxu1 %v11779_v12 }
 0x288   :  { %v13004_v11 = vadd.f32 %v10588_v28, %v4231_v20  ;;  %10750 = vmatpush3.bf16.msra.mxu0 %v11782_v13  ;;  %10690 = vmatpush3.bf16.msra.mxu1 %v11781_v61 }
 0x289   :  { %v10531_v48 = vpop.f32.mrb[116].mxu0  ;;  %10751 = vmatprep.subr.bf16.mxu0 %v11783_v55  ;;  %10691 = vmatprep.subr.bf16.mxu1 %v11785_v53 }
 0x28a   :  { %v10589_v57 = vpop.f32.mrb[112].mxu1  ;;  %v10532_v6 = vpop.f32.mrb[117].mxu0 }
 0x28b   :  { %v10590_v59 = vpop.f32.mrb[113].mxu1  ;;  %v10533_v60 = vadd.f32 %v10532_v6, %v10531_v48  ;;  %v10534_v16 = vpop.f32.mrb[118].mxu0 }
 0x28c   :  { %v10591_v30 = vadd.f32 %v10590_v59, %v10589_v57  ;;  %v10592_v10 = vpop.f32.mrb[114].mxu1  ;;  %v10535_v51 = vpop.f32.mrb[119].mxu0  ;;  %10752 = vmatpush3.bf16.msra.mxu0 %v11784_v18  ;;  %10692 = vmatpush3.bf16.msra.mxu1 %v11787_v52  ;;  %v11791_v59 = vld [vmem:[#allocation11 + $0x140] sm:$0xff]  }
 0x28d   :  { %v10593_v36 = vpop.f32.mrb[115].mxu1  ;;  %v4244_v58 = vadd.f32 %v10533_v60, %v12966_v49  ;;  %v10536_v9 = vadd.f32 %v10535_v51, %v10534_v16  ;;  %10753 = vmatprep.subr.bf16.mxu0 %v11786_v40  ;;  %10805 = vmatprep.subr.bf16.mxu1 %v11791_v59 }
 0x28e   :  { %v13008_v5 = vadd.f32 %v10591_v30, %v4236_v54  ;;  %v10594_v35 = vadd.f32 %v10593_v36, %v10592_v10 }
 0x28f   :  { %v4247_v47 = vadd.f32 %v10536_v9, %v12968_v43 }
 0x290   :  { %v13010_v37 = vadd.f32 %v10594_v35, %v4239_v50  ;;  %10754 = vmatpush3.bf16.msra.mxu0 %v11788_v38 }
 0x291   :  { %v10537_v49 = vpop.f32.mrb[120].mxu0  ;;  %10755 = vmatprep.subr.bf16.mxu0 %v11789_v17 }
 0x292   :  { %v10595_v19 = vpop.f32.mrb[116].mxu1  ;;  %v10538_v24 = vpop.f32.mrb[121].mxu0 }
 0x293   :  { %v10596_v20 = vpop.f32.mrb[117].mxu1  ;;  %v10539_v44 = vadd.f32 %v10538_v24, %v10537_v49  ;;  %v10540_v28 = vpop.f32.mrb[122].mxu0 }
 0x294   :  { %v10597_v21 = vadd.f32 %v10596_v20, %v10595_v19  ;;  %v10598_v25 = vpop.f32.mrb[118].mxu1  ;;  %v10541_v4 = vpop.f32.mrb[123].mxu0  ;;  %10756 = vmatpush3.bf16.msra.mxu0 %v11790_v62 }
 0x295   :  { %v10599_v46 = vpop.f32.mrb[119].mxu1  ;;  %v4252_v54 = vadd.f32 %v10539_v44, %v12972_v8  ;;  %v10542_v56 = vadd.f32 %v10541_v4, %v10540_v28 }
 0x296   :  { %v13014_v39 = vadd.f32 %v10597_v21, %v4244_v58  ;;  %v10600_v43 = vadd.f32 %v10599_v46, %v10598_v25 }
 0x297   :  { %v4255_v32 = vadd.f32 %v10542_v56, %v12974_v22 }
 0x298   :  { %v13016_v41 = vadd.f32 %v10600_v43, %v4247_v47 }
 0x299   :  { %v10543_v45 = vpop.f32.mrb[124].mxu0 }
 0x29a   :  { %v10601_v31 = vpop.f32.mrb[120].mxu1  ;;  %v10544_v10 = vpop.f32.mrb[125].mxu0 }
 0x29b   :  { %v10602_v2 = vpop.f32.mrb[121].mxu1  ;;  %v10545_v8 = vadd.f32 %v10544_v10, %v10543_v45  ;;  %v10546_v36 = vpop.f32.mrb[126].mxu0 }
 0x29c   :  { %v10603_v57 = vadd.f32 %v10602_v2, %v10601_v31  ;;  %v10604_v50 = vpop.f32.mrb[122].mxu1  ;;  %v10547_v6 = vpop.f32.mrb[127].mxu0 }
 0x29d   :  { %v10605_v30 = vpop.f32.mrb[123].mxu1  ;;  %v4260_v22 = vadd.f32 %v10545_v8, %v12978_v15  ;;  %v10548_v3 = vadd.f32 %v10547_v6, %v10546_v36  ;;  %v11800_v8 = vld [vmem:[#allocation11 + $0x1c0] sm:$0xff]  }
 0x29e   :  { %v13020_v48 = vadd.f32 %v10603_v57, %v4252_v54  ;;  %v10606_v63 = vadd.f32 %v10605_v30, %v10604_v50  ;;  %10869 = vmatprep.subr.bf16.mxu0 %v11800_v8 }
 0x29f   :  { %v4263_v60 = vadd.f32 %v10548_v3, %v12981_v0 }
 0x2a0   :  { %v13022_v42 = vadd.f32 %v10606_v63, %v4255_v32 }
 0x2a1   :  { %v10629_v58 = vpop.f32.mrb[128].mxu0 }
 0x2a2   :  { %v10607_v35 = vpop.f32.mrb[124].mxu1  ;;  %v10630_v1 = vpop.f32.mrb[129].mxu0 }
 0x2a3   :  { %v10608_v16 = vpop.f32.mrb[125].mxu1  ;;  %v10631_v55 = vadd.f32 %v10630_v1, %v10629_v58  ;;  %v10632_v18 = vpop.f32.mrb[130].mxu0 }
 0x2a4   :  { %v10609_v13 = vadd.f32 %v10608_v16, %v10607_v35  ;;  %v10610_v51 = vpop.f32.mrb[126].mxu1  ;;  %v10633_v19 = vpop.f32.mrb[131].mxu0 }
 0x2a5   :  { %v10611_v9 = vpop.f32.mrb[127].mxu1  ;;  %v13031_v15 = vadd.f32 %v10631_v55, %v12984_v23  ;;  %v10634_v40 = vadd.f32 %v10633_v19, %v10632_v18 }
 0x2a6   :  { %v13026_v33 = vadd.f32 %v10609_v13, %v4260_v22  ;;  %v10612_v12 = vadd.f32 %v10611_v9, %v10610_v51 }
 0x2a7   :  { %v13034_v0 = vadd.f32 %v10634_v40, %v12987_v29  ;;  %v4483_v20 = vmul.f32 %v13031_v15, %v13031_v15 }
 0x2a8   :  { %v13028_v47 = vadd.f32 %v10612_v12, %v4263_v60 }
 0x2a9   :  { %v4460_v61 = vadd.f32 %v13034_v0, %v13031_v15  ;;  %v4484_v53 = vmul.f32 %v13034_v0, %v13034_v0  ;;  %v10635_v21 = vpop.f32.mrb[132].mxu0 }
 0x2aa   :  { %v10636_v25 = vpop.f32.mrb[133].mxu0 }
 0x2ab   :  { %v4499_v49 = vadd.f32 %v4484_v53, %v4483_v20  ;;  %v10637_v38 = vadd.f32 %v10636_v25, %v10635_v21  ;;  %v10638_v17 = vpop.f32.mrb[134].mxu0 }
 0x2ac   :  { %v10639_v23 = vpop.f32.mrb[135].mxu0 }
 0x2ad   :  { %v13043_v46 = vadd.f32 %v10637_v38, %v12990_v34  ;;  %v10640_v29 = vadd.f32 %v10639_v23, %v10638_v17 }
 0x2af   :  { %v4461_v24 = vadd.f32 %v4460_v61, %v13043_v46  ;;  %v4485_v43 = vmul.f32 %v13043_v46, %v13043_v46  ;;  %v13049_v44 = vadd.f32 %v10640_v29, %v12993_v7 }
 0x2b1   :  { %v4500_v28 = vadd.f32 %v4499_v49, %v4485_v43  ;;  %v4462_v52 = vadd.f32 %v4461_v24, %v13049_v44  ;;  %v4486_v4 = vmul.f32 %v13049_v44, %v13049_v44 }
 0x2b3   :  { %v10641_v62 = vpop.f32.mrb[136].mxu0  ;;  %v4501_v56 = vadd.f32 %v4500_v28, %v4486_v4 }
 0x2b4   :  { %v10642_v54 = vpop.f32.mrb[137].mxu0 }
 0x2b5   :  { %v10643_v34 = vadd.f32 %v10642_v54, %v10641_v62  ;;  %v10644_v31 = vpop.f32.mrb[138].mxu0 }
 0x2b6   :  { %v10645_v32 = vpop.f32.mrb[139].mxu0 }
 0x2b7   :  { %v13055_v2 = vadd.f32 %v10643_v34, %v12996_v14  ;;  %v10646_v57 = vadd.f32 %v10645_v32, %v10644_v31 }
 0x2b9   :  { %v4463_v50 = vadd.f32 %v4462_v52, %v13055_v2  ;;  %v4487_v7 = vmul.f32 %v13055_v2, %v13055_v2  ;;  %v13061_v45 = vadd.f32 %v10646_v57, %v12998_v26 }
 0x2bb   :  { %v4502_v59 = vadd.f32 %v4501_v56, %v4487_v7  ;;  %v4464_v30 = vadd.f32 %v4463_v50, %v13061_v45  ;;  %v4488_v10 = vmul.f32 %v13061_v45, %v13061_v45 }
 0x2bd   :  { %v4503_v14 = vadd.f32 %v4502_v59, %v4488_v10 }
 0x2c4   :  { %v10647_v63 = vpop.f32.mrb[140].mxu0 }
 0x2c5   :  { %v10648_v36 = vpop.f32.mrb[141].mxu0 }
 0x2c6   :  { %v10649_v6 = vadd.f32 %v10648_v36, %v10647_v63  ;;  %v10650_v22 = vpop.f32.mrb[142].mxu0 }
 0x2c7   :  { %v10651_v3 = vpop.f32.mrb[143].mxu0 }
 0x2c8   :  { %v13067_v35 = vadd.f32 %v10649_v6, %v13002_v27  ;;  %v10652_v60 = vadd.f32 %v10651_v3, %v10650_v22 }
 0x2ca   :  { %v4465_v26 = vadd.f32 %v4464_v30, %v13067_v35  ;;  %v4489_v16 = vmul.f32 %v13067_v35, %v13067_v35  ;;  %v13073_v13 = vadd.f32 %v10652_v60, %v13004_v11 }
 0x2cc   :  { %v4504_v51 = vadd.f32 %v4503_v14, %v4489_v16  ;;  %v4466_v58 = vadd.f32 %v4465_v26, %v13073_v13  ;;  %v4490_v9 = vmul.f32 %v13073_v13, %v13073_v13  ;;  %v10653_v1 = vpop.f32.mrb[144].mxu0 }
 0x2cd   :  { %v10654_v12 = vpop.f32.mrb[145].mxu0 }
 0x2ce   :  { %v4505_v55 = vadd.f32 %v4504_v51, %v4490_v9  ;;  %v10655_v27 = vadd.f32 %v10654_v12, %v10653_v1  ;;  %v10656_v18 = vpop.f32.mrb[146].mxu0 }
 0x2cf   :  { %v10657_v19 = vpop.f32.mrb[147].mxu0 }
 0x2d0   :  { %v13079_v40 = vadd.f32 %v10655_v27, %v13008_v5  ;;  %v10658_v20 = vadd.f32 %v10657_v19, %v10656_v18 }
 0x2d2   :  { %v4467_v61 = vadd.f32 %v4466_v58, %v13079_v40  ;;  %v4491_v11 = vmul.f32 %v13079_v40, %v13079_v40  ;;  %v13085_v53 = vadd.f32 %v10658_v20, %v13010_v37 }
 0x2d4   :  { %v4506_v21 = vadd.f32 %v4505_v55, %v4491_v11  ;;  %v4468_v25 = vadd.f32 %v4467_v61, %v13085_v53  ;;  %v4492_v49 = vmul.f32 %v13085_v53, %v13085_v53  ;;  %v10659_v38 = vpop.f32.mrb[148].mxu0 }
 0x2d5   :  { %v10660_v17 = vpop.f32.mrb[149].mxu0 }
 0x2d6   :  { %v4507_v23 = vadd.f32 %v4506_v21, %v4492_v49  ;;  %v10661_v5 = vadd.f32 %v10660_v17, %v10659_v38  ;;  %v10662_v29 = vpop.f32.mrb[150].mxu0 }
 0x2d7   :  { %v10663_v24 = vpop.f32.mrb[151].mxu0 }
 0x2d8   :  { %v13091_v43 = vadd.f32 %v10661_v5, %v13014_v39  ;;  %v10664_v28 = vadd.f32 %v10663_v24, %v10662_v29 }
 0x2da   :  { %v4469_v52 = vadd.f32 %v4468_v25, %v13091_v43  ;;  %v4493_v37 = vmul.f32 %v13091_v43, %v13091_v43  ;;  %v13097_v4 = vadd.f32 %v10664_v28, %v13016_v41 }
 0x2dc   :  { %v4508_v62 = vadd.f32 %v4507_v23, %v4493_v37  ;;  %v4470_v54 = vadd.f32 %v4469_v52, %v13097_v4  ;;  %v4494_v56 = vmul.f32 %v13097_v4, %v13097_v4  ;;  %v10665_v34 = vpop.f32.mrb[152].mxu0 }
 0x2dd   :  { %v10666_v31 = vpop.f32.mrb[153].mxu0 }
 0x2de   :  { %v4509_v32 = vadd.f32 %v4508_v62, %v4494_v56  ;;  %v10667_v39 = vadd.f32 %v10666_v31, %v10665_v34  ;;  %v10668_v57 = vpop.f32.mrb[154].mxu0 }
 0x2df   :  { %v10669_v50 = vpop.f32.mrb[155].mxu0 }
 0x2e0   :  { %v13103_v7 = vadd.f32 %v10667_v39, %v13020_v48  ;;  %v10670_v59 = vadd.f32 %v10669_v50, %v10668_v57  ;;  %v13161_v50 = vld [vmem:[%s14790_s5] ss:$0 sm:$0xff] }
 0x2e2   :  { %v4471_v30 = vadd.f32 %v4470_v54, %v13103_v7  ;;  %v4495_v41 = vmul.f32 %v13103_v7, %v13103_v7  ;;  %v13109_v10 = vadd.f32 %v10670_v59, %v13022_v42 }
 0x2e4   :  { %v4510_v63 = vadd.f32 %v4509_v32, %v4495_v41  ;;  %v4472_v8 = vadd.f32 %v4471_v30, %v13109_v10  ;;  %v4496_v36 = vmul.f32 %v13109_v10, %v13109_v10  ;;  %v10671_v14 = vpop.f32.mrb[156].mxu0 }
 0x2e5   :  { %v10672_v6 = vpop.f32.mrb[157].mxu0 }
 0x2e6   :  { %v4511_v22 = vadd.f32 %v4510_v63, %v4496_v36  ;;  %v10673_v48 = vadd.f32 %v10672_v6, %v10671_v14  ;;  %v10674_v3 = vpop.f32.mrb[158].mxu0 }
 0x2e7   :  { %v10675_v60 = vpop.f32.mrb[159].mxu0 }
 0x2e8   :  { %v13115_v26 = vadd.f32 %v10673_v48, %v13026_v33  ;;  %v10676_v16 = vadd.f32 %v10675_v60, %v10674_v3 }
 0x2ea   :  { %v4473_v51 = vadd.f32 %v4472_v8, %v13115_v26  ;;  %v4497_v42 = vmul.f32 %v13115_v26, %v13115_v26  ;;  %v4457_v58 = vadd.f32 %v10676_v16, %v13028_v47  ;;  %v13170_v8 = vld [vmem:[%s14791_s6] ss:$0 sm:$0xff] }
 0x2ec   :  { %v4512_v9 = vadd.f32 %v4511_v22, %v4497_v42  ;;  %v4474_v1 = vadd.f32 %v4473_v51, %v4457_v58  ;;  %v4498_v12 = vmul.f32 %v4457_v58, %v4457_v58 }
 0x2ee   :  { %v4475_v55 = vrot.slane %v4474_v1, 4  ;;  %v4513_v27 = vadd.f32 %v4512_v9, %v4498_v12 }
 0x2f0   :  { %v4476_v18 = vadd.f32 %v4475_v55, %v4474_v1  ;;  %v4514_v19 = vrot.slane %v4513_v27, 4 }
 0x2f2   :  { %v4477_v20 = vrot.slane %v4476_v18, 2  ;;  %v4515_v61 = vadd.f32 %v4514_v19, %v4513_v27 }
 0x2f4   :  { %v4478_v11 = vadd.f32 %v4477_v20, %v4476_v18  ;;  %v4516_v33 = vrot.slane %v4515_v61, 2  ;;  %v4737_v18 = vld [vmem:[#allocation3 + $0x1] sm:$0xff] }
 0x2f6   :  { %v4479_v21 = vrot.slane %v4478_v11, 1  ;;  %v4517_v25 = vadd.f32 %v4516_v33, %v4515_v61 }
 0x2f8   :  { %v4480_v49 = vadd.f32 %v4479_v21, %v4478_v11  ;;  %v4518_v38 = vrot.slane %v4517_v25, 1 }
 0x2fa   :  { %v13121_v17 = vmul.f32 0.0078125, %v4480_v49  ;;  %v4519_v23 = vadd.f32 %v4518_v38, %v4517_v25 }
 0x2fc   :  { %v4520_v5 = vmul.f32 0.0078125, %v4519_v23  ;;  %v4521_v47 = vmul.f32 %v13121_v17, %v13121_v17  ;;  %v4538_v29 = vsub.f32 %v4457_v58, %v13121_v17  ;;  %v4523_v24 = vsub.f32 %v13031_v15, %v13121_v17 }
 0x2fd   :  { %v4524_v28 = vsub.f32 %v13034_v0, %v13121_v17  ;;  %v4525_v52 = vsub.f32 %v13043_v46, %v13121_v17  ;;  %v4526_v37 = vsub.f32 %v13049_v44, %v13121_v17  ;;  %v4527_v62 = vsub.f32 %v13055_v2, %v13121_v17 }
 0x2fe   :  { %v4522_v54 = vsub.f32 %v4520_v5, %v4521_v47  ;;  %v4528_v56 = vsub.f32 %v13061_v45, %v13121_v17  ;;  %v4529_v34 = vsub.f32 %v13067_v35, %v13121_v17  ;;  %v4530_v15 = vsub.f32 %v13073_v13, %v13121_v17 }
 0x2ff   :  { %v4531_v0 = vsub.f32 %v13079_v40, %v13121_v17  ;;  %v4532_v46 = vsub.f32 %v13085_v53, %v13121_v17  ;;  %v4533_v44 = vsub.f32 %v13091_v43, %v13121_v17  ;;  %v4534_v2 = vsub.f32 %v13097_v4, %v13121_v17  ;;  %v4769_v53 = vld [vmem:[#allocation3 + $0x2] sm:$0xff] }
 0x300   :  { %v4539_v31 = vmax.f32 %v4522_v54, 0.0  ;;  %v4535_v45 = vsub.f32 %v13103_v7, %v13121_v17  ;;  %v4536_v35 = vsub.f32 %v13109_v10, %v13121_v17  ;;  %v4537_v32 = vsub.f32 %v13115_v26, %v13121_v17 }
 0x302   :  { %v4540_v39 = vadd.f32 1e-05, %v4539_v31 }
 0x304   :  { %11975 = vrsqrt.f32 %v4540_v39 }
 0x30e   :  { %v13156_v57 = vpop.eup %11975 }
 0x30f   :  { %v4557_v59 = vmul.f32 %v13156_v57, %v4538_v29  ;;  %v4542_v30 = vmul.f32 %v13156_v57, %v4523_v24  ;;  %v4543_v41 = vmul.f32 %v13156_v57, %v4524_v28  ;;  %v4544_v63 = vmul.f32 %v13156_v57, %v4525_v52 }
 0x310   :  { %v4545_v36 = vmul.f32 %v13156_v57, %v4526_v37  ;;  %v4546_v14 = vmul.f32 %v13156_v57, %v4527_v62  ;;  %v4547_v6 = vmul.f32 %v13156_v57, %v4528_v56  ;;  %v4548_v22 = vmul.f32 %v13156_v57, %v4529_v34 }
 0x311   :  { %v4578_v48 = vmul.f32 %v13161_v50, %v4557_v59  ;;  %v4563_v3 = vmul.f32 %v13161_v50, %v4542_v30  ;;  %v4564_v60 = vmul.f32 %v13161_v50, %v4543_v41  ;;  %v4565_v16 = vmul.f32 %v13161_v50, %v4544_v63 }
 0x312   :  { %v4566_v51 = vmul.f32 %v13161_v50, %v4545_v36  ;;  %v4567_v42 = vmul.f32 %v13161_v50, %v4546_v14  ;;  %v4568_v58 = vmul.f32 %v13161_v50, %v4547_v6  ;;  %v4569_v9 = vmul.f32 %v13161_v50, %v4548_v22 }
 0x313   :  { %v4599_v1 = vadd.f32 %v13170_v8, %v4578_v48  ;;  %v4584_v12 = vadd.f32 %v13170_v8, %v4563_v3  ;;  %v4585_v55 = vadd.f32 %v13170_v8, %v4564_v60  ;;  %v4586_v27 = vadd.f32 %v13170_v8, %v4565_v16  ;;  %v11792_v16 = vld [vmem:[#allocation11 + $0x100] sm:$0xff]  }
 0x314   :  { %v4587_v19 = vadd.f32 %v13170_v8, %v4566_v51  ;;  %v4588_v20 = vadd.f32 %v13170_v8, %v4567_v42  ;;  %v4589_v61 = vadd.f32 %v13170_v8, %v4568_v58  ;;  %v4590_v11 = vadd.f32 %v13170_v8, %v4569_v9  ;;  %v11793_v9 = vld [vmem:[#allocation11 + $0x148] sm:$0xff]  }
 0x315   :  { %vm4615_vm2 = vcmp.ge.f32.partialorder %v4599_v1, 0.0  ;;  %v4631_v33 = vmul.f32 0.2, %v4599_v1  ;;  %vm4600_vm3 = vcmp.ge.f32.partialorder %v4584_v12, 0.0  ;;  %v4616_v21 = vmul.f32 0.2, %v4584_v12 }
 0x316   :  { %vm4601_vm4 = vcmp.ge.f32.partialorder %v4585_v55, 0.0  ;;  %v4617_v25 = vmul.f32 0.2, %v4585_v55  ;;  %vm4602_vm5 = vcmp.ge.f32.partialorder %v4586_v27, 0.0  ;;  %v4618_v49 = vmul.f32 0.2, %v4586_v27 }
 0x317   :  { %v4647_v38 = vsel %vm4615_vm2, %v4599_v1, %v4631_v33  ;;  %v13192_v23 = vsel %vm4600_vm3, %v4584_v12, %v4616_v21  ;;  %vm4603_vm6 = vcmp.ge.f32.partialorder %v4587_v19, 0.0  ;;  %v4619_v5 = vmul.f32 0.2, %v4587_v19  ;;  %v11804_v21 = vld [vmem:[#allocation11 + $0x188] sm:$0xff]  }
 0x318   :  { %4704 = vst [vmem:[#allocation3 + $0x121] sm:$0xff] %v4647_v38  ;;  %4689 = vst [vmem:[#allocation3 + $0x11] sm:$0xff] %v13192_v23  ;;  %v4753_v47 = vpack.c.bf16 %v13192_v23, %v4737_v18  ;;  %v13196_v29 = vsel %vm4601_vm4, %v4585_v55, %v4617_v25  ;;  %v13198_v24 = vsel %vm4602_vm5, %v4586_v27, %v4618_v49  ;;  %vm4604_vm7 = vcmp.ge.f32.partialorder %v4588_v20, 0.0  ;;  %v11803_v27 = vld [vmem:[#allocation11 + $0x1c8] sm:$0xff]  }
 0x319   :  { %4690 = vst [vmem:[#allocation3 + $0x21] sm:$0xff] %v13196_v29  ;;  %4691 = vst [vmem:[#allocation3 + $0x31] sm:$0xff] %v13198_v24  ;;  %v13204_v28 = vpack.c.bf16 %v13198_v24, %v13196_v29  ;;  %v13206_v52 = vsel %vm4603_vm6, %v4587_v19, %v4619_v5  ;;  %v4620_v37 = vmul.f32 0.2, %v4588_v20  ;;  %vm4605_vm8 = vcmp.ge.f32.partialorder %v4589_v61, 0.0  ;;  %v11794_v18 = vld [vmem:[#allocation11 + $0x108] sm:$0xff]  }
 0x31a   :  { %5674 = vmatprep.mubr.bf16.mxu1 %v4753_v47  ;;  %4692 = vst [vmem:[#allocation3 + $0x41] sm:$0xff] %v13206_v52  ;;  %v4621_v62 = vmul.f32 0.2, %v4589_v61  ;;  %vm4606_vm9 = vcmp.ge.f32.partialorder %v4590_v11, 0.0  ;;  %v4622_v54 = vmul.f32 0.2, %v4590_v11  ;;  %v4549_v56 = vmul.f32 %v13156_v57, %v4530_v15 }
 0x31b   :  { %v13213_v34 = vsel %vm4604_vm7, %v4588_v20, %v4620_v37  ;;  %v4550_v31 = vmul.f32 %v13156_v57, %v4531_v0  ;;  %v4551_v39 = vmul.f32 %v13156_v57, %v4532_v46  ;;  %v4552_v59 = vmul.f32 %v13156_v57, %v4533_v44  ;;  %v11795_v20 = vld [vmem:[#allocation11 + $0x150] sm:$0xff]  }
 0x31c   :  { %4693 = vst [vmem:[#allocation3 + $0x51] sm:$0xff] %v13213_v34  ;;  %v13230_v13 = vpack.c.bf16 %v13213_v34, %v13206_v52  ;;  %v13232_v15 = vsel %vm4605_vm8, %v4589_v61, %v4621_v62  ;;  %v13234_v40 = vsel %vm4606_vm9, %v4590_v11, %v4622_v54  ;;  %v4570_v0 = vmul.f32 %v13161_v50, %v4549_v56  ;;  %v11806_v37 = vld [vmem:[#allocation11 + $0x1d0] sm:$0xff]  }
 0x31d   :  { %4694 = vst [vmem:[#allocation3 + $0x61] sm:$0xff] %v13232_v15  ;;  %4695 = vst [vmem:[#allocation3 + $0x71] sm:$0xff] %v13234_v40  ;;  %v13241_v43 = vpack.c.bf16 %v13234_v40, %v13232_v15  ;;  %v4571_v46 = vmul.f32 %v13161_v50, %v4550_v31  ;;  %v4572_v44 = vmul.f32 %v13161_v50, %v4551_v39  ;;  %v11796_v39 = vld [vmem:[#allocation11 + $0x110] sm:$0xff]  }
 0x31e   :  { %v4573_v30 = vmul.f32 %v13161_v50, %v4552_v59  ;;  %v4591_v41 = vadd.f32 %v13170_v8, %v4570_v0  ;;  %v4553_v63 = vmul.f32 %v13156_v57, %v4534_v2  ;;  %v4554_v36 = vmul.f32 %v13156_v57, %v4535_v45  ;;  %v13268_v45 = vld [vmem:[#allocation2 + $0x8] sm:$0xff] }
 0x31f   :  { %v4555_v14 = vmul.f32 %v13156_v57, %v4536_v35  ;;  %v4801_v6 = vld [vmem:[#allocation3 + $0x10] sm:$0xff]  ;;  %v4592_v48 = vadd.f32 %v13170_v8, %v4571_v46  ;;  %v4593_v3 = vadd.f32 %v13170_v8, %v4572_v44  ;;  %v4556_v7 = vmul.f32 %v13156_v57, %v4537_v32  ;;  %v11802_v32 = vld [vmem:[#allocation11 + $0x180] sm:$0xff]   ;;  %v11797_v46 = vld [vmem:[#allocation11 + $0x158] sm:$0xff]  }
 0x320   :  { %v13259_v22 = vld [vmem:[#allocation3 + $0x12] sm:$0xff]  ;;  %v4594_v4 = vadd.f32 %v13170_v8, %v4573_v30  ;;  %v4802_v2 = vld [vmem:[#allocation3 + $0x20] sm:$0xff]  ;;  %v4721_v10 = vpack.c.bf16 %v4801_v6, %v13268_v45  ;;  %vm4607_vm10 = vcmp.ge.f32.partialorder %v4591_v41, 0.0  ;;  %v4623_v51 = vmul.f32 0.2, %v4591_v41 }
 0x321   :  { %v4785_v35 = vpack.c.bf16 %v13259_v22, %v4769_v53  ;;  %v4803_v60 = vld [vmem:[#allocation3 + $0x30] sm:$0xff]  ;;  %v4817_v42 = vpack.c.bf16 %v4802_v2, %v4801_v6  ;;  %v13272_v58 = vld [vmem:[#allocation3 + $0x40] sm:$0xff]  ;;  %vm4608_vm11 = vcmp.ge.f32.partialorder %v4592_v48, 0.0  ;;  %v4624_v1 = vmul.f32 0.2, %v4592_v48 }
 0x322   :  { %5675 = vmatmul.mubr.bf16.vlgmr.msra.gmra.mrb[128].mxu1 %v4721_v10  ;;  %v4818_v26 = vpack.c.bf16 %v13272_v58, %v4803_v60  ;;  %v13275_v17 = vsel %vm4607_vm10, %v4591_v41, %v4623_v51  ;;  %vm4609_vm12 = vcmp.ge.f32.partialorder %v4593_v3, 0.0  ;;  %v4625_v12 = vmul.f32 0.2, %v4593_v3  ;;  %v13293_v38 = vld [vmem:[#allocation3 + $0x22] sm:$0xff]  ;;  %v13295_v5 = vld [vmem:[#allocation3 + $0x32] sm:$0xff] }
 0x323   :  { %5771 = vmatprep.mubr.bf16.mxu0 %v4817_v42  ;;  %5682 = vmatprep.mubr.bf16.mxu1 %v13204_v28  ;;  %4696 = vst [vmem:[#allocation3 + $0x81] sm:$0xff] %v13275_v17  ;;  %v13279_v57 = vsel %vm4608_vm11, %v4592_v48, %v4624_v1  ;;  %vm4610_vm13 = vcmp.ge.f32.partialorder %v4594_v4, 0.0  ;;  %v4574_v55 = vmul.f32 %v13161_v50, %v4553_v63  ;;  %v4626_v19 = vmul.f32 0.2, %v4594_v4  ;;  %v4805_v56 = vld [vmem:[#allocation3 + $0x50] sm:$0xff]  ;;  %v11809_v48 = vld [vmem:[#allocation11 + $0x1d8] sm:$0xff]  }
 0x324   :  { %5772 = vmatmul.mubr.bf16.vlgmr.msra.gmra.mrb[160].mxu0 %v4785_v35  ;;  %10806 = vmatpush3.bf16.msra.mxu1 %v11792_v16  ;;  %4697 = vst [vmem:[#allocation3 + $0xb1] sm:$0xff] %v13279_v57  ;;  %v13284_v61 = vsel %vm4609_vm12, %v4593_v3, %v4625_v12  ;;  %v4575_v25 = vmul.f32 %v13161_v50, %v4554_v36  ;;  %v13304_v31 = vld [vmem:[#allocation3 + $0x60] sm:$0xff]  ;;  %v11798_v3 = vld [vmem:[#allocation11 + $0x118] sm:$0xff]  }
 0x325   :  { %5779 = vmatprep.mubr.bf16.mxu0 %v4818_v26  ;;  %10807 = vmatprep.subr.bf16.mxu1 %v11793_v9  ;;  %4698 = vst [vmem:[#allocation3 + $0xc1] sm:$0xff] %v13284_v61  ;;  %v13287_v11 = vsel %vm4610_vm13, %v4594_v4, %v4626_v19  ;;  %v4595_v33 = vadd.f32 %v13170_v8, %v4574_v55  ;;  %v11810_v16 = vld [vmem:[#allocation11 + $0x198] sm:$0xff]   ;;  %v13339_v42 = vld [vmem:[#allocation3 + $0x42] sm:$0xff]  ;;  %v4807_v55 = vld [vmem:[#allocation3 + $0x70] sm:$0xff] }
 0x326   :  { %10870 = vmatpush3.bf16.msra.mxu0 %v11802_v32  ;;  %v13291_v49 = vpack.c.bf16 %v4803_v60, %v4802_v2  ;;  %4699 = vst [vmem:[#allocation3 + $0xd1] sm:$0xff] %v13287_v11  ;;  %v13300_v47 = vpack.c.bf16 %v13287_v11, %v13284_v61  ;;  %v4576_v62 = vmul.f32 %v13161_v50, %v4555_v14  ;;  %v11808_v14 = vld [vmem:[#allocation11 + $0x190] sm:$0xff]   ;;  %v11799_v2 = vld [vmem:[#allocation11 + $0x160] sm:$0xff]  }
 0x327   :  { %10871 = vmatprep.subr.bf16.mxu0 %v11803_v27  ;;  %v4577_v54 = vmul.f32 %v13161_v50, %v4556_v7  ;;  %vm4611_vm14 = vcmp.ge.f32.partialorder %v4595_v33, 0.0  ;;  %v4627_v59 = vmul.f32 0.2, %v4595_v33  ;;  %v4596_v0 = vadd.f32 %v13170_v8, %v4575_v25  ;;  %v13341_v9 = vld [vmem:[#allocation3 + $0x52] sm:$0xff]  ;;  %v11812_v1 = vld [vmem:[#allocation11 + $0x1e0] sm:$0xff]  }
 0x328   :  { %10808 = vmatpush3.bf16.msra.mxu1 %v11794_v18  ;;  %v4849_v53 = vpack.c.bf16 %v13196_v29, %v13192_v23  ;;  %v4597_v44 = vadd.f32 %v13170_v8, %v4576_v62  ;;  %v4850_v50 = vpack.c.bf16 %v13206_v52, %v13198_v24  ;;  %v13316_v41 = vpack.c.bf16 %v13295_v5, %v13293_v38  ;;  %v11801_v18 = vld [vmem:[#allocation11 + $0x120] sm:$0xff]   ;;  %v11815_v62 = vld [vmem:[#allocation11 + $0x1e8] sm:$0xff]   ;;  %v11829_v52 = vld [vmem:[#allocation11 + $0x230] sm:$0xff]  }
 0x329   :  { %10809 = vmatprep.subr.bf16.mxu1 %v11795_v20  ;;  %v4598_v30 = vadd.f32 %v13170_v8, %v4577_v54  ;;  %v13318_v63 = vsel %vm4611_vm14, %v4595_v33, %v4627_v59  ;;  %vm4612_vm15 = vcmp.ge.f32.partialorder %v4596_v0, 0.0  ;;  %v4628_v36 = vmul.f32 0.2, %v4596_v0  ;;  %v11805_v33 = vld [vmem:[#allocation11 + $0x168] sm:$0xff]   ;;  %v11814_v25 = vld [vmem:[#allocation11 + $0x1a0] sm:$0xff]  }
 0x32a   :  { %5683 = vmatmul.mubr.bf16.gmra.mrb[132].mxu1 %v13291_v49  ;;  %10872 = vmatpush3.bf16.msra.mxu0 %v11804_v21  ;;  %v4819_v6 = vpack.c.bf16 %v13304_v31, %v4805_v56  ;;  %4700 = vst [vmem:[#allocation3 + $0xe1] sm:$0xff] %v13318_v63  ;;  %vm4613_vm0 = vcmp.ge.f32.partialorder %v4597_v44, 0.0  ;;  %v4629_v8 = vmul.f32 0.2, %v4597_v44  ;;  %v4851_v60 = vpack.c.bf16 %v13232_v15, %v13213_v34  ;;  %v13353_v27 = vld [vmem:[#allocation3 + $0x80] sm:$0xff]  ;;  %v11807_v54 = vld [vmem:[#allocation11 + $0x128] sm:$0xff]  }
 0x32b   :  { %5690 = vmatprep.mubr.bf16.mxu1 %v13230_v13  ;;  %10873 = vmatprep.subr.bf16.mxu0 %v11806_v37  ;;  %vm4614_vm1 = vcmp.ge.f32.partialorder %v4598_v30, 0.0  ;;  %v13324_v4 = vsel %vm4612_vm15, %v4596_v0, %v4628_v36  ;;  %v4630_v7 = vmul.f32 0.2, %v4598_v30  ;;  %v4852_v32 = vpack.c.bf16 %v13275_v17, %v13234_v40  ;;  %v11816_v59 = vld [vmem:[#allocation11 + $0x1a8] sm:$0xff]   ;;  %v4809_v36 = vld [vmem:[#allocation3 + $0xb0] sm:$0xff]  ;;  %v11827_v23 = vld [vmem:[#allocation11 + $0x220] sm:$0xff]  }
 0x32c   :  { %5780 = vmatmul.mubr.bf16.gmra.mrb[164].mxu0 %v13316_v41  ;;  %10810 = vmatpush3.bf16.msra.mxu1 %v11796_v39  ;;  %4701 = vst [vmem:[#allocation3 + $0xf1] sm:$0xff] %v13324_v4  ;;  %v13329_v10 = vpack.c.bf16 %v13324_v4, %v13318_v63  ;;  %v13331_v35 = vsel %vm4613_vm0, %v4597_v44, %v4629_v8  ;;  %v4745_v39 = vld [vmem:[#allocation3 + $0xa1] sm:$0xff]  ;;  %v11818_v44 = vld [vmem:[#allocation11 + $0x1f0] sm:$0xff]  }
 0x32d   :  { %5787 = vmatprep.mubr.bf16.mxu0 %v4819_v6  ;;  %10811 = vmatprep.subr.bf16.mxu1 %v11797_v46  ;;  %4702 = vst [vmem:[#allocation3 + $0x101] sm:$0xff] %v13331_v35  ;;  %v13337_v51 = vsel %vm4614_vm1, %v4598_v30, %v4630_v7  ;;  %v13351_v12 = vpack.c.bf16 %v4805_v56, %v13272_v58  ;;  %v11811_v56 = vld [vmem:[#allocation11 + $0x170] sm:$0xff]   ;;  %v13369_v0 = vld [vmem:[#allocation3 + $0x62] sm:$0xff] }
 0x32e   :  { %10874 = vmatpush3.bf16.msra.mxu0 %v11808_v14  ;;  %4703 = vst [vmem:[#allocation3 + $0x111] sm:$0xff] %v13337_v51  ;;  %v13346_v26 = vpack.c.bf16 %v13337_v51, %v13331_v35  ;;  %v4853_v19 = vpack.c.bf16 %v13284_v61, %v13279_v57  ;;  %v4854_v20 = vpack.c.bf16 %v13318_v63, %v13287_v11  ;;  %v13371_v46 = vld [vmem:[#allocation3 + $0x72] sm:$0xff]  ;;  %v4810_v14 = vld [vmem:[#allocation3 + $0xc0] sm:$0xff] }
 0x32f   :  { %10875 = vmatprep.subr.bf16.mxu0 %v11809_v48  ;;  %v4855_v21 = vpack.c.bf16 %v13331_v35, %v13324_v4  ;;  %v13364_v58 = vpack.c.bf16 %v13341_v9, %v13339_v42  ;;  %v4820_v37 = vpack.c.bf16 %v13353_v27, %v4807_v55  ;;  %v13374_v30 = vpack.c.bf16 %v4807_v55, %v13304_v31  ;;  %v11813_v6 = vld [vmem:[#allocation11 + $0x130] sm:$0xff]   ;;  %v11817_v48 = vld [vmem:[#allocation11 + $0x178] sm:$0xff]   ;;  %v4872_v29 = vld [vmem:[#allocation3 + $0x82] sm:$0xff] }
 0x330   :  { %10812 = vmatpush3.bf16.msra.mxu1 %v11798_v3  ;;  %v4757_v8 = vpack.c.bf16 %v13279_v57, %v4745_v39  ;;  %v13380_v3 = vpack.c.bf16 %v13371_v46, %v13369_v0  ;;  %v11820_v7 = vld [vmem:[#allocation11 + $0x1b0] sm:$0xff]   ;;  %v11821_v31 = vld [vmem:[#allocation11 + $0x1f8] sm:$0xff]   ;;  %v13388_v39 = vld [vmem:[#allocation3 + $0xc2] sm:$0xff]  ;;  %v4917_v34 = vpack.c.bf16 %v13268_v45, %v13353_v27 }
 0x331   :  { %10813 = vmatprep.subr.bf16.mxu1 %v11799_v2  ;;  %v4821_v2 = vpack.c.bf16 %v4810_v14, %v4809_v36  ;;  %v11822_v55 = vld [vmem:[#allocation11 + $0x1b8] sm:$0xff]  }
 0x332   :  { %5691 = vmatmul.mubr.bf16.gmra.mrb[136].mxu1 %v13351_v12  ;;  %10876 = vmatpush3.bf16.msra.mxu0 %v11810_v16  ;;  %v11819_v16 = vld [vmem:[#allocation11 + $0x138] sm:$0xff]  }
 0x333   :  { %5698 = vmatprep.mubr.bf16.mxu1 %v13241_v43  ;;  %10877 = vmatprep.subr.bf16.mxu0 %v11812_v1  ;;  %v11823_v1 = vld [vmem:[#allocation11 + $0x200] sm:$0xff]   ;;  %v4945_v57 = vld [vmem:[#allocation3 + $0x131] sm:$0xff] }
 0x334   :  { %5788 = vmatmul.mubr.bf16.gmra.mrb[168].mxu0 %v13364_v58  ;;  %10814 = vmatpush3.bf16.msra.mxu1 %v11801_v18  ;;  %v4777_v18 = vld [vmem:[#allocation3 + $0xa2] sm:$0xff]  ;;  %v4969_v4 = vld [vmem:[#allocation3 + $0x92] sm:$0xff] }
 0x335   :  { %5795 = vmatprep.mubr.bf16.mxu0 %v4820_v37  ;;  %10815 = vmatprep.subr.bf16.mxu1 %v11805_v33  ;;  %v13383_v33 = vld [vmem:[#allocation3 + $0xb2] sm:$0xff] }
 0x336   :  { %10878 = vmatpush3.bf16.msra.mxu0 %v11814_v25  ;;  %v4725_v25 = vpack.c.bf16 %v4809_v36, %v13268_v45  ;;  %v4811_v37 = vld [vmem:[#allocation3 + $0xd0] sm:$0xff] }
 0x337   :  { %10879 = vmatprep.subr.bf16.mxu0 %v11815_v62  ;;  %v4812_v62 = vld [vmem:[#allocation3 + $0xe0] sm:$0xff]  ;;  %v4813_v36 = vld [vmem:[#allocation3 + $0xf0] sm:$0xff] }
 0x338   :  { %10816 = vmatpush3.bf16.msra.mxu1 %v11807_v54  ;;  %v4789_v54 = vpack.c.bf16 %v13383_v33, %v4777_v18  ;;  %v4977_v35 = vld [vmem:[#allocation3 + $0x132] sm:$0xff] }
 0x339   :  { %10817 = vmatprep.subr.bf16.mxu1 %v11811_v56  ;;  %v4822_v56 = vpack.c.bf16 %v4812_v62, %v4811_v37 }
 0x33a   :  { %5699 = vmatmul.mubr.bf16.gmra.mrb[140].mxu1 %v13374_v30  ;;  %10880 = vmatpush3.bf16.msra.mxu0 %v11816_v59  ;;  %v13390_v59 = vld [vmem:[#allocation3 + $0xd2] sm:$0xff] }
 0x33b   :  { %5706 = vmatprep.mubr.bf16.mxu1 %v4757_v8  ;;  %10881 = vmatprep.subr.bf16.mxu0 %v11818_v44  ;;  %v13392_v44 = vpack.c.bf16 %v4811_v37, %v4810_v14  ;;  %v13397_v8 = vpack.c.bf16 %v13390_v59, %v13388_v39  ;;  %v13405_v14 = vpack.c.bf16 %v4813_v36, %v4812_v62  ;;  %v13417_v37 = vld [vmem:[#allocation3 + $0x112] sm:$0xff] }
 0x33c   :  { %5796 = vmatmul.mubr.bf16.gmra.mrb[172].mxu0 %v13380_v3  ;;  %10818 = vmatpush3.bf16.msra.mxu1 %v11813_v6  ;;  %v4814_v6 = vld [vmem:[#allocation3 + $0x100] sm:$0xff] }
 0x33d   :  { %5803 = vmatprep.mubr.bf16.mxu0 %v4821_v2  ;;  %10819 = vmatprep.subr.bf16.mxu1 %v11817_v48  ;;  %v4823_v48 = vpack.c.bf16 %v4814_v6, %v4813_v36  ;;  %v13403_v2 = vld [vmem:[#allocation3 + $0xf2] sm:$0xff]  ;;  %v11824_v36 = vld [vmem:[#allocation11 + $0x208] sm:$0xff]  }
 0x33e   :  { %10882 = vmatpush3.bf16.msra.mxu0 %v11820_v7  ;;  %v13401_v7 = vld [vmem:[#allocation3 + $0xe2] sm:$0xff] }
 0x33f   :  { %10883 = vmatprep.subr.bf16.mxu0 %v11821_v31  ;;  %v4815_v31 = vld [vmem:[#allocation3 + $0x110] sm:$0xff]  ;;  %v4886_v15 = vpack.c.bf16 %v13401_v7, %v13390_v59 }
 0x340   :  { %10820 = vmatpush3.bf16.msra.mxu1 %v11819_v16  ;;  %v13407_v16 = vld [vmem:[#allocation3 + $0x120] sm:$0xff]  ;;  %v13419_v62 = vpack.c.bf16 %v4815_v31, %v4814_v6 }
 0x341   :  { %11493 = vmatprep.subr.bf16.mxu1 %v11823_v1  ;;  %v4824_v18 = vpack.c.bf16 %v13407_v16, %v4815_v31  ;;  %v4921_v63 = vpack.c.bf16 %v13268_v45, %v13407_v16 }
 0x342   :  { %5707 = vmatmul.mubr.bf16.gmra.mrb[144].mxu1 %v4725_v25  ;;  %10884 = vmatpush3.bf16.msra.mxu0 %v11822_v55  ;;  %v13412_v55 = vpack.c.bf16 %v13403_v2, %v13401_v7  ;;  %v4783_v25 = vld [vmem:[#allocation3 + $0x102] sm:$0xff] }
 0x343   :  { %5714 = vmatprep.mubr.bf16.mxu1 %v13300_v47  ;;  %v4887_v40 = vpack.c.bf16 %v4783_v25, %v13403_v2 }
 0x344   :  { %5804 = vmatmul.mubr.bf16.gmra.mrb[176].mxu0 %v4789_v54  ;;  %v4881_v54 = vpack.c.bf16 %v13293_v38, %v13259_v22  ;;  %v11825_v22 = vld [vmem:[#allocation11 + $0x210] sm:$0xff]   ;;  %v11826_v38 = vld [vmem:[#allocation11 + $0x218] sm:$0xff]  }
 0x345   :  { %5811 = vmatprep.mubr.bf16.mxu0 %v4822_v56  ;;  %v13425_v56 = vpack.c.bf16 %v13417_v37, %v4783_v25 }
 0x34a   :  { %5715 = vmatmul.mubr.bf16.gmra.mrb[148].mxu1 %v13392_v44 }
 0x34b   :  { %5722 = vmatprep.mubr.bf16.mxu1 %v13329_v10 }
 0x34c   :  { %5812 = vmatmul.mubr.bf16.gmra.mrb[180].mxu0 %v13397_v8 }
 0x34d   :  { %5819 = vmatprep.mubr.bf16.mxu0 %v4823_v48  ;;  %v4882_v48 = vpack.c.bf16 %v13339_v42, %v13295_v5  ;;  %v4884_v5 = vpack.c.bf16 %v4872_v29, %v13371_v46 }
 0x352   :  { %5723 = vmatmul.mubr.bf16.gmra.mrb[152].mxu1 %v13405_v14 }
 0x353   :  { %5730 = vmatprep.mubr.bf16.mxu1 %v13346_v26 }
 0x354   :  { %5820 = vmatmul.mubr.bf16.gmra.mrb[184].mxu0 %v13412_v55 }
 0x355   :  { %5827 = vmatprep.mubr.bf16.mxu0 %v4824_v18 }
 0x35a   :  { %5731 = vmatmul.mubr.bf16.gmra.mrb[156].mxu1 %v13419_v62 }
 0x35b   :  { %5868 = vmatprep.mubr.bf16.mxu1 %v4881_v54 }
 0x35c   :  { %5828 = vmatmul.mubr.bf16.gmra.mrb[188].mxu0 %v13425_v56 }
 0x35d   :  { %5965 = vmatprep.mubr.bf16.mxu0 %v13204_v28  ;;  %v4883_v28 = vpack.c.bf16 %v13369_v0, %v13341_v9 }
 0x362   :  { %5869 = vmatmul.mubr.bf16.vlgmr.msra.gmra.mrb[160].mxu1 %v4849_v53  ;;  %v4885_v53 = vpack.c.bf16 %v13388_v39, %v13383_v33 }
 0x363   :  { %5876 = vmatprep.mubr.bf16.mxu1 %v4882_v48  ;;  %11494 = vmatpush3.bf16.msra.mxu1 %v11823_v1 }
 0x364   :  { %5966 = vmatmul.mubr.bf16.vlgmr.msra.gmra.mrb[192].mxu0 %v13291_v49  ;;  %11495 = vmatprep.subr.bf16.mxu1 %v11824_v36  ;;  %v11828_v49 = vld [vmem:[#allocation11 + $0x228] sm:$0xff]  }
 0x365   :  { %5973 = vmatprep.mubr.bf16.mxu0 %v13230_v13  ;;  %v4937_v13 = vld [vmem:[#allocation3 + $0x91] sm:$0xff] }
 0x366   :  { %v4949_v24 = vpack.c.bf16 %v4937_v13, %v13275_v17  ;;  %v4880_v17 = vld [vmem:[#allocation3 + $0x122] sm:$0xff] }
 0x367   :  { %11496 = vmatpush3.bf16.msra.mxu1 %v11824_v36  ;;  %v4888_v61 = vpack.c.bf16 %v4880_v17, %v13417_v37 }
 0x368   :  { %11497 = vmatprep.subr.bf16.mxu1 %v11825_v22 }
 0x36a   :  { %5877 = vmatmul.mubr.bf16.gmra.mrb[164].mxu1 %v4850_v50 }
 0x36b   :  { %5884 = vmatprep.mubr.bf16.mxu1 %v4883_v28  ;;  %11498 = vmatpush3.bf16.msra.mxu1 %v11825_v22 }
 0x36c   :  { %5974 = vmatmul.mubr.bf16.gmra.mrb[196].mxu0 %v13351_v12  ;;  %11499 = vmatprep.subr.bf16.mxu1 %v11826_v38 }
 0x36d   :  { %5981 = vmatprep.mubr.bf16.mxu0 %v13241_v43  ;;  %v11830_v43 = vld [vmem:[#allocation11 + $0x238] sm:$0xff]  }
 0x36f   :  { %11500 = vmatpush3.bf16.msra.mxu1 %v11826_v38 }
 0x370   :  { %11501 = vmatprep.subr.bf16.mxu1 %v11827_v23 }
 0x372   :  { %5885 = vmatmul.mubr.bf16.gmra.mrb[168].mxu1 %v4851_v60  ;;  %v4985_v60 = vpack.c.bf16 %v4977_v35, %v4880_v17 }
 0x373   :  { %5892 = vmatprep.mubr.bf16.mxu1 %v4884_v5  ;;  %11502 = vmatpush3.bf16.msra.mxu1 %v11827_v23 }
 0x374   :  { %5982 = vmatmul.mubr.bf16.gmra.mrb[200].mxu0 %v13374_v30  ;;  %11503 = vmatprep.subr.bf16.mxu1 %v11828_v49 }
 0x375   :  { %5989 = vmatprep.mubr.bf16.mxu0 %v4949_v24 }
 0x377   :  { %11504 = vmatpush3.bf16.msra.mxu1 %v11828_v49 }
 0x378   :  { %11505 = vmatprep.subr.bf16.mxu1 %v11829_v52 }
 0x37a   :  { %5893 = vmatmul.mubr.bf16.gmra.mrb[172].mxu1 %v4852_v32 }
 0x37b   :  { %5900 = vmatprep.mubr.bf16.mxu1 %v4885_v53  ;;  %11506 = vmatpush3.bf16.msra.mxu1 %v11829_v52 }
 0x37c   :  { %5990 = vmatmul.mubr.bf16.gmra.mrb[204].mxu0 %v4917_v34  ;;  %11507 = vmatprep.subr.bf16.mxu1 %v11830_v43 }
 0x37d   :  { %5997 = vmatprep.mubr.bf16.mxu0 %v13300_v47  ;;  %v4944_v47 = vld [vmem:[#allocation3 + $0x121] sm:$0xff] }
 0x37e   :  { %v4953_v50 = vpack.c.bf16 %v4945_v57, %v4944_v47  ;;  %v4856_v11 = vpack.c.bf16 %v4944_v47, %v13337_v51 }
 0x37f   :  { %11508 = vmatpush3.bf16.msra.mxu1 %v11830_v43 }
 0x382   :  { %5901 = vmatmul.mubr.bf16.gmra.mrb[176].mxu1 %v4853_v19 }
 0x383   :  { %5908 = vmatprep.mubr.bf16.mxu1 %v4886_v15 }
 0x384   :  { %5998 = vmatmul.mubr.bf16.gmra.mrb[208].mxu0 %v13392_v44 }
 0x385   :  { %6005 = vmatprep.mubr.bf16.mxu0 %v13329_v10  ;;  %v4981_v10 = vpack.c.bf16 %v4969_v4, %v4872_v29 }
 0x38a   :  { %5909 = vmatmul.mubr.bf16.gmra.mrb[180].mxu1 %v4854_v20 }
 0x38b   :  { %5916 = vmatprep.mubr.bf16.mxu1 %v4887_v40 }
 0x38c   :  { %6006 = vmatmul.mubr.bf16.gmra.mrb[212].mxu0 %v13405_v14 }
 0x38d   :  { %6013 = vmatprep.mubr.bf16.mxu0 %v13346_v26 }
 0x392   :  { %5917 = vmatmul.mubr.bf16.gmra.mrb[184].mxu1 %v4855_v21 }
 0x393   :  { %5924 = vmatprep.mubr.bf16.mxu1 %v4888_v61 }
 0x394   :  { %6014 = vmatmul.mubr.bf16.gmra.mrb[216].mxu0 %v13419_v62 }
 0x395   :  { %6021 = vmatprep.mubr.bf16.mxu0 %v4953_v50 }
 0x39a   :  { %5925 = vmatmul.mubr.bf16.gmra.mrb[188].mxu1 %v4856_v11 }
 0x39b   :  { %11509 = vmatprep.mubr.bf16.mxu1 %v13316_v41 }
 0x39c   :  { %6022 = vmatmul.mubr.bf16.gmra.mrb[220].mxu0 %v4921_v63 }
 0x3a2   :  { %11510 = vmatmul.mubr.bf16.vlgmr.msra.gmra.mrb[192].mxu1 %v13364_v58 }
 0x3a3   :  { %11513 = vmatprep.mubr.bf16.mxu1 %v13380_v3 }
 0x3aa   :  { %11514 = vmatmul.mubr.bf16.gmra.mrb[196].mxu1 %v4981_v10 }
 0x3ab   :  { %11517 = vmatprep.mubr.bf16.mxu1 %v13397_v8 }
 0x3b2   :  { %11518 = vmatmul.mubr.bf16.gmra.mrb[200].mxu1 %v13412_v55 }
 0x3b3   :  { %11521 = vmatprep.mubr.bf16.mxu1 %v13425_v56 }
 0x3ba   :  { %11522 = vmatmul.mubr.bf16.gmra.mrb[204].mxu1 %v4985_v60 }
 0x3f5   :  { %v10693_v45 = vpop.f32.mrb[128].mxu1 }
 0x3f6   :  { %v10694_v51 = vpop.f32.mrb[129].mxu1 }
 0x3f7   :  { %v10757_v41 = vpop.f32.mrb[160].mxu0  ;;  %v10695_v42 = vadd.f32 %v10694_v51, %v10693_v45  ;;  %v10696_v9 = vpop.f32.mrb[130].mxu1 }
 0x3f8   :  { %v10758_v26 = vpop.f32.mrb[161].mxu0  ;;  %v10697_v32 = vpop.f32.mrb[131].mxu1 }
 0x3f9   :  { %v10759_v12 = vadd.f32 %v10758_v26, %v10757_v41  ;;  %v10760_v27 = vpop.f32.mrb[162].mxu0  ;;  %v10698_v19 = vadd.f32 %v10697_v32, %v10696_v9 }
 0x3fa   :  { %v10761_v20 = vpop.f32.mrb[163].mxu0 }
 0x3fb   :  { %v13484_v21 = vadd.f32 %v10759_v12, %v10695_v42  ;;  %v10762_v58 = vadd.f32 %v10761_v20, %v10760_v27 }
 0x3fd   :  { %v13486_v0 = vadd.f32 %v10762_v58, %v10698_v19  ;;  %v10699_v46 = vpop.f32.mrb[132].mxu1 }
 0x3fe   :  { %v10700_v30 = vpop.f32.mrb[133].mxu1 }
 0x3ff   :  { %v10763_v3 = vpop.f32.mrb[164].mxu0  ;;  %v10701_v1 = vadd.f32 %v10700_v30, %v10699_v46  ;;  %v10702_v33 = vpop.f32.mrb[134].mxu1 }
 0x400   :  { %v10764_v39 = vpop.f32.mrb[165].mxu0  ;;  %v10703_v59 = vpop.f32.mrb[135].mxu1 }
 0x401   :  { %v10765_v44 = vadd.f32 %v10764_v39, %v10763_v3  ;;  %v10766_v6 = vpop.f32.mrb[166].mxu0  ;;  %v10704_v8 = vadd.f32 %v10703_v59, %v10702_v33 }
 0x402   :  { %v10767_v7 = vpop.f32.mrb[167].mxu0 }
 0x403   :  { %v13488_v2 = vadd.f32 %v10765_v44, %v10701_v1  ;;  %v10768_v14 = vadd.f32 %v10767_v7, %v10766_v6 }
 0x405   :  { %v13490_v31 = vadd.f32 %v10768_v14, %v10704_v8  ;;  %v10705_v16 = vpop.f32.mrb[136].mxu1 }
 0x406   :  { %v10706_v55 = vpop.f32.mrb[137].mxu1 }
 0x407   :  { %v10769_v18 = vpop.f32.mrb[168].mxu0  ;;  %v10707_v25 = vadd.f32 %v10706_v55, %v10705_v16  ;;  %v10708_v37 = vpop.f32.mrb[138].mxu1 }
 0x408   :  { %v10770_v62 = vpop.f32.mrb[169].mxu0  ;;  %v10709_v54 = vpop.f32.mrb[139].mxu1 }
 0x409   :  { %v10771_v56 = vadd.f32 %v10770_v62, %v10769_v18  ;;  %v10772_v36 = vpop.f32.mrb[170].mxu0  ;;  %v10710_v48 = vadd.f32 %v10709_v54, %v10708_v37 }
 0x40a   :  { %v10773_v22 = vpop.f32.mrb[171].mxu0 }
 0x40b   :  { %v13492_v38 = vadd.f32 %v10771_v56, %v10707_v25  ;;  %v10774_v28 = vadd.f32 %v10773_v22, %v10772_v36 }
 0x40d   :  { %v13494_v23 = vadd.f32 %v10774_v28, %v10710_v48  ;;  %v10711_v29 = vpop.f32.mrb[140].mxu1 }
 0x40e   :  { %v10712_v13 = vpop.f32.mrb[141].mxu1 }
 0x40f   :  { %v10775_v49 = vpop.f32.mrb[172].mxu0  ;;  %v10713_v5 = vadd.f32 %v10712_v13, %v10711_v29  ;;  %v10714_v24 = vpop.f32.mrb[142].mxu1 }
 0x410   :  { %v10776_v52 = vpop.f32.mrb[173].mxu0  ;;  %v10715_v43 = vpop.f32.mrb[143].mxu1 }
 0x411   :  { %v10777_v53 = vadd.f32 %v10776_v52, %v10775_v49  ;;  %v10778_v34 = vpop.f32.mrb[174].mxu0  ;;  %v10716_v15 = vadd.f32 %v10715_v43, %v10714_v24 }
 0x412   :  { %v10779_v40 = vpop.f32.mrb[175].mxu0 }
 0x413   :  { %v13496_v17 = vadd.f32 %v10777_v53, %v10713_v5  ;;  %v10780_v47 = vadd.f32 %v10779_v40, %v10778_v34 }
 0x415   :  { %v13498_v57 = vadd.f32 %v10780_v47, %v10716_v15  ;;  %v10717_v61 = vpop.f32.mrb[144].mxu1 }
 0x416   :  { %v10718_v50 = vpop.f32.mrb[145].mxu1 }
 0x417   :  { %v10781_v11 = vpop.f32.mrb[176].mxu0  ;;  %v10719_v63 = vadd.f32 %v10718_v50, %v10717_v61  ;;  %v10720_v4 = vpop.f32.mrb[146].mxu1 }
 0x418   :  { %v10782_v10 = vpop.f32.mrb[177].mxu0  ;;  %v10721_v35 = vpop.f32.mrb[147].mxu1 }
 0x419   :  { %v10783_v60 = vadd.f32 %v10782_v10, %v10781_v11  ;;  %v10784_v45 = vpop.f32.mrb[178].mxu0  ;;  %v10722_v51 = vadd.f32 %v10721_v35, %v10720_v4 }
 0x41a   :  { %v10785_v41 = vpop.f32.mrb[179].mxu0 }
 0x41b   :  { %v13500_v42 = vadd.f32 %v10783_v60, %v10719_v63  ;;  %v10786_v9 = vadd.f32 %v10785_v41, %v10784_v45 }
 0x41d   :  { %v13502_v26 = vadd.f32 %v10786_v9, %v10722_v51  ;;  %v10723_v32 = vpop.f32.mrb[148].mxu1 }
 0x41e   :  { %v10724_v12 = vpop.f32.mrb[149].mxu1 }
 0x41f   :  { %v10787_v27 = vpop.f32.mrb[180].mxu0  ;;  %v10725_v19 = vadd.f32 %v10724_v12, %v10723_v32  ;;  %v10726_v20 = vpop.f32.mrb[150].mxu1 }
 0x420   :  { %v10788_v58 = vpop.f32.mrb[181].mxu0  ;;  %v10727_v46 = vpop.f32.mrb[151].mxu1 }
 0x421   :  { %v10789_v30 = vadd.f32 %v10788_v58, %v10787_v27  ;;  %v10790_v3 = vpop.f32.mrb[182].mxu0  ;;  %v10728_v1 = vadd.f32 %v10727_v46, %v10726_v20 }
 0x422   :  { %v10791_v33 = vpop.f32.mrb[183].mxu0 }
 0x423   :  { %v13504_v39 = vadd.f32 %v10789_v30, %v10725_v19  ;;  %v10792_v59 = vadd.f32 %v10791_v33, %v10790_v3 }
 0x425   :  { %v13506_v44 = vadd.f32 %v10792_v59, %v10728_v1  ;;  %v10729_v6 = vpop.f32.mrb[152].mxu1 }
 0x426   :  { %v10730_v8 = vpop.f32.mrb[153].mxu1 }
 0x427   :  { %v10793_v7 = vpop.f32.mrb[184].mxu0  ;;  %v10731_v14 = vadd.f32 %v10730_v8, %v10729_v6  ;;  %v10732_v16 = vpop.f32.mrb[154].mxu1 }
 0x428   :  { %v10794_v55 = vpop.f32.mrb[185].mxu0  ;;  %v10733_v18 = vpop.f32.mrb[155].mxu1 }
 0x429   :  { %v10795_v25 = vadd.f32 %v10794_v55, %v10793_v7  ;;  %v10796_v37 = vpop.f32.mrb[186].mxu0  ;;  %v10734_v62 = vadd.f32 %v10733_v18, %v10732_v16  ;;  %v11831_v55 = vld [vmem:[#allocation12 + $0x40] sm:$0xff]  }
 0x42a   :  { %v10797_v54 = vpop.f32.mrb[187].mxu0  ;;  %v11832_v18 = vld [vmem:[#allocation12 + $0xc0] sm:$0xff]   ;;  %10949 = vmatprep.subr.bf16.mxu1 %v11831_v55 }
 0x42b   :  { %v13508_v56 = vadd.f32 %v10795_v25, %v10731_v14  ;;  %v10798_v36 = vadd.f32 %v10797_v54, %v10796_v37  ;;  %v11833_v25 = vld [vmem:[#allocation12] sm:$0xff]   ;;  %v11836_v54 = vld [vmem:[#allocation12 + $0xc8] sm:$0xff]   ;;  %11013 = vmatprep.subr.bf16.mxu0 %v11832_v18 }
 0x42c   :  { %v11834_v37 = vld [vmem:[#allocation12 + $0x80] sm:$0xff]   ;;  %10950 = vmatpush3.bf16.msra.mxu1 %v11833_v25  ;;  %v11851_v18 = vld [vmem:[#allocation12 + $0x68] sm:$0xff]  }
 0x42d   :  { %v13510_v48 = vadd.f32 %v10798_v36, %v10734_v62  ;;  %v10735_v22 = vpop.f32.mrb[156].mxu1  ;;  %v11835_v62 = vld [vmem:[#allocation12 + $0x48] sm:$0xff]   ;;  %11014 = vmatpush3.bf16.msra.mxu0 %v11834_v37 }
 0x42e   :  { %v10736_v28 = vpop.f32.mrb[157].mxu1  ;;  %10951 = vmatprep.subr.bf16.mxu1 %v11835_v62  ;;  %11015 = vmatprep.subr.bf16.mxu0 %v11836_v54  ;;  %v11852_v25 = vld [vmem:[#allocation12 + $0xe8] sm:$0xff]  }
 0x42f   :  { %v10799_v29 = vpop.f32.mrb[188].mxu0  ;;  %v10737_v13 = vadd.f32 %v10736_v28, %v10735_v22  ;;  %v10738_v49 = vpop.f32.mrb[158].mxu1  ;;  %v11837_v28 = vld [vmem:[#allocation12 + $0x8] sm:$0xff]  }
 0x430   :  { %v10800_v5 = vpop.f32.mrb[189].mxu0  ;;  %v10739_v24 = vpop.f32.mrb[159].mxu1  ;;  %10952 = vmatpush3.bf16.msra.mxu1 %v11837_v28  ;;  %v11853_v54 = vld [vmem:[#allocation12 + $0x28] sm:$0xff]  }
 0x431   :  { %v10801_v52 = vadd.f32 %v10800_v5, %v10799_v29  ;;  %v10802_v43 = vpop.f32.mrb[190].mxu0  ;;  %v10740_v53 = vadd.f32 %v10739_v24, %v10738_v49  ;;  %v11838_v29 = vld [vmem:[#allocation12 + $0x88] sm:$0xff]   ;;  %v11839_v5 = vld [vmem:[#allocation12 + $0x50] sm:$0xff]  }
 0x432   :  { %v10803_v34 = vpop.f32.mrb[191].mxu0  ;;  %v11840_v24 = vld [vmem:[#allocation12 + $0xd0] sm:$0xff]   ;;  %11016 = vmatpush3.bf16.msra.mxu0 %v11838_v29  ;;  %10953 = vmatprep.subr.bf16.mxu1 %v11839_v5 }
 0x433   :  { %v13512_v15 = vadd.f32 %v10801_v52, %v10737_v13  ;;  %v10804_v40 = vadd.f32 %v10803_v34, %v10802_v43  ;;  %11017 = vmatprep.subr.bf16.mxu0 %v11840_v24 }
 0x435   :  { %v13514_v47 = vadd.f32 %v10804_v40, %v10740_v53  ;;  %v10821_v61 = vpop.f32.mrb[160].mxu1 }
 0x436   :  { %v10822_v50 = vpop.f32.mrb[161].mxu1 }
 0x437   :  { %v10885_v11 = vpop.f32.mrb[192].mxu0  ;;  %v10823_v63 = vadd.f32 %v10822_v50, %v10821_v61  ;;  %v10824_v4 = vpop.f32.mrb[162].mxu1 }
 0x438   :  { %v10886_v10 = vpop.f32.mrb[193].mxu0  ;;  %v10825_v35 = vpop.f32.mrb[163].mxu1 }
 0x439   :  { %v5871_v60 = vadd.f32 %v10823_v63, %v13484_v21  ;;  %v10887_v45 = vadd.f32 %v10886_v10, %v10885_v11  ;;  %v10888_v51 = vpop.f32.mrb[194].mxu0  ;;  %v10826_v41 = vadd.f32 %v10825_v35, %v10824_v4  ;;  %v11841_v11 = vld [vmem:[#allocation12 + $0x10] sm:$0xff]  }
 0x43a   :  { %v10889_v9 = vpop.f32.mrb[195].mxu0  ;;  %v11842_v63 = vld [vmem:[#allocation12 + $0x90] sm:$0xff]   ;;  %10954 = vmatpush3.bf16.msra.mxu1 %v11841_v11 }
 0x43b   :  { %v5874_v32 = vadd.f32 %v10826_v41, %v13486_v0  ;;  %v10890_v12 = vadd.f32 %v10889_v9, %v10888_v51  ;;  %v13518_v27 = vadd.f32 %v10887_v45, %v5871_v60  ;;  %v11843_v60 = vld [vmem:[#allocation12 + $0x58] sm:$0xff]   ;;  %11018 = vmatpush3.bf16.msra.mxu0 %v11842_v63 }
 0x43c   :  { %v11844_v45 = vld [vmem:[#allocation12 + $0xd8] sm:$0xff]   ;;  %10955 = vmatprep.subr.bf16.mxu1 %v11843_v60 }
 0x43d   :  { %v10827_v19 = vpop.f32.mrb[164].mxu1  ;;  %v13520_v20 = vadd.f32 %v10890_v12, %v5874_v32  ;;  %v11845_v9 = vld [vmem:[#allocation12 + $0x18] sm:$0xff]   ;;  %11019 = vmatprep.subr.bf16.mxu0 %v11844_v45 }
 0x43e   :  { %v10828_v58 = vpop.f32.mrb[165].mxu1  ;;  %v11846_v32 = vld [vmem:[#allocation12 + $0x98] sm:$0xff]   ;;  %10956 = vmatpush3.bf16.msra.mxu1 %v11845_v9 }
 0x43f   :  { %v10891_v46 = vpop.f32.mrb[196].mxu0  ;;  %v10829_v30 = vadd.f32 %v10828_v58, %v10827_v19  ;;  %v10830_v3 = vpop.f32.mrb[166].mxu1  ;;  %11020 = vmatpush3.bf16.msra.mxu0 %v11846_v32  ;;  %v11859_v63 = vld [vmem:[#allocation12 + $0x78] sm:$0xff]  }
 0x440   :  { %v10892_v1 = vpop.f32.mrb[197].mxu0  ;;  %v10831_v33 = vpop.f32.mrb[167].mxu1  ;;  %v11861_v45 = vld [vmem:[#allocation12 + $0x38] sm:$0xff]  }
 0x441   :  { %v5879_v21 = vadd.f32 %v10829_v30, %v13488_v2  ;;  %v10893_v59 = vadd.f32 %v10892_v1, %v10891_v46  ;;  %v10894_v6 = vpop.f32.mrb[198].mxu0  ;;  %v10832_v8 = vadd.f32 %v10831_v33, %v10830_v3  ;;  %v11848_v46 = vld [vmem:[#allocation12 + $0xe0] sm:$0xff]  }
 0x442   :  { %v10895_v7 = vpop.f32.mrb[199].mxu0  ;;  %11021 = vmatprep.subr.bf16.mxu0 %v11848_v46 }
 0x443   :  { %v5882_v0 = vadd.f32 %v10832_v8, %v13490_v31  ;;  %v10896_v14 = vadd.f32 %v10895_v7, %v10894_v6  ;;  %v13524_v16 = vadd.f32 %v10893_v59, %v5879_v21  ;;  %v11849_v8 = vld [vmem:[#allocation12 + $0x20] sm:$0xff]  }
 0x444   :  { %v11850_v7 = vld [vmem:[#allocation12 + $0xa0] sm:$0xff]  }
 0x445   :  { %v10833_v36 = vpop.f32.mrb[168].mxu1  ;;  %v13526_v22 = vadd.f32 %v10896_v14, %v5882_v0  ;;  %11022 = vmatpush3.bf16.msra.mxu0 %v11850_v7 }
 0x446   :  { %v10834_v2 = vpop.f32.mrb[169].mxu1  ;;  %11023 = vmatprep.subr.bf16.mxu0 %v11852_v25 }
 0x447   :  { %v10897_v31 = vpop.f32.mrb[200].mxu0  ;;  %v10835_v13 = vadd.f32 %v10834_v2, %v10833_v36  ;;  %v10836_v49 = vpop.f32.mrb[170].mxu1  ;;  %v11854_v36 = vld [vmem:[#allocation12 + $0xa8] sm:$0xff]  }
 0x448   :  { %v10898_v52 = vpop.f32.mrb[201].mxu0  ;;  %v10837_v43 = vpop.f32.mrb[171].mxu1 }
 0x449   :  { %v5887_v53 = vadd.f32 %v10835_v13, %v13492_v38  ;;  %v10899_v34 = vadd.f32 %v10898_v52, %v10897_v31  ;;  %v10900_v40 = vpop.f32.mrb[202].mxu0  ;;  %v10838_v61 = vadd.f32 %v10837_v43, %v10836_v49  ;;  %v11856_v31 = vld [vmem:[#allocation12 + $0xf0] sm:$0xff]   ;;  %11024 = vmatpush3.bf16.msra.mxu0 %v11854_v36 }
 0x44a   :  { %v10901_v50 = vpop.f32.mrb[203].mxu0  ;;  %11025 = vmatprep.subr.bf16.mxu0 %v11856_v31 }
 0x44b   :  { %v5890_v4 = vadd.f32 %v10838_v61, %v13494_v23  ;;  %v10902_v10 = vadd.f32 %v10901_v50, %v10900_v40  ;;  %v13530_v35 = vadd.f32 %v10899_v34, %v5887_v53  ;;  %v11847_v23 = vld [vmem:[#allocation12 + $0x60] sm:$0xff]   ;;  %v11857_v34 = vld [vmem:[#allocation12 + $0x30] sm:$0xff]  }
 0x44c   :  { %10957 = vmatprep.subr.bf16.mxu1 %v11847_v23  ;;  %v11858_v40 = vld [vmem:[#allocation12 + $0xb0] sm:$0xff]  }
 0x44d   :  { %v10839_v51 = vpop.f32.mrb[172].mxu1  ;;  %v13532_v41 = vadd.f32 %v10902_v10, %v5890_v4  ;;  %10958 = vmatpush3.bf16.msra.mxu1 %v11849_v8  ;;  %v11860_v4 = vld [vmem:[#allocation12 + $0xf8] sm:$0xff]   ;;  %11026 = vmatpush3.bf16.msra.mxu0 %v11858_v40 }
 0x44e   :  { %v10840_v38 = vpop.f32.mrb[173].mxu1  ;;  %10959 = vmatprep.subr.bf16.mxu1 %v11851_v18  ;;  %11027 = vmatprep.subr.bf16.mxu0 %v11860_v4 }
 0x44f   :  { %v10903_v12 = vpop.f32.mrb[204].mxu0  ;;  %v10841_v19 = vadd.f32 %v10840_v38, %v10839_v51  ;;  %v10842_v58 = vpop.f32.mrb[174].mxu1  ;;  %v11862_v51 = vld [vmem:[#allocation12 + $0xb8] sm:$0xff]  }
 0x450   :  { %v10904_v30 = vpop.f32.mrb[205].mxu0  ;;  %v10843_v3 = vpop.f32.mrb[175].mxu1 }
 0x451   :  { %v5895_v1 = vadd.f32 %v10841_v19, %v13496_v17  ;;  %v10905_v33 = vadd.f32 %v10904_v30, %v10903_v12  ;;  %v10906_v21 = vpop.f32.mrb[206].mxu0  ;;  %v10844_v59 = vadd.f32 %v10843_v3, %v10842_v58  ;;  %10960 = vmatpush3.bf16.msra.mxu1 %v11853_v54  ;;  %11028 = vmatpush3.bf16.msra.mxu0 %v11862_v51 }
 0x452   :  { %v10907_v6 = vpop.f32.mrb[207].mxu0 }
 0x453   :  { %v5898_v0 = vadd.f32 %v10844_v59, %v13498_v57  ;;  %v10908_v14 = vadd.f32 %v10907_v6, %v10906_v21  ;;  %v13536_v55 = vadd.f32 %v10905_v33, %v5895_v1  ;;  %v11855_v57 = vld [vmem:[#allocation12 + $0x70] sm:$0xff]  }
 0x454   :  { %10961 = vmatprep.subr.bf16.mxu1 %v11855_v57 }
 0x455   :  { %v10845_v37 = vpop.f32.mrb[176].mxu1  ;;  %v13538_v62 = vadd.f32 %v10908_v14, %v5898_v0  ;;  %10962 = vmatpush3.bf16.msra.mxu1 %v11857_v34 }
 0x456   :  { %v10846_v17 = vpop.f32.mrb[177].mxu1  ;;  %10963 = vmatprep.subr.bf16.mxu1 %v11859_v63 }
 0x457   :  { %v10909_v2 = vpop.f32.mrb[208].mxu0  ;;  %v10847_v28 = vadd.f32 %v10846_v17, %v10845_v37  ;;  %v10848_v29 = vpop.f32.mrb[178].mxu1 }
 0x458   :  { %v10910_v13 = vpop.f32.mrb[209].mxu0  ;;  %v10849_v49 = vpop.f32.mrb[179].mxu1 }
 0x459   :  { %v5903_v5 = vadd.f32 %v10847_v28, %v13500_v42  ;;  %v10911_v24 = vadd.f32 %v10910_v13, %v10909_v2  ;;  %v10912_v52 = vpop.f32.mrb[210].mxu0  ;;  %v10850_v43 = vadd.f32 %v10849_v49, %v10848_v29  ;;  %10964 = vmatpush3.bf16.msra.mxu1 %v11861_v45 }
 0x45a   :  { %v10913_v53 = vpop.f32.mrb[211].mxu0 }
 0x45b   :  { %v5906_v61 = vadd.f32 %v10850_v43, %v13502_v26  ;;  %v10914_v50 = vadd.f32 %v10913_v53, %v10912_v52  ;;  %v13542_v11 = vadd.f32 %v10911_v24, %v5903_v5  ;;  %v11863_v26 = vld [vmem:[#allocation12 + $0x140] sm:$0xff]  }
 0x45c   :  { %11077 = vmatprep.subr.bf16.mxu1 %v11863_v26  ;;  %v11872_v24 = vld [vmem:[#allocation12 + $0x1c0] sm:$0xff]  }
 0x45d   :  { %v10851_v10 = vpop.f32.mrb[180].mxu1  ;;  %v13544_v60 = vadd.f32 %v10914_v50, %v5906_v61  ;;  %11141 = vmatprep.subr.bf16.mxu0 %v11872_v24 }
 0x45e   :  { %v10852_v42 = vpop.f32.mrb[181].mxu1 }
 0x45f   :  { %v10915_v38 = vpop.f32.mrb[212].mxu0  ;;  %v10853_v9 = vadd.f32 %v10852_v42, %v10851_v10  ;;  %v10854_v32 = vpop.f32.mrb[182].mxu1 }
 0x460   :  { %v10916_v12 = vpop.f32.mrb[213].mxu0  ;;  %v10855_v19 = vpop.f32.mrb[183].mxu1 }
 0x461   :  { %v5911_v58 = vadd.f32 %v10853_v9, %v13504_v39  ;;  %v10917_v23 = vadd.f32 %v10916_v12, %v10915_v38  ;;  %v10918_v46 = vpop.f32.mrb[214].mxu0  ;;  %v10856_v30 = vadd.f32 %v10855_v19, %v10854_v32 }
 0x462   :  { %v10919_v3 = vpop.f32.mrb[215].mxu0 }
 0x463   :  { %v5914_v1 = vadd.f32 %v10856_v30, %v13506_v44  ;;  %v10920_v33 = vadd.f32 %v10919_v3, %v10918_v46  ;;  %v13548_v21 = vadd.f32 %v10917_v23, %v5911_v58 }
 0x465   :  { %v10857_v59 = vpop.f32.mrb[184].mxu1  ;;  %v13550_v6 = vadd.f32 %v10920_v33, %v5914_v1 }
 0x466   :  { %v10858_v8 = vpop.f32.mrb[185].mxu1 }
 0x467   :  { %v10921_v7 = vpop.f32.mrb[216].mxu0  ;;  %v10859_v0 = vadd.f32 %v10858_v8, %v10857_v59  ;;  %v10860_v14 = vpop.f32.mrb[186].mxu1 }
 0x468   :  { %v10922_v39 = vpop.f32.mrb[217].mxu0  ;;  %v10861_v18 = vpop.f32.mrb[187].mxu1 }
 0x469   :  { %v5919_v25 = vadd.f32 %v10859_v0, %v13508_v56  ;;  %v10923_v37 = vadd.f32 %v10922_v39, %v10921_v7  ;;  %v10924_v17 = vpop.f32.mrb[218].mxu0  ;;  %v10862_v54 = vadd.f32 %v10861_v18, %v10860_v14 }
 0x46a   :  { %v10925_v36 = vpop.f32.mrb[219].mxu0 }
 0x46b   :  { %v5922_v44 = vadd.f32 %v10862_v54, %v13510_v48  ;;  %v10926_v2 = vadd.f32 %v10925_v36, %v10924_v17  ;;  %v13554_v28 = vadd.f32 %v10923_v37, %v5919_v25 }
 0x46d   :  { %v10863_v29 = vpop.f32.mrb[188].mxu1  ;;  %v13556_v57 = vadd.f32 %v10926_v2, %v5922_v44 }
 0x46e   :  { %v10864_v31 = vpop.f32.mrb[189].mxu1 }
 0x46f   :  { %v10927_v13 = vpop.f32.mrb[220].mxu0  ;;  %v10865_v49 = vadd.f32 %v10864_v31, %v10863_v29  ;;  %v10866_v5 = vpop.f32.mrb[190].mxu1 }
 0x470   :  { %v10928_v52 = vpop.f32.mrb[221].mxu0  ;;  %v10867_v43 = vpop.f32.mrb[191].mxu1 }
 0x471   :  { %v5927_v56 = vadd.f32 %v10865_v49, %v13512_v15  ;;  %v10929_v53 = vadd.f32 %v10928_v52, %v10927_v13  ;;  %v10930_v34 = vpop.f32.mrb[222].mxu0  ;;  %v10868_v40 = vadd.f32 %v10867_v43, %v10866_v5 }
 0x472   :  { %v10931_v48 = vpop.f32.mrb[223].mxu0 }
 0x473   :  { %v5930_v61 = vadd.f32 %v10868_v40, %v13514_v47  ;;  %v10932_v50 = vadd.f32 %v10931_v48, %v10930_v34  ;;  %v6024_v63 = vadd.f32 %v10929_v53, %v5927_v56 }
 0x475   :  { %v11511_v4 = vpop.f32.mrb[192].mxu1  ;;  %v6027_v10 = vadd.f32 %v10932_v50, %v5930_v61 }
 0x476   :  { %v13561_v42 = vadd.f32 %v11511_v4, %v13524_v16  ;;  %v6064_v45 = vpop.f32.mrb[193].mxu1 }
 0x477   :  { %v13564_v51 = vadd.f32 %v6064_v45, %v13518_v27  ;;  %v11512_v38 = vpop.f32.mrb[194].mxu1 }
 0x478   :  { %v13567_v15 = vadd.f32 %v11512_v38, %v13526_v22  ;;  %v6067_v9 = vpop.f32.mrb[195].mxu1  ;;  %v6151_v27 = vmul.f32 %v13561_v42, %v13561_v42 }
 0x479   :  { %v13570_v32 = vadd.f32 %v6067_v9, %v13520_v20  ;;  %v6149_v47 = vmul.f32 %v13564_v51, %v13564_v51 }
 0x47a   :  { %v6152_v23 = vmul.f32 %v13567_v15, %v13567_v15 }
 0x47b   :  { %v6127_v26 = vadd.f32 %v13570_v32, %v13564_v51  ;;  %v6150_v16 = vmul.f32 %v13570_v32, %v13570_v32 }
 0x47d   :  { %v6128_v12 = vadd.f32 %v6127_v26, %v13561_v42  ;;  %v6165_v22 = vadd.f32 %v6150_v16, %v6149_v47  ;;  %v11515_v19 = vpop.f32.mrb[196].mxu1 }
 0x47e   :  { %v13582_v58 = vadd.f32 %v11515_v19, %v13536_v55  ;;  %v6080_v20 = vpop.f32.mrb[197].mxu1 }
 0x47f   :  { %v6166_v46 = vadd.f32 %v6165_v22, %v6151_v27  ;;  %v13587_v30 = vadd.f32 %v6080_v20, %v13530_v35  ;;  %v6129_v3 = vadd.f32 %v6128_v12, %v13567_v15  ;;  %v11516_v1 = vpop.f32.mrb[198].mxu1 }
 0x480   :  { %v13591_v33 = vadd.f32 %v11516_v1, %v13538_v62  ;;  %v6083_v59 = vpop.f32.mrb[199].mxu1  ;;  %v6155_v62 = vmul.f32 %v13582_v58, %v13582_v58 }
 0x481   :  { %v6130_v8 = vadd.f32 %v6129_v3, %v13587_v30  ;;  %v6153_v55 = vmul.f32 %v13587_v30, %v13587_v30  ;;  %v6167_v7 = vadd.f32 %v6166_v46, %v6152_v23  ;;  %v13597_v0 = vadd.f32 %v6083_v59, %v13532_v41 }
 0x482   :  { %v6156_v41 = vmul.f32 %v13591_v33, %v13591_v33 }
 0x483   :  { %v6168_v14 = vadd.f32 %v6167_v7, %v6153_v55  ;;  %v6131_v35 = vadd.f32 %v6130_v8, %v13597_v0  ;;  %v6154_v39 = vmul.f32 %v13597_v0, %v13597_v0 }
 0x485   :  { %v6132_v18 = vadd.f32 %v6131_v35, %v13582_v58  ;;  %v6169_v25 = vadd.f32 %v6168_v14, %v6154_v39  ;;  %v11519_v37 = vpop.f32.mrb[200].mxu1 }
 0x486   :  { %v13606_v17 = vadd.f32 %v11519_v37, %v13548_v21  ;;  %v6096_v54 = vpop.f32.mrb[201].mxu1 }
 0x487   :  { %v6170_v36 = vadd.f32 %v6169_v25, %v6155_v62  ;;  %v13611_v44 = vadd.f32 %v6096_v54, %v13542_v11  ;;  %v6133_v2 = vadd.f32 %v6132_v18, %v13591_v33  ;;  %v11520_v29 = vpop.f32.mrb[202].mxu1 }
 0x488   :  { %v13615_v31 = vadd.f32 %v11520_v29, %v13550_v6  ;;  %v6099_v13 = vpop.f32.mrb[203].mxu1  ;;  %v6159_v6 = vmul.f32 %v13606_v17, %v13606_v17 }
 0x489   :  { %v6134_v49 = vadd.f32 %v6133_v2, %v13611_v44  ;;  %v6157_v21 = vmul.f32 %v13611_v44, %v13611_v44  ;;  %v6171_v5 = vadd.f32 %v6170_v36, %v6156_v41  ;;  %v13621_v24 = vadd.f32 %v6099_v13, %v13544_v60 }
 0x48a   :  { %v6160_v60 = vmul.f32 %v13615_v31, %v13615_v31 }
 0x48b   :  { %v6172_v52 = vadd.f32 %v6171_v5, %v6157_v21  ;;  %v6135_v11 = vadd.f32 %v6134_v49, %v13621_v24  ;;  %v6158_v43 = vmul.f32 %v13621_v24, %v13621_v24 }
 0x48d   :  { %v6136_v56 = vadd.f32 %v6135_v11, %v13606_v17  ;;  %v6173_v53 = vadd.f32 %v6172_v52, %v6158_v43  ;;  %v11523_v34 = vpop.f32.mrb[204].mxu1 }
 0x48e   :  { %v13629_v40 = vadd.f32 %v11523_v34, %v6024_v63  ;;  %v6112_v48 = vpop.f32.mrb[205].mxu1  ;;  %v13689_v34 = vld [vmem:[%s14790_s5 + $0x1] ss:$0 sm:$0xff] }
 0x48f   :  { %v6174_v61 = vadd.f32 %v6173_v53, %v6159_v6  ;;  %v13634_v50 = vadd.f32 %v6112_v48, %v13554_v28  ;;  %v6137_v4 = vadd.f32 %v6136_v56, %v13615_v31  ;;  %v11524_v45 = vpop.f32.mrb[206].mxu1 }
 0x490   :  { %v13637_v38 = vadd.f32 %v11524_v45, %v6027_v10  ;;  %v6115_v9 = vpop.f32.mrb[207].mxu1  ;;  %v6163_v28 = vmul.f32 %v13629_v40, %v13629_v40  ;;  %v13698_v45 = vld [vmem:[%s14791_s6 + $0x1] ss:$0 sm:$0xff] }
 0x491   :  { %v6138_v47 = vadd.f32 %v6137_v4, %v13634_v50  ;;  %v6161_v63 = vmul.f32 %v13634_v50, %v13634_v50  ;;  %v6175_v26 = vadd.f32 %v6174_v61, %v6160_v60  ;;  %v6116_v16 = vadd.f32 %v6115_v9, %v13556_v57 }
 0x492   :  { %v6164_v10 = vmul.f32 %v13637_v38, %v13637_v38 }
 0x493   :  { %v6176_v27 = vadd.f32 %v6175_v26, %v6161_v63  ;;  %v6139_v12 = vadd.f32 %v6138_v47, %v6116_v16  ;;  %v6162_v22 = vmul.f32 %v6116_v16, %v6116_v16 }
 0x495   :  { %v6140_v19 = vadd.f32 %v6139_v12, %v13629_v40  ;;  %v6177_v20 = vadd.f32 %v6176_v27, %v6162_v22 }
 0x497   :  { %v6141_v23 = vadd.f32 %v6140_v19, %v13637_v38  ;;  %v6178_v46 = vadd.f32 %v6177_v20, %v6163_v28 }
 0x499   :  { %v6142_v3 = vrot.slane %v6141_v23, 4  ;;  %v6179_v1 = vadd.f32 %v6178_v46, %v6164_v10 }
 0x49b   :  { %v6143_v59 = vadd.f32 %v6142_v3, %v6141_v23  ;;  %v6180_v8 = vrot.slane %v6179_v1, 4 }
 0x49d   :  { %v6144_v57 = vrot.slane %v6143_v59, 2  ;;  %v6181_v55 = vadd.f32 %v6180_v8, %v6179_v1 }
 0x49f   :  { %v6145_v7 = vadd.f32 %v6144_v57, %v6143_v59  ;;  %v6182_v14 = vrot.slane %v6181_v55, 2  ;;  %v6403_v59 = vld [vmem:[#allocation4 + $0x1] sm:$0xff] }
 0x4a1   :  { %v6146_v35 = vrot.slane %v6145_v7, 1  ;;  %v6183_v39 = vadd.f32 %v6182_v14, %v6181_v55 }
 0x4a3   :  { %v6147_v62 = vadd.f32 %v6146_v35, %v6145_v7  ;;  %v6184_v18 = vrot.slane %v6183_v39, 1 }
 0x4a5   :  { %v13649_v25 = vmul.f32 0.0078125, %v6147_v62  ;;  %v6185_v37 = vadd.f32 %v6184_v18, %v6183_v39 }
 0x4a7   :  { %v6186_v54 = vmul.f32 0.0078125, %v6185_v37  ;;  %v6187_v41 = vmul.f32 %v13649_v25, %v13649_v25  ;;  %v6202_v36 = vsub.f32 %v6116_v16, %v13649_v25  ;;  %v6189_v2 = vsub.f32 %v13564_v51, %v13649_v25 }
 0x4a8   :  { %v6190_v29 = vsub.f32 %v13570_v32, %v13649_v25  ;;  %v6191_v13 = vsub.f32 %v13561_v42, %v13649_v25  ;;  %v6192_v49 = vsub.f32 %v13567_v15, %v13649_v25  ;;  %v6193_v21 = vsub.f32 %v13587_v30, %v13649_v25 }
 0x4a9   :  { %v6188_v5 = vsub.f32 %v6186_v54, %v6187_v41  ;;  %v6194_v52 = vsub.f32 %v13597_v0, %v13649_v25  ;;  %v6195_v11 = vsub.f32 %v13582_v58, %v13649_v25  ;;  %v6196_v51 = vsub.f32 %v13591_v33, %v13649_v25 }
 0x4aa   :  { %v6197_v32 = vsub.f32 %v13611_v44, %v13649_v25  ;;  %v6198_v42 = vsub.f32 %v13621_v24, %v13649_v25  ;;  %v6199_v15 = vsub.f32 %v13606_v17, %v13649_v25  ;;  %v6200_v30 = vsub.f32 %v13615_v31, %v13649_v25  ;;  %v6435_v24 = vld [vmem:[#allocation4 + $0x2] sm:$0xff] }
 0x4ab   :  { %v6205_v43 = vmax.f32 %v6188_v5, 0.0  ;;  %v6201_v0 = vsub.f32 %v13634_v50, %v13649_v25  ;;  %v6203_v58 = vsub.f32 %v13629_v40, %v13649_v25  ;;  %v6204_v6 = vsub.f32 %v13637_v38, %v13649_v25 }
 0x4ad   :  { %v6206_v56 = vadd.f32 1e-05, %v6205_v43 }
 0x4af   :  { %11977 = vrsqrt.f32 %v6206_v56 }
 0x4b9   :  { %v13684_v53 = vpop.eup %11977 }
 0x4ba   :  { %v6221_v48 = vmul.f32 %v13684_v53, %v6202_v36  ;;  %v6208_v60 = vmul.f32 %v13684_v53, %v6189_v2  ;;  %v6209_v61 = vmul.f32 %v13684_v53, %v6190_v29  ;;  %v6210_v4 = vmul.f32 %v13684_v53, %v6191_v13 }
 0x4bb   :  { %v6211_v9 = vmul.f32 %v13684_v53, %v6192_v49  ;;  %v6212_v47 = vmul.f32 %v13684_v53, %v6193_v21  ;;  %v6213_v63 = vmul.f32 %v13684_v53, %v6194_v52  ;;  %v6214_v26 = vmul.f32 %v13684_v53, %v6195_v11 }
 0x4bc   :  { %v6242_v16 = vmul.f32 %v13689_v34, %v6221_v48  ;;  %v6229_v27 = vmul.f32 %v13689_v34, %v6208_v60  ;;  %v6230_v12 = vmul.f32 %v13689_v34, %v6209_v61  ;;  %v6231_v22 = vmul.f32 %v13689_v34, %v6210_v4 }
 0x4bd   :  { %v6232_v28 = vmul.f32 %v13689_v34, %v6211_v9  ;;  %v6233_v19 = vmul.f32 %v13689_v34, %v6212_v47  ;;  %v6234_v20 = vmul.f32 %v13689_v34, %v6213_v63  ;;  %v6235_v10 = vmul.f32 %v13689_v34, %v6214_v26 }
 0x4be   :  { %v6263_v23 = vadd.f32 %v13698_v45, %v6242_v16  ;;  %v6250_v46 = vadd.f32 %v13698_v45, %v6229_v27  ;;  %v6251_v3 = vadd.f32 %v13698_v45, %v6230_v12  ;;  %v6252_v1 = vadd.f32 %v13698_v45, %v6231_v22  ;;  %v11864_v22 = vld [vmem:[#allocation12 + $0x100] sm:$0xff]  }
 0x4bf   :  { %v6253_v8 = vadd.f32 %v13698_v45, %v6232_v28  ;;  %v6254_v57 = vadd.f32 %v13698_v45, %v6233_v19  ;;  %v6255_v55 = vadd.f32 %v13698_v45, %v6234_v20  ;;  %v6256_v7 = vadd.f32 %v13698_v45, %v6235_v10  ;;  %v11865_v10 = vld [vmem:[#allocation12 + $0x148] sm:$0xff]  }
 0x4c0   :  { %vm6279_vm2 = vcmp.ge.f32.partialorder %v6263_v23, 0.0  ;;  %v6295_v14 = vmul.f32 0.2, %v6263_v23  ;;  %vm6266_vm3 = vcmp.ge.f32.partialorder %v6250_v46, 0.0  ;;  %v6282_v35 = vmul.f32 0.2, %v6250_v46 }
 0x4c1   :  { %vm6267_vm4 = vcmp.ge.f32.partialorder %v6251_v3, 0.0  ;;  %v6283_v39 = vmul.f32 0.2, %v6251_v3  ;;  %vm6268_vm5 = vcmp.ge.f32.partialorder %v6252_v1, 0.0  ;;  %v6284_v62 = vmul.f32 0.2, %v6252_v1 }
 0x4c2   :  { %v13720_v18 = vsel %vm6279_vm2, %v6263_v23, %v6295_v14  ;;  %v13722_v37 = vsel %vm6266_vm3, %v6250_v46, %v6282_v35  ;;  %vm6269_vm6 = vcmp.ge.f32.partialorder %v6253_v8, 0.0  ;;  %v6285_v54 = vmul.f32 0.2, %v6253_v8  ;;  %v11876_v35 = vld [vmem:[#allocation12 + $0x188] sm:$0xff]  }
 0x4c3   :  { %6368 = vst [vmem:[#allocation4 + $0x101] sm:$0xff] %v13720_v18  ;;  %6355 = vst [vmem:[#allocation4 + $0x11] sm:$0xff] %v13722_v37  ;;  %v6419_v41 = vpack.c.bf16 %v13722_v37, %v6403_v59  ;;  %v13727_v36 = vsel %vm6267_vm4, %v6251_v3, %v6283_v39  ;;  %v13729_v2 = vsel %vm6268_vm5, %v6252_v1, %v6284_v62  ;;  %vm6270_vm7 = vcmp.ge.f32.partialorder %v6254_v57, 0.0  ;;  %v11875_v1 = vld [vmem:[#allocation12 + $0x1c8] sm:$0xff]  }
 0x4c4   :  { %6356 = vst [vmem:[#allocation4 + $0x21] sm:$0xff] %v13727_v36  ;;  %6357 = vst [vmem:[#allocation4 + $0x31] sm:$0xff] %v13729_v2  ;;  %v13735_v29 = vpack.c.bf16 %v13729_v2, %v13727_v36  ;;  %v13737_v13 = vsel %vm6269_vm6, %v6253_v8, %v6285_v54  ;;  %v6286_v49 = vmul.f32 0.2, %v6254_v57  ;;  %vm6271_vm8 = vcmp.ge.f32.partialorder %v6255_v55, 0.0  ;;  %v11866_v59 = vld [vmem:[#allocation12 + $0x108] sm:$0xff]  }
 0x4c5   :  { %7340 = vmatprep.mubr.bf16.mxu1 %v6419_v41  ;;  %6358 = vst [vmem:[#allocation4 + $0x41] sm:$0xff] %v13737_v13  ;;  %v6287_v21 = vmul.f32 0.2, %v6255_v55  ;;  %vm6272_vm9 = vcmp.ge.f32.partialorder %v6256_v7, 0.0  ;;  %v6288_v5 = vmul.f32 0.2, %v6256_v7  ;;  %v6215_v52 = vmul.f32 %v13684_v53, %v6196_v51 }
 0x4c6   :  { %v13744_v11 = vsel %vm6270_vm7, %v6254_v57, %v6286_v49  ;;  %v6216_v43 = vmul.f32 %v13684_v53, %v6197_v32  ;;  %v6217_v56 = vmul.f32 %v13684_v53, %v6198_v42  ;;  %v6218_v48 = vmul.f32 %v13684_v53, %v6199_v15  ;;  %v11867_v57 = vld [vmem:[#allocation12 + $0x150] sm:$0xff]  }
 0x4c7   :  { %6359 = vst [vmem:[#allocation4 + $0x51] sm:$0xff] %v13744_v11  ;;  %v13761_v33 = vpack.c.bf16 %v13744_v11, %v13737_v13  ;;  %v13763_v51 = vsel %vm6271_vm8, %v6255_v55, %v6287_v21  ;;  %v13765_v44 = vsel %vm6272_vm9, %v6256_v7, %v6288_v5  ;;  %v6236_v32 = vmul.f32 %v13689_v34, %v6215_v52  ;;  %v11878_v21 = vld [vmem:[#allocation12 + $0x1d0] sm:$0xff]  }
 0x4c8   :  { %6360 = vst [vmem:[#allocation4 + $0x61] sm:$0xff] %v13763_v51  ;;  %6361 = vst [vmem:[#allocation4 + $0x71] sm:$0xff] %v13765_v44  ;;  %v13772_v17 = vpack.c.bf16 %v13765_v44, %v13763_v51  ;;  %v6237_v42 = vmul.f32 %v13689_v34, %v6216_v43  ;;  %v6238_v15 = vmul.f32 %v13689_v34, %v6217_v56 }
 0x4c9   :  { %v6239_v60 = vmul.f32 %v13689_v34, %v6218_v48  ;;  %v6257_v61 = vadd.f32 %v13698_v45, %v6236_v32  ;;  %v6219_v4 = vmul.f32 %v13684_v53, %v6200_v30  ;;  %v6220_v9 = vmul.f32 %v13684_v53, %v6201_v0  ;;  %v13799_v0 = vld [vmem:[#allocation2 + $0x8] sm:$0xff]  ;;  %v11868_v48 = vld [vmem:[#allocation12 + $0x110] sm:$0xff]  }
 0x4ca   :  { %v6222_v47 = vmul.f32 %v13684_v53, %v6203_v58  ;;  %v6467_v63 = vld [vmem:[#allocation4 + $0x10] sm:$0xff]  ;;  %v6258_v16 = vadd.f32 %v13698_v45, %v6237_v42  ;;  %v6259_v27 = vadd.f32 %v13698_v45, %v6238_v15  ;;  %v6223_v50 = vmul.f32 %v13684_v53, %v6204_v6  ;;  %v11874_v6 = vld [vmem:[#allocation12 + $0x180] sm:$0xff]   ;;  %v11869_v15 = vld [vmem:[#allocation12 + $0x158] sm:$0xff]  }
 0x4cb   :  { %v13790_v26 = vld [vmem:[#allocation4 + $0x12] sm:$0xff]  ;;  %v6260_v31 = vadd.f32 %v13698_v45, %v6239_v60  ;;  %v6468_v30 = vld [vmem:[#allocation4 + $0x20] sm:$0xff]  ;;  %v6387_v40 = vpack.c.bf16 %v6467_v63, %v13799_v0  ;;  %vm6273_vm10 = vcmp.ge.f32.partialorder %v6257_v61, 0.0  ;;  %v6289_v28 = vmul.f32 0.2, %v6257_v61 }
 0x4cc   :  { %v6451_v58 = vpack.c.bf16 %v13790_v26, %v6435_v24  ;;  %v6469_v12 = vld [vmem:[#allocation4 + $0x30] sm:$0xff]  ;;  %v6483_v19 = vpack.c.bf16 %v6468_v30, %v6467_v63  ;;  %v13803_v20 = vld [vmem:[#allocation4 + $0x40] sm:$0xff]  ;;  %vm6274_vm11 = vcmp.ge.f32.partialorder %v6258_v16, 0.0  ;;  %v6290_v23 = vmul.f32 0.2, %v6258_v16 }
 0x4cd   :  { %7341 = vmatmul.mubr.bf16.vlgmr.msra.gmra.mrb[208].mxu1 %v6387_v40  ;;  %v6484_v38 = vpack.c.bf16 %v13803_v20, %v6469_v12  ;;  %v13806_v25 = vsel %vm6273_vm10, %v6257_v61, %v6289_v28  ;;  %vm6275_vm12 = vcmp.ge.f32.partialorder %v6259_v27, 0.0  ;;  %v6291_v46 = vmul.f32 0.2, %v6259_v27  ;;  %v13824_v54 = vld [vmem:[#allocation4 + $0x22] sm:$0xff]  ;;  %v13826_v41 = vld [vmem:[#allocation4 + $0x32] sm:$0xff] }
 0x4ce   :  { %7437 = vmatprep.mubr.bf16.mxu0 %v6483_v19  ;;  %7348 = vmatprep.mubr.bf16.mxu1 %v13735_v29  ;;  %6362 = vst [vmem:[#allocation4 + $0x81] sm:$0xff] %v13806_v25  ;;  %v13810_v53 = vsel %vm6274_vm11, %v6258_v16, %v6290_v23  ;;  %vm6276_vm13 = vcmp.ge.f32.partialorder %v6260_v31, 0.0  ;;  %v6240_v3 = vmul.f32 %v13689_v34, %v6219_v4  ;;  %v6292_v8 = vmul.f32 0.2, %v6260_v31  ;;  %v6471_v43 = vld [vmem:[#allocation4 + $0x50] sm:$0xff]  ;;  %v11871_v40 = vld [vmem:[#allocation12 + $0x160] sm:$0xff]  }
 0x4cf   :  { %7438 = vmatmul.mubr.bf16.vlgmr.msra.gmra.mrb[224].mxu0 %v6451_v58  ;;  %11078 = vmatpush3.bf16.msra.mxu1 %v11864_v22  ;;  %6363 = vst [vmem:[#allocation4 + $0xb1] sm:$0xff] %v13810_v53  ;;  %v13815_v55 = vsel %vm6275_vm12, %v6259_v27, %v6291_v46  ;;  %v6241_v39 = vmul.f32 %v13689_v34, %v6220_v9  ;;  %v13835_v56 = vld [vmem:[#allocation4 + $0x60] sm:$0xff]  ;;  %v11880_v63 = vld [vmem:[#allocation12 + $0x190] sm:$0xff]   ;;  %v11882_v28 = vld [vmem:[#allocation12 + $0x198] sm:$0xff]  }
 0x4d0   :  { %7445 = vmatprep.mubr.bf16.mxu0 %v6484_v38  ;;  %11079 = vmatprep.subr.bf16.mxu1 %v11865_v10  ;;  %6364 = vst [vmem:[#allocation4 + $0xc1] sm:$0xff] %v13815_v55  ;;  %v13818_v7 = vsel %vm6276_vm13, %v6260_v31, %v6292_v8  ;;  %v6261_v14 = vadd.f32 %v13698_v45, %v6240_v3  ;;  %v11870_v31 = vld [vmem:[#allocation12 + $0x118] sm:$0xff]   ;;  %v13872_v23 = vld [vmem:[#allocation4 + $0x42] sm:$0xff] }
 0x4d1   :  { %11142 = vmatpush3.bf16.msra.mxu0 %v11874_v6  ;;  %v13822_v62 = vpack.c.bf16 %v6469_v12, %v6468_v30  ;;  %6365 = vst [vmem:[#allocation4 + $0xd1] sm:$0xff] %v13818_v7  ;;  %v13831_v49 = vpack.c.bf16 %v13818_v7, %v13815_v55  ;;  %v6243_v5 = vmul.f32 %v13689_v34, %v6222_v47  ;;  %v13874_v38 = vld [vmem:[#allocation4 + $0x52] sm:$0xff]  ;;  %v11884_v6 = vld [vmem:[#allocation12 + $0x1e0] sm:$0xff]  }
 0x4d2   :  { %11143 = vmatprep.subr.bf16.mxu0 %v11875_v1  ;;  %v6244_v52 = vmul.f32 %v13689_v34, %v6223_v50  ;;  %vm6277_vm14 = vcmp.ge.f32.partialorder %v6261_v14, 0.0  ;;  %v6293_v32 = vmul.f32 0.2, %v6261_v14  ;;  %v6262_v24 = vadd.f32 %v13698_v45, %v6241_v39  ;;  %v6473_v1 = vld [vmem:[#allocation4 + $0x70] sm:$0xff]  ;;  %v11873_v8 = vld [vmem:[#allocation12 + $0x120] sm:$0xff]  }
 0x4d3   :  { %11080 = vmatpush3.bf16.msra.mxu1 %v11866_v59  ;;  %v6515_v42 = vpack.c.bf16 %v13727_v36, %v13722_v37  ;;  %v6264_v60 = vadd.f32 %v13698_v45, %v6243_v5  ;;  %v6516_v34 = vpack.c.bf16 %v13737_v13, %v13729_v2  ;;  %v13847_v4 = vpack.c.bf16 %v13826_v41, %v13824_v54  ;;  %v11899_v37 = vld [vmem:[#allocation12 + $0x220] sm:$0xff]   ;;  %v11901_v13 = vld [vmem:[#allocation12 + $0x230] sm:$0xff]  }
 0x4d4   :  { %11081 = vmatprep.subr.bf16.mxu1 %v11867_v57  ;;  %v6265_v61 = vadd.f32 %v13698_v45, %v6244_v52  ;;  %v13849_v9 = vsel %vm6277_vm14, %v6261_v14, %v6293_v32  ;;  %vm6278_vm15 = vcmp.ge.f32.partialorder %v6262_v24, 0.0  ;;  %v6294_v47 = vmul.f32 0.2, %v6262_v24  ;;  %v11881_v45 = vld [vmem:[#allocation12 + $0x1d8] sm:$0xff]   ;;  %v11887_v52 = vld [vmem:[#allocation12 + $0x1e8] sm:$0xff]  }
 0x4d5   :  { %7349 = vmatmul.mubr.bf16.gmra.mrb[212].mxu1 %v13822_v62  ;;  %11144 = vmatpush3.bf16.msra.mxu0 %v11876_v35  ;;  %v6485_v16 = vpack.c.bf16 %v13835_v56, %v6471_v43  ;;  %6366 = vst [vmem:[#allocation4 + $0xe1] sm:$0xff] %v13849_v9  ;;  %vm6280_vm0 = vcmp.ge.f32.partialorder %v6264_v60, 0.0  ;;  %v6296_v27 = vmul.f32 0.2, %v6264_v60  ;;  %v6517_v22 = vpack.c.bf16 %v13763_v51, %v13744_v11  ;;  %v13882_v59 = vld [vmem:[#allocation4 + $0x80] sm:$0xff]  ;;  %v11877_v35 = vld [vmem:[#allocation12 + $0x168] sm:$0xff]  }
 0x4d6   :  { %7356 = vmatprep.mubr.bf16.mxu1 %v13761_v33  ;;  %11145 = vmatprep.subr.bf16.mxu0 %v11878_v21  ;;  %vm6281_vm1 = vcmp.ge.f32.partialorder %v6265_v61, 0.0  ;;  %v13855_v50 = vsel %vm6278_vm15, %v6262_v24, %v6294_v47  ;;  %v6297_v30 = vmul.f32 0.2, %v6265_v61  ;;  %v6518_v46 = vpack.c.bf16 %v13806_v25, %v13765_v44  ;;  %v11886_v21 = vld [vmem:[#allocation12 + $0x1a0] sm:$0xff]   ;;  %v11888_v24 = vld [vmem:[#allocation12 + $0x1a8] sm:$0xff]  }
 0x4d7   :  { %7446 = vmatmul.mubr.bf16.gmra.mrb[228].mxu0 %v13847_v4  ;;  %11082 = vmatpush3.bf16.msra.mxu1 %v11868_v48  ;;  %6367 = vst [vmem:[#allocation4 + $0xf1] sm:$0xff] %v13855_v50  ;;  %v13860_v58 = vpack.c.bf16 %v13855_v50, %v13849_v9  ;;  %v13862_v12 = vsel %vm6280_vm0, %v6264_v60, %v6296_v27  ;;  %v11883_v48 = vld [vmem:[#allocation12 + $0x170] sm:$0xff]   ;;  %v6411_v32 = vld [vmem:[#allocation4 + $0xa1] sm:$0xff] }
 0x4d8   :  { %7453 = vmatprep.mubr.bf16.mxu0 %v6485_v16  ;;  %11083 = vmatprep.subr.bf16.mxu1 %v11869_v15  ;;  %6369 = vst [vmem:[#allocation4 + $0x111] sm:$0xff] %v13862_v12  ;;  %v6426_v19 = vpack.c.bf16 %v13862_v12, %v13720_v18  ;;  %v13870_v10 = vsel %vm6281_vm1, %v6265_v61, %v6297_v30  ;;  %v13898_v15 = vld [vmem:[#allocation4 + $0x62] sm:$0xff]  ;;  %v13900_v60 = vld [vmem:[#allocation4 + $0x72] sm:$0xff] }
 0x4d9   :  { %11146 = vmatpush3.bf16.msra.mxu0 %v11880_v63  ;;  %6370 = vst [vmem:[#allocation4 + $0x121] sm:$0xff] %v13870_v10  ;;  %v13880_v3 = vpack.c.bf16 %v6471_v43, %v13803_v20  ;;  %v6519_v57 = vpack.c.bf16 %v13815_v55, %v13810_v53  ;;  %v6520_v14 = vpack.c.bf16 %v13849_v9, %v13818_v7  ;;  %v11879_v43 = vld [vmem:[#allocation12 + $0x128] sm:$0xff]   ;;  %v11890_v61 = vld [vmem:[#allocation12 + $0x1f0] sm:$0xff]   ;;  %v6476_v16 = vld [vmem:[#allocation4 + $0xc0] sm:$0xff] }
 0x4da   :  { %11147 = vmatprep.subr.bf16.mxu0 %v11881_v45  ;;  %v6522_v39 = vpack.c.bf16 %v13870_v10, %v13862_v12  ;;  %v13893_v20 = vpack.c.bf16 %v13874_v38, %v13872_v23  ;;  %v6486_v5 = vpack.c.bf16 %v13882_v59, %v6473_v1  ;;  %v13903_v47 = vpack.c.bf16 %v6473_v1, %v13835_v56  ;;  %v6475_v63 = vld [vmem:[#allocation4 + $0xb0] sm:$0xff]  ;;  %v11893_v56 = vld [vmem:[#allocation12 + $0x1f8] sm:$0xff]   ;;  %v11895_v1 = vld [vmem:[#allocation12 + $0x200] sm:$0xff]  }
 0x4db   :  { %11084 = vmatpush3.bf16.msra.mxu1 %v11870_v31  ;;  %v11885_v45 = vld [vmem:[#allocation12 + $0x130] sm:$0xff]   ;;  %v6423_v27 = vpack.c.bf16 %v13810_v53, %v6411_v32  ;;  %v11889_v31 = vld [vmem:[#allocation12 + $0x178] sm:$0xff]   ;;  %v13909_v30 = vpack.c.bf16 %v13900_v60, %v13898_v15  ;;  %v6538_v36 = vld [vmem:[#allocation4 + $0x82] sm:$0xff]  ;;  %v6583_v11 = vpack.c.bf16 %v13799_v0, %v13882_v59 }
 0x4dc   :  { %11085 = vmatprep.subr.bf16.mxu1 %v11871_v40  ;;  %v11892_v40 = vld [vmem:[#allocation12 + $0x1b0] sm:$0xff]   ;;  %v6608_v44 = vld [vmem:[#allocation4 + $0x101] sm:$0xff] }
 0x4dd   :  { %7357 = vmatmul.mubr.bf16.gmra.mrb[216].mxu1 %v13880_v3  ;;  %11148 = vmatpush3.bf16.msra.mxu0 %v11882_v28  ;;  %v6487_v28 = vpack.c.bf16 %v6476_v16, %v6475_v63  ;;  %v6521_v55 = vpack.c.bf16 %v6608_v44, %v13855_v50  ;;  %v6635_v9 = vld [vmem:[#allocation4 + $0x92] sm:$0xff] }
 0x4de   :  { %7364 = vmatprep.mubr.bf16.mxu1 %v13772_v17  ;;  %11149 = vmatprep.subr.bf16.mxu0 %v11884_v6  ;;  %v11891_v6 = vld [vmem:[#allocation12 + $0x138] sm:$0xff]   ;;  %v6647_v50 = vpack.c.bf16 %v6635_v9, %v6538_v36 }
 0x4df   :  { %7454 = vmatmul.mubr.bf16.gmra.mrb[232].mxu0 %v13893_v20  ;;  %11086 = vmatpush3.bf16.msra.mxu1 %v11873_v8  ;;  %v11894_v8 = vld [vmem:[#allocation12 + $0x1b8] sm:$0xff]  }
 0x4e0   :  { %7461 = vmatprep.mubr.bf16.mxu0 %v6486_v5  ;;  %11087 = vmatprep.subr.bf16.mxu1 %v11877_v35  ;;  %v6443_v35 = vld [vmem:[#allocation4 + $0xa2] sm:$0xff]  ;;  %v6391_v5 = vpack.c.bf16 %v6475_v63, %v13799_v0  ;;  %v6479_v63 = vld [vmem:[#allocation4 + $0xf0] sm:$0xff] }
 0x4e1   :  { %11150 = vmatpush3.bf16.msra.mxu0 %v11886_v21  ;;  %v13912_v21 = vld [vmem:[#allocation4 + $0xb2] sm:$0xff]  ;;  %v6546_v53 = vld [vmem:[#allocation4 + $0x122] sm:$0xff] }
 0x4e2   :  { %11151 = vmatprep.subr.bf16.mxu0 %v11887_v52  ;;  %v6477_v52 = vld [vmem:[#allocation4 + $0xd0] sm:$0xff] }
 0x4e3   :  { %11088 = vmatpush3.bf16.msra.mxu1 %v11879_v43  ;;  %v6478_v43 = vld [vmem:[#allocation4 + $0xe0] sm:$0xff] }
 0x4e4   :  { %11089 = vmatprep.subr.bf16.mxu1 %v11883_v48  ;;  %v6455_v48 = vpack.c.bf16 %v13912_v21, %v6443_v35  ;;  %v6488_v32 = vpack.c.bf16 %v6478_v43, %v6477_v52 }
 0x4e5   :  { %7365 = vmatmul.mubr.bf16.gmra.mrb[220].mxu1 %v13903_v47  ;;  %11152 = vmatpush3.bf16.msra.mxu0 %v11888_v24  ;;  %v13917_v24 = vld [vmem:[#allocation4 + $0xc2] sm:$0xff] }
 0x4e6   :  { %7372 = vmatprep.mubr.bf16.mxu1 %v6423_v27  ;;  %11153 = vmatprep.subr.bf16.mxu0 %v11890_v61  ;;  %v13919_v61 = vld [vmem:[#allocation4 + $0xd2] sm:$0xff]  ;;  %v6480_v27 = vld [vmem:[#allocation4 + $0x100] sm:$0xff] }
 0x4e7   :  { %7462 = vmatmul.mubr.bf16.gmra.mrb[236].mxu0 %v13909_v30  ;;  %11090 = vmatpush3.bf16.msra.mxu1 %v11885_v45  ;;  %v13921_v45 = vpack.c.bf16 %v6477_v52, %v6476_v16  ;;  %v13934_v16 = vpack.c.bf16 %v6479_v63, %v6478_v43  ;;  %v13948_v52 = vld [vmem:[#allocation4 + $0x102] sm:$0xff]  ;;  %v13950_v43 = vld [vmem:[#allocation4 + $0x112] sm:$0xff] }
 0x4e8   :  { %7469 = vmatprep.mubr.bf16.mxu0 %v6487_v28  ;;  %11091 = vmatprep.subr.bf16.mxu1 %v11889_v31  ;;  %v13926_v31 = vpack.c.bf16 %v13919_v61, %v13917_v24  ;;  %v13930_v28 = vld [vmem:[#allocation4 + $0xe2] sm:$0xff]  ;;  %v13959_v18 = vpack.c.bf16 %v13950_v43, %v13948_v52 }
 0x4e9   :  { %11154 = vmatpush3.bf16.msra.mxu0 %v11892_v40  ;;  %v6489_v40 = vpack.c.bf16 %v6480_v27, %v6479_v63  ;;  %v6548_v63 = vpack.c.bf16 %v13872_v23, %v13826_v41  ;;  %v6550_v41 = vpack.c.bf16 %v6538_v36, %v13900_v60  ;;  %v6552_v51 = vpack.c.bf16 %v13930_v28, %v13919_v61 }
 0x4ea   :  { %11155 = vmatprep.subr.bf16.mxu0 %v11893_v56  ;;  %v13932_v56 = vld [vmem:[#allocation4 + $0xf2] sm:$0xff] }
 0x4eb   :  { %11092 = vmatpush3.bf16.msra.mxu1 %v11891_v6  ;;  %v6481_v6 = vld [vmem:[#allocation4 + $0x110] sm:$0xff]  ;;  %v13941_v35 = vpack.c.bf16 %v13932_v56, %v13930_v28 }
 0x4ec   :  { %11525 = vmatprep.subr.bf16.mxu1 %v11895_v1 }
 0x4ed   :  { %7373 = vmatmul.mubr.bf16.gmra.mrb[224].mxu1 %v6391_v5  ;;  %11156 = vmatpush3.bf16.msra.mxu0 %v11894_v8  ;;  %v13936_v8 = vld [vmem:[#allocation4 + $0x120] sm:$0xff] }
 0x4ee   :  { %7380 = vmatprep.mubr.bf16.mxu1 %v13831_v49  ;;  %v6490_v5 = vpack.c.bf16 %v13936_v8, %v6481_v6  ;;  %v6587_v7 = vpack.c.bf16 %v13799_v0, %v13936_v8 }
 0x4ef   :  { %7470 = vmatmul.mubr.bf16.gmra.mrb[240].mxu0 %v6455_v48  ;;  %v13952_v48 = vpack.c.bf16 %v6481_v6, %v6480_v27 }
 0x4f0   :  { %7477 = vmatprep.mubr.bf16.mxu0 %v6488_v32  ;;  %v6547_v32 = vpack.c.bf16 %v13824_v54, %v13790_v26  ;;  %v11897_v26 = vld [vmem:[#allocation12 + $0x210] sm:$0xff]   ;;  %v11898_v54 = vld [vmem:[#allocation12 + $0x218] sm:$0xff]  }
 0x4f5   :  { %7381 = vmatmul.mubr.bf16.gmra.mrb[228].mxu1 %v13921_v45 }
 0x4f6   :  { %7388 = vmatprep.mubr.bf16.mxu1 %v13860_v58 }
 0x4f7   :  { %7478 = vmatmul.mubr.bf16.gmra.mrb[244].mxu0 %v13926_v31 }
 0x4f8   :  { %7485 = vmatprep.mubr.bf16.mxu0 %v6489_v40 }
 0x4fd   :  { %7389 = vmatmul.mubr.bf16.gmra.mrb[232].mxu1 %v13934_v16 }
 0x4fe   :  { %7396 = vmatprep.mubr.bf16.mxu1 %v6426_v19  ;;  %v11896_v19 = vld [vmem:[#allocation12 + $0x208] sm:$0xff]  }
 0x4ff   :  { %7486 = vmatmul.mubr.bf16.gmra.mrb[248].mxu0 %v13941_v35 }
 0x500   :  { %7493 = vmatprep.mubr.bf16.mxu0 %v6490_v5 }
 0x505   :  { %7397 = vmatmul.mubr.bf16.gmra.mrb[236].mxu1 %v13952_v48 }
 0x506   :  { %7534 = vmatprep.mubr.bf16.mxu1 %v6547_v32 }
 0x507   :  { %7494 = vmatmul.mubr.bf16.gmra.mrb[252].mxu0 %v13959_v18 }
 0x508   :  { %7631 = vmatprep.mubr.bf16.mxu0 %v13735_v29  ;;  %v6549_v29 = vpack.c.bf16 %v13898_v15, %v13874_v38 }
 0x50d   :  { %7535 = vmatmul.mubr.bf16.vlgmr.msra.gmra.mrb[240].mxu1 %v6515_v42  ;;  %v6551_v42 = vpack.c.bf16 %v13917_v24, %v13912_v21 }
 0x50e   :  { %7542 = vmatprep.mubr.bf16.mxu1 %v6548_v63  ;;  %11526 = vmatpush3.bf16.msra.mxu1 %v11895_v1 }
 0x50f   :  { %7632 = vmatmul.mubr.bf16.vlgmr.msra.gmra.mrb[0].mxu0 %v13822_v62  ;;  %11527 = vmatprep.subr.bf16.mxu1 %v11896_v19  ;;  %v11900_v62 = vld [vmem:[#allocation12 + $0x228] sm:$0xff]  }
 0x510   :  { %7639 = vmatprep.mubr.bf16.mxu0 %v13761_v33  ;;  %v6603_v33 = vld [vmem:[#allocation4 + $0x91] sm:$0xff] }
 0x511   :  { %v6615_v2 = vpack.c.bf16 %v6603_v33, %v13806_v25  ;;  %v6553_v25 = vpack.c.bf16 %v13948_v52, %v13932_v56 }
 0x512   :  { %11528 = vmatpush3.bf16.msra.mxu1 %v11896_v19 }
 0x513   :  { %11529 = vmatprep.subr.bf16.mxu1 %v11897_v26 }
 0x515   :  { %7543 = vmatmul.mubr.bf16.gmra.mrb[244].mxu1 %v6516_v34  ;;  %v6611_v34 = vld [vmem:[#allocation4 + $0x131] sm:$0xff] }
 0x516   :  { %7550 = vmatprep.mubr.bf16.mxu1 %v6549_v29  ;;  %11530 = vmatpush3.bf16.msra.mxu1 %v11897_v26 }
 0x517   :  { %7640 = vmatmul.mubr.bf16.gmra.mrb[4].mxu0 %v13880_v3  ;;  %11531 = vmatprep.subr.bf16.mxu1 %v11898_v54 }
 0x518   :  { %7647 = vmatprep.mubr.bf16.mxu0 %v13772_v17  ;;  %v11902_v17 = vld [vmem:[#allocation12 + $0x238] sm:$0xff]  }
 0x51a   :  { %11532 = vmatpush3.bf16.msra.mxu1 %v11898_v54 }
 0x51b   :  { %11533 = vmatprep.subr.bf16.mxu1 %v11899_v37 }
 0x51d   :  { %7551 = vmatmul.mubr.bf16.gmra.mrb[248].mxu1 %v6517_v22  ;;  %v6619_v22 = vpack.c.bf16 %v6611_v34, %v13870_v10  ;;  %v11904_v34 = vld [vmem:[#allocation14] sm:$0xff]  }
 0x51e   :  { %7558 = vmatprep.mubr.bf16.mxu1 %v6550_v41  ;;  %11534 = vmatpush3.bf16.msra.mxu1 %v11899_v37 }
 0x51f   :  { %7648 = vmatmul.mubr.bf16.gmra.mrb[8].mxu0 %v13903_v47  ;;  %11535 = vmatprep.subr.bf16.mxu1 %v11900_v62 }
 0x520   :  { %7655 = vmatprep.mubr.bf16.mxu0 %v6615_v2 }
 0x522   :  { %11536 = vmatpush3.bf16.msra.mxu1 %v11900_v62 }
 0x523   :  { %11537 = vmatprep.subr.bf16.mxu1 %v11901_v13 }
 0x525   :  { %7559 = vmatmul.mubr.bf16.gmra.mrb[252].mxu1 %v6518_v46 }
 0x526   :  { %7566 = vmatprep.mubr.bf16.mxu1 %v6551_v42  ;;  %11538 = vmatpush3.bf16.msra.mxu1 %v11901_v13 }
 0x527   :  { %7656 = vmatmul.mubr.bf16.gmra.mrb[12].mxu0 %v6583_v11  ;;  %11539 = vmatprep.subr.bf16.mxu1 %v11902_v17 }
 0x528   :  { %7663 = vmatprep.mubr.bf16.mxu0 %v13831_v49  ;;  %v6618_v49 = vpack.c.bf16 %v13862_v12, %v6608_v44  ;;  %v6643_v12 = vld [vmem:[#allocation4 + $0x132] sm:$0xff] }
 0x529   :  { %v6651_v10 = vpack.c.bf16 %v6643_v12, %v6546_v53 }
 0x52a   :  { %11540 = vmatpush3.bf16.msra.mxu1 %v11902_v17 }
 0x52d   :  { %7567 = vmatmul.mubr.bf16.gmra.mrb[0].mxu1 %v6519_v57 }
 0x52e   :  { %7574 = vmatprep.mubr.bf16.mxu1 %v6552_v51 }
 0x52f   :  { %7664 = vmatmul.mubr.bf16.gmra.mrb[16].mxu0 %v13921_v45 }
 0x530   :  { %7671 = vmatprep.mubr.bf16.mxu0 %v13860_v58  ;;  %v6554_v58 = vpack.c.bf16 %v6546_v53, %v13950_v43 }
 0x535   :  { %7575 = vmatmul.mubr.bf16.gmra.mrb[4].mxu1 %v6520_v14 }
 0x536   :  { %7582 = vmatprep.mubr.bf16.mxu1 %v6553_v25 }
 0x537   :  { %7672 = vmatmul.mubr.bf16.gmra.mrb[20].mxu0 %v13934_v16 }
 0x538   :  { %7679 = vmatprep.mubr.bf16.mxu0 %v6618_v49 }
 0x53d   :  { %7583 = vmatmul.mubr.bf16.gmra.mrb[8].mxu1 %v6521_v55  ;;  %v11903_v55 = vld [vmem:[#allocation14 + $0x40] sm:$0xff]  }
 0x53e   :  { %7590 = vmatprep.mubr.bf16.mxu1 %v6554_v58  ;;  %11221 = vmatprep.subr.bf16.mxu0 %v11903_v55 }
 0x53f   :  { %7680 = vmatmul.mubr.bf16.gmra.mrb[24].mxu0 %v13952_v48 }
 0x540   :  { %7687 = vmatprep.mubr.bf16.mxu0 %v6619_v22  ;;  %11222 = vmatpush3.bf16.msra.mxu0 %v11904_v34 }
 0x545   :  { %7591 = vmatmul.mubr.bf16.gmra.mrb[12].mxu1 %v6522_v39 }
 0x546   :  { %11541 = vmatprep.mubr.bf16.mxu1 %v13847_v4 }
 0x547   :  { %7688 = vmatmul.mubr.bf16.gmra.mrb[28].mxu0 %v6587_v7 }
 0x54d   :  { %11542 = vmatmul.mubr.bf16.vlgmr.msra.gmra.mrb[16].mxu1 %v13893_v20 }
 0x54e   :  { %11545 = vmatprep.mubr.bf16.mxu1 %v13909_v30 }
 0x555   :  { %11546 = vmatmul.mubr.bf16.gmra.mrb[20].mxu1 %v6647_v50 }
 0x556   :  { %11549 = vmatprep.mubr.bf16.mxu1 %v13926_v31 }
 0x55d   :  { %11550 = vmatmul.mubr.bf16.gmra.mrb[24].mxu1 %v13941_v35 }
 0x55e   :  { %11553 = vmatprep.mubr.bf16.mxu1 %v13959_v18 }
 0x565   :  { %11554 = vmatmul.mubr.bf16.gmra.mrb[28].mxu1 %v6651_v10 }
 0x5a0   :  { %v10965_v0 = vpop.f32.mrb[208].mxu1 }
 0x5a1   :  { %v10966_v23 = vpop.f32.mrb[209].mxu1 }
 0x5a2   :  { %v11029_v4 = vpop.f32.mrb[224].mxu0  ;;  %v10967_v38 = vadd.f32 %v10966_v23, %v10965_v0  ;;  %v10968_v46 = vpop.f32.mrb[210].mxu1 }
 0x5a3   :  { %v11030_v3 = vpop.f32.mrb[225].mxu0  ;;  %v10969_v59 = vpop.f32.mrb[211].mxu1 }
 0x5a4   :  { %v11031_v57 = vadd.f32 %v11030_v3, %v11029_v4  ;;  %v11032_v14 = vpop.f32.mrb[226].mxu0  ;;  %v10970_v39 = vadd.f32 %v10969_v59, %v10968_v46 }
 0x5a5   :  { %v11033_v20 = vpop.f32.mrb[227].mxu0 }
 0x5a6   :  { %v14020_v15 = vadd.f32 %v11031_v57, %v10967_v38  ;;  %v11034_v60 = vadd.f32 %v11033_v20, %v11032_v14 }
 0x5a8   :  { %v14022_v47 = vadd.f32 %v11034_v60, %v10970_v39  ;;  %v10971_v30 = vpop.f32.mrb[212].mxu1 }
 0x5a9   :  { %v10972_v1 = vpop.f32.mrb[213].mxu1 }
 0x5aa   :  { %v11035_v21 = vpop.f32.mrb[228].mxu0  ;;  %v10973_v24 = vadd.f32 %v10972_v1, %v10971_v30  ;;  %v10974_v61 = vpop.f32.mrb[214].mxu1 }
 0x5ab   :  { %v11036_v45 = vpop.f32.mrb[229].mxu0  ;;  %v10975_v27 = vpop.f32.mrb[215].mxu1 }
 0x5ac   :  { %v11037_v31 = vadd.f32 %v11036_v45, %v11035_v21  ;;  %v11038_v40 = vpop.f32.mrb[230].mxu0  ;;  %v10976_v28 = vadd.f32 %v10975_v27, %v10974_v61 }
 0x5ad   :  { %v11039_v56 = vpop.f32.mrb[231].mxu0 }
 0x5ae   :  { %v14024_v16 = vadd.f32 %v11037_v31, %v10973_v24  ;;  %v11040_v6 = vadd.f32 %v11039_v56, %v11038_v40 }
 0x5b0   :  { %v14026_v8 = vadd.f32 %v11040_v6, %v10976_v28  ;;  %v10977_v35 = vpop.f32.mrb[216].mxu1 }
 0x5b1   :  { %v10978_v5 = vpop.f32.mrb[217].mxu1 }
 0x5b2   :  { %v11041_v52 = vpop.f32.mrb[232].mxu0  ;;  %v10979_v43 = vadd.f32 %v10978_v5, %v10977_v35  ;;  %v10980_v48 = vpop.f32.mrb[218].mxu1 }
 0x5b3   :  { %v11042_v32 = vpop.f32.mrb[233].mxu0  ;;  %v10981_v18 = vpop.f32.mrb[219].mxu1 }
 0x5b4   :  { %v11043_v19 = vadd.f32 %v11042_v32, %v11041_v52  ;;  %v11044_v63 = vpop.f32.mrb[234].mxu0  ;;  %v10982_v26 = vadd.f32 %v10981_v18, %v10980_v48 }
 0x5b5   :  { %v11045_v54 = vpop.f32.mrb[235].mxu0 }
 0x5b6   :  { %v14028_v29 = vadd.f32 %v11043_v19, %v10979_v43  ;;  %v11046_v37 = vadd.f32 %v11045_v54, %v11044_v63 }
 0x5b8   :  { %v14030_v36 = vadd.f32 %v11046_v37, %v10982_v26  ;;  %v10983_v33 = vpop.f32.mrb[220].mxu1 }
 0x5b9   :  { %v10984_v62 = vpop.f32.mrb[221].mxu1 }
 0x5ba   :  { %v11047_v41 = vpop.f32.mrb[236].mxu0  ;;  %v10985_v2 = vadd.f32 %v10984_v62, %v10983_v33  ;;  %v10986_v13 = vpop.f32.mrb[222].mxu1 }
 0x5bb   :  { %v11048_v17 = vpop.f32.mrb[237].mxu0  ;;  %v10987_v42 = vpop.f32.mrb[223].mxu1 }
 0x5bc   :  { %v11049_v11 = vadd.f32 %v11048_v17, %v11047_v41  ;;  %v11050_v51 = vpop.f32.mrb[238].mxu0  ;;  %v10988_v44 = vadd.f32 %v10987_v42, %v10986_v13 }
 0x5bd   :  { %v11051_v25 = vpop.f32.mrb[239].mxu0 }
 0x5be   :  { %v14032_v49 = vadd.f32 %v11049_v11, %v10985_v2  ;;  %v11052_v53 = vadd.f32 %v11051_v25, %v11050_v51 }
 0x5c0   :  { %v14034_v58 = vadd.f32 %v11052_v53, %v10988_v44  ;;  %v10989_v22 = vpop.f32.mrb[224].mxu1 }
 0x5c1   :  { %v10990_v7 = vpop.f32.mrb[225].mxu1 }
 0x5c2   :  { %v11053_v9 = vpop.f32.mrb[240].mxu0  ;;  %v10991_v50 = vadd.f32 %v10990_v7, %v10989_v22  ;;  %v10992_v12 = vpop.f32.mrb[226].mxu1 }
 0x5c3   :  { %v11054_v10 = vpop.f32.mrb[241].mxu0  ;;  %v10993_v0 = vpop.f32.mrb[227].mxu1 }
 0x5c4   :  { %v11055_v23 = vadd.f32 %v11054_v10, %v11053_v9  ;;  %v11056_v4 = vpop.f32.mrb[242].mxu0  ;;  %v10994_v38 = vadd.f32 %v10993_v0, %v10992_v12 }
 0x5c5   :  { %v11057_v46 = vpop.f32.mrb[243].mxu0 }
 0x5c6   :  { %v14036_v3 = vadd.f32 %v11055_v23, %v10991_v50  ;;  %v11058_v59 = vadd.f32 %v11057_v46, %v11056_v4 }
 0x5c8   :  { %v14038_v57 = vadd.f32 %v11058_v59, %v10994_v38  ;;  %v10995_v14 = vpop.f32.mrb[228].mxu1 }
 0x5c9   :  { %v10996_v39 = vpop.f32.mrb[229].mxu1 }
 0x5ca   :  { %v11059_v20 = vpop.f32.mrb[244].mxu0  ;;  %v10997_v60 = vadd.f32 %v10996_v39, %v10995_v14  ;;  %v10998_v30 = vpop.f32.mrb[230].mxu1 }
 0x5cb   :  { %v11060_v1 = vpop.f32.mrb[245].mxu0  ;;  %v10999_v21 = vpop.f32.mrb[231].mxu1 }
 0x5cc   :  { %v11061_v24 = vadd.f32 %v11060_v1, %v11059_v20  ;;  %v11062_v61 = vpop.f32.mrb[246].mxu0  ;;  %v11000_v45 = vadd.f32 %v10999_v21, %v10998_v30 }
 0x5cd   :  { %v11063_v27 = vpop.f32.mrb[247].mxu0 }
 0x5ce   :  { %v14040_v31 = vadd.f32 %v11061_v24, %v10997_v60  ;;  %v11064_v40 = vadd.f32 %v11063_v27, %v11062_v61 }
 0x5d0   :  { %v14042_v28 = vadd.f32 %v11064_v40, %v11000_v45  ;;  %v11001_v56 = vpop.f32.mrb[232].mxu1 }
 0x5d1   :  { %v11002_v6 = vpop.f32.mrb[233].mxu1 }
 0x5d2   :  { %v11065_v35 = vpop.f32.mrb[248].mxu0  ;;  %v11003_v5 = vadd.f32 %v11002_v6, %v11001_v56  ;;  %v11004_v52 = vpop.f32.mrb[234].mxu1 }
 0x5d3   :  { %v11066_v43 = vpop.f32.mrb[249].mxu0  ;;  %v11005_v48 = vpop.f32.mrb[235].mxu1 }
 0x5d4   :  { %v11067_v32 = vadd.f32 %v11066_v43, %v11065_v35  ;;  %v11068_v18 = vpop.f32.mrb[250].mxu0  ;;  %v11006_v19 = vadd.f32 %v11005_v48, %v11004_v52  ;;  %v11905_v43 = vld [vmem:[#allocation14 + $0x48] sm:$0xff]  }
 0x5d5   :  { %v11069_v63 = vpop.f32.mrb[251].mxu0  ;;  %v11906_v48 = vld [vmem:[#allocation14 + $0x8] sm:$0xff]   ;;  %11223 = vmatprep.subr.bf16.mxu0 %v11905_v43  ;;  %v11923_v43 = vld [vmem:[#allocation14 + $0x70] sm:$0xff]  }
 0x5d6   :  { %v14044_v26 = vadd.f32 %v11067_v32, %v11003_v5  ;;  %v11070_v54 = vadd.f32 %v11069_v63, %v11068_v18  ;;  %v11907_v32 = vld [vmem:[#allocation14 + $0x50] sm:$0xff]   ;;  %v11912_v63 = vld [vmem:[#allocation14 + $0xc0] sm:$0xff]   ;;  %11224 = vmatpush3.bf16.msra.mxu0 %v11906_v48 }
 0x5d7   :  { %11225 = vmatprep.subr.bf16.mxu0 %v11907_v32  ;;  %11285 = vmatprep.subr.bf16.mxu1 %v11912_v63  ;;  %v11926_v48 = vld [vmem:[#allocation14 + $0xa0] sm:$0xff]  }
 0x5d8   :  { %v14046_v37 = vadd.f32 %v11070_v54, %v11006_v19  ;;  %v11007_v33 = vpop.f32.mrb[236].mxu1 }
 0x5d9   :  { %v11008_v62 = vpop.f32.mrb[237].mxu1 }
 0x5da   :  { %v11071_v41 = vpop.f32.mrb[252].mxu0  ;;  %v11009_v2 = vadd.f32 %v11008_v62, %v11007_v33  ;;  %v11010_v13 = vpop.f32.mrb[238].mxu1  ;;  %v11914_v33 = vld [vmem:[#allocation14 + $0x80] sm:$0xff]   ;;  %v11915_v62 = vld [vmem:[#allocation14 + $0xc8] sm:$0xff]  }
 0x5db   :  { %v11072_v17 = vpop.f32.mrb[253].mxu0  ;;  %v11011_v42 = vpop.f32.mrb[239].mxu1  ;;  %11286 = vmatpush3.bf16.msra.mxu1 %v11914_v33 }
 0x5dc   :  { %v11073_v11 = vadd.f32 %v11072_v17, %v11071_v41  ;;  %v11074_v51 = vpop.f32.mrb[254].mxu0  ;;  %v11012_v44 = vadd.f32 %v11011_v42, %v11010_v13  ;;  %11287 = vmatprep.subr.bf16.mxu1 %v11915_v62 }
 0x5dd   :  { %v11075_v25 = vpop.f32.mrb[255].mxu0 }
 0x5de   :  { %v14048_v53 = vadd.f32 %v11073_v11, %v11009_v2  ;;  %v11076_v55 = vadd.f32 %v11075_v25, %v11074_v51  ;;  %v11916_v11 = vld [vmem:[#allocation14 + $0x88] sm:$0xff]  }
 0x5df   :  { %11288 = vmatpush3.bf16.msra.mxu1 %v11916_v11 }
 0x5e0   :  { %v14050_v34 = vadd.f32 %v11076_v55, %v11012_v44  ;;  %v11093_v22 = vpop.f32.mrb[240].mxu1 }
 0x5e1   :  { %v11094_v7 = vpop.f32.mrb[241].mxu1 }
 0x5e2   :  { %v11157_v9 = vpop.f32.mrb[0].mxu0  ;;  %v11095_v50 = vadd.f32 %v11094_v7, %v11093_v22  ;;  %v11096_v12 = vpop.f32.mrb[242].mxu1  ;;  %v11918_v22 = vld [vmem:[#allocation14 + $0xd0] sm:$0xff]  }
 0x5e3   :  { %v11158_v10 = vpop.f32.mrb[1].mxu0  ;;  %v11097_v0 = vpop.f32.mrb[243].mxu1  ;;  %11289 = vmatprep.subr.bf16.mxu1 %v11918_v22 }
 0x5e4   :  { %v7537_v23 = vadd.f32 %v11095_v50, %v14020_v15  ;;  %v11159_v4 = vadd.f32 %v11158_v10, %v11157_v9  ;;  %v11160_v38 = vpop.f32.mrb[2].mxu0  ;;  %v11098_v46 = vadd.f32 %v11097_v0, %v11096_v12  ;;  %v11910_v9 = vld [vmem:[#allocation14 + $0x18] sm:$0xff]   ;;  %v11911_v0 = vld [vmem:[#allocation14 + $0x60] sm:$0xff]  }
 0x5e5   :  { %v11161_v59 = vpop.f32.mrb[3].mxu0 }
 0x5e6   :  { %v7540_v14 = vadd.f32 %v11098_v46, %v14022_v47  ;;  %v11162_v39 = vadd.f32 %v11161_v59, %v11160_v38  ;;  %v14054_v20 = vadd.f32 %v11159_v4, %v7537_v23  ;;  %v11920_v23 = vld [vmem:[#allocation14 + $0x90] sm:$0xff]   ;;  %v11913_v59 = vld [vmem:[#allocation14 + $0x20] sm:$0xff]  }
 0x5e7   :  { %11290 = vmatpush3.bf16.msra.mxu1 %v11920_v23 }
 0x5e8   :  { %v11099_v60 = vpop.f32.mrb[244].mxu1  ;;  %v14056_v30 = vadd.f32 %v11162_v39, %v7540_v14 }
 0x5e9   :  { %v11100_v1 = vpop.f32.mrb[245].mxu1 }
 0x5ea   :  { %v11163_v21 = vpop.f32.mrb[4].mxu0  ;;  %v11101_v24 = vadd.f32 %v11100_v1, %v11099_v60  ;;  %v11102_v61 = vpop.f32.mrb[246].mxu1 }
 0x5eb   :  { %v11164_v45 = vpop.f32.mrb[5].mxu0  ;;  %v11103_v27 = vpop.f32.mrb[247].mxu1 }
 0x5ec   :  { %v7545_v15 = vadd.f32 %v11101_v24, %v14024_v16  ;;  %v11165_v40 = vadd.f32 %v11164_v45, %v11163_v21  ;;  %v11166_v56 = vpop.f32.mrb[6].mxu0  ;;  %v11104_v6 = vadd.f32 %v11103_v27, %v11102_v61  ;;  %v11908_v16 = vld [vmem:[#allocation14 + $0x10] sm:$0xff]   ;;  %v11922_v24 = vld [vmem:[#allocation14 + $0x98] sm:$0xff]  }
 0x5ed   :  { %v11167_v35 = vpop.f32.mrb[7].mxu0  ;;  %11226 = vmatpush3.bf16.msra.mxu0 %v11908_v16 }
 0x5ee   :  { %v7548_v47 = vadd.f32 %v11104_v6, %v14026_v8  ;;  %v11168_v5 = vadd.f32 %v11167_v35, %v11166_v56  ;;  %v14060_v52 = vadd.f32 %v11165_v40, %v7545_v15  ;;  %v11909_v8 = vld [vmem:[#allocation14 + $0x58] sm:$0xff]   ;;  %v11924_v40 = vld [vmem:[#allocation14 + $0xe0] sm:$0xff]   ;;  %v11919_v6 = vld [vmem:[#allocation14 + $0x28] sm:$0xff]  }
 0x5ef   :  { %11227 = vmatprep.subr.bf16.mxu0 %v11909_v8 }
 0x5f0   :  { %v11105_v18 = vpop.f32.mrb[248].mxu1  ;;  %v14062_v19 = vadd.f32 %v11168_v5, %v7548_v47 }
 0x5f1   :  { %v11106_v54 = vpop.f32.mrb[249].mxu1  ;;  %11228 = vmatpush3.bf16.msra.mxu0 %v11910_v9  ;;  %v11935_v9 = vld [vmem:[#allocation14 + $0x140] sm:$0xff]  }
 0x5f2   :  { %v11169_v41 = vpop.f32.mrb[8].mxu0  ;;  %v11107_v2 = vadd.f32 %v11106_v54, %v11105_v18  ;;  %v11108_v13 = vpop.f32.mrb[250].mxu1  ;;  %11229 = vmatprep.subr.bf16.mxu0 %v11911_v0  ;;  %v11925_v54 = vld [vmem:[#allocation14 + $0x30] sm:$0xff]  }
 0x5f3   :  { %v11170_v17 = vpop.f32.mrb[9].mxu0  ;;  %v11109_v42 = vpop.f32.mrb[251].mxu1 }
 0x5f4   :  { %v7553_v51 = vadd.f32 %v11107_v2, %v14028_v29  ;;  %v11171_v44 = vadd.f32 %v11170_v17, %v11169_v41  ;;  %v11172_v25 = vpop.f32.mrb[10].mxu0  ;;  %v11110_v55 = vadd.f32 %v11109_v42, %v11108_v13  ;;  %v11921_v29 = vld [vmem:[#allocation14 + $0xd8] sm:$0xff]   ;;  %v11928_v13 = vld [vmem:[#allocation14 + $0xa8] sm:$0xff]  }
 0x5f5   :  { %v11173_v7 = vpop.f32.mrb[11].mxu0  ;;  %11291 = vmatprep.subr.bf16.mxu1 %v11921_v29  ;;  %11230 = vmatpush3.bf16.msra.mxu0 %v11913_v59 }
 0x5f6   :  { %v7556_v50 = vadd.f32 %v11110_v55, %v14030_v36  ;;  %v11174_v12 = vadd.f32 %v11173_v7, %v11172_v25  ;;  %v14066_v10 = vadd.f32 %v11171_v44, %v7553_v51  ;;  %v11917_v36 = vld [vmem:[#allocation14 + $0x68] sm:$0xff]   ;;  %11292 = vmatpush3.bf16.msra.mxu1 %v11922_v24  ;;  %v11930_v51 = vld [vmem:[#allocation14 + $0xf0] sm:$0xff]   ;;  %v11931_v25 = vld [vmem:[#allocation14 + $0x38] sm:$0xff]  }
 0x5f7   :  { %11231 = vmatprep.subr.bf16.mxu0 %v11917_v36  ;;  %11293 = vmatprep.subr.bf16.mxu1 %v11924_v40 }
 0x5f8   :  { %v11111_v4 = vpop.f32.mrb[252].mxu1  ;;  %v14068_v38 = vadd.f32 %v11174_v12, %v7556_v50  ;;  %v11932_v50 = vld [vmem:[#allocation14 + $0xb0] sm:$0xff]  }
 0x5f9   :  { %v11112_v46 = vpop.f32.mrb[253].mxu1  ;;  %11232 = vmatpush3.bf16.msra.mxu0 %v11919_v6 }
 0x5fa   :  { %v11175_v14 = vpop.f32.mrb[12].mxu0  ;;  %v11113_v39 = vadd.f32 %v11112_v46, %v11111_v4  ;;  %v11114_v60 = vpop.f32.mrb[254].mxu1  ;;  %11233 = vmatprep.subr.bf16.mxu0 %v11923_v43  ;;  %11294 = vmatpush3.bf16.msra.mxu1 %v11926_v48 }
 0x5fb   :  { %v11176_v1 = vpop.f32.mrb[13].mxu0  ;;  %v11115_v21 = vpop.f32.mrb[255].mxu1 }
 0x5fc   :  { %v7561_v61 = vadd.f32 %v11113_v39, %v14032_v49  ;;  %v11177_v45 = vadd.f32 %v11176_v1, %v11175_v14  ;;  %v11178_v27 = vpop.f32.mrb[14].mxu0  ;;  %v11116_v15 = vadd.f32 %v11115_v21, %v11114_v60  ;;  %v11927_v49 = vld [vmem:[#allocation14 + $0xe8] sm:$0xff]   ;;  %v11934_v14 = vld [vmem:[#allocation14 + $0xb8] sm:$0xff]   ;;  %v11940_v21 = vld [vmem:[#allocation14 + $0x1c0] sm:$0xff]  }
 0x5fd   :  { %v11179_v56 = vpop.f32.mrb[15].mxu0  ;;  %11295 = vmatprep.subr.bf16.mxu1 %v11927_v49  ;;  %11234 = vmatpush3.bf16.msra.mxu0 %v11925_v54 }
 0x5fe   :  { %v7564_v35 = vadd.f32 %v11116_v15, %v14034_v58  ;;  %v11180_v47 = vadd.f32 %v11179_v56, %v11178_v27  ;;  %v14072_v5 = vadd.f32 %v11177_v45, %v7561_v61  ;;  %v11929_v58 = vld [vmem:[#allocation14 + $0x78] sm:$0xff]   ;;  %11296 = vmatpush3.bf16.msra.mxu1 %v11928_v13 }
 0x5ff   :  { %11235 = vmatprep.subr.bf16.mxu0 %v11929_v58  ;;  %11297 = vmatprep.subr.bf16.mxu1 %v11930_v51 }
 0x600   :  { %v11117_v32 = vpop.f32.mrb[0].mxu1  ;;  %v14074_v18 = vadd.f32 %v11180_v47, %v7564_v35 }
 0x601   :  { %v11118_v63 = vpop.f32.mrb[1].mxu1  ;;  %11236 = vmatpush3.bf16.msra.mxu0 %v11931_v25 }
 0x602   :  { %v11181_v16 = vpop.f32.mrb[16].mxu0  ;;  %v11119_v33 = vadd.f32 %v11118_v63, %v11117_v32  ;;  %v11120_v62 = vpop.f32.mrb[2].mxu1  ;;  %11349 = vmatprep.subr.bf16.mxu0 %v11935_v9  ;;  %11298 = vmatpush3.bf16.msra.mxu1 %v11932_v50 }
 0x603   :  { %v11182_v41 = vpop.f32.mrb[17].mxu0  ;;  %v11121_v2 = vpop.f32.mrb[3].mxu1 }
 0x604   :  { %v7569_v8 = vadd.f32 %v11119_v33, %v14036_v3  ;;  %v11183_v17 = vadd.f32 %v11182_v41, %v11181_v16  ;;  %v11184_v42 = vpop.f32.mrb[18].mxu0  ;;  %v11122_v11 = vadd.f32 %v11121_v2, %v11120_v62  ;;  %v11933_v3 = vld [vmem:[#allocation14 + $0xf8] sm:$0xff]  }
 0x605   :  { %v11185_v44 = vpop.f32.mrb[19].mxu0  ;;  %11299 = vmatprep.subr.bf16.mxu1 %v11933_v3 }
 0x606   :  { %v7572_v55 = vadd.f32 %v11122_v11, %v14038_v57  ;;  %v11186_v22 = vadd.f32 %v11185_v44, %v11184_v42  ;;  %v14078_v7 = vadd.f32 %v11183_v17, %v7569_v8  ;;  %11300 = vmatpush3.bf16.msra.mxu1 %v11934_v14 }
 0x607   :  { %11413 = vmatprep.subr.bf16.mxu1 %v11940_v21 }
 0x608   :  { %v11123_v12 = vpop.f32.mrb[4].mxu1  ;;  %v14080_v0 = vadd.f32 %v11186_v22, %v7572_v55 }
 0x609   :  { %v11124_v23 = vpop.f32.mrb[5].mxu1 }
 0x60a   :  { %v11187_v4 = vpop.f32.mrb[20].mxu0  ;;  %v11125_v29 = vadd.f32 %v11124_v23, %v11123_v12  ;;  %v11126_v46 = vpop.f32.mrb[6].mxu1 }
 0x60b   :  { %v11188_v59 = vpop.f32.mrb[21].mxu0  ;;  %v11127_v57 = vpop.f32.mrb[7].mxu1 }
 0x60c   :  { %v7577_v39 = vadd.f32 %v11125_v29, %v14040_v31  ;;  %v11189_v60 = vadd.f32 %v11188_v59, %v11187_v4  ;;  %v11190_v36 = vpop.f32.mrb[22].mxu0  ;;  %v11128_v1 = vadd.f32 %v11127_v57, %v11126_v46 }
 0x60d   :  { %v11191_v24 = vpop.f32.mrb[23].mxu0 }
 0x60e   :  { %v7580_v61 = vadd.f32 %v11128_v1, %v14042_v28  ;;  %v11192_v45 = vadd.f32 %v11191_v24, %v11190_v36  ;;  %v14084_v27 = vadd.f32 %v11189_v60, %v7577_v39 }
 0x610   :  { %v11129_v15 = vpop.f32.mrb[8].mxu1  ;;  %v14086_v40 = vadd.f32 %v11192_v45, %v7580_v61 }
 0x611   :  { %v11130_v56 = vpop.f32.mrb[9].mxu1 }
 0x612   :  { %v11193_v6 = vpop.f32.mrb[24].mxu0  ;;  %v11131_v35 = vadd.f32 %v11130_v56, %v11129_v15  ;;  %v11132_v31 = vpop.f32.mrb[10].mxu1 }
 0x613   :  { %v11194_v47 = vpop.f32.mrb[25].mxu0  ;;  %v11133_v43 = vpop.f32.mrb[11].mxu1 }
 0x614   :  { %v7585_v48 = vadd.f32 %v11131_v35, %v14044_v26  ;;  %v11195_v32 = vadd.f32 %v11194_v47, %v11193_v6  ;;  %v11196_v49 = vpop.f32.mrb[26].mxu0  ;;  %v11134_v63 = vadd.f32 %v11133_v43, %v11132_v31 }
 0x615   :  { %v11197_v28 = vpop.f32.mrb[27].mxu0 }
 0x616   :  { %v7588_v54 = vadd.f32 %v11134_v63, %v14046_v37  ;;  %v11198_v16 = vadd.f32 %v11197_v28, %v11196_v49  ;;  %v14090_v33 = vadd.f32 %v11195_v32, %v7585_v48 }
 0x618   :  { %v11135_v62 = vpop.f32.mrb[12].mxu1  ;;  %v14092_v58 = vadd.f32 %v11198_v16, %v7588_v54 }
 0x619   :  { %v11136_v41 = vpop.f32.mrb[13].mxu1 }
 0x61a   :  { %v11199_v2 = vpop.f32.mrb[28].mxu0  ;;  %v11137_v13 = vadd.f32 %v11136_v41, %v11135_v62  ;;  %v11138_v8 = vpop.f32.mrb[14].mxu1 }
 0x61b   :  { %v11200_v17 = vpop.f32.mrb[29].mxu0  ;;  %v11139_v42 = vpop.f32.mrb[15].mxu1 }
 0x61c   :  { %v7593_v26 = vadd.f32 %v11137_v13, %v14048_v53  ;;  %v11201_v11 = vadd.f32 %v11200_v17, %v11199_v2  ;;  %v11202_v51 = vpop.f32.mrb[30].mxu0  ;;  %v11140_v44 = vadd.f32 %v11139_v42, %v11138_v8 }
 0x61d   :  { %v11203_v25 = vpop.f32.mrb[31].mxu0 }
 0x61e   :  { %v7596_v37 = vadd.f32 %v11140_v44, %v14050_v34  ;;  %v11204_v55 = vadd.f32 %v11203_v25, %v11202_v51  ;;  %v7690_v22 = vadd.f32 %v11201_v11, %v7593_v26 }
 0x620   :  { %v11543_v9 = vpop.f32.mrb[16].mxu1  ;;  %v7693_v50 = vadd.f32 %v11204_v55, %v7596_v37 }
 0x621   :  { %v14097_v12 = vadd.f32 %v11543_v9, %v14060_v52  ;;  %v7730_v3 = vpop.f32.mrb[17].mxu1 }
 0x622   :  { %v14100_v23 = vadd.f32 %v7730_v3, %v14054_v20  ;;  %v11544_v4 = vpop.f32.mrb[18].mxu1 }
 0x623   :  { %v14103_v53 = vadd.f32 %v11544_v4, %v14062_v19  ;;  %v7733_v29 = vpop.f32.mrb[19].mxu1  ;;  %v7817_v20 = vmul.f32 %v14097_v12, %v14097_v12 }
 0x624   :  { %v14106_v46 = vadd.f32 %v7733_v29, %v14056_v30  ;;  %v7815_v34 = vmul.f32 %v14100_v23, %v14100_v23 }
 0x625   :  { %v7818_v60 = vmul.f32 %v14103_v53, %v14103_v53 }
 0x626   :  { %v7793_v59 = vadd.f32 %v14106_v46, %v14100_v23  ;;  %v7816_v52 = vmul.f32 %v14106_v46, %v14106_v46 }
 0x628   :  { %v7794_v57 = vadd.f32 %v7793_v59, %v14097_v12  ;;  %v7831_v19 = vadd.f32 %v7816_v52, %v7815_v34  ;;  %v11547_v14 = vpop.f32.mrb[20].mxu1 }
 0x629   :  { %v14118_v39 = vadd.f32 %v11547_v14, %v14072_v5  ;;  %v7746_v30 = vpop.f32.mrb[21].mxu1 }
 0x62a   :  { %v7832_v36 = vadd.f32 %v7831_v19, %v7817_v20  ;;  %v14123_v1 = vadd.f32 %v7746_v30, %v14066_v10  ;;  %v7795_v21 = vadd.f32 %v7794_v57, %v14103_v53  ;;  %v11548_v24 = vpop.f32.mrb[22].mxu1 }
 0x62b   :  { %v14127_v61 = vadd.f32 %v11548_v24, %v14074_v18  ;;  %v7749_v45 = vpop.f32.mrb[23].mxu1  ;;  %v7821_v18 = vmul.f32 %v14118_v39, %v14118_v39 }
 0x62c   :  { %v7796_v15 = vadd.f32 %v7795_v21, %v14123_v1  ;;  %v7819_v5 = vmul.f32 %v14123_v1, %v14123_v1  ;;  %v7833_v56 = vadd.f32 %v7832_v36, %v7818_v60  ;;  %v14133_v6 = vadd.f32 %v7749_v45, %v14068_v38 }
 0x62d   :  { %v7822_v38 = vmul.f32 %v14127_v61, %v14127_v61 }
 0x62e   :  { %v7834_v35 = vadd.f32 %v7833_v56, %v7819_v5  ;;  %v7797_v10 = vadd.f32 %v7796_v15, %v14133_v6  ;;  %v7820_v31 = vmul.f32 %v14133_v6, %v14133_v6 }
 0x630   :  { %v7798_v47 = vadd.f32 %v7797_v10, %v14118_v39  ;;  %v7835_v43 = vadd.f32 %v7834_v35, %v7820_v31  ;;  %v11551_v48 = vpop.f32.mrb[24].mxu1 }
 0x631   :  { %v14142_v32 = vadd.f32 %v11551_v48, %v14084_v27  ;;  %v7762_v49 = vpop.f32.mrb[25].mxu1 }
 0x632   :  { %v7836_v63 = vadd.f32 %v7835_v43, %v7821_v18  ;;  %v14147_v28 = vadd.f32 %v7762_v49, %v14078_v7  ;;  %v7799_v54 = vadd.f32 %v7798_v47, %v14127_v61  ;;  %v11552_v16 = vpop.f32.mrb[26].mxu1 }
 0x633   :  { %v14151_v62 = vadd.f32 %v11552_v16, %v14086_v40  ;;  %v7765_v41 = vpop.f32.mrb[27].mxu1  ;;  %v7825_v40 = vmul.f32 %v14142_v32, %v14142_v32 }
 0x634   :  { %v7800_v2 = vadd.f32 %v7799_v54, %v14147_v28  ;;  %v7823_v27 = vmul.f32 %v14147_v28, %v14147_v28  ;;  %v7837_v13 = vadd.f32 %v7836_v63, %v7822_v38  ;;  %v14157_v8 = vadd.f32 %v7765_v41, %v14080_v0 }
 0x635   :  { %v7826_v0 = vmul.f32 %v14151_v62, %v14151_v62 }
 0x636   :  { %v7838_v17 = vadd.f32 %v7837_v13, %v7823_v27  ;;  %v7801_v7 = vadd.f32 %v7800_v2, %v14157_v8  ;;  %v7824_v42 = vmul.f32 %v14157_v8, %v14157_v8 }
 0x638   :  { %v7802_v26 = vadd.f32 %v7801_v7, %v14142_v32  ;;  %v7839_v11 = vadd.f32 %v7838_v17, %v7824_v42  ;;  %v11555_v51 = vpop.f32.mrb[28].mxu1 }
 0x639   :  { %v14165_v44 = vadd.f32 %v11555_v51, %v7690_v22  ;;  %v7778_v25 = vpop.f32.mrb[29].mxu1  ;;  %v14225_v51 = vld [vmem:[%s14790_s5 + $0x2] ss:$0 sm:$0xff] }
 0x63a   :  { %v7840_v37 = vadd.f32 %v7839_v11, %v7825_v40  ;;  %v14170_v55 = vadd.f32 %v7778_v25, %v14090_v33  ;;  %v7803_v9 = vadd.f32 %v7802_v26, %v14151_v62  ;;  %v11556_v3 = vpop.f32.mrb[30].mxu1 }
 0x63b   :  { %v14173_v4 = vadd.f32 %v11556_v3, %v7693_v50  ;;  %v7781_v29 = vpop.f32.mrb[31].mxu1  ;;  %v7829_v33 = vmul.f32 %v14165_v44, %v14165_v44  ;;  %v14234_v3 = vld [vmem:[%s14791_s6 + $0x2] ss:$0 sm:$0xff] }
 0x63c   :  { %v7804_v34 = vadd.f32 %v7803_v9, %v14170_v55  ;;  %v7827_v22 = vmul.f32 %v14170_v55, %v14170_v55  ;;  %v7841_v59 = vadd.f32 %v7840_v37, %v7826_v0  ;;  %v7782_v52 = vadd.f32 %v7781_v29, %v14092_v58 }
 0x63d   :  { %v7830_v50 = vmul.f32 %v14173_v4, %v14173_v4 }
 0x63e   :  { %v7842_v20 = vadd.f32 %v7841_v59, %v7827_v22  ;;  %v7805_v57 = vadd.f32 %v7804_v34, %v7782_v52  ;;  %v7828_v19 = vmul.f32 %v7782_v52, %v7782_v52 }
 0x640   :  { %v7806_v14 = vadd.f32 %v7805_v57, %v14165_v44  ;;  %v7843_v30 = vadd.f32 %v7842_v20, %v7828_v19 }
 0x642   :  { %v7807_v60 = vadd.f32 %v7806_v14, %v14173_v4  ;;  %v7844_v36 = vadd.f32 %v7843_v30, %v7829_v33 }
 0x644   :  { %v7808_v21 = vrot.slane %v7807_v60, 4  ;;  %v7845_v24 = vadd.f32 %v7844_v36, %v7830_v50 }
 0x646   :  { %v7809_v45 = vadd.f32 %v7808_v21, %v7807_v60  ;;  %v7846_v15 = vrot.slane %v7845_v24, 4 }
 0x648   :  { %v7810_v58 = vrot.slane %v7809_v45, 2  ;;  %v7847_v5 = vadd.f32 %v7846_v15, %v7845_v24 }
 0x64a   :  { %v7811_v56 = vadd.f32 %v7810_v58, %v7809_v45  ;;  %v7848_v35 = vrot.slane %v7847_v5, 2  ;;  %v8069_v45 = vld [vmem:[#allocation5 + $0x1] sm:$0xff] }
 0x64c   :  { %v7812_v10 = vrot.slane %v7811_v56, 1  ;;  %v7849_v31 = vadd.f32 %v7848_v35, %v7847_v5 }
 0x64e   :  { %v7813_v18 = vadd.f32 %v7812_v10, %v7811_v56  ;;  %v7850_v47 = vrot.slane %v7849_v31, 1 }
 0x650   :  { %v14185_v43 = vmul.f32 0.0078125, %v7813_v18  ;;  %v7851_v48 = vadd.f32 %v7850_v47, %v7849_v31 }
 0x652   :  { %v7852_v49 = vmul.f32 0.0078125, %v7851_v48  ;;  %v7853_v38 = vmul.f32 %v14185_v43, %v14185_v43  ;;  %v7868_v63 = vsub.f32 %v7782_v52, %v14185_v43  ;;  %v7855_v54 = vsub.f32 %v14100_v23, %v14185_v43 }
 0x653   :  { %v7856_v16 = vsub.f32 %v14106_v46, %v14185_v43  ;;  %v7857_v41 = vsub.f32 %v14097_v12, %v14185_v43  ;;  %v7858_v2 = vsub.f32 %v14103_v53, %v14185_v43  ;;  %v7859_v27 = vsub.f32 %v14123_v1, %v14185_v43 }
 0x654   :  { %v7854_v13 = vsub.f32 %v7852_v49, %v7853_v38  ;;  %v7860_v17 = vsub.f32 %v14133_v6, %v14185_v43  ;;  %v7861_v7 = vsub.f32 %v14118_v39, %v14185_v43  ;;  %v7862_v23 = vsub.f32 %v14127_v61, %v14185_v43 }
 0x655   :  { %v7863_v46 = vsub.f32 %v14147_v28, %v14185_v43  ;;  %v7864_v12 = vsub.f32 %v14157_v8, %v14185_v43  ;;  %v7865_v53 = vsub.f32 %v14142_v32, %v14185_v43  ;;  %v7866_v1 = vsub.f32 %v14151_v62, %v14185_v43  ;;  %v8101_v8 = vld [vmem:[#allocation5 + $0x2] sm:$0xff] }
 0x656   :  { %v7871_v42 = vmax.f32 %v7854_v13, 0.0  ;;  %v7867_v6 = vsub.f32 %v14170_v55, %v14185_v43  ;;  %v7869_v39 = vsub.f32 %v14165_v44, %v14185_v43  ;;  %v7870_v40 = vsub.f32 %v14173_v4, %v14185_v43 }
 0x658   :  { %v7872_v26 = vadd.f32 1e-05, %v7871_v42 }
 0x65a   :  { %11979 = vrsqrt.f32 %v7872_v26 }
 0x664   :  { %v14220_v11 = vpop.eup %11979 }
 0x665   :  { %v7887_v25 = vmul.f32 %v14220_v11, %v7868_v63  ;;  %v7874_v0 = vmul.f32 %v14220_v11, %v7855_v54  ;;  %v7875_v37 = vmul.f32 %v14220_v11, %v7856_v16  ;;  %v7876_v9 = vmul.f32 %v14220_v11, %v7857_v41 }
 0x666   :  { %v7877_v29 = vmul.f32 %v14220_v11, %v7858_v2  ;;  %v7878_v34 = vmul.f32 %v14220_v11, %v7859_v27  ;;  %v7879_v22 = vmul.f32 %v14220_v11, %v7860_v17  ;;  %v7880_v59 = vmul.f32 %v14220_v11, %v7861_v7 }
 0x667   :  { %v7908_v52 = vmul.f32 %v14225_v51, %v7887_v25  ;;  %v7895_v20 = vmul.f32 %v14225_v51, %v7874_v0  ;;  %v7896_v57 = vmul.f32 %v14225_v51, %v7875_v37  ;;  %v7897_v19 = vmul.f32 %v14225_v51, %v7876_v9 }
 0x668   :  { %v7898_v33 = vmul.f32 %v14225_v51, %v7877_v29  ;;  %v7899_v14 = vmul.f32 %v14225_v51, %v7878_v34  ;;  %v7900_v30 = vmul.f32 %v14225_v51, %v7879_v22  ;;  %v7901_v50 = vmul.f32 %v14225_v51, %v7880_v59 }
 0x669   :  { %v7929_v60 = vadd.f32 %v14234_v3, %v7908_v52  ;;  %v7916_v36 = vadd.f32 %v14234_v3, %v7895_v20  ;;  %v7917_v21 = vadd.f32 %v14234_v3, %v7896_v57  ;;  %v7918_v24 = vadd.f32 %v14234_v3, %v7897_v19  ;;  %v11936_v19 = vld [vmem:[#allocation14 + $0x100] sm:$0xff]  }
 0x66a   :  { %v7919_v15 = vadd.f32 %v14234_v3, %v7898_v33  ;;  %v7920_v58 = vadd.f32 %v14234_v3, %v7899_v14  ;;  %v7921_v5 = vadd.f32 %v14234_v3, %v7900_v30  ;;  %v7922_v56 = vadd.f32 %v14234_v3, %v7901_v50  ;;  %v11937_v50 = vld [vmem:[#allocation14 + $0x148] sm:$0xff]  }
 0x66b   :  { %vm7945_vm2 = vcmp.ge.f32.partialorder %v7929_v60, 0.0  ;;  %v7961_v35 = vmul.f32 0.2, %v7929_v60  ;;  %vm7932_vm3 = vcmp.ge.f32.partialorder %v7916_v36, 0.0  ;;  %v7948_v10 = vmul.f32 0.2, %v7916_v36 }
 0x66c   :  { %vm7933_vm4 = vcmp.ge.f32.partialorder %v7917_v21, 0.0  ;;  %v7949_v31 = vmul.f32 0.2, %v7917_v21  ;;  %vm7934_vm5 = vcmp.ge.f32.partialorder %v7918_v24, 0.0  ;;  %v7950_v18 = vmul.f32 0.2, %v7918_v24 }
 0x66d   :  { %v14256_v47 = vsel %vm7945_vm2, %v7929_v60, %v7961_v35  ;;  %v14258_v48 = vsel %vm7932_vm3, %v7916_v36, %v7948_v10  ;;  %vm7935_vm6 = vcmp.ge.f32.partialorder %v7919_v15, 0.0  ;;  %v7951_v49 = vmul.f32 0.2, %v7919_v15 }
 0x66e   :  { %8034 = vst [vmem:[#allocation5 + $0x101] sm:$0xff] %v14256_v47  ;;  %8021 = vst [vmem:[#allocation5 + $0x11] sm:$0xff] %v14258_v48  ;;  %v8085_v38 = vpack.c.bf16 %v14258_v48, %v8069_v45  ;;  %v14263_v63 = vsel %vm7933_vm4, %v7917_v21, %v7949_v31  ;;  %v14265_v54 = vsel %vm7934_vm5, %v7918_v24, %v7950_v18  ;;  %vm7936_vm7 = vcmp.ge.f32.partialorder %v7920_v58, 0.0  ;;  %v11938_v45 = vld [vmem:[#allocation14 + $0x108] sm:$0xff]  }
 0x66f   :  { %8022 = vst [vmem:[#allocation5 + $0x21] sm:$0xff] %v14263_v63  ;;  %8023 = vst [vmem:[#allocation5 + $0x31] sm:$0xff] %v14265_v54  ;;  %v14271_v16 = vpack.c.bf16 %v14265_v54, %v14263_v63  ;;  %v14273_v41 = vsel %vm7935_vm6, %v7919_v15, %v7951_v49  ;;  %v7952_v2 = vmul.f32 0.2, %v7920_v58  ;;  %vm7937_vm8 = vcmp.ge.f32.partialorder %v7921_v5, 0.0 }
 0x670   :  { %9006 = vmatprep.mubr.bf16.mxu0 %v8085_v38  ;;  %8024 = vst [vmem:[#allocation5 + $0x41] sm:$0xff] %v14273_v41  ;;  %v7953_v27 = vmul.f32 0.2, %v7921_v5  ;;  %vm7938_vm9 = vcmp.ge.f32.partialorder %v7922_v56, 0.0  ;;  %v7954_v13 = vmul.f32 0.2, %v7922_v56  ;;  %v7881_v17 = vmul.f32 %v14220_v11, %v7862_v23 }
 0x671   :  { %v14280_v7 = vsel %vm7936_vm7, %v7920_v58, %v7952_v2  ;;  %v7882_v42 = vmul.f32 %v14220_v11, %v7863_v46  ;;  %v7883_v26 = vmul.f32 %v14220_v11, %v7864_v12  ;;  %v7884_v25 = vmul.f32 %v14220_v11, %v7865_v53  ;;  %v11939_v58 = vld [vmem:[#allocation14 + $0x150] sm:$0xff]  }
 0x672   :  { %8025 = vst [vmem:[#allocation5 + $0x51] sm:$0xff] %v14280_v7  ;;  %v14297_v61 = vpack.c.bf16 %v14280_v7, %v14273_v41  ;;  %v14299_v23 = vsel %vm7937_vm8, %v7921_v5, %v7953_v27  ;;  %v14301_v28 = vsel %vm7938_vm9, %v7922_v56, %v7954_v13  ;;  %v7902_v46 = vmul.f32 %v14225_v51, %v7881_v17  ;;  %v11946_v56 = vld [vmem:[#allocation14 + $0x188] sm:$0xff]   ;;  %v11948_v2 = vld [vmem:[#allocation14 + $0x1d0] sm:$0xff]  }
 0x673   :  { %8026 = vst [vmem:[#allocation5 + $0x61] sm:$0xff] %v14299_v23  ;;  %8027 = vst [vmem:[#allocation5 + $0x71] sm:$0xff] %v14301_v28  ;;  %v14308_v32 = vpack.c.bf16 %v14301_v28, %v14299_v23  ;;  %v7903_v12 = vmul.f32 %v14225_v51, %v7882_v42  ;;  %v7904_v53 = vmul.f32 %v14225_v51, %v7883_v26 }
 0x674   :  { %v7905_v0 = vmul.f32 %v14225_v51, %v7884_v25  ;;  %v7923_v37 = vadd.f32 %v14234_v3, %v7902_v46  ;;  %v7885_v9 = vmul.f32 %v14220_v11, %v7866_v1  ;;  %v7886_v29 = vmul.f32 %v14220_v11, %v7867_v6  ;;  %v14335_v6 = vld [vmem:[#allocation2 + $0x8] sm:$0xff]  ;;  %v11941_v25 = vld [vmem:[#allocation14 + $0x110] sm:$0xff]  }
 0x675   :  { %v7888_v34 = vmul.f32 %v14220_v11, %v7869_v39  ;;  %v8133_v22 = vld [vmem:[#allocation5 + $0x10] sm:$0xff]  ;;  %v7924_v52 = vadd.f32 %v14234_v3, %v7903_v12  ;;  %v7925_v20 = vadd.f32 %v14234_v3, %v7904_v53  ;;  %v7889_v55 = vmul.f32 %v14220_v11, %v7870_v40  ;;  %v11942_v40 = vld [vmem:[#allocation14 + $0x180] sm:$0xff]   ;;  %v11944_v11 = vld [vmem:[#allocation14 + $0x1c8] sm:$0xff]  }
 0x676   :  { %v14326_v59 = vld [vmem:[#allocation5 + $0x12] sm:$0xff]  ;;  %v7926_v62 = vadd.f32 %v14234_v3, %v7905_v0  ;;  %v8134_v1 = vld [vmem:[#allocation5 + $0x20] sm:$0xff]  ;;  %v8053_v44 = vpack.c.bf16 %v8133_v22, %v14335_v6  ;;  %vm7939_vm10 = vcmp.ge.f32.partialorder %v7923_v37, 0.0  ;;  %v7955_v33 = vmul.f32 0.2, %v7923_v37 }
 0x677   :  { %v8117_v39 = vpack.c.bf16 %v14326_v59, %v8101_v8  ;;  %v8135_v57 = vld [vmem:[#allocation5 + $0x30] sm:$0xff]  ;;  %v8149_v14 = vpack.c.bf16 %v8134_v1, %v8133_v22  ;;  %v14339_v30 = vld [vmem:[#allocation5 + $0x40] sm:$0xff]  ;;  %vm7940_vm11 = vcmp.ge.f32.partialorder %v7924_v52, 0.0  ;;  %v7956_v60 = vmul.f32 0.2, %v7924_v52  ;;  %v11943_v53 = vld [vmem:[#allocation14 + $0x158] sm:$0xff]  }
 0x678   :  { %9007 = vmatmul.mubr.bf16.vlgmr.msra.gmra.mrb[32].mxu0 %v8053_v44  ;;  %v8150_v4 = vpack.c.bf16 %v14339_v30, %v8135_v57  ;;  %v14342_v43 = vsel %vm7939_vm10, %v7923_v37, %v7955_v33  ;;  %vm7941_vm12 = vcmp.ge.f32.partialorder %v7925_v20, 0.0  ;;  %v7957_v21 = vmul.f32 0.2, %v7925_v20  ;;  %v14360_v49 = vld [vmem:[#allocation5 + $0x22] sm:$0xff]  ;;  %v14362_v38 = vld [vmem:[#allocation5 + $0x32] sm:$0xff] }
 0x679   :  { %9103 = vmatprep.mubr.bf16.mxu1 %v8149_v14  ;;  %9014 = vmatprep.mubr.bf16.mxu0 %v14271_v16  ;;  %8028 = vst [vmem:[#allocation5 + $0x81] sm:$0xff] %v14342_v43  ;;  %v14346_v36 = vsel %vm7940_vm11, %v7924_v52, %v7956_v60  ;;  %vm7942_vm13 = vcmp.ge.f32.partialorder %v7926_v62, 0.0  ;;  %v7906_v24 = vmul.f32 %v14225_v51, %v7885_v9  ;;  %v7958_v15 = vmul.f32 0.2, %v7926_v62  ;;  %v8137_v42 = vld [vmem:[#allocation5 + $0x50] sm:$0xff]  ;;  %v11947_v44 = vld [vmem:[#allocation14 + $0x160] sm:$0xff]  }
 0x67a   :  { %9104 = vmatmul.mubr.bf16.vlgmr.msra.gmra.mrb[32].mxu1 %v8117_v39  ;;  %11350 = vmatpush3.bf16.msra.mxu0 %v11936_v19  ;;  %8029 = vst [vmem:[#allocation5 + $0xb1] sm:$0xff] %v14346_v36  ;;  %v14351_v5 = vsel %vm7941_vm12, %v7925_v20, %v7957_v21  ;;  %v7907_v31 = vmul.f32 %v14225_v51, %v7886_v29  ;;  %v14371_v26 = vld [vmem:[#allocation5 + $0x60] sm:$0xff]  ;;  %v11954_v33 = vld [vmem:[#allocation14 + $0x198] sm:$0xff]  }
 0x67b   :  { %9111 = vmatprep.mubr.bf16.mxu1 %v8150_v4  ;;  %11351 = vmatprep.subr.bf16.mxu0 %v11937_v50  ;;  %8030 = vst [vmem:[#allocation5 + $0xc1] sm:$0xff] %v14351_v5  ;;  %v14354_v35 = vsel %vm7942_vm13, %v7926_v62, %v7958_v15  ;;  %v7927_v10 = vadd.f32 %v14234_v3, %v7906_v24  ;;  %v11945_v62 = vld [vmem:[#allocation14 + $0x118] sm:$0xff]   ;;  %v14408_v60 = vld [vmem:[#allocation5 + $0x42] sm:$0xff]  ;;  %v8139_v24 = vld [vmem:[#allocation5 + $0x70] sm:$0xff] }
 0x67c   :  { %11414 = vmatpush3.bf16.msra.mxu1 %v11942_v40  ;;  %v14358_v18 = vpack.c.bf16 %v8135_v57, %v8134_v1  ;;  %8031 = vst [vmem:[#allocation5 + $0xd1] sm:$0xff] %v14354_v35  ;;  %v14367_v27 = vpack.c.bf16 %v14354_v35, %v14351_v5  ;;  %v7909_v13 = vmul.f32 %v14225_v51, %v7888_v34  ;;  %v11950_v34 = vld [vmem:[#allocation14 + $0x190] sm:$0xff]   ;;  %v11956_v40 = vld [vmem:[#allocation14 + $0x1e0] sm:$0xff]  }
 0x67d   :  { %11415 = vmatprep.subr.bf16.mxu1 %v11944_v11  ;;  %v7910_v17 = vmul.f32 %v14225_v51, %v7889_v55  ;;  %vm7943_vm14 = vcmp.ge.f32.partialorder %v7927_v10, 0.0  ;;  %v7959_v46 = vmul.f32 0.2, %v7927_v10  ;;  %v7928_v8 = vadd.f32 %v14234_v3, %v7907_v31  ;;  %v14410_v4 = vld [vmem:[#allocation5 + $0x52] sm:$0xff]  ;;  %v11949_v15 = vld [vmem:[#allocation14 + $0x120] sm:$0xff]  }
 0x67e   :  { %11352 = vmatpush3.bf16.msra.mxu0 %v11938_v45  ;;  %v8181_v12 = vpack.c.bf16 %v14263_v63, %v14258_v48  ;;  %v7930_v0 = vadd.f32 %v14234_v3, %v7909_v13  ;;  %v8182_v51 = vpack.c.bf16 %v14273_v41, %v14265_v54  ;;  %v14383_v9 = vpack.c.bf16 %v14362_v38, %v14360_v49  ;;  %v11971_v48 = vld [vmem:[#allocation14 + $0x220] sm:$0xff]  }
 0x67f   :  { %11353 = vmatprep.subr.bf16.mxu0 %v11939_v58  ;;  %v7931_v37 = vadd.f32 %v14234_v3, %v7910_v17  ;;  %v14385_v29 = vsel %vm7943_vm14, %v7927_v10, %v7959_v46  ;;  %vm7944_vm15 = vcmp.ge.f32.partialorder %v7928_v8, 0.0  ;;  %v7960_v22 = vmul.f32 0.2, %v7928_v8  ;;  %v11952_v3 = vld [vmem:[#allocation14 + $0x1d8] sm:$0xff]   ;;  %v11951_v10 = vld [vmem:[#allocation14 + $0x168] sm:$0xff]  }
 0x680   :  { %9015 = vmatmul.mubr.bf16.gmra.mrb[36].mxu0 %v14358_v18  ;;  %11416 = vmatpush3.bf16.msra.mxu1 %v11946_v56  ;;  %v8151_v52 = vpack.c.bf16 %v14371_v26, %v8137_v42  ;;  %8032 = vst [vmem:[#allocation5 + $0xe1] sm:$0xff] %v14385_v29  ;;  %vm7946_vm0 = vcmp.ge.f32.partialorder %v7930_v0, 0.0  ;;  %v7962_v20 = vmul.f32 0.2, %v7930_v0  ;;  %v8183_v19 = vpack.c.bf16 %v14299_v23, %v14280_v7  ;;  %v14418_v45 = vld [vmem:[#allocation5 + $0x80] sm:$0xff]  ;;  %v11959_v17 = vld [vmem:[#allocation14 + $0x1e8] sm:$0xff]  }
 0x681   :  { %9022 = vmatprep.mubr.bf16.mxu0 %v14297_v61  ;;  %11417 = vmatprep.subr.bf16.mxu1 %v11948_v2  ;;  %vm7947_vm1 = vcmp.ge.f32.partialorder %v7931_v37, 0.0  ;;  %v14391_v55 = vsel %vm7944_vm15, %v7928_v8, %v7960_v22  ;;  %v7963_v1 = vmul.f32 0.2, %v7931_v37  ;;  %v8184_v11 = vpack.c.bf16 %v14342_v43, %v14301_v28  ;;  %v11958_v2 = vld [vmem:[#allocation14 + $0x1a0] sm:$0xff]   ;;  %v11960_v8 = vld [vmem:[#allocation14 + $0x1a8] sm:$0xff]   ;;  %v8141_v22 = vld [vmem:[#allocation5 + $0xb0] sm:$0xff] }
 0x682   :  { %9112 = vmatmul.mubr.bf16.gmra.mrb[36].mxu1 %v14383_v9  ;;  %11354 = vmatpush3.bf16.msra.mxu0 %v11941_v25  ;;  %8033 = vst [vmem:[#allocation5 + $0xf1] sm:$0xff] %v14391_v55  ;;  %v14396_v39 = vpack.c.bf16 %v14391_v55, %v14385_v29  ;;  %v14398_v57 = vsel %vm7946_vm0, %v7930_v0, %v7962_v20  ;;  %v11955_v25 = vld [vmem:[#allocation14 + $0x170] sm:$0xff]   ;;  %v8077_v46 = vld [vmem:[#allocation5 + $0xa1] sm:$0xff] }
 0x683   :  { %9119 = vmatprep.mubr.bf16.mxu1 %v8151_v52  ;;  %11355 = vmatprep.subr.bf16.mxu0 %v11943_v53  ;;  %8035 = vst [vmem:[#allocation5 + $0x111] sm:$0xff] %v14398_v57  ;;  %v8092_v14 = vpack.c.bf16 %v14398_v57, %v14256_v47  ;;  %v14406_v50 = vsel %vm7947_vm1, %v7931_v37, %v7963_v1  ;;  %v14434_v53 = vld [vmem:[#allocation5 + $0x62] sm:$0xff]  ;;  %v14436_v0 = vld [vmem:[#allocation5 + $0x72] sm:$0xff] }
 0x684   :  { %11418 = vmatpush3.bf16.msra.mxu1 %v11950_v34  ;;  %8036 = vst [vmem:[#allocation5 + $0x121] sm:$0xff] %v14406_v50  ;;  %v14416_v21 = vpack.c.bf16 %v8137_v42, %v14339_v30  ;;  %v8185_v58 = vpack.c.bf16 %v14351_v5, %v14346_v36  ;;  %v8186_v56 = vpack.c.bf16 %v14385_v29, %v14354_v35  ;;  %v11953_v42 = vld [vmem:[#allocation14 + $0x128] sm:$0xff]   ;;  %v11962_v37 = vld [vmem:[#allocation14 + $0x1f0] sm:$0xff]   ;;  %v8142_v52 = vld [vmem:[#allocation5 + $0xc0] sm:$0xff] }
 0x685   :  { %11419 = vmatprep.subr.bf16.mxu1 %v11952_v3  ;;  %v8188_v31 = vpack.c.bf16 %v14406_v50, %v14398_v57  ;;  %v14429_v30 = vpack.c.bf16 %v14410_v4, %v14408_v60  ;;  %v8152_v13 = vpack.c.bf16 %v14418_v45, %v8139_v24  ;;  %v14439_v34 = vpack.c.bf16 %v8139_v24, %v14371_v26  ;;  %v11957_v3 = vld [vmem:[#allocation14 + $0x130] sm:$0xff]   ;;  %v11965_v26 = vld [vmem:[#allocation14 + $0x1f8] sm:$0xff]   ;;  %v11967_v24 = vld [vmem:[#allocation14 + $0x200] sm:$0xff]  }
 0x686   :  { %11356 = vmatpush3.bf16.msra.mxu0 %v11945_v62  ;;  %v8089_v20 = vpack.c.bf16 %v14346_v36, %v8077_v46  ;;  %v11961_v62 = vld [vmem:[#allocation14 + $0x178] sm:$0xff]   ;;  %v14445_v1 = vpack.c.bf16 %v14436_v0, %v14434_v53  ;;  %v14513_v63 = vld [vmem:[#allocation5 + $0x82] sm:$0xff]  ;;  %v8249_v7 = vpack.c.bf16 %v14335_v6, %v14418_v45 }
 0x687   :  { %11357 = vmatprep.subr.bf16.mxu0 %v11947_v44  ;;  %v11964_v44 = vld [vmem:[#allocation14 + $0x1b0] sm:$0xff]   ;;  %v8216_v54 = vpack.c.bf16 %v14513_v63, %v14436_v0  ;;  %v8274_v28 = vld [vmem:[#allocation5 + $0x101] sm:$0xff] }
 0x688   :  { %9023 = vmatmul.mubr.bf16.gmra.mrb[40].mxu0 %v14416_v21  ;;  %11420 = vmatpush3.bf16.msra.mxu1 %v11954_v33  ;;  %v8153_v33 = vpack.c.bf16 %v8142_v52, %v8141_v22  ;;  %v8187_v5 = vpack.c.bf16 %v8274_v28, %v14391_v55  ;;  %v8301_v29 = vld [vmem:[#allocation5 + $0x92] sm:$0xff] }
 0x689   :  { %9030 = vmatprep.mubr.bf16.mxu0 %v14308_v32  ;;  %11421 = vmatprep.subr.bf16.mxu1 %v11956_v40  ;;  %v11963_v40 = vld [vmem:[#allocation14 + $0x138] sm:$0xff]  }
 0x68a   :  { %9120 = vmatmul.mubr.bf16.gmra.mrb[40].mxu1 %v14429_v30  ;;  %11358 = vmatpush3.bf16.msra.mxu0 %v11949_v15  ;;  %v11966_v15 = vld [vmem:[#allocation14 + $0x1b8] sm:$0xff]  }
 0x68b   :  { %9127 = vmatprep.mubr.bf16.mxu1 %v8152_v13  ;;  %11359 = vmatprep.subr.bf16.mxu0 %v11951_v10  ;;  %v8109_v10 = vld [vmem:[#allocation5 + $0xa2] sm:$0xff]  ;;  %v8057_v13 = vpack.c.bf16 %v8141_v22, %v14335_v6  ;;  %v8145_v22 = vld [vmem:[#allocation5 + $0xf0] sm:$0xff] }
 0x68c   :  { %11422 = vmatpush3.bf16.msra.mxu1 %v11958_v2  ;;  %v14448_v2 = vld [vmem:[#allocation5 + $0xb2] sm:$0xff]  ;;  %v8212_v36 = vld [vmem:[#allocation5 + $0x122] sm:$0xff] }
 0x68d   :  { %11423 = vmatprep.subr.bf16.mxu1 %v11959_v17  ;;  %v8143_v17 = vld [vmem:[#allocation5 + $0xd0] sm:$0xff] }
 0x68e   :  { %11360 = vmatpush3.bf16.msra.mxu0 %v11953_v42  ;;  %v8144_v42 = vld [vmem:[#allocation5 + $0xe0] sm:$0xff]  ;;  %v8309_v55 = vld [vmem:[#allocation5 + $0x132] sm:$0xff] }
 0x68f   :  { %11361 = vmatprep.subr.bf16.mxu0 %v11955_v25  ;;  %v8121_v25 = vpack.c.bf16 %v14448_v2, %v8109_v10  ;;  %v8154_v46 = vpack.c.bf16 %v8144_v42, %v8143_v17 }
 0x690   :  { %9031 = vmatmul.mubr.bf16.gmra.mrb[44].mxu0 %v14439_v34  ;;  %11424 = vmatpush3.bf16.msra.mxu1 %v11960_v8  ;;  %v14453_v8 = vld [vmem:[#allocation5 + $0xc2] sm:$0xff] }
 0x691   :  { %9038 = vmatprep.mubr.bf16.mxu0 %v8089_v20  ;;  %11425 = vmatprep.subr.bf16.mxu1 %v11962_v37  ;;  %v14455_v37 = vld [vmem:[#allocation5 + $0xd2] sm:$0xff]  ;;  %v8146_v20 = vld [vmem:[#allocation5 + $0x100] sm:$0xff] }
 0x692   :  { %9128 = vmatmul.mubr.bf16.gmra.mrb[44].mxu1 %v14445_v1  ;;  %11362 = vmatpush3.bf16.msra.mxu0 %v11957_v3  ;;  %v14457_v3 = vpack.c.bf16 %v8143_v17, %v8142_v52  ;;  %v14470_v52 = vpack.c.bf16 %v8145_v22, %v8144_v42  ;;  %v14484_v17 = vld [vmem:[#allocation5 + $0x102] sm:$0xff]  ;;  %v14486_v42 = vld [vmem:[#allocation5 + $0x112] sm:$0xff] }
 0x693   :  { %9135 = vmatprep.mubr.bf16.mxu1 %v8153_v33  ;;  %11363 = vmatprep.subr.bf16.mxu0 %v11961_v62  ;;  %v14462_v62 = vpack.c.bf16 %v14455_v37, %v14453_v8  ;;  %v14466_v33 = vld [vmem:[#allocation5 + $0xe2] sm:$0xff]  ;;  %v14495_v47 = vpack.c.bf16 %v14486_v42, %v14484_v17 }
 0x694   :  { %11426 = vmatpush3.bf16.msra.mxu1 %v11964_v44  ;;  %v8155_v44 = vpack.c.bf16 %v8146_v20, %v8145_v22  ;;  %v8214_v22 = vpack.c.bf16 %v14408_v60, %v14362_v38  ;;  %v11974_v38 = vld [vmem:[#allocation14 + $0x238] sm:$0xff]   ;;  %v8218_v23 = vpack.c.bf16 %v14466_v33, %v14455_v37 }
 0x695   :  { %11427 = vmatprep.subr.bf16.mxu1 %v11965_v26  ;;  %v14468_v26 = vld [vmem:[#allocation5 + $0xf2] sm:$0xff] }
 0x696   :  { %11364 = vmatpush3.bf16.msra.mxu0 %v11963_v40  ;;  %v8147_v40 = vld [vmem:[#allocation5 + $0x110] sm:$0xff]  ;;  %v14477_v10 = vpack.c.bf16 %v14468_v26, %v14466_v33 }
 0x697   :  { %11557 = vmatprep.subr.bf16.mxu0 %v11967_v24 }
 0x698   :  { %9039 = vmatmul.mubr.bf16.gmra.mrb[48].mxu0 %v8057_v13  ;;  %11428 = vmatpush3.bf16.msra.mxu1 %v11966_v15  ;;  %v14472_v15 = vld [vmem:[#allocation5 + $0x120] sm:$0xff] }
 0x699   :  { %9046 = vmatprep.mubr.bf16.mxu0 %v14367_v27  ;;  %11589 = vmatprep.subr.bf16.mxu1 %v11967_v24  ;;  %v8156_v13 = vpack.c.bf16 %v14472_v15, %v8147_v40  ;;  %v8253_v35 = vpack.c.bf16 %v14335_v6, %v14472_v15 }
 0x69a   :  { %9136 = vmatmul.mubr.bf16.gmra.mrb[48].mxu1 %v8121_v25  ;;  %v14488_v25 = vpack.c.bf16 %v8147_v40, %v8146_v20 }
 0x69b   :  { %9143 = vmatprep.mubr.bf16.mxu1 %v8154_v46  ;;  %v8213_v46 = vpack.c.bf16 %v14360_v49, %v14326_v59  ;;  %v11969_v59 = vld [vmem:[#allocation14 + $0x210] sm:$0xff]   ;;  %v8215_v49 = vpack.c.bf16 %v14434_v53, %v14410_v4 }
 0x6a0   :  { %9047 = vmatmul.mubr.bf16.gmra.mrb[52].mxu0 %v14457_v3 }
 0x6a1   :  { %9054 = vmatprep.mubr.bf16.mxu0 %v14396_v39 }
 0x6a2   :  { %9144 = vmatmul.mubr.bf16.gmra.mrb[52].mxu1 %v14462_v62 }
 0x6a3   :  { %9151 = vmatprep.mubr.bf16.mxu1 %v8155_v44 }
 0x6a8   :  { %9055 = vmatmul.mubr.bf16.gmra.mrb[56].mxu0 %v14470_v52 }
 0x6a9   :  { %9062 = vmatprep.mubr.bf16.mxu0 %v8092_v14  ;;  %v11968_v14 = vld [vmem:[#allocation14 + $0x208] sm:$0xff]  }
 0x6aa   :  { %9152 = vmatmul.mubr.bf16.gmra.mrb[56].mxu1 %v14477_v10 }
 0x6ab   :  { %9159 = vmatprep.mubr.bf16.mxu1 %v8156_v13 }
 0x6b0   :  { %9063 = vmatmul.mubr.bf16.gmra.mrb[60].mxu0 %v14488_v25 }
 0x6b1   :  { %9200 = vmatprep.mubr.bf16.mxu0 %v8213_v46 }
 0x6b2   :  { %9160 = vmatmul.mubr.bf16.gmra.mrb[60].mxu1 %v14495_v47 }
 0x6b3   :  { %9297 = vmatprep.mubr.bf16.mxu1 %v14271_v16  ;;  %v11970_v16 = vld [vmem:[#allocation14 + $0x218] sm:$0xff]  }
 0x6b8   :  { %9201 = vmatmul.mubr.bf16.vlgmr.msra.gmra.mrb[64].mxu0 %v8181_v12  ;;  %v8217_v12 = vpack.c.bf16 %v14453_v8, %v14448_v2 }
 0x6b9   :  { %9208 = vmatprep.mubr.bf16.mxu0 %v8214_v22  ;;  %11558 = vmatpush3.bf16.msra.mxu0 %v11967_v24 }
 0x6ba   :  { %9298 = vmatmul.mubr.bf16.vlgmr.msra.gmra.mrb[64].mxu1 %v14358_v18  ;;  %11559 = vmatprep.subr.bf16.mxu0 %v11968_v14  ;;  %v11972_v18 = vld [vmem:[#allocation14 + $0x228] sm:$0xff]  }
 0x6bb   :  { %9305 = vmatprep.mubr.bf16.mxu1 %v14297_v61  ;;  %11597 = vmatpush3.bf16.msra.mxu1 %v11967_v24  ;;  %v8269_v61 = vld [vmem:[#allocation5 + $0x91] sm:$0xff] }
 0x6bc   :  { %11590 = vmatprep.subr.bf16.mxu1 %v11968_v14  ;;  %v8281_v41 = vpack.c.bf16 %v8269_v61, %v14342_v43  ;;  %v8219_v43 = vpack.c.bf16 %v14484_v17, %v14468_v26 }
 0x6bd   :  { %11560 = vmatpush3.bf16.msra.mxu0 %v11968_v14 }
 0x6be   :  { %11561 = vmatprep.subr.bf16.mxu0 %v11969_v59 }
 0x6bf   :  { %11598 = vmatpush3.bf16.msra.mxu1 %v11968_v14 }
 0x6c0   :  { %9209 = vmatmul.mubr.bf16.gmra.mrb[68].mxu0 %v8182_v51  ;;  %11591 = vmatprep.subr.bf16.mxu1 %v11969_v59  ;;  %v8277_v51 = vld [vmem:[#allocation5 + $0x131] sm:$0xff] }
 0x6c1   :  { %9216 = vmatprep.mubr.bf16.mxu0 %v8215_v49  ;;  %11562 = vmatpush3.bf16.msra.mxu0 %v11969_v59 }
 0x6c2   :  { %9306 = vmatmul.mubr.bf16.gmra.mrb[68].mxu1 %v14416_v21  ;;  %11563 = vmatprep.subr.bf16.mxu0 %v11970_v16 }
 0x6c3   :  { %9313 = vmatprep.mubr.bf16.mxu1 %v14308_v32  ;;  %11599 = vmatpush3.bf16.msra.mxu1 %v11969_v59  ;;  %v11973_v32 = vld [vmem:[#allocation14 + $0x230] sm:$0xff]  }
 0x6c4   :  { %11592 = vmatprep.subr.bf16.mxu1 %v11970_v16 }
 0x6c5   :  { %11564 = vmatpush3.bf16.msra.mxu0 %v11970_v16 }
 0x6c6   :  { %11565 = vmatprep.subr.bf16.mxu0 %v11971_v48 }
 0x6c7   :  { %11600 = vmatpush3.bf16.msra.mxu1 %v11970_v16 }
 0x6c8   :  { %9217 = vmatmul.mubr.bf16.gmra.mrb[72].mxu0 %v8183_v19  ;;  %11593 = vmatprep.subr.bf16.mxu1 %v11971_v48  ;;  %v8285_v19 = vpack.c.bf16 %v8277_v51, %v14406_v50  ;;  %v8317_v50 = vpack.c.bf16 %v8309_v55, %v8212_v36 }
 0x6c9   :  { %9224 = vmatprep.mubr.bf16.mxu0 %v8216_v54  ;;  %11566 = vmatpush3.bf16.msra.mxu0 %v11971_v48 }
 0x6ca   :  { %9314 = vmatmul.mubr.bf16.gmra.mrb[72].mxu1 %v14439_v34  ;;  %11567 = vmatprep.subr.bf16.mxu0 %v11972_v18 }
 0x6cb   :  { %9321 = vmatprep.mubr.bf16.mxu1 %v8281_v41  ;;  %11601 = vmatpush3.bf16.msra.mxu1 %v11971_v48 }
 0x6cc   :  { %11594 = vmatprep.subr.bf16.mxu1 %v11972_v18 }
 0x6cd   :  { %11568 = vmatpush3.bf16.msra.mxu0 %v11972_v18 }
 0x6ce   :  { %11569 = vmatprep.subr.bf16.mxu0 %v11973_v32 }
 0x6cf   :  { %11602 = vmatpush3.bf16.msra.mxu1 %v11972_v18 }
 0x6d0   :  { %9225 = vmatmul.mubr.bf16.gmra.mrb[76].mxu0 %v8184_v11  ;;  %11595 = vmatprep.subr.bf16.mxu1 %v11973_v32 }
 0x6d1   :  { %9232 = vmatprep.mubr.bf16.mxu0 %v8217_v12  ;;  %11570 = vmatpush3.bf16.msra.mxu0 %v11973_v32 }
 0x6d2   :  { %9322 = vmatmul.mubr.bf16.gmra.mrb[76].mxu1 %v8249_v7  ;;  %11571 = vmatprep.subr.bf16.mxu0 %v11974_v38 }
 0x6d3   :  { %9329 = vmatprep.mubr.bf16.mxu1 %v14367_v27  ;;  %11603 = vmatpush3.bf16.msra.mxu1 %v11973_v32  ;;  %v8284_v27 = vpack.c.bf16 %v14398_v57, %v8274_v28  ;;  %v8313_v57 = vpack.c.bf16 %v8301_v29, %v14513_v63 }
 0x6d4   :  { %11596 = vmatprep.subr.bf16.mxu1 %v11974_v38 }
 0x6d5   :  { %11572 = vmatpush3.bf16.msra.mxu0 %v11974_v38 }
 0x6d7   :  { %11604 = vmatpush3.bf16.msra.mxu1 %v11974_v38 }
 0x6d8   :  { %9233 = vmatmul.mubr.bf16.gmra.mrb[80].mxu0 %v8185_v58 }
 0x6d9   :  { %9240 = vmatprep.mubr.bf16.mxu0 %v8218_v23 }
 0x6da   :  { %9330 = vmatmul.mubr.bf16.gmra.mrb[80].mxu1 %v14457_v3 }
 0x6db   :  { %9337 = vmatprep.mubr.bf16.mxu1 %v14396_v39  ;;  %v8220_v39 = vpack.c.bf16 %v8212_v36, %v14486_v42 }
 0x6e0   :  { %9241 = vmatmul.mubr.bf16.gmra.mrb[84].mxu0 %v8186_v56 }
 0x6e1   :  { %9248 = vmatprep.mubr.bf16.mxu0 %v8219_v43 }
 0x6e2   :  { %9338 = vmatmul.mubr.bf16.gmra.mrb[84].mxu1 %v14470_v52 }
 0x6e3   :  { %9345 = vmatprep.mubr.bf16.mxu1 %v8284_v27 }
 0x6e8   :  { %9249 = vmatmul.mubr.bf16.gmra.mrb[88].mxu0 %v8187_v5 }
 0x6e9   :  { %9256 = vmatprep.mubr.bf16.mxu0 %v8220_v39 }
 0x6ea   :  { %9346 = vmatmul.mubr.bf16.gmra.mrb[88].mxu1 %v14488_v25 }
 0x6eb   :  { %9353 = vmatprep.mubr.bf16.mxu1 %v8285_v19 }
 0x6f0   :  { %9257 = vmatmul.mubr.bf16.gmra.mrb[92].mxu0 %v8188_v31 }
 0x6f1   :  { %11573 = vmatprep.mubr.bf16.mxu0 %v14383_v9 }
 0x6f2   :  { %9354 = vmatmul.mubr.bf16.gmra.mrb[92].mxu1 %v8253_v35 }
 0x6f3   :  { %11581 = vmatprep.mubr.bf16.mxu1 %v14462_v62 }
 0x6f8   :  { %11574 = vmatmul.mubr.bf16.vlgmr.msra.gmra.mrb[96].mxu0 %v14429_v30 }
 0x6f9   :  { %11577 = vmatprep.mubr.bf16.mxu0 %v14445_v1 }
 0x6fa   :  { %11582 = vmatmul.mubr.bf16.vlgmr.msra.gmra.mrb[96].mxu1 %v14477_v10 }
 0x6fb   :  { %11585 = vmatprep.mubr.bf16.mxu1 %v14495_v47 }
 0x700   :  { %11578 = vmatmul.mubr.bf16.gmra.mrb[100].mxu0 %v8313_v57 }
 0x702   :  { %11586 = vmatmul.mubr.bf16.gmra.mrb[100].mxu1 %v8317_v50 }
 0x74b   :  { %v11237_v6 = vpop.f32.mrb[32].mxu0 }
 0x74c   :  { %v11238_v9 = vpop.f32.mrb[33].mxu0 }
 0x74d   :  { %v11301_v60 = vpop.f32.mrb[32].mxu1  ;;  %v11239_v4 = vadd.f32 %v11238_v9, %v11237_v6  ;;  %v11240_v11 = vpop.f32.mrb[34].mxu0 }
 0x74e   :  { %v11302_v21 = vpop.f32.mrb[33].mxu1  ;;  %v11241_v45 = vpop.f32.mrb[35].mxu0 }
 0x74f   :  { %v11303_v58 = vadd.f32 %v11302_v21, %v11301_v60  ;;  %v11304_v56 = vpop.f32.mrb[34].mxu1  ;;  %v11242_v31 = vadd.f32 %v11241_v45, %v11240_v11 }
 0x750   :  { %v11305_v30 = vpop.f32.mrb[35].mxu1 }
 0x751   :  { %v14560_v53 = vadd.f32 %v11303_v58, %v11239_v4  ;;  %v11306_v0 = vadd.f32 %v11305_v30, %v11304_v56 }
 0x753   :  { %v14562_v34 = vadd.f32 %v11306_v0, %v11242_v31  ;;  %v11243_v1 = vpop.f32.mrb[36].mxu0 }
 0x754   :  { %v11244_v24 = vpop.f32.mrb[37].mxu0 }
 0x755   :  { %v11307_v2 = vpop.f32.mrb[36].mxu1  ;;  %v11245_v8 = vadd.f32 %v11244_v24, %v11243_v1  ;;  %v11246_v37 = vpop.f32.mrb[38].mxu0 }
 0x756   :  { %v11308_v3 = vpop.f32.mrb[37].mxu1  ;;  %v11247_v20 = vpop.f32.mrb[39].mxu0 }
 0x757   :  { %v11309_v62 = vadd.f32 %v11308_v3, %v11307_v2  ;;  %v11310_v44 = vpop.f32.mrb[38].mxu1  ;;  %v11248_v33 = vadd.f32 %v11247_v20, %v11246_v37 }
 0x758   :  { %v11311_v26 = vpop.f32.mrb[39].mxu1 }
 0x759   :  { %v14564_v52 = vadd.f32 %v11309_v62, %v11245_v8  ;;  %v11312_v40 = vadd.f32 %v11311_v26, %v11310_v44 }
 0x75b   :  { %v14566_v15 = vadd.f32 %v11312_v40, %v11248_v33  ;;  %v11249_v10 = vpop.f32.mrb[40].mxu0 }
 0x75c   :  { %v11250_v13 = vpop.f32.mrb[41].mxu0 }
 0x75d   :  { %v11313_v17 = vpop.f32.mrb[40].mxu1  ;;  %v11251_v42 = vadd.f32 %v11250_v13, %v11249_v10  ;;  %v11252_v25 = vpop.f32.mrb[42].mxu0 }
 0x75e   :  { %v11314_v46 = vpop.f32.mrb[41].mxu1  ;;  %v11253_v47 = vpop.f32.mrb[43].mxu0 }
 0x75f   :  { %v11315_v14 = vadd.f32 %v11314_v46, %v11313_v17  ;;  %v11316_v22 = vpop.f32.mrb[42].mxu1  ;;  %v11254_v59 = vadd.f32 %v11253_v47, %v11252_v25 }
 0x760   :  { %v11317_v16 = vpop.f32.mrb[43].mxu1 }
 0x761   :  { %v14568_v49 = vadd.f32 %v11315_v14, %v11251_v42  ;;  %v11318_v48 = vadd.f32 %v11317_v16, %v11316_v22 }
 0x763   :  { %v14570_v63 = vadd.f32 %v11318_v48, %v11254_v59  ;;  %v11255_v61 = vpop.f32.mrb[44].mxu0 }
 0x764   :  { %v11256_v18 = vpop.f32.mrb[45].mxu0 }
 0x765   :  { %v11319_v54 = vpop.f32.mrb[44].mxu1  ;;  %v11257_v41 = vadd.f32 %v11256_v18, %v11255_v61  ;;  %v11258_v32 = vpop.f32.mrb[46].mxu0 }
 0x766   :  { %v11320_v38 = vpop.f32.mrb[45].mxu1  ;;  %v11259_v12 = vpop.f32.mrb[47].mxu0 }
 0x767   :  { %v11321_v7 = vadd.f32 %v11320_v38, %v11319_v54  ;;  %v11322_v23 = vpop.f32.mrb[46].mxu1  ;;  %v11260_v28 = vadd.f32 %v11259_v12, %v11258_v32 }
 0x768   :  { %v11323_v43 = vpop.f32.mrb[47].mxu1 }
 0x769   :  { %v14572_v27 = vadd.f32 %v11321_v7, %v11257_v41  ;;  %v11324_v36 = vadd.f32 %v11323_v43, %v11322_v23 }
 0x76b   :  { %v14574_v5 = vadd.f32 %v11324_v36, %v11260_v28  ;;  %v11261_v51 = vpop.f32.mrb[48].mxu0 }
 0x76c   :  { %v11262_v39 = vpop.f32.mrb[49].mxu0 }
 0x76d   :  { %v11325_v19 = vpop.f32.mrb[48].mxu1  ;;  %v11263_v35 = vadd.f32 %v11262_v39, %v11261_v51  ;;  %v11264_v29 = vpop.f32.mrb[50].mxu0 }
 0x76e   :  { %v11326_v55 = vpop.f32.mrb[49].mxu1  ;;  %v11265_v57 = vpop.f32.mrb[51].mxu0 }
 0x76f   :  { %v11327_v50 = vadd.f32 %v11326_v55, %v11325_v19  ;;  %v11328_v6 = vpop.f32.mrb[50].mxu1  ;;  %v11266_v9 = vadd.f32 %v11265_v57, %v11264_v29 }
 0x770   :  { %v11329_v60 = vpop.f32.mrb[51].mxu1 }
 0x771   :  { %v14576_v4 = vadd.f32 %v11327_v50, %v11263_v35  ;;  %v11330_v11 = vadd.f32 %v11329_v60, %v11328_v6 }
 0x773   :  { %v14578_v21 = vadd.f32 %v11330_v11, %v11266_v9  ;;  %v11267_v45 = vpop.f32.mrb[52].mxu0 }
 0x774   :  { %v11268_v58 = vpop.f32.mrb[53].mxu0 }
 0x775   :  { %v11331_v56 = vpop.f32.mrb[52].mxu1  ;;  %v11269_v31 = vadd.f32 %v11268_v58, %v11267_v45  ;;  %v11270_v30 = vpop.f32.mrb[54].mxu0 }
 0x776   :  { %v11332_v0 = vpop.f32.mrb[53].mxu1  ;;  %v11271_v1 = vpop.f32.mrb[55].mxu0 }
 0x777   :  { %v11333_v24 = vadd.f32 %v11332_v0, %v11331_v56  ;;  %v11334_v2 = vpop.f32.mrb[54].mxu1  ;;  %v11272_v8 = vadd.f32 %v11271_v1, %v11270_v30 }
 0x778   :  { %v11335_v37 = vpop.f32.mrb[55].mxu1 }
 0x779   :  { %v14580_v3 = vadd.f32 %v11333_v24, %v11269_v31  ;;  %v11336_v20 = vadd.f32 %v11335_v37, %v11334_v2 }
 0x77b   :  { %v14582_v62 = vadd.f32 %v11336_v20, %v11272_v8  ;;  %v11273_v44 = vpop.f32.mrb[56].mxu0 }
 0x77c   :  { %v11274_v33 = vpop.f32.mrb[57].mxu0 }
 0x77d   :  { %v11337_v26 = vpop.f32.mrb[56].mxu1  ;;  %v11275_v40 = vadd.f32 %v11274_v33, %v11273_v44  ;;  %v11276_v10 = vpop.f32.mrb[58].mxu0 }
 0x77e   :  { %v11338_v13 = vpop.f32.mrb[57].mxu1  ;;  %v11277_v17 = vpop.f32.mrb[59].mxu0 }
 0x77f   :  { %v11339_v42 = vadd.f32 %v11338_v13, %v11337_v26  ;;  %v11340_v25 = vpop.f32.mrb[58].mxu1  ;;  %v11278_v46 = vadd.f32 %v11277_v17, %v11276_v10 }
 0x780   :  { %v11341_v47 = vpop.f32.mrb[59].mxu1 }
 0x781   :  { %v14584_v14 = vadd.f32 %v11339_v42, %v11275_v40  ;;  %v11342_v22 = vadd.f32 %v11341_v47, %v11340_v25 }
 0x783   :  { %v14586_v59 = vadd.f32 %v11342_v22, %v11278_v46  ;;  %v11279_v16 = vpop.f32.mrb[60].mxu0 }
 0x784   :  { %v11280_v48 = vpop.f32.mrb[61].mxu0 }
 0x785   :  { %v11343_v61 = vpop.f32.mrb[60].mxu1  ;;  %v11281_v18 = vadd.f32 %v11280_v48, %v11279_v16  ;;  %v11282_v54 = vpop.f32.mrb[62].mxu0 }
 0x786   :  { %v11344_v41 = vpop.f32.mrb[61].mxu1  ;;  %v11283_v32 = vpop.f32.mrb[63].mxu0 }
 0x787   :  { %v11345_v38 = vadd.f32 %v11344_v41, %v11343_v61  ;;  %v11346_v12 = vpop.f32.mrb[62].mxu1  ;;  %v11284_v7 = vadd.f32 %v11283_v32, %v11282_v54 }
 0x788   :  { %v11347_v23 = vpop.f32.mrb[63].mxu1 }
 0x789   :  { %v14588_v28 = vadd.f32 %v11345_v38, %v11281_v18  ;;  %v11348_v43 = vadd.f32 %v11347_v23, %v11346_v12 }
 0x78b   :  { %v14590_v36 = vadd.f32 %v11348_v43, %v11284_v7  ;;  %v11365_v51 = vpop.f32.mrb[64].mxu0 }
 0x78c   :  { %v11366_v39 = vpop.f32.mrb[65].mxu0 }
 0x78d   :  { %v11429_v19 = vpop.f32.mrb[64].mxu1  ;;  %v11367_v35 = vadd.f32 %v11366_v39, %v11365_v51  ;;  %v11368_v29 = vpop.f32.mrb[66].mxu0 }
 0x78e   :  { %v11430_v55 = vpop.f32.mrb[65].mxu1  ;;  %v11369_v57 = vpop.f32.mrb[67].mxu0 }
 0x78f   :  { %v9203_v50 = vadd.f32 %v11367_v35, %v14560_v53  ;;  %v11431_v6 = vadd.f32 %v11430_v55, %v11429_v19  ;;  %v11432_v9 = vpop.f32.mrb[66].mxu1  ;;  %v11370_v60 = vadd.f32 %v11369_v57, %v11368_v29 }
 0x790   :  { %v11433_v11 = vpop.f32.mrb[67].mxu1 }
 0x791   :  { %v9206_v45 = vadd.f32 %v11370_v60, %v14562_v34  ;;  %v11434_v58 = vadd.f32 %v11433_v11, %v11432_v9  ;;  %v14594_v56 = vadd.f32 %v11431_v6, %v9203_v50 }
 0x793   :  { %v11371_v31 = vpop.f32.mrb[68].mxu0  ;;  %v14596_v30 = vadd.f32 %v11434_v58, %v9206_v45 }
 0x794   :  { %v11372_v0 = vpop.f32.mrb[69].mxu0 }
 0x795   :  { %v11435_v1 = vpop.f32.mrb[68].mxu1  ;;  %v11373_v24 = vadd.f32 %v11372_v0, %v11371_v31  ;;  %v11374_v2 = vpop.f32.mrb[70].mxu0 }
 0x796   :  { %v11436_v8 = vpop.f32.mrb[69].mxu1  ;;  %v11375_v37 = vpop.f32.mrb[71].mxu0 }
 0x797   :  { %v9211_v53 = vadd.f32 %v11373_v24, %v14564_v52  ;;  %v11437_v20 = vadd.f32 %v11436_v8, %v11435_v1  ;;  %v11438_v44 = vpop.f32.mrb[70].mxu1  ;;  %v11376_v33 = vadd.f32 %v11375_v37, %v11374_v2 }
 0x798   :  { %v11439_v26 = vpop.f32.mrb[71].mxu1 }
 0x799   :  { %v9214_v34 = vadd.f32 %v11376_v33, %v14566_v15  ;;  %v11440_v40 = vadd.f32 %v11439_v26, %v11438_v44  ;;  %v14600_v10 = vadd.f32 %v11437_v20, %v9211_v53 }
 0x79b   :  { %v11377_v13 = vpop.f32.mrb[72].mxu0  ;;  %v14602_v17 = vadd.f32 %v11440_v40, %v9214_v34 }
 0x79c   :  { %v11378_v42 = vpop.f32.mrb[73].mxu0 }
 0x79d   :  { %v11441_v25 = vpop.f32.mrb[72].mxu1  ;;  %v11379_v46 = vadd.f32 %v11378_v42, %v11377_v13  ;;  %v11380_v47 = vpop.f32.mrb[74].mxu0 }
 0x79e   :  { %v11442_v22 = vpop.f32.mrb[73].mxu1  ;;  %v11381_v16 = vpop.f32.mrb[75].mxu0 }
 0x79f   :  { %v9219_v52 = vadd.f32 %v11379_v46, %v14568_v49  ;;  %v11443_v48 = vadd.f32 %v11442_v22, %v11441_v25  ;;  %v11444_v61 = vpop.f32.mrb[74].mxu1  ;;  %v11382_v18 = vadd.f32 %v11381_v16, %v11380_v47 }
 0x7a0   :  { %v11445_v54 = vpop.f32.mrb[75].mxu1 }
 0x7a1   :  { %v9222_v15 = vadd.f32 %v11382_v18, %v14570_v63  ;;  %v11446_v41 = vadd.f32 %v11445_v54, %v11444_v61  ;;  %v14606_v32 = vadd.f32 %v11443_v48, %v9219_v52 }
 0x7a3   :  { %v11383_v38 = vpop.f32.mrb[76].mxu0  ;;  %v14608_v12 = vadd.f32 %v11446_v41, %v9222_v15 }
 0x7a4   :  { %v11384_v7 = vpop.f32.mrb[77].mxu0 }
 0x7a5   :  { %v11447_v23 = vpop.f32.mrb[76].mxu1  ;;  %v11385_v43 = vadd.f32 %v11384_v7, %v11383_v38  ;;  %v11386_v51 = vpop.f32.mrb[78].mxu0 }
 0x7a6   :  { %v11448_v39 = vpop.f32.mrb[77].mxu1  ;;  %v11387_v19 = vpop.f32.mrb[79].mxu0 }
 0x7a7   :  { %v9227_v49 = vadd.f32 %v11385_v43, %v14572_v27  ;;  %v11449_v35 = vadd.f32 %v11448_v39, %v11447_v23  ;;  %v11450_v29 = vpop.f32.mrb[78].mxu1  ;;  %v11388_v55 = vadd.f32 %v11387_v19, %v11386_v51 }
 0x7a8   :  { %v11451_v57 = vpop.f32.mrb[79].mxu1 }
 0x7a9   :  { %v9230_v63 = vadd.f32 %v11388_v55, %v14574_v5  ;;  %v11452_v50 = vadd.f32 %v11451_v57, %v11450_v29  ;;  %v14612_v6 = vadd.f32 %v11449_v35, %v9227_v49 }
 0x7ab   :  { %v11389_v9 = vpop.f32.mrb[80].mxu0  ;;  %v14614_v60 = vadd.f32 %v11452_v50, %v9230_v63 }
 0x7ac   :  { %v11390_v11 = vpop.f32.mrb[81].mxu0 }
 0x7ad   :  { %v11453_v45 = vpop.f32.mrb[80].mxu1  ;;  %v11391_v58 = vadd.f32 %v11390_v11, %v11389_v9  ;;  %v11392_v31 = vpop.f32.mrb[82].mxu0 }
 0x7ae   :  { %v11454_v0 = vpop.f32.mrb[81].mxu1  ;;  %v11393_v1 = vpop.f32.mrb[83].mxu0 }
 0x7af   :  { %v9235_v27 = vadd.f32 %v11391_v58, %v14576_v4  ;;  %v11455_v24 = vadd.f32 %v11454_v0, %v11453_v45  ;;  %v11456_v2 = vpop.f32.mrb[82].mxu1  ;;  %v11394_v8 = vadd.f32 %v11393_v1, %v11392_v31 }
 0x7b0   :  { %v11457_v37 = vpop.f32.mrb[83].mxu1 }
 0x7b1   :  { %v9238_v5 = vadd.f32 %v11394_v8, %v14578_v21  ;;  %v11458_v53 = vadd.f32 %v11457_v37, %v11456_v2  ;;  %v9332_v20 = vadd.f32 %v11455_v24, %v9235_v27 }
 0x7b3   :  { %v11395_v44 = vpop.f32.mrb[84].mxu0  ;;  %v14618_v33 = vadd.f32 %v11458_v53, %v9238_v5 }
 0x7b4   :  { %v11396_v26 = vpop.f32.mrb[85].mxu0 }
 0x7b5   :  { %v11459_v34 = vpop.f32.mrb[84].mxu1  ;;  %v11397_v40 = vadd.f32 %v11396_v26, %v11395_v44  ;;  %v11398_v13 = vpop.f32.mrb[86].mxu0 }
 0x7b6   :  { %v11460_v42 = vpop.f32.mrb[85].mxu1  ;;  %v11399_v25 = vpop.f32.mrb[87].mxu0 }
 0x7b7   :  { %v9243_v46 = vadd.f32 %v11397_v40, %v14580_v3  ;;  %v11461_v4 = vadd.f32 %v11460_v42, %v11459_v34  ;;  %v11462_v47 = vpop.f32.mrb[86].mxu1  ;;  %v11400_v22 = vadd.f32 %v11399_v25, %v11398_v13 }
 0x7b8   :  { %v11463_v16 = vpop.f32.mrb[87].mxu1 }
 0x7b9   :  { %v9246_v52 = vadd.f32 %v11400_v22, %v14582_v62  ;;  %v11464_v21 = vadd.f32 %v11463_v16, %v11462_v47  ;;  %v9340_v48 = vadd.f32 %v11461_v4, %v9243_v46 }
 0x7bb   :  { %v11401_v61 = vpop.f32.mrb[88].mxu0  ;;  %v9343_v18 = vadd.f32 %v11464_v21, %v9246_v52 }
 0x7bc   :  { %v11402_v54 = vpop.f32.mrb[89].mxu0 }
 0x7bd   :  { %v11465_v15 = vpop.f32.mrb[88].mxu1  ;;  %v11403_v41 = vadd.f32 %v11402_v54, %v11401_v61  ;;  %v11404_v38 = vpop.f32.mrb[90].mxu0 }
 0x7be   :  { %v11466_v7 = vpop.f32.mrb[89].mxu1  ;;  %v11405_v23 = vpop.f32.mrb[91].mxu0 }
 0x7bf   :  { %v9251_v43 = vadd.f32 %v11403_v41, %v14584_v14  ;;  %v11467_v51 = vadd.f32 %v11466_v7, %v11465_v15  ;;  %v11468_v3 = vpop.f32.mrb[90].mxu1  ;;  %v11406_v39 = vadd.f32 %v11405_v23, %v11404_v38 }
 0x7c0   :  { %v11469_v19 = vpop.f32.mrb[91].mxu1 }
 0x7c1   :  { %v9254_v49 = vadd.f32 %v11406_v39, %v14586_v59  ;;  %v11470_v35 = vadd.f32 %v11469_v19, %v11468_v3  ;;  %v9348_v62 = vadd.f32 %v11467_v51, %v9251_v43 }
 0x7c3   :  { %v11407_v29 = vpop.f32.mrb[92].mxu0  ;;  %v9351_v55 = vadd.f32 %v11470_v35, %v9254_v49 }
 0x7c4   :  { %v11408_v57 = vpop.f32.mrb[93].mxu0 }
 0x7c5   :  { %v11471_v63 = vpop.f32.mrb[92].mxu1  ;;  %v11409_v50 = vadd.f32 %v11408_v57, %v11407_v29  ;;  %v11410_v9 = vpop.f32.mrb[94].mxu0 }
 0x7c6   :  { %v11472_v11 = vpop.f32.mrb[93].mxu1  ;;  %v11411_v45 = vpop.f32.mrb[95].mxu0 }
 0x7c7   :  { %v9259_v58 = vadd.f32 %v11409_v50, %v14588_v28  ;;  %v11473_v31 = vadd.f32 %v11472_v11, %v11471_v63  ;;  %v11474_v14 = vpop.f32.mrb[94].mxu1  ;;  %v11412_v0 = vadd.f32 %v11411_v45, %v11410_v9 }
 0x7c8   :  { %v11475_v1 = vpop.f32.mrb[95].mxu1 }
 0x7c9   :  { %v9262_v27 = vadd.f32 %v11412_v0, %v14590_v36  ;;  %v11476_v24 = vadd.f32 %v11475_v1, %v11474_v14  ;;  %v9356_v59 = vadd.f32 %v11473_v31, %v9259_v58 }
 0x7cb   :  { %v11575_v2 = vpop.f32.mrb[96].mxu0  ;;  %v9359_v8 = vadd.f32 %v11476_v24, %v9262_v27 }
 0x7cc   :  { %v14627_v37 = vadd.f32 %v11575_v2, %v14600_v10  ;;  %v9396_v5 = vpop.f32.mrb[97].mxu0 }
 0x7cd   :  { %v11583_v53 = vpop.f32.mrb[96].mxu1  ;;  %v14630_v44 = vadd.f32 %v9396_v5, %v14594_v56  ;;  %v11576_v26 = vpop.f32.mrb[98].mxu0 }
 0x7ce   :  { %v14632_v28 = vadd.f32 %v11583_v53, %v9340_v48  ;;  %v9428_v34 = vpop.f32.mrb[97].mxu1  ;;  %v14635_v40 = vadd.f32 %v11576_v26, %v14602_v17  ;;  %v9399_v36 = vpop.f32.mrb[99].mxu0 }
 0x7cf   :  { %v14637_v13 = vadd.f32 %v9428_v34, %v9332_v20  ;;  %v11584_v42 = vpop.f32.mrb[98].mxu1  ;;  %v14640_v25 = vadd.f32 %v9399_v36, %v14596_v30  ;;  %v9481_v56 = vmul.f32 %v14630_v44, %v14630_v44  ;;  %v9483_v20 = vmul.f32 %v14627_v37, %v14627_v37 }
 0x7d0   :  { %v14642_v10 = vadd.f32 %v11584_v42, %v9343_v18  ;;  %v9431_v46 = vpop.f32.mrb[99].mxu1  ;;  %v9484_v48 = vmul.f32 %v14635_v40, %v14635_v40  ;;  %v9491_v1 = vmul.f32 %v14632_v28, %v14632_v28 }
 0x7d1   :  { %v9459_v4 = vadd.f32 %v14640_v25, %v14630_v44  ;;  %v9482_v17 = vmul.f32 %v14640_v25, %v14640_v25  ;;  %v14651_v47 = vadd.f32 %v9431_v46, %v14618_v33 }
 0x7d3   :  { %v9460_v30 = vadd.f32 %v9459_v4, %v14627_v37  ;;  %v9497_v22 = vadd.f32 %v9482_v17, %v9481_v56  ;;  %v11579_v16 = vpop.f32.mrb[100].mxu0  ;;  %v9490_v31 = vmul.f32 %v14651_v47, %v14651_v47 }
 0x7d4   :  { %v14657_v52 = vadd.f32 %v11579_v16, %v14612_v6  ;;  %v9412_v21 = vpop.f32.mrb[101].mxu0 }
 0x7d5   :  { %v9498_v61 = vadd.f32 %v9497_v22, %v9483_v20  ;;  %v11587_v18 = vpop.f32.mrb[100].mxu1  ;;  %v14662_v54 = vadd.f32 %v9412_v21, %v14606_v32  ;;  %v9461_v33 = vadd.f32 %v9460_v30, %v14635_v40  ;;  %v11580_v15 = vpop.f32.mrb[102].mxu0 }
 0x7d6   :  { %v14665_v41 = vadd.f32 %v11587_v18, %v9356_v59  ;;  %v9444_v38 = vpop.f32.mrb[101].mxu1  ;;  %v14668_v7 = vadd.f32 %v11580_v15, %v14614_v60  ;;  %v9415_v6 = vpop.f32.mrb[103].mxu0  ;;  %v9487_v63 = vmul.f32 %v14657_v52, %v14657_v52  ;;  %v9492_v59 = vmul.f32 %v14642_v10, %v14642_v10 }
 0x7d7   :  { %v9462_v23 = vadd.f32 %v9461_v33, %v14662_v54  ;;  %v9485_v43 = vmul.f32 %v14662_v54, %v14662_v54  ;;  %v9499_v51 = vadd.f32 %v9498_v61, %v9484_v48  ;;  %v14673_v3 = vadd.f32 %v9444_v38, %v9348_v62  ;;  %v11588_v32 = vpop.f32.mrb[102].mxu1 }
 0x7d8   :  { %v14675_v39 = vadd.f32 %v11588_v32, %v9359_v8  ;;  %v14678_v19 = vadd.f32 %v9415_v6, %v14608_v12  ;;  %v9447_v49 = vpop.f32.mrb[103].mxu1  ;;  %v9488_v9 = vmul.f32 %v14668_v7, %v14668_v7  ;;  %v9495_v46 = vmul.f32 %v14665_v41, %v14665_v41 }
 0x7d9   :  { %v9500_v35 = vadd.f32 %v9499_v51, %v9485_v43  ;;  %v14680_v29 = vadd.f32 %v9447_v49, %v9351_v55  ;;  %v9489_v55 = vmul.f32 %v14637_v13, %v14637_v13  ;;  %v9493_v5 = vmul.f32 %v14673_v3, %v14673_v3 }
 0x7da   :  { %v9463_v60 = vadd.f32 %v9462_v23, %v14678_v19  ;;  %v9486_v57 = vmul.f32 %v14678_v19, %v14678_v19  ;;  %v9496_v17 = vmul.f32 %v14675_v39, %v14675_v39 }
 0x7db   :  { %v9494_v36 = vmul.f32 %v14680_v29, %v14680_v29 }
 0x7dc   :  { %v9464_v62 = vadd.f32 %v9463_v60, %v14657_v52  ;;  %v9501_v50 = vadd.f32 %v9500_v35, %v9486_v57 }
 0x7de   :  { %v9465_v12 = vadd.f32 %v9464_v62, %v14668_v7  ;;  %v9502_v11 = vadd.f32 %v9501_v50, %v9487_v63 }
 0x7e0   :  { %v9466_v45 = vadd.f32 %v9465_v12, %v14637_v13  ;;  %v9503_v58 = vadd.f32 %v9502_v11, %v9488_v9 }
 0x7e2   :  { %v9504_v14 = vadd.f32 %v9503_v58, %v9489_v55  ;;  %v9467_v0 = vadd.f32 %v9466_v45, %v14651_v47 }
 0x7e4   :  { %v9468_v27 = vadd.f32 %v9467_v0, %v14632_v28  ;;  %v9505_v24 = vadd.f32 %v9504_v14, %v9490_v31 }
 0x7e6   :  { %v9469_v2 = vadd.f32 %v9468_v27, %v14642_v10  ;;  %v9506_v8 = vadd.f32 %v9505_v24, %v9491_v1 }
 0x7e8   :  { %v9470_v53 = vadd.f32 %v9469_v2, %v14673_v3  ;;  %v9507_v26 = vadd.f32 %v9506_v8, %v9492_v59 }
 0x7ea   :  { %v9471_v34 = vadd.f32 %v9470_v53, %v14680_v29  ;;  %v9508_v42 = vadd.f32 %v9507_v26, %v9493_v5 }
 0x7ec   :  { %v9472_v56 = vadd.f32 %v9471_v34, %v14665_v41  ;;  %v9509_v4 = vadd.f32 %v9508_v42, %v9494_v36  ;;  %v10084_v42 = vld [vmem:[%s14791_s6 + $0x3] ss:$0 sm:$0xff] }
 0x7ee   :  { %v9473_v20 = vadd.f32 %v9472_v56, %v14675_v39  ;;  %v9510_v30 = vadd.f32 %v9509_v4, %v9495_v46 }
 0x7f0   :  { %v9474_v22 = vrot.slane %v9473_v20, 4  ;;  %v9511_v16 = vadd.f32 %v9510_v30, %v9496_v17 }
 0x7f2   :  { %v9475_v21 = vadd.f32 %v9474_v22, %v9473_v20  ;;  %v9512_v48 = vrot.slane %v9511_v16, 4 }
 0x7f4   :  { %v9476_v61 = vrot.slane %v9475_v21, 2  ;;  %v9513_v18 = vadd.f32 %v9512_v48, %v9511_v16 }
 0x7f6   :  { %v9477_v33 = vadd.f32 %v9476_v61, %v9475_v21  ;;  %v9514_v15 = vrot.slane %v9513_v18, 2 }
 0x7f8   :  { %v9478_v38 = vrot.slane %v9477_v33, 1  ;;  %v9515_v6 = vadd.f32 %v9514_v15, %v9513_v18 }
 0x7fa   :  { %v9479_v23 = vadd.f32 %v9478_v38, %v9477_v33  ;;  %v9516_v43 = vrot.slane %v9515_v6, 1 }
 0x7fc   :  { %v9480_v51 = vmul.f32 0.0078125, %v9479_v23  ;;  %v9517_v32 = vadd.f32 %v9516_v43, %v9515_v6 }
 0x7fe   :  { %v9518_v49 = vmul.f32 0.0078125, %v9517_v32  ;;  %v9519_v35 = vmul.f32 %v9480_v51, %v9480_v51  ;;  %v9521_v60 = vsub.f32 %v14630_v44, %v9480_v51  ;;  %v9522_v57 = vsub.f32 %v14640_v25, %v9480_v51 }
 0x7ff   :  { %v9523_v63 = vsub.f32 %v14627_v37, %v9480_v51  ;;  %v9524_v62 = vsub.f32 %v14635_v40, %v9480_v51  ;;  %v9525_v50 = vsub.f32 %v14662_v54, %v9480_v51  ;;  %v9526_v9 = vsub.f32 %v14678_v19, %v9480_v51 }
 0x800   :  { %v9520_v12 = vsub.f32 %v9518_v49, %v9519_v35  ;;  %v9527_v11 = vsub.f32 %v14657_v52, %v9480_v51  ;;  %v9528_v55 = vsub.f32 %v14668_v7, %v9480_v51  ;;  %v9529_v45 = vsub.f32 %v14637_v13, %v9480_v51 }
 0x801   :  { %v9530_v58 = vsub.f32 %v14651_v47, %v9480_v51  ;;  %v9531_v44 = vsub.f32 %v14632_v28, %v9480_v51  ;;  %v9532_v25 = vsub.f32 %v14642_v10, %v9480_v51  ;;  %v9533_v37 = vsub.f32 %v14673_v3, %v9480_v51  ;;  %v10083_v3 = vld [vmem:[%s14790_s5 + $0x3] ss:$0 sm:$0xff] }
 0x802   :  { %v9534_v40 = vsub.f32 %v14680_v29, %v9480_v51  ;;  %v9535_v54 = vsub.f32 %v14665_v41, %v9480_v51  ;;  %v9536_v19 = vsub.f32 %v14675_v39, %v9480_v51  ;;  %v9537_v31 = vmax.f32 %v9520_v12, 0.0 }
 0x804   :  { %v9538_v52 = vadd.f32 1e-05, %v9537_v31 }
 0x806   :  { %11981 = vrsqrt.f32 %v9538_v52 }
 0x810   :  { %v11982_v7 = vpop.eup %11981 }
 0x811   :  { %v9540_v14 = vmul.f32 %v11982_v7, %v9521_v60  ;;  %v9541_v13 = vmul.f32 %v11982_v7, %v9522_v57  ;;  %v9542_v0 = vmul.f32 %v11982_v7, %v9523_v63  ;;  %v9543_v47 = vmul.f32 %v11982_v7, %v9524_v62 }
 0x812   :  { %v9544_v1 = vmul.f32 %v11982_v7, %v9525_v50  ;;  %v9545_v28 = vmul.f32 %v11982_v7, %v9526_v9  ;;  %v9546_v27 = vmul.f32 %v11982_v7, %v9527_v11  ;;  %v9547_v10 = vmul.f32 %v11982_v7, %v9528_v55 }
 0x813   :  { %v9548_v29 = vmul.f32 %v11982_v7, %v9529_v45  ;;  %v9549_v41 = vmul.f32 %v11982_v7, %v9530_v58  ;;  %v9550_v24 = vmul.f32 %v11982_v7, %v9531_v44  ;;  %v9551_v39 = vmul.f32 %v11982_v7, %v9532_v25 }
 0x814   :  { %v9552_v59 = vmul.f32 %v11982_v7, %v9533_v37  ;;  %v9553_v2 = vmul.f32 %v11982_v7, %v9534_v40  ;;  %v9554_v8 = vmul.f32 %v11982_v7, %v9535_v54  ;;  %v9555_v5 = vmul.f32 %v11982_v7, %v9536_v19 }
 0x815   :  { %v9561_v53 = vmul.f32 %v10083_v3, %v9540_v14  ;;  %v9562_v26 = vmul.f32 %v10083_v3, %v9541_v13  ;;  %v9563_v34 = vmul.f32 %v10083_v3, %v9542_v0  ;;  %v9564_v36 = vmul.f32 %v10083_v3, %v9543_v47 }
 0x816   :  { %v9565_v46 = vmul.f32 %v10083_v3, %v9544_v1  ;;  %v9566_v56 = vmul.f32 %v10083_v3, %v9545_v28  ;;  %v9567_v4 = vmul.f32 %v10083_v3, %v9546_v27  ;;  %v9568_v22 = vmul.f32 %v10083_v3, %v9547_v10 }
 0x817   :  { %v9582_v17 = vadd.f32 %v10084_v42, %v9561_v53  ;;  %v9583_v20 = vadd.f32 %v10084_v42, %v9562_v26  ;;  %v9584_v30 = vadd.f32 %v10084_v42, %v9563_v34  ;;  %v9585_v16 = vadd.f32 %v10084_v42, %v9564_v36 }
 0x818   :  { %v9569_v21 = vmul.f32 %v10083_v3, %v9548_v29  ;;  %v9586_v48 = vadd.f32 %v10084_v42, %v9565_v46  ;;  %v9570_v61 = vmul.f32 %v10083_v3, %v9549_v41  ;;  %v9571_v18 = vmul.f32 %v10083_v3, %v9550_v24 }
 0x819   :  { %v9587_v33 = vadd.f32 %v10084_v42, %v9566_v56  ;;  %v9588_v15 = vadd.f32 %v10084_v42, %v9567_v4  ;;  %v10085_v38 = vmul.f32 -1.442695, %v9582_v17  ;;  %v10086_v6 = vmul.f32 -1.442695, %v9583_v20 }
 0x81a   :  { %v10087_v23 = vmul.f32 -1.442695, %v9584_v30  ;;  %v9572_v43 = vmul.f32 %v10083_v3, %v9551_v39  ;;  %v9589_v51 = vadd.f32 %v10084_v42, %v9568_v22  ;;  %v10088_v32 = vmul.f32 -1.442695, %v9585_v16 }
 0x81b   :  { %v9573_v49 = vmul.f32 %v10083_v3, %v9552_v59  ;;  %v9590_v35 = vadd.f32 %v10084_v42, %v9569_v21  ;;  %11983 = vpow2.f32 %v10085_v38  ;;  %v10089_v60 = vmul.f32 -1.442695, %v9586_v48 }
 0x81c   :  { %v9574_v57 = vmul.f32 %v10083_v3, %v9553_v2  ;;  %v9591_v63 = vadd.f32 %v10084_v42, %v9570_v61  ;;  %11985 = vpow2.f32 %v10086_v6  ;;  %v10090_v62 = vmul.f32 -1.442695, %v9587_v33 }
 0x81d   :  { %v9575_v50 = vmul.f32 %v10083_v3, %v9554_v8  ;;  %v9592_v9 = vadd.f32 %v10084_v42, %v9571_v18  ;;  %11987 = vpow2.f32 %v10087_v23  ;;  %v10091_v12 = vmul.f32 -1.442695, %v9588_v15 }
 0x81e   :  { %v9576_v11 = vmul.f32 %v10083_v3, %v9555_v5  ;;  %v9593_v55 = vadd.f32 %v10084_v42, %v9572_v43  ;;  %11989 = vpow2.f32 %v10088_v32  ;;  %v10092_v45 = vmul.f32 -1.442695, %v9589_v51 }
 0x81f   :  { %v9594_v58 = vadd.f32 %v10084_v42, %v9573_v49  ;;  %11991 = vpow2.f32 %v10089_v60  ;;  %v10093_v44 = vmul.f32 -1.442695, %v9590_v35  ;;  %v9595_v25 = vadd.f32 %v10084_v42, %v9574_v57 }
 0x820   :  { %11993 = vpow2.f32 %v10090_v62  ;;  %v10094_v37 = vmul.f32 -1.442695, %v9591_v63  ;;  %v9596_v40 = vadd.f32 %v10084_v42, %v9575_v50  ;;  %v10095_v54 = vmul.f32 -1.442695, %v9592_v9 }
 0x821   :  { %11995 = vpow2.f32 %v10091_v12  ;;  %v9597_v19 = vadd.f32 %v10084_v42, %v9576_v11  ;;  %v10096_v31 = vmul.f32 -1.442695, %v9593_v55  ;;  %v10097_v52 = vmul.f32 -1.442695, %v9594_v58 }
 0x822   :  { %11997 = vpow2.f32 %v10092_v45  ;;  %v10098_v7 = vmul.f32 -1.442695, %v9595_v25  ;;  %v10099_v13 = vmul.f32 -1.442695, %v9596_v40 }
 0x823   :  { %11999 = vpow2.f32 %v10093_v44  ;;  %v10100_v47 = vmul.f32 -1.442695, %v9597_v19 }
 0x824   :  { %12001 = vpow2.f32 %v10094_v37 }
 0x825   :  { %v11984_v14 = vpop.eup %11983  ;;  %12003 = vpow2.f32 %v10095_v54 }
 0x826   :  { %v11986_v0 = vpop.eup %11985  ;;  %12005 = vpow2.f32 %v10096_v31  ;;  %v9646_v28 = vadd.f32 1.0, %v11984_v14 }
 0x827   :  { %v11988_v1 = vpop.eup %11987  ;;  %12007 = vpow2.f32 %v10097_v52  ;;  %v9647_v10 = vadd.f32 1.0, %v11986_v0 }
 0x828   :  { %v11990_v27 = vpop.eup %11989  ;;  %12009 = vpow2.f32 %v10098_v7  ;;  %v9648_v29 = vadd.f32 1.0, %v11988_v1 }
 0x829   :  { %v11992_v3 = vpop.eup %11991  ;;  %12011 = vpow2.f32 %v10099_v13  ;;  %v9649_v24 = vadd.f32 1.0, %v11990_v27 }
 0x82a   :  { %v11994_v41 = vpop.eup %11993  ;;  %12013 = vpow2.f32 %v10100_v47  ;;  %v9650_v59 = vadd.f32 1.0, %v11992_v3 }
 0x82b   :  { %v11996_v39 = vpop.eup %11995  ;;  %12015 = vrcp.f32 %v9646_v28  ;;  %v9651_v8 = vadd.f32 1.0, %v11994_v41 }
 0x82c   :  { %v11998_v2 = vpop.eup %11997  ;;  %12017 = vrcp.f32 %v9647_v10  ;;  %v9652_v53 = vadd.f32 1.0, %v11996_v39 }
 0x82d   :  { %v12000_v5 = vpop.eup %11999  ;;  %12019 = vrcp.f32 %v9648_v29  ;;  %v9653_v34 = vadd.f32 1.0, %v11998_v2 }
 0x82e   :  { %v12002_v26 = vpop.eup %12001  ;;  %12021 = vrcp.f32 %v9649_v24  ;;  %v9654_v42 = vadd.f32 1.0, %v12000_v5 }
 0x82f   :  { %v12004_v36 = vpop.eup %12003  ;;  %12023 = vrcp.f32 %v9650_v59  ;;  %v9655_v56 = vadd.f32 1.0, %v12002_v26 }
 0x830   :  { %v12006_v46 = vpop.eup %12005  ;;  %12025 = vrcp.f32 %v9651_v8  ;;  %v9656_v17 = vadd.f32 1.0, %v12004_v36 }
 0x831   :  { %v12008_v4 = vpop.eup %12007  ;;  %12027 = vrcp.f32 %v9652_v53  ;;  %v9657_v30 = vadd.f32 1.0, %v12006_v46 }
 0x832   :  { %v12010_v20 = vpop.eup %12009  ;;  %12029 = vrcp.f32 %v9653_v34  ;;  %v9658_v16 = vadd.f32 1.0, %v12008_v4 }
 0x833   :  { %v12012_v22 = vpop.eup %12011  ;;  %12031 = vrcp.f32 %v9654_v42  ;;  %v9659_v48 = vadd.f32 1.0, %v12010_v20 }
 0x834   :  { %v12014_v21 = vpop.eup %12013  ;;  %12033 = vrcp.f32 %v9655_v56  ;;  %v9660_v18 = vadd.f32 1.0, %v12012_v22 }
 0x835   :  { %v12016_v61 = vpop.eup %12015  ;;  %12035 = vrcp.f32 %v9656_v17  ;;  %v9661_v15 = vadd.f32 1.0, %v12014_v21 }
 0x836   :  { %v12018_v33 = vpop.eup %12017  ;;  %12037 = vrcp.f32 %v9657_v30  ;;  %9694 = vst [vmem:[%s14792_s7] sm:$0xff] %v12016_v61 }
 0x837   :  { %v12020_v38 = vpop.eup %12019  ;;  %12039 = vrcp.f32 %v9658_v16  ;;  %9695 = vst [vmem:[%s14792_s7 + $0x8] sm:$0xff] %v12018_v33 }
 0x838   :  { %v12022_v6 = vpop.eup %12021  ;;  %12041 = vrcp.f32 %v9659_v48  ;;  %9696 = vst [vmem:[%s14792_s7 + $0x10] sm:$0xff] %v12020_v38 }
 0x839   :  { %v12024_v23 = vpop.eup %12023  ;;  %12043 = vrcp.f32 %v9660_v18  ;;  %9697 = vst [vmem:[%s14792_s7 + $0x18] sm:$0xff] %v12022_v6 }
 0x83a   :  { %v12026_v43 = vpop.eup %12025  ;;  %12045 = vrcp.f32 %v9661_v15  ;;  %9698 = vst [vmem:[%s14792_s7 + $0x20] sm:$0xff] %v12024_v23 }
 0x83b   :  { %v12028_v51 = vpop.eup %12027  ;;  %9699 = vst [vmem:[%s14792_s7 + $0x28] sm:$0xff] %v12026_v43 }
 0x83c   :  { %v12030_v32 = vpop.eup %12029  ;;  %9700 = vst [vmem:[%s14792_s7 + $0x30] sm:$0xff] %v12028_v51 }
 0x83d   :  { %v12032_v49 = vpop.eup %12031  ;;  %9701 = vst [vmem:[%s14792_s7 + $0x38] sm:$0xff] %v12030_v32 }
 0x83e   :  { %v12034_v35 = vpop.eup %12033  ;;  %9702 = vst [vmem:[%s14792_s7 + $0x40] sm:$0xff] %v12032_v49 }
 0x83f   :  { %v12036_v60 = vpop.eup %12035  ;;  %9703 = vst [vmem:[%s14792_s7 + $0x48] sm:$0xff] %v12034_v35 }
 0x840   :  { %v12038_v57 = vpop.eup %12037  ;;  %9704 = vst [vmem:[%s14792_s7 + $0x50] sm:$0xff] %v12036_v60 }
 0x841   :  { %v12040_v63 = vpop.eup %12039  ;;  %9705 = vst [vmem:[%s14792_s7 + $0x58] sm:$0xff] %v12038_v57 }
 0x842   :  { %v12042_v62 = vpop.eup %12041  ;;  %9706 = vst [vmem:[%s14792_s7 + $0x60] sm:$0xff] %v12040_v63 }
 0x843   :  { %v12044_v50 = vpop.eup %12043  ;;  %9707 = vst [vmem:[%s14792_s7 + $0x68] sm:$0xff] %v12042_v62 }
 0x844   :  { %v12046_v9 = vpop.eup %12045  ;;  %9708 = vst [vmem:[%s14792_s7 + $0x70] sm:$0xff] %v12044_v50 }
 0x845   :  { %9709 = vst [vmem:[%s14792_s7 + $0x78] sm:$0xff] %v12046_v9 }
 0x846   :  { %9714 = vsyncpa [#allocation8], 1 }
 0x847   :  { %9715 = vsyncpa [#allocation10], 1 }
 0x848   :  { %9716 = vsyncpa [#allocation13], 1 }

</bundles_post_ra>
